<compile_context>
chip_gen: v7x
topology: tpu7x:2x2x1
jax: 0.10.0
libtpu: 0.0.40
codegen_flags: <defaults>
</compile_context>

<pallas_src>
import functools
import math

import jax
import jax.numpy as jnp
from jax.experimental import pallas as pl
from jax.experimental.pallas import tpu as pltpu


# ----------------------------------------------------------------------------
# Pallas kernel: fused (weights @ patches) + bias + activation, lane-dense out
# ----------------------------------------------------------------------------
def _make_fused_kernel(act):
    def kernel(w_ref, x_ref, b_ref, o_ref):
        acc = jnp.dot(w_ref[...], x_ref[...], preferred_element_type=jnp.float32)
        acc = acc + b_ref[...]                      # (N, 1) f32, broadcast on lanes
        if act == "leaky_relu":
            acc = jnp.where(acc >= 0, acc, 0.01 * acc)
        elif act == "sigmoid":
            acc = jax.nn.sigmoid(acc)
        o_ref[...] = acc.astype(o_ref.dtype)

    return kernel


def _round_up(x, m):
    return (x + m - 1) // m * m


def _choose_tm(M, K, itemsize, budget_bytes=4 * 1024 * 1024):
    """Largest lane tile (multiple of 128, power of two) whose double-buffered
    input fits the budget; keeps >=2 grid steps when M allows (v7x megacore)."""
    cap = max(128, budget_bytes // (K * itemsize))
    cap = 1 << (int(cap).bit_length() - 1)          # round down to power of two
    cap = min(cap, 8192)
    Mp = _round_up(M, 128)
    if Mp <= cap:
        if Mp >= 256 and (Mp // 2) % 128 == 0:      # give both v7x cores work
            return Mp // 2, Mp
        return Mp, Mp
    Mp = _round_up(M, cap)
    return cap, Mp


def fused_matmul_bias_act(w2d, pats, b, act, out_dtype):
    """w2d: (N, K) bf16, pats: (K, M) bf16, b: (N,) f32 -> (N, M) out_dtype."""
    N, K = w2d.shape
    K2, M = pats.shape
    assert K == K2
    tm, Mp = _choose_tm(M, K, pats.dtype.itemsize)
    if Mp != M:
        pats = jnp.pad(pats, ((0, 0), (0, Mp - M)))
    grid = (Mp // tm,)
    out = pl.pallas_call(
        _make_fused_kernel(act),
        out_shape=jax.ShapeDtypeStruct((N, Mp), out_dtype),
        grid_spec=pltpu.PrefetchScalarGridSpec(
            num_scalar_prefetch=0,
            grid=grid,
            in_specs=[
                pl.BlockSpec((N, K), lambda i: (0, 0)),    # weights, VMEM-resident
                pl.BlockSpec((K, tm), lambda i: (0, i)),   # patch tile
                pl.BlockSpec((N, 1), lambda i: (0, 0)),    # bias, VMEM-resident
            ],
            out_specs=pl.BlockSpec((N, tm), lambda i: (0, i)),  # lane-dense store
        ),
        compiler_params=pltpu.CompilerParams(
            dimension_semantics=("parallel",),
            vmem_limit_bytes=32 * 1024 * 1024,
        ),
    )(w2d, pats, b.reshape(N, 1).astype(jnp.float32))
    return out[:, :M] if Mp != M else out


# ----------------------------------------------------------------------------
# im2col in (K, M) order — channel-major input, no transposes
# ----------------------------------------------------------------------------
def extract_patches_km(x, ksize, stride, pad):
    """x: (C, B, D, H, W) -> (ksize^3 * C, B*Do*Ho*Wo).
    K rows ordered (kd, kh, kw, c); matches weights reordered to (Cout, kd, kh, kw, Cin)."""
    C, B, D, H, W = x.shape
    xp = jnp.pad(x, ((0, 0), (0, 0), (pad, pad), (pad, pad), (pad, pad)))
    Do = (D + 2 * pad - ksize) // stride + 1
    Ho = (H + 2 * pad - ksize) // stride + 1
    Wo = (W + 2 * pad - ksize) // stride + 1
    taps = []
    for kd in range(ksize):
        for kh in range(ksize):
            for kw in range(ksize):
                taps.append(xp[:, :,
                               kd:kd + stride * Do:stride,
                               kh:kh + stride * Ho:stride,
                               kw:kw + stride * Wo:stride])
    pats = jnp.stack(taps, axis=0)                  # (k^3, C, B, Do, Ho, Wo)
    return pats.reshape(ksize ** 3 * C, B * Do * Ho * Wo), (Do, Ho, Wo)


def _apply_act(acc, act):
    if act == "leaky_relu":
        return jnp.where(acc >= 0, acc, 0.01 * acc)
    if act == "sigmoid":
        return jax.nn.sigmoid(acc)
    return acc


def conv3d_block(x, w, b, stride, pad, act, use_pallas, out_dtype=jnp.bfloat16):
    """x: (Cin, B, D, H, W); w: (Cout, Cin, k, k, k) torch layout; b: (Cout,)."""
    Cout, Cin, k = w.shape[0], w.shape[1], w.shape[2]
    B = x.shape[1]
    pats, (Do, Ho, Wo) = extract_patches_km(x, k, stride, pad)       # (K, M) bf16
    w2d = (jnp.transpose(w, (0, 2, 3, 4, 1))
           .reshape(Cout, k ** 3 * Cin).astype(jnp.bfloat16))
    if use_pallas:
        out = fused_matmul_bias_act(w2d, pats, b, act, out_dtype)    # (Cout, M)
    else:  # tiny layers: launch overhead > work, plain XLA dot
        acc = jnp.dot(w2d, pats, preferred_element_type=jnp.float32)
        out = _apply_act(acc + b[:, None], act).astype(out_dtype)
    return out.reshape(Cout, B, Do, Ho, Wo)          # already channel-major


# ----------------------------------------------------------------------------
# encoder module (BSP-NET)
# ----------------------------------------------------------------------------
def xavier_uniform(key, shape):
    fan_in = shape[1] * shape[2] * shape[3] * shape[4]
    fan_out = shape[0] * shape[2] * shape[3] * shape[4]
    bound = math.sqrt(6.0 / (fan_in + fan_out))
    return jax.random.uniform(key, shape, jnp.float32, -bound, bound)


def init_encoder_params(key, ef_dim):
    ks = jax.random.split(key, 5)
    shapes = [
        (ef_dim, 1, 4, 4, 4),
        (ef_dim * 2, ef_dim, 4, 4, 4),
        (ef_dim * 4, ef_dim * 2, 4, 4, 4),
        (ef_dim * 8, ef_dim * 4, 4, 4, 4),
        (ef_dim * 8, ef_dim * 8, 4, 4, 4),
    ]
    return [(xavier_uniform(k, s), jnp.zeros((s[0],), jnp.float32))
            for k, s in zip(ks, shapes)]


def encoder_forward(params, inputs, ef_dim):
    """inputs: (B, 1, D, H, W) f32 (NCDHW like torch) -> (B, ef_dim*8) f32."""
    (w1, b1), (w2, b2), (w3, b3), (w4, b4), (w5, b5) = params
    # channel-major (C, B, D, H, W), bf16 activations for halved HBM traffic
    x = jnp.transpose(inputs, (1, 0, 2, 3, 4)).astype(jnp.bfloat16)
    x = conv3d_block(x, w1, b1, 2, 1, "leaky_relu", use_pallas=True)
    x = conv3d_block(x, w2, b2, 2, 1, "leaky_relu", use_pallas=True)
    x = conv3d_block(x, w3, b3, 2, 1, "leaky_relu", use_pallas=True)
    x = conv3d_block(x, w4, b4, 2, 1, "leaky_relu", use_pallas=False)
    x = conv3d_block(x, w5, b5, 1, 0, "sigmoid", use_pallas=False,
                     out_dtype=jnp.float32)          # (8ef, B, 1, 1, 1)
    return x.reshape(ef_dim * 8, -1).T               # == torch .view(-1, ef_dim*8)


# ----------------------------------------------------------------------------
# Pure-JAX references (lax conv) for sanity checks
# ----------------------------------------------------------------------------
def encoder_reference(params, inputs, ef_dim, compute_dtype=jnp.float32):
    """compute_dtype=bfloat16 reproduces the Pallas pipeline's quantization
    points exactly (bf16 conv inputs, f32 accumulation)."""
    def conv(x, w, b, stride, pad):
        y = jax.lax.conv_general_dilated(
            x.astype(compute_dtype), w.astype(compute_dtype),
            window_strides=(stride,) * 3, padding=[(pad, pad)] * 3,
            dimension_numbers=("NCDHW", "OIDHW", "NCDHW"),
            preferred_element_type=jnp.float32)
        return y + b.reshape(1, -1, 1, 1, 1)

    (w1, b1), (w2, b2), (w3, b3), (w4, b4), (w5, b5) = params
    lrelu = lambda v: jnp.where(v >= 0, v, 0.01 * v)
    d = lrelu(conv(inputs, w1, b1, 2, 1))
    d = lrelu(conv(d, w2, b2, 2, 1))
    d = lrelu(conv(d, w3, b3, 2, 1))
    d = lrelu(conv(d, w4, b4, 2, 1))
    d = jax.nn.sigmoid(conv(d, w5, b5, 1, 0))
    return d.reshape(-1, ef_dim * 8)


if __name__ == "__main__":
    ef_dim = 4
    batch = 2
    key = jax.random.PRNGKey(0)
    k_param, k_in = jax.random.split(key)
    params = init_encoder_params(k_param, ef_dim)
    # BSP-NET encoder expects 64^3 occupancy volumes (final 4^3 valid conv -> 1^3)
    inputs = jax.random.uniform(k_in, (batch, 1, 64, 64, 64), jnp.float32)

    fwd = jax.jit(functools.partial(encoder_forward, ef_dim=ef_dim))
    out = jax.block_until_ready(fwd(params, inputs))
    assert out.shape == (batch, ef_dim * 8), out.shape

    # tight structural check vs a reference with identical bf16 quantization
    ref_bf16 = jax.block_until_ready(
        jax.jit(functools.partial(encoder_reference, ef_dim=ef_dim,
                                  compute_dtype=jnp.bfloat16))(params, inputs))
    assert jnp.allclose(out, ref_bf16, atol=2e-3, rtol=2e-3), \
        float(jnp.max(jnp.abs(out - ref_bf16)))

    # loose check vs the full-f32 reference (absorbs bf16 activation rounding)
    ref_f32 = jax.block_until_ready(
        jax.jit(functools.partial(encoder_reference, ef_dim=ef_dim))(params, inputs))
    assert jnp.allclose(out, ref_f32, atol=5e-2, rtol=5e-2), \
        float(jnp.max(jnp.abs(out - ref_f32)))

    print("KERNEL_OK")
</pallas_src>

<mosaic_0001>
module attributes {stable_mosaic.version = 11 : i64} {
  func.func @kernel(%arg0: i32, %arg1: memref<4x64xbf16, #tpu.memory_space<vmem>>, %arg2: memref<64x8192xbf16, #tpu.memory_space<vmem>>, %arg3: memref<4x1xf32, #tpu.memory_space<vmem>>, %arg4: memref<4x8192xbf16, #tpu.memory_space<vmem>>) attributes {dimension_semantics = [#tpu.dimension_semantics<parallel>], iteration_bounds = array<i64: 8>, scalar_prefetch = 0 : i64, scratch_operands = 0 : i64, tpu.core_type = #tpu.core_type<tc>, window_params = [{pipeline_mode = #tpu.pipeline_mode<synchronous>, transform_indices = @transform_0, window_bounds = array<i64: 4, 64>}, {transform_indices = @transform_1, window_bounds = array<i64: 64, 8192>}, {pipeline_mode = #tpu.pipeline_mode<synchronous>, transform_indices = @transform_2, window_bounds = array<i64: 4, 1>}, {transform_indices = @transform_3, window_bounds = array<i64: 4, 8192>}]} {
    %c0 = arith.constant 0 : index
    %c0_0 = arith.constant 0 : index
    %0 = vector.load %arg1[%c0, %c0_0] : memref<4x64xbf16, #tpu.memory_space<vmem>>, vector<4x64xbf16>
    %c0_1 = arith.constant 0 : index
    %c0_2 = arith.constant 0 : index
    %1 = vector.load %arg2[%c0_1, %c0_2] : memref<64x8192xbf16, #tpu.memory_space<vmem>>, vector<64x8192xbf16>
    %cst = arith.constant dense<0.000000e+00> : vector<4x8192xf32>
    %2 = tpu.matmul %0, %1, %cst {dimension_numbers = #tpu.dot_dimension_numbers<[1], [0], [0], [1], [0, 0, 1, 1], [], []>} : vector<4x64xbf16>, vector<64x8192xbf16>, vector<4x8192xf32> -> vector<4x8192xf32>
    %c0_3 = arith.constant 0 : index
    %c0_4 = arith.constant 0 : index
    %3 = vector.load %arg3[%c0_3, %c0_4] : memref<4x1xf32, #tpu.memory_space<vmem>>, vector<4x1xf32>
    %4 = vector.broadcast %3 : vector<4x1xf32> to vector<4x8192xf32>
    %5 = arith.addf %2, %4 : vector<4x8192xf32>
    %cst_5 = arith.constant 0.000000e+00 : f32
    %6 = vector.broadcast %cst_5 : f32 to vector<4x8192xf32>
    %7 = arith.cmpf oge, %5, %6 : vector<4x8192xf32>
    %cst_6 = arith.constant 0.00999999977 : f32
    %8 = vector.broadcast %cst_6 : f32 to vector<4x8192xf32>
    %9 = arith.mulf %8, %5 : vector<4x8192xf32>
    %10 = arith.select %7, %5, %9 : vector<4x8192xi1>, vector<4x8192xf32>
    %11 = arith.truncf %10 : vector<4x8192xf32> to vector<4x8192xbf16>
    %c0_7 = arith.constant 0 : index
    %c0_8 = arith.constant 0 : index
    %12 = vector.load %arg4[%c0_7, %c0_8] : memref<4x8192xbf16, #tpu.memory_space<vmem>>, vector<4x8192xbf16>
    tpu.vector_store %arg4[%c0_7, %c0_8], %11 {strides = array<i32>} : memref<4x8192xbf16, #tpu.memory_space<vmem>>, vector<4x8192xbf16>,
    return
  }
  func.func @transform_0(%arg0: i32) -> (i32, i32) {
    %c0_i32 = arith.constant 0 : i32
    %c0_i32_0 = arith.constant 0 : i32
    %c0_i32_1 = arith.constant 0 : i32
    return %c0_i32, %c0_i32_0 : i32, i32
  }
  func.func @transform_1(%arg0: i32) -> (i32, i32) {
    %c0_i32 = arith.constant 0 : i32
    %c0_i32_0 = arith.constant 0 : i32
    return %c0_i32, %arg0 : i32, i32
  }
  func.func @transform_2(%arg0: i32) -> (i32, i32) {
    %c0_i32 = arith.constant 0 : i32
    %c0_i32_0 = arith.constant 0 : i32
    %c0_i32_1 = arith.constant 0 : i32
    return %c0_i32, %c0_i32_0 : i32, i32
  }
  func.func @transform_3(%arg0: i32) -> (i32, i32) {
    %c0_i32 = arith.constant 0 : i32
    %c0_i32_0 = arith.constant 0 : i32
    return %c0_i32, %arg0 : i32, i32
  }
}

module attributes {stable_mosaic.version = 11 : i64} {
  func.func @kernel(%arg0: i32, %arg1: memref<8x256xbf16, #tpu.memory_space<vmem>>, %arg2: memref<256x4096xbf16, #tpu.memory_space<vmem>>, %arg3: memref<8x1xf32, #tpu.memory_space<vmem>>, %arg4: memref<8x4096xbf16, #tpu.memory_space<vmem>>) attributes {dimension_semantics = [#tpu.dimension_semantics<parallel>], iteration_bounds = array<i64: 2>, scalar_prefetch = 0 : i64, scratch_operands = 0 : i64, tpu.core_type = #tpu.core_type<tc>, window_params = [{pipeline_mode = #tpu.pipeline_mode<synchronous>, transform_indices = @transform_0, window_bounds = array<i64: 8, 256>}, {transform_indices = @transform_1, window_bounds = array<i64: 256, 4096>}, {pipeline_mode = #tpu.pipeline_mode<synchronous>, transform_indices = @transform_2, window_bounds = array<i64: 8, 1>}, {transform_indices = @transform_3, window_bounds = array<i64: 8, 4096>}]} {
    %c0 = arith.constant 0 : index
    %c0_0 = arith.constant 0 : index
    %0 = vector.load %arg1[%c0, %c0_0] : memref<8x256xbf16, #tpu.memory_space<vmem>>, vector<8x256xbf16>
    %c0_1 = arith.constant 0 : index
    %c0_2 = arith.constant 0 : index
    %1 = vector.load %arg2[%c0_1, %c0_2] : memref<256x4096xbf16, #tpu.memory_space<vmem>>, vector<256x4096xbf16>
    %cst = arith.constant dense<0.000000e+00> : vector<8x4096xf32>
    %2 = tpu.matmul %0, %1, %cst {dimension_numbers = #tpu.dot_dimension_numbers<[1], [0], [0], [1], [0, 0, 1, 1], [], []>} : vector<8x256xbf16>, vector<256x4096xbf16>, vector<8x4096xf32> -> vector<8x4096xf32>
    %c0_3 = arith.constant 0 : index
    %c0_4 = arith.constant 0 : index
    %3 = vector.load %arg3[%c0_3, %c0_4] : memref<8x1xf32, #tpu.memory_space<vmem>>, vector<8x1xf32>
    %4 = vector.broadcast %3 : vector<8x1xf32> to vector<8x4096xf32>
    %5 = arith.addf %2, %4 : vector<8x4096xf32>
    %cst_5 = arith.constant 0.000000e+00 : f32
    %6 = vector.broadcast %cst_5 : f32 to vector<8x4096xf32>
    %7 = arith.cmpf oge, %5, %6 : vector<8x4096xf32>
    %cst_6 = arith.constant 0.00999999977 : f32
    %8 = vector.broadcast %cst_6 : f32 to vector<8x4096xf32>
    %9 = arith.mulf %8, %5 : vector<8x4096xf32>
    %10 = arith.select %7, %5, %9 : vector<8x4096xi1>, vector<8x4096xf32>
    %11 = arith.truncf %10 : vector<8x4096xf32> to vector<8x4096xbf16>
    %c0_7 = arith.constant 0 : index
    %c0_8 = arith.constant 0 : index
    %12 = vector.load %arg4[%c0_7, %c0_8] : memref<8x4096xbf16, #tpu.memory_space<vmem>>, vector<8x4096xbf16>
    tpu.vector_store %arg4[%c0_7, %c0_8], %11 {strides = array<i32>} : memref<8x4096xbf16, #tpu.memory_space<vmem>>, vector<8x4096xbf16>,
    return
  }
  func.func @transform_0(%arg0: i32) -> (i32, i32) {
    %c0_i32 = arith.constant 0 : i32
    %c0_i32_0 = arith.constant 0 : i32
    %c0_i32_1 = arith.constant 0 : i32
    return %c0_i32, %c0_i32_0 : i32, i32
  }
  func.func @transform_1(%arg0: i32) -> (i32, i32) {
    %c0_i32 = arith.constant 0 : i32
    %c0_i32_0 = arith.constant 0 : i32
    return %c0_i32, %arg0 : i32, i32
  }
  func.func @transform_2(%arg0: i32) -> (i32, i32) {
    %c0_i32 = arith.constant 0 : i32
    %c0_i32_0 = arith.constant 0 : i32
    %c0_i32_1 = arith.constant 0 : i32
    return %c0_i32, %c0_i32_0 : i32, i32
  }
  func.func @transform_3(%arg0: i32) -> (i32, i32) {
    %c0_i32 = arith.constant 0 : i32
    %c0_i32_0 = arith.constant 0 : i32
    return %c0_i32, %arg0 : i32, i32
  }
}

module attributes {stable_mosaic.version = 11 : i64} {
  func.func @kernel(%arg0: i32, %arg1: memref<16x512xbf16, #tpu.memory_space<vmem>>, %arg2: memref<512x512xbf16, #tpu.memory_space<vmem>>, %arg3: memref<16x1xf32, #tpu.memory_space<vmem>>, %arg4: memref<16x512xbf16, #tpu.memory_space<vmem>>) attributes {dimension_semantics = [#tpu.dimension_semantics<parallel>], iteration_bounds = array<i64: 2>, scalar_prefetch = 0 : i64, scratch_operands = 0 : i64, tpu.core_type = #tpu.core_type<tc>, window_params = [{pipeline_mode = #tpu.pipeline_mode<synchronous>, transform_indices = @transform_0, window_bounds = array<i64: 16, 512>}, {transform_indices = @transform_1, window_bounds = array<i64: 512, 512>}, {pipeline_mode = #tpu.pipeline_mode<synchronous>, transform_indices = @transform_2, window_bounds = array<i64: 16, 1>}, {transform_indices = @transform_3, window_bounds = array<i64: 16, 512>}]} {
    %c0 = arith.constant 0 : index
    %c0_0 = arith.constant 0 : index
    %0 = vector.load %arg1[%c0, %c0_0] : memref<16x512xbf16, #tpu.memory_space<vmem>>, vector<16x512xbf16>
    %c0_1 = arith.constant 0 : index
    %c0_2 = arith.constant 0 : index
    %1 = vector.load %arg2[%c0_1, %c0_2] : memref<512x512xbf16, #tpu.memory_space<vmem>>, vector<512x512xbf16>
    %cst = arith.constant dense<0.000000e+00> : vector<16x512xf32>
    %2 = tpu.matmul %0, %1, %cst {dimension_numbers = #tpu.dot_dimension_numbers<[1], [0], [0], [1], [0, 0, 1, 1], [], []>} : vector<16x512xbf16>, vector<512x512xbf16>, vector<16x512xf32> -> vector<16x512xf32>
    %c0_3 = arith.constant 0 : index
    %c0_4 = arith.constant 0 : index
    %3 = vector.load %arg3[%c0_3, %c0_4] : memref<16x1xf32, #tpu.memory_space<vmem>>, vector<16x1xf32>
    %4 = vector.broadcast %3 : vector<16x1xf32> to vector<16x512xf32>
    %5 = arith.addf %2, %4 : vector<16x512xf32>
    %cst_5 = arith.constant 0.000000e+00 : f32
    %6 = vector.broadcast %cst_5 : f32 to vector<16x512xf32>
    %7 = arith.cmpf oge, %5, %6 : vector<16x512xf32>
    %cst_6 = arith.constant 0.00999999977 : f32
    %8 = vector.broadcast %cst_6 : f32 to vector<16x512xf32>
    %9 = arith.mulf %8, %5 : vector<16x512xf32>
    %10 = arith.select %7, %5, %9 : vector<16x512xi1>, vector<16x512xf32>
    %11 = arith.truncf %10 : vector<16x512xf32> to vector<16x512xbf16>
    %c0_7 = arith.constant 0 : index
    %c0_8 = arith.constant 0 : index
    %12 = vector.load %arg4[%c0_7, %c0_8] : memref<16x512xbf16, #tpu.memory_space<vmem>>, vector<16x512xbf16>
    tpu.vector_store %arg4[%c0_7, %c0_8], %11 {strides = array<i32>} : memref<16x512xbf16, #tpu.memory_space<vmem>>, vector<16x512xbf16>,
    return
  }
  func.func @transform_0(%arg0: i32) -> (i32, i32) {
    %c0_i32 = arith.constant 0 : i32
    %c0_i32_0 = arith.constant 0 : i32
    %c0_i32_1 = arith.constant 0 : i32
    return %c0_i32, %c0_i32_0 : i32, i32
  }
  func.func @transform_1(%arg0: i32) -> (i32, i32) {
    %c0_i32 = arith.constant 0 : i32
    %c0_i32_0 = arith.constant 0 : i32
    return %c0_i32, %arg0 : i32, i32
  }
  func.func @transform_2(%arg0: i32) -> (i32, i32) {
    %c0_i32 = arith.constant 0 : i32
    %c0_i32_0 = arith.constant 0 : i32
    %c0_i32_1 = arith.constant 0 : i32
    return %c0_i32, %c0_i32_0 : i32, i32
  }
  func.func @transform_3(%arg0: i32) -> (i32, i32) {
    %c0_i32 = arith.constant 0 : i32
    %c0_i32_0 = arith.constant 0 : i32
    return %c0_i32, %arg0 : i32, i32
  }
}

</mosaic_0001>

<bundles_post_ra>
// kernel: encoder_forward.3
= control target key start
LH: loop header
LB: loop body
LE: loop exit
PB: predicated region body
PF: predicated region fallthrough
CT: control target
= control target key end

     0   :  { %s4657_s12 = smov 0   ;;  %s4659_s13 = smov 0   ;;  %s5748_s0 = inlined_call_operand.vmem [shape: bf16[4,64], index: 0, kind: input, shape index: {}]   ;;  %s5749_s1 = inlined_call_operand.vmem [shape: bf16[64,65536], index: 1, kind: input, shape index: {}]   ;;  %s5750_s2 = inlined_call_operand.vmem [shape: f32[4,1], index: 2, kind: input, shape index: {}]   ;;  %s5751_s3 = inlined_call_operand.vmem [shape: bf16[4,65536], index: 3, kind: output, shape index: {}]  }
   0x1   :  { %s4661_s14 = smov 0  }
   0x2 LB: > { %s4249_s15 = sadd.s32 4294967295, %s4633_s14   ;;  %s4674_s16 = sadd.s32 1, %s4633_s14   ;;  %s4633_s14 = sphi %s4661_s14, %s5754_s14   ;;  %s4629_s13 = sphi %s4659_s13, %s5753_s13   ;;  %s4625_s12 = sphi %s4657_s12, %s5752_s12  }
   0x3   : > { %s38_s17 = ssub.s32 %s4633_s14, %s4674_s16  ;;  %s41_s18 = sadd.s32 1, %s4629_s13 }
   0x4   : > { %p39_p0 = scmp.eq.s32.totalorder %s38_s17, 0  ;;  %p48_p1 = scmp.ne.s32.totalorder %s4629_s13, %s4625_s12 }
   0x5   : > { %p49_p2 = scmp.eq.s32.totalorder %s4633_s14, 0  ;;  %p4252_p4 = scmp.ge.s32.totalorder %s4633_s14, 8 }
   0x6   : > { %s4683_s19 = scalar_select %p39_p0, %s4629_s13, %s41_s18  }
   0x7   : > { %p50_p3 = por %p49_p2, %p48_p1  ;;  %127 = sbr.rel (%p4252_p4) target bundleno = 146 (0x92), region = 24 }
   0xe   : > { %130 = sbr.rel (!%p50_p3) target bundleno = 146 (0x92), region = 28  ;;  %s132_s20 = sand.u32 (%p50_p3), 1, %s4629_s13  }
   0xf   : > { %s4582_s21 = sshll.u32 (%p50_p3), %s4633_s14, 8  ;;  %s4253_s22 = sshll.u32 (%p50_p3), %s132_s20, 11 }
  0x10   : > { %s4691_s25 = scalar_lea.vmem (%p50_p3), %s5749_s1, %s4582_s21  ;;  %s4696_s26 = scalar_lea.vmem (%p50_p3), [#allocation2], %s4253_s22 }
  0x11   : > { %v150_v0 = vld [vmem:[%s4691_s25] sm:$0xff] (%p50_p3)  ;;  %v152_v1 = vld [vmem:[%s4691_s25 + $0x8] sm:$0xff] (%p50_p3)  ;;  %v154_v2 = vld [vmem:[%s4691_s25 + $0x10] sm:$0xff] (%p50_p3) }
  0x12   : > { %151 = vst [vmem:[%s4696_s26] sm:$0xff] (%p50_p3), %v150_v0  ;;  %153 = vst [vmem:[%s4696_s26 + $0x8] sm:$0xff] (%p50_p3), %v152_v1  ;;  %v156_v3 = vld [vmem:[%s4691_s25 + $0x18] sm:$0xff] (%p50_p3)  ;;  %v158_v4 = vld [vmem:[%s4691_s25 + $0x20] sm:$0xff] (%p50_p3) }
  0x13   : > { %155 = vst [vmem:[%s4696_s26 + $0x10] sm:$0xff] (%p50_p3), %v154_v2  ;;  %v160_v5 = vld [vmem:[%s4691_s25 + $0x28] sm:$0xff] (%p50_p3)  ;;  %157 = vst [vmem:[%s4696_s26 + $0x18] sm:$0xff] (%p50_p3), %v156_v3  ;;  %v162_v6 = vld [vmem:[%s4691_s25 + $0x30] sm:$0xff] (%p50_p3) }
  0x14   : > { %159 = vst [vmem:[%s4696_s26 + $0x20] sm:$0xff] (%p50_p3), %v158_v4  ;;  %161 = vst [vmem:[%s4696_s26 + $0x28] sm:$0xff] (%p50_p3), %v160_v5  ;;  %v164_v7 = vld [vmem:[%s4691_s25 + $0x38] sm:$0xff] (%p50_p3)  ;;  %v166_v8 = vld [vmem:[%s4691_s25 + $0x40] sm:$0xff] (%p50_p3) }
  0x15   : > { %163 = vst [vmem:[%s4696_s26 + $0x30] sm:$0xff] %v162_v6  ;;  %165 = vst [vmem:[%s4696_s26 + $0x38] sm:$0xff] %v164_v7  ;;  %v168_v9 = vld [vmem:[%s4691_s25 + $0x48] sm:$0xff]  ;;  %v170_v10 = vld [vmem:[%s4691_s25 + $0x50] sm:$0xff] }
  0x16   : > { %167 = vst [vmem:[%s4696_s26 + $0x40] sm:$0xff] %v166_v8  ;;  %v172_v11 = vld [vmem:[%s4691_s25 + $0x58] sm:$0xff]  ;;  %169 = vst [vmem:[%s4696_s26 + $0x48] sm:$0xff] %v168_v9  ;;  %v174_v12 = vld [vmem:[%s4691_s25 + $0x60] sm:$0xff] }
  0x17   : > { %171 = vst [vmem:[%s4696_s26 + $0x50] sm:$0xff] %v170_v10  ;;  %173 = vst [vmem:[%s4696_s26 + $0x58] sm:$0xff] %v172_v11  ;;  %v176_v13 = vld [vmem:[%s4691_s25 + $0x68] sm:$0xff]  ;;  %v178_v14 = vld [vmem:[%s4691_s25 + $0x70] sm:$0xff] }
  0x18   : > { %175 = vst [vmem:[%s4696_s26 + $0x60] sm:$0xff] %v174_v12  ;;  %177 = vst [vmem:[%s4696_s26 + $0x68] sm:$0xff] %v176_v13  ;;  %v180_v15 = vld [vmem:[%s4691_s25 + $0x78] sm:$0xff]  ;;  %v182_v16 = vld [vmem:[%s4691_s25 + $0x80] sm:$0xff] }
  0x19   : > { %179 = vst [vmem:[%s4696_s26 + $0x70] sm:$0xff] %v178_v14  ;;  %v184_v17 = vld [vmem:[%s4691_s25 + $0x88] sm:$0xff]  ;;  %181 = vst [vmem:[%s4696_s26 + $0x78] sm:$0xff] %v180_v15  ;;  %v186_v18 = vld [vmem:[%s4691_s25 + $0x90] sm:$0xff] }
  0x1a   : > { %183 = vst [vmem:[%s4696_s26 + $0x80] sm:$0xff] %v182_v16  ;;  %185 = vst [vmem:[%s4696_s26 + $0x88] sm:$0xff] %v184_v17  ;;  %v188_v19 = vld [vmem:[%s4691_s25 + $0x98] sm:$0xff]  ;;  %v190_v20 = vld [vmem:[%s4691_s25 + $0xa0] sm:$0xff] }
  0x1b   : > { %187 = vst [vmem:[%s4696_s26 + $0x90] sm:$0xff] %v186_v18  ;;  %189 = vst [vmem:[%s4696_s26 + $0x98] sm:$0xff] %v188_v19  ;;  %v192_v21 = vld [vmem:[%s4691_s25 + $0xa8] sm:$0xff]  ;;  %v194_v22 = vld [vmem:[%s4691_s25 + $0xb0] sm:$0xff] }
  0x1c   : > { %191 = vst [vmem:[%s4696_s26 + $0xa0] sm:$0xff] %v190_v20  ;;  %v196_v23 = vld [vmem:[%s4691_s25 + $0xb8] sm:$0xff]  ;;  %193 = vst [vmem:[%s4696_s26 + $0xa8] sm:$0xff] %v192_v21  ;;  %v198_v24 = vld [vmem:[%s4691_s25 + $0xc0] sm:$0xff] }
  0x1d   : > { %195 = vst [vmem:[%s4696_s26 + $0xb0] sm:$0xff] %v194_v22  ;;  %197 = vst [vmem:[%s4696_s26 + $0xb8] sm:$0xff] %v196_v23  ;;  %v200_v25 = vld [vmem:[%s4691_s25 + $0xc8] sm:$0xff]  ;;  %v202_v26 = vld [vmem:[%s4691_s25 + $0xd0] sm:$0xff] }
  0x1e   : > { %199 = vst [vmem:[%s4696_s26 + $0xc0] sm:$0xff] %v198_v24  ;;  %201 = vst [vmem:[%s4696_s26 + $0xc8] sm:$0xff] %v200_v25  ;;  %v204_v27 = vld [vmem:[%s4691_s25 + $0xd8] sm:$0xff]  ;;  %v206_v28 = vld [vmem:[%s4691_s25 + $0xe0] sm:$0xff] }
  0x1f   : > { %203 = vst [vmem:[%s4696_s26 + $0xd0] sm:$0xff] %v202_v26  ;;  %v208_v29 = vld [vmem:[%s4691_s25 + $0xe8] sm:$0xff]  ;;  %205 = vst [vmem:[%s4696_s26 + $0xd8] sm:$0xff] %v204_v27  ;;  %v210_v30 = vld [vmem:[%s4691_s25 + $0xf0] sm:$0xff] }
  0x20   : > { %207 = vst [vmem:[%s4696_s26 + $0xe0] sm:$0xff] %v206_v28  ;;  %209 = vst [vmem:[%s4696_s26 + $0xe8] sm:$0xff] %v208_v29  ;;  %v212_v31 = vld [vmem:[%s4691_s25 + $0xf8] sm:$0xff]  ;;  %v214_v32 = vld [vmem:[%s4691_s25 + $0x800] sm:$0xff] }
  0x21   : > { %211 = vst [vmem:[%s4696_s26 + $0xf0] sm:$0xff] %v210_v30  ;;  %213 = vst [vmem:[%s4696_s26 + $0xf8] sm:$0xff] %v212_v31  ;;  %v216_v33 = vld [vmem:[%s4691_s25 + $0x808] sm:$0xff]  ;;  %v218_v34 = vld [vmem:[%s4691_s25 + $0x810] sm:$0xff] }
  0x22   : > { %215 = vst [vmem:[%s4696_s26 + $0x100] sm:$0xff] %v214_v32  ;;  %v220_v35 = vld [vmem:[%s4691_s25 + $0x818] sm:$0xff]  ;;  %217 = vst [vmem:[%s4696_s26 + $0x108] sm:$0xff] %v216_v33  ;;  %v222_v36 = vld [vmem:[%s4691_s25 + $0x820] sm:$0xff] }
  0x23   : > { %219 = vst [vmem:[%s4696_s26 + $0x110] sm:$0xff] %v218_v34  ;;  %221 = vst [vmem:[%s4696_s26 + $0x118] sm:$0xff] %v220_v35  ;;  %v224_v37 = vld [vmem:[%s4691_s25 + $0x828] sm:$0xff]  ;;  %v226_v38 = vld [vmem:[%s4691_s25 + $0x830] sm:$0xff] }
  0x24   : > { %223 = vst [vmem:[%s4696_s26 + $0x120] sm:$0xff] %v222_v36  ;;  %225 = vst [vmem:[%s4696_s26 + $0x128] sm:$0xff] %v224_v37  ;;  %v228_v39 = vld [vmem:[%s4691_s25 + $0x838] sm:$0xff]  ;;  %v230_v40 = vld [vmem:[%s4691_s25 + $0x840] sm:$0xff] }
  0x25   : > { %227 = vst [vmem:[%s4696_s26 + $0x130] sm:$0xff] %v226_v38  ;;  %v232_v41 = vld [vmem:[%s4691_s25 + $0x848] sm:$0xff]  ;;  %229 = vst [vmem:[%s4696_s26 + $0x138] sm:$0xff] %v228_v39  ;;  %v234_v42 = vld [vmem:[%s4691_s25 + $0x850] sm:$0xff] }
  0x26   : > { %231 = vst [vmem:[%s4696_s26 + $0x140] sm:$0xff] %v230_v40  ;;  %233 = vst [vmem:[%s4696_s26 + $0x148] sm:$0xff] %v232_v41  ;;  %v236_v43 = vld [vmem:[%s4691_s25 + $0x858] sm:$0xff]  ;;  %v238_v44 = vld [vmem:[%s4691_s25 + $0x860] sm:$0xff] }
  0x27   : > { %235 = vst [vmem:[%s4696_s26 + $0x150] sm:$0xff] %v234_v42  ;;  %237 = vst [vmem:[%s4696_s26 + $0x158] sm:$0xff] %v236_v43  ;;  %v240_v45 = vld [vmem:[%s4691_s25 + $0x868] sm:$0xff]  ;;  %v242_v46 = vld [vmem:[%s4691_s25 + $0x870] sm:$0xff] }
  0x28   : > { %239 = vst [vmem:[%s4696_s26 + $0x160] sm:$0xff] %v238_v44  ;;  %v244_v47 = vld [vmem:[%s4691_s25 + $0x878] sm:$0xff]  ;;  %241 = vst [vmem:[%s4696_s26 + $0x168] sm:$0xff] %v240_v45  ;;  %v246_v48 = vld [vmem:[%s4691_s25 + $0x880] sm:$0xff] }
  0x29   : > { %243 = vst [vmem:[%s4696_s26 + $0x170] sm:$0xff] %v242_v46  ;;  %245 = vst [vmem:[%s4696_s26 + $0x178] sm:$0xff] %v244_v47  ;;  %v248_v49 = vld [vmem:[%s4691_s25 + $0x888] sm:$0xff]  ;;  %v250_v50 = vld [vmem:[%s4691_s25 + $0x890] sm:$0xff] }
  0x2a   : > { %247 = vst [vmem:[%s4696_s26 + $0x180] sm:$0xff] %v246_v48  ;;  %249 = vst [vmem:[%s4696_s26 + $0x188] sm:$0xff] %v248_v49  ;;  %v252_v51 = vld [vmem:[%s4691_s25 + $0x898] sm:$0xff]  ;;  %v254_v52 = vld [vmem:[%s4691_s25 + $0x8a0] sm:$0xff] }
  0x2b   : > { %251 = vst [vmem:[%s4696_s26 + $0x190] sm:$0xff] %v250_v50  ;;  %v256_v53 = vld [vmem:[%s4691_s25 + $0x8a8] sm:$0xff]  ;;  %253 = vst [vmem:[%s4696_s26 + $0x198] sm:$0xff] %v252_v51  ;;  %v258_v54 = vld [vmem:[%s4691_s25 + $0x8b0] sm:$0xff] }
  0x2c   : > { %255 = vst [vmem:[%s4696_s26 + $0x1a0] sm:$0xff] %v254_v52  ;;  %257 = vst [vmem:[%s4696_s26 + $0x1a8] sm:$0xff] %v256_v53  ;;  %v260_v55 = vld [vmem:[%s4691_s25 + $0x8b8] sm:$0xff]  ;;  %v262_v56 = vld [vmem:[%s4691_s25 + $0x8c0] sm:$0xff] }
  0x2d   : > { %259 = vst [vmem:[%s4696_s26 + $0x1b0] sm:$0xff] %v258_v54  ;;  %261 = vst [vmem:[%s4696_s26 + $0x1b8] sm:$0xff] %v260_v55  ;;  %v264_v57 = vld [vmem:[%s4691_s25 + $0x8c8] sm:$0xff]  ;;  %v266_v58 = vld [vmem:[%s4691_s25 + $0x8d0] sm:$0xff] }
  0x2e   : > { %263 = vst [vmem:[%s4696_s26 + $0x1c0] sm:$0xff] %v262_v56  ;;  %v268_v59 = vld [vmem:[%s4691_s25 + $0x8d8] sm:$0xff]  ;;  %265 = vst [vmem:[%s4696_s26 + $0x1c8] sm:$0xff] %v264_v57  ;;  %v270_v60 = vld [vmem:[%s4691_s25 + $0x8e0] sm:$0xff] }
  0x2f   : > { %267 = vst [vmem:[%s4696_s26 + $0x1d0] sm:$0xff] %v266_v58  ;;  %269 = vst [vmem:[%s4696_s26 + $0x1d8] sm:$0xff] %v268_v59  ;;  %v272_v61 = vld [vmem:[%s4691_s25 + $0x8e8] sm:$0xff]  ;;  %v274_v62 = vld [vmem:[%s4691_s25 + $0x8f0] sm:$0xff] }
  0x30   : > { %271 = vst [vmem:[%s4696_s26 + $0x1e0] sm:$0xff] %v270_v60  ;;  %273 = vst [vmem:[%s4696_s26 + $0x1e8] sm:$0xff] %v272_v61  ;;  %v276_v63 = vld [vmem:[%s4691_s25 + $0x8f8] sm:$0xff]  ;;  %v278_v0 = vld [vmem:[%s4691_s25 + $0x1000] sm:$0xff] }
  0x31   : > { %275 = vst [vmem:[%s4696_s26 + $0x1f0] sm:$0xff] %v274_v62  ;;  %v280_v1 = vld [vmem:[%s4691_s25 + $0x1008] sm:$0xff]  ;;  %277 = vst [vmem:[%s4696_s26 + $0x1f8] sm:$0xff] %v276_v63  ;;  %v282_v2 = vld [vmem:[%s4691_s25 + $0x1010] sm:$0xff] }
  0x32   : > { %279 = vst [vmem:[%s4696_s26 + $0x200] sm:$0xff] %v278_v0  ;;  %281 = vst [vmem:[%s4696_s26 + $0x208] sm:$0xff] %v280_v1  ;;  %v284_v3 = vld [vmem:[%s4691_s25 + $0x1018] sm:$0xff]  ;;  %v286_v4 = vld [vmem:[%s4691_s25 + $0x1020] sm:$0xff] }
  0x33   : > { %283 = vst [vmem:[%s4696_s26 + $0x210] sm:$0xff] %v282_v2  ;;  %285 = vst [vmem:[%s4696_s26 + $0x218] sm:$0xff] %v284_v3  ;;  %v288_v5 = vld [vmem:[%s4691_s25 + $0x1028] sm:$0xff]  ;;  %v290_v6 = vld [vmem:[%s4691_s25 + $0x1030] sm:$0xff] }
  0x34   : > { %287 = vst [vmem:[%s4696_s26 + $0x220] sm:$0xff] %v286_v4  ;;  %v292_v7 = vld [vmem:[%s4691_s25 + $0x1038] sm:$0xff]  ;;  %289 = vst [vmem:[%s4696_s26 + $0x228] sm:$0xff] %v288_v5  ;;  %v294_v8 = vld [vmem:[%s4691_s25 + $0x1040] sm:$0xff] }
  0x35   : > { %291 = vst [vmem:[%s4696_s26 + $0x230] sm:$0xff] %v290_v6  ;;  %293 = vst [vmem:[%s4696_s26 + $0x238] sm:$0xff] %v292_v7  ;;  %v296_v9 = vld [vmem:[%s4691_s25 + $0x1048] sm:$0xff]  ;;  %v298_v10 = vld [vmem:[%s4691_s25 + $0x1050] sm:$0xff] }
  0x36   : > { %295 = vst [vmem:[%s4696_s26 + $0x240] sm:$0xff] %v294_v8  ;;  %297 = vst [vmem:[%s4696_s26 + $0x248] sm:$0xff] %v296_v9  ;;  %v300_v11 = vld [vmem:[%s4691_s25 + $0x1058] sm:$0xff]  ;;  %v302_v12 = vld [vmem:[%s4691_s25 + $0x1060] sm:$0xff] }
  0x37   : > { %299 = vst [vmem:[%s4696_s26 + $0x250] sm:$0xff] %v298_v10  ;;  %v304_v13 = vld [vmem:[%s4691_s25 + $0x1068] sm:$0xff]  ;;  %301 = vst [vmem:[%s4696_s26 + $0x258] sm:$0xff] %v300_v11  ;;  %v306_v14 = vld [vmem:[%s4691_s25 + $0x1070] sm:$0xff] }
  0x38   : > { %303 = vst [vmem:[%s4696_s26 + $0x260] sm:$0xff] %v302_v12  ;;  %305 = vst [vmem:[%s4696_s26 + $0x268] sm:$0xff] %v304_v13  ;;  %v308_v15 = vld [vmem:[%s4691_s25 + $0x1078] sm:$0xff]  ;;  %v310_v16 = vld [vmem:[%s4691_s25 + $0x1080] sm:$0xff] }
  0x39   : > { %307 = vst [vmem:[%s4696_s26 + $0x270] sm:$0xff] %v306_v14  ;;  %309 = vst [vmem:[%s4696_s26 + $0x278] sm:$0xff] %v308_v15  ;;  %v312_v17 = vld [vmem:[%s4691_s25 + $0x1088] sm:$0xff]  ;;  %v314_v18 = vld [vmem:[%s4691_s25 + $0x1090] sm:$0xff] }
  0x3a   : > { %311 = vst [vmem:[%s4696_s26 + $0x280] sm:$0xff] %v310_v16  ;;  %v316_v19 = vld [vmem:[%s4691_s25 + $0x1098] sm:$0xff]  ;;  %313 = vst [vmem:[%s4696_s26 + $0x288] sm:$0xff] %v312_v17  ;;  %v318_v20 = vld [vmem:[%s4691_s25 + $0x10a0] sm:$0xff] }
  0x3b   : > { %315 = vst [vmem:[%s4696_s26 + $0x290] sm:$0xff] %v314_v18  ;;  %317 = vst [vmem:[%s4696_s26 + $0x298] sm:$0xff] %v316_v19  ;;  %v320_v21 = vld [vmem:[%s4691_s25 + $0x10a8] sm:$0xff]  ;;  %v322_v22 = vld [vmem:[%s4691_s25 + $0x10b0] sm:$0xff] }
  0x3c   : > { %319 = vst [vmem:[%s4696_s26 + $0x2a0] sm:$0xff] %v318_v20  ;;  %321 = vst [vmem:[%s4696_s26 + $0x2a8] sm:$0xff] %v320_v21  ;;  %v324_v23 = vld [vmem:[%s4691_s25 + $0x10b8] sm:$0xff]  ;;  %v326_v24 = vld [vmem:[%s4691_s25 + $0x10c0] sm:$0xff] }
  0x3d   : > { %323 = vst [vmem:[%s4696_s26 + $0x2b0] sm:$0xff] %v322_v22  ;;  %v328_v25 = vld [vmem:[%s4691_s25 + $0x10c8] sm:$0xff]  ;;  %325 = vst [vmem:[%s4696_s26 + $0x2b8] sm:$0xff] %v324_v23  ;;  %v330_v26 = vld [vmem:[%s4691_s25 + $0x10d0] sm:$0xff] }
  0x3e   : > { %327 = vst [vmem:[%s4696_s26 + $0x2c0] sm:$0xff] %v326_v24  ;;  %329 = vst [vmem:[%s4696_s26 + $0x2c8] sm:$0xff] %v328_v25  ;;  %v332_v27 = vld [vmem:[%s4691_s25 + $0x10d8] sm:$0xff]  ;;  %v334_v28 = vld [vmem:[%s4691_s25 + $0x10e0] sm:$0xff] }
  0x3f   : > { %331 = vst [vmem:[%s4696_s26 + $0x2d0] sm:$0xff] %v330_v26  ;;  %333 = vst [vmem:[%s4696_s26 + $0x2d8] sm:$0xff] %v332_v27  ;;  %v336_v29 = vld [vmem:[%s4691_s25 + $0x10e8] sm:$0xff]  ;;  %v338_v30 = vld [vmem:[%s4691_s25 + $0x10f0] sm:$0xff] }
  0x40   : > { %335 = vst [vmem:[%s4696_s26 + $0x2e0] sm:$0xff] %v334_v28  ;;  %v340_v31 = vld [vmem:[%s4691_s25 + $0x10f8] sm:$0xff]  ;;  %337 = vst [vmem:[%s4696_s26 + $0x2e8] sm:$0xff] %v336_v29  ;;  %v342_v32 = vld [vmem:[%s4691_s25 + $0x1800] sm:$0xff] }
  0x41   : > { %339 = vst [vmem:[%s4696_s26 + $0x2f0] sm:$0xff] %v338_v30  ;;  %341 = vst [vmem:[%s4696_s26 + $0x2f8] sm:$0xff] %v340_v31  ;;  %v344_v33 = vld [vmem:[%s4691_s25 + $0x1808] sm:$0xff]  ;;  %v346_v34 = vld [vmem:[%s4691_s25 + $0x1810] sm:$0xff] }
  0x42   : > { %343 = vst [vmem:[%s4696_s26 + $0x300] sm:$0xff] %v342_v32  ;;  %345 = vst [vmem:[%s4696_s26 + $0x308] sm:$0xff] %v344_v33  ;;  %v348_v35 = vld [vmem:[%s4691_s25 + $0x1818] sm:$0xff]  ;;  %v350_v36 = vld [vmem:[%s4691_s25 + $0x1820] sm:$0xff] }
  0x43   : > { %347 = vst [vmem:[%s4696_s26 + $0x310] sm:$0xff] %v346_v34  ;;  %v352_v37 = vld [vmem:[%s4691_s25 + $0x1828] sm:$0xff]  ;;  %349 = vst [vmem:[%s4696_s26 + $0x318] sm:$0xff] %v348_v35  ;;  %v354_v38 = vld [vmem:[%s4691_s25 + $0x1830] sm:$0xff] }
  0x44   : > { %351 = vst [vmem:[%s4696_s26 + $0x320] sm:$0xff] %v350_v36  ;;  %353 = vst [vmem:[%s4696_s26 + $0x328] sm:$0xff] %v352_v37  ;;  %v356_v39 = vld [vmem:[%s4691_s25 + $0x1838] sm:$0xff]  ;;  %v358_v40 = vld [vmem:[%s4691_s25 + $0x1840] sm:$0xff] }
  0x45   : > { %355 = vst [vmem:[%s4696_s26 + $0x330] sm:$0xff] %v354_v38  ;;  %357 = vst [vmem:[%s4696_s26 + $0x338] sm:$0xff] %v356_v39  ;;  %v360_v41 = vld [vmem:[%s4691_s25 + $0x1848] sm:$0xff]  ;;  %v362_v42 = vld [vmem:[%s4691_s25 + $0x1850] sm:$0xff] }
  0x46   : > { %359 = vst [vmem:[%s4696_s26 + $0x340] sm:$0xff] %v358_v40  ;;  %v364_v43 = vld [vmem:[%s4691_s25 + $0x1858] sm:$0xff]  ;;  %361 = vst [vmem:[%s4696_s26 + $0x348] sm:$0xff] %v360_v41  ;;  %v366_v44 = vld [vmem:[%s4691_s25 + $0x1860] sm:$0xff] }
  0x47   : > { %363 = vst [vmem:[%s4696_s26 + $0x350] sm:$0xff] %v362_v42  ;;  %365 = vst [vmem:[%s4696_s26 + $0x358] sm:$0xff] %v364_v43  ;;  %v368_v45 = vld [vmem:[%s4691_s25 + $0x1868] sm:$0xff]  ;;  %v370_v46 = vld [vmem:[%s4691_s25 + $0x1870] sm:$0xff] }
  0x48   : > { %367 = vst [vmem:[%s4696_s26 + $0x360] sm:$0xff] %v366_v44  ;;  %369 = vst [vmem:[%s4696_s26 + $0x368] sm:$0xff] %v368_v45  ;;  %v372_v47 = vld [vmem:[%s4691_s25 + $0x1878] sm:$0xff]  ;;  %v374_v48 = vld [vmem:[%s4691_s25 + $0x1880] sm:$0xff] }
  0x49   : > { %371 = vst [vmem:[%s4696_s26 + $0x370] sm:$0xff] %v370_v46  ;;  %v376_v49 = vld [vmem:[%s4691_s25 + $0x1888] sm:$0xff]  ;;  %373 = vst [vmem:[%s4696_s26 + $0x378] sm:$0xff] %v372_v47  ;;  %v378_v50 = vld [vmem:[%s4691_s25 + $0x1890] sm:$0xff] }
  0x4a   : > { %375 = vst [vmem:[%s4696_s26 + $0x380] sm:$0xff] %v374_v48  ;;  %377 = vst [vmem:[%s4696_s26 + $0x388] sm:$0xff] %v376_v49  ;;  %v380_v51 = vld [vmem:[%s4691_s25 + $0x1898] sm:$0xff]  ;;  %v382_v52 = vld [vmem:[%s4691_s25 + $0x18a0] sm:$0xff] }
  0x4b   : > { %379 = vst [vmem:[%s4696_s26 + $0x390] sm:$0xff] %v378_v50  ;;  %381 = vst [vmem:[%s4696_s26 + $0x398] sm:$0xff] %v380_v51  ;;  %v384_v53 = vld [vmem:[%s4691_s25 + $0x18a8] sm:$0xff]  ;;  %v386_v54 = vld [vmem:[%s4691_s25 + $0x18b0] sm:$0xff] }
  0x4c   : > { %383 = vst [vmem:[%s4696_s26 + $0x3a0] sm:$0xff] %v382_v52  ;;  %v388_v55 = vld [vmem:[%s4691_s25 + $0x18b8] sm:$0xff]  ;;  %385 = vst [vmem:[%s4696_s26 + $0x3a8] sm:$0xff] %v384_v53  ;;  %v390_v56 = vld [vmem:[%s4691_s25 + $0x18c0] sm:$0xff] }
  0x4d   : > { %387 = vst [vmem:[%s4696_s26 + $0x3b0] sm:$0xff] %v386_v54  ;;  %389 = vst [vmem:[%s4696_s26 + $0x3b8] sm:$0xff] %v388_v55  ;;  %v392_v57 = vld [vmem:[%s4691_s25 + $0x18c8] sm:$0xff]  ;;  %v394_v58 = vld [vmem:[%s4691_s25 + $0x18d0] sm:$0xff] }
  0x4e   : > { %391 = vst [vmem:[%s4696_s26 + $0x3c0] sm:$0xff] %v390_v56  ;;  %393 = vst [vmem:[%s4696_s26 + $0x3c8] sm:$0xff] %v392_v57  ;;  %v396_v59 = vld [vmem:[%s4691_s25 + $0x18d8] sm:$0xff]  ;;  %v398_v60 = vld [vmem:[%s4691_s25 + $0x18e0] sm:$0xff] }
  0x4f   : > { %395 = vst [vmem:[%s4696_s26 + $0x3d0] sm:$0xff] %v394_v58  ;;  %v400_v61 = vld [vmem:[%s4691_s25 + $0x18e8] sm:$0xff]  ;;  %397 = vst [vmem:[%s4696_s26 + $0x3d8] sm:$0xff] %v396_v59  ;;  %v402_v62 = vld [vmem:[%s4691_s25 + $0x18f0] sm:$0xff] }
  0x50   : > { %399 = vst [vmem:[%s4696_s26 + $0x3e0] sm:$0xff] %v398_v60  ;;  %401 = vst [vmem:[%s4696_s26 + $0x3e8] sm:$0xff] %v400_v61  ;;  %v404_v63 = vld [vmem:[%s4691_s25 + $0x18f8] sm:$0xff]  ;;  %v406_v0 = vld [vmem:[%s4691_s25 + $0x2000] sm:$0xff] }
  0x51   : > { %403 = vst [vmem:[%s4696_s26 + $0x3f0] sm:$0xff] %v402_v62  ;;  %405 = vst [vmem:[%s4696_s26 + $0x3f8] sm:$0xff] %v404_v63  ;;  %v408_v1 = vld [vmem:[%s4691_s25 + $0x2008] sm:$0xff]  ;;  %v410_v2 = vld [vmem:[%s4691_s25 + $0x2010] sm:$0xff] }
  0x52   : > { %407 = vst [vmem:[%s4696_s26 + $0x400] sm:$0xff] %v406_v0  ;;  %v412_v3 = vld [vmem:[%s4691_s25 + $0x2018] sm:$0xff]  ;;  %409 = vst [vmem:[%s4696_s26 + $0x408] sm:$0xff] %v408_v1  ;;  %v414_v4 = vld [vmem:[%s4691_s25 + $0x2020] sm:$0xff] }
  0x53   : > { %411 = vst [vmem:[%s4696_s26 + $0x410] sm:$0xff] %v410_v2  ;;  %413 = vst [vmem:[%s4696_s26 + $0x418] sm:$0xff] %v412_v3  ;;  %v416_v5 = vld [vmem:[%s4691_s25 + $0x2028] sm:$0xff]  ;;  %v418_v6 = vld [vmem:[%s4691_s25 + $0x2030] sm:$0xff] }
  0x54   : > { %415 = vst [vmem:[%s4696_s26 + $0x420] sm:$0xff] %v414_v4  ;;  %417 = vst [vmem:[%s4696_s26 + $0x428] sm:$0xff] %v416_v5  ;;  %v420_v7 = vld [vmem:[%s4691_s25 + $0x2038] sm:$0xff]  ;;  %v422_v8 = vld [vmem:[%s4691_s25 + $0x2040] sm:$0xff] }
  0x55   : > { %419 = vst [vmem:[%s4696_s26 + $0x430] sm:$0xff] %v418_v6  ;;  %v424_v9 = vld [vmem:[%s4691_s25 + $0x2048] sm:$0xff]  ;;  %421 = vst [vmem:[%s4696_s26 + $0x438] sm:$0xff] %v420_v7  ;;  %v426_v10 = vld [vmem:[%s4691_s25 + $0x2050] sm:$0xff] }
  0x56   : > { %423 = vst [vmem:[%s4696_s26 + $0x440] sm:$0xff] %v422_v8  ;;  %425 = vst [vmem:[%s4696_s26 + $0x448] sm:$0xff] %v424_v9  ;;  %v428_v11 = vld [vmem:[%s4691_s25 + $0x2058] sm:$0xff]  ;;  %v430_v12 = vld [vmem:[%s4691_s25 + $0x2060] sm:$0xff] }
  0x57   : > { %427 = vst [vmem:[%s4696_s26 + $0x450] sm:$0xff] %v426_v10  ;;  %429 = vst [vmem:[%s4696_s26 + $0x458] sm:$0xff] %v428_v11  ;;  %v432_v13 = vld [vmem:[%s4691_s25 + $0x2068] sm:$0xff]  ;;  %v434_v14 = vld [vmem:[%s4691_s25 + $0x2070] sm:$0xff] }
  0x58   : > { %431 = vst [vmem:[%s4696_s26 + $0x460] sm:$0xff] %v430_v12  ;;  %v436_v15 = vld [vmem:[%s4691_s25 + $0x2078] sm:$0xff]  ;;  %433 = vst [vmem:[%s4696_s26 + $0x468] sm:$0xff] %v432_v13  ;;  %v438_v16 = vld [vmem:[%s4691_s25 + $0x2080] sm:$0xff] }
  0x59   : > { %435 = vst [vmem:[%s4696_s26 + $0x470] sm:$0xff] %v434_v14  ;;  %437 = vst [vmem:[%s4696_s26 + $0x478] sm:$0xff] %v436_v15  ;;  %v440_v17 = vld [vmem:[%s4691_s25 + $0x2088] sm:$0xff]  ;;  %v442_v18 = vld [vmem:[%s4691_s25 + $0x2090] sm:$0xff] }
  0x5a   : > { %439 = vst [vmem:[%s4696_s26 + $0x480] sm:$0xff] %v438_v16  ;;  %441 = vst [vmem:[%s4696_s26 + $0x488] sm:$0xff] %v440_v17  ;;  %v444_v19 = vld [vmem:[%s4691_s25 + $0x2098] sm:$0xff]  ;;  %v446_v20 = vld [vmem:[%s4691_s25 + $0x20a0] sm:$0xff] }
  0x5b   : > { %443 = vst [vmem:[%s4696_s26 + $0x490] sm:$0xff] %v442_v18  ;;  %v448_v21 = vld [vmem:[%s4691_s25 + $0x20a8] sm:$0xff]  ;;  %445 = vst [vmem:[%s4696_s26 + $0x498] sm:$0xff] %v444_v19  ;;  %v450_v22 = vld [vmem:[%s4691_s25 + $0x20b0] sm:$0xff] }
  0x5c   : > { %447 = vst [vmem:[%s4696_s26 + $0x4a0] sm:$0xff] %v446_v20  ;;  %449 = vst [vmem:[%s4696_s26 + $0x4a8] sm:$0xff] %v448_v21  ;;  %v452_v23 = vld [vmem:[%s4691_s25 + $0x20b8] sm:$0xff]  ;;  %v454_v24 = vld [vmem:[%s4691_s25 + $0x20c0] sm:$0xff] }
  0x5d   : > { %451 = vst [vmem:[%s4696_s26 + $0x4b0] sm:$0xff] %v450_v22  ;;  %453 = vst [vmem:[%s4696_s26 + $0x4b8] sm:$0xff] %v452_v23  ;;  %v456_v25 = vld [vmem:[%s4691_s25 + $0x20c8] sm:$0xff]  ;;  %v458_v26 = vld [vmem:[%s4691_s25 + $0x20d0] sm:$0xff] }
  0x5e   : > { %455 = vst [vmem:[%s4696_s26 + $0x4c0] sm:$0xff] %v454_v24  ;;  %v460_v27 = vld [vmem:[%s4691_s25 + $0x20d8] sm:$0xff]  ;;  %457 = vst [vmem:[%s4696_s26 + $0x4c8] sm:$0xff] %v456_v25  ;;  %v462_v28 = vld [vmem:[%s4691_s25 + $0x20e0] sm:$0xff] }
  0x5f   : > { %459 = vst [vmem:[%s4696_s26 + $0x4d0] sm:$0xff] %v458_v26  ;;  %461 = vst [vmem:[%s4696_s26 + $0x4d8] sm:$0xff] %v460_v27  ;;  %v464_v29 = vld [vmem:[%s4691_s25 + $0x20e8] sm:$0xff]  ;;  %v466_v30 = vld [vmem:[%s4691_s25 + $0x20f0] sm:$0xff] }
  0x60   : > { %463 = vst [vmem:[%s4696_s26 + $0x4e0] sm:$0xff] %v462_v28  ;;  %465 = vst [vmem:[%s4696_s26 + $0x4e8] sm:$0xff] %v464_v29  ;;  %v468_v31 = vld [vmem:[%s4691_s25 + $0x20f8] sm:$0xff]  ;;  %v470_v32 = vld [vmem:[%s4691_s25 + $0x2800] sm:$0xff] }
  0x61   : > { %467 = vst [vmem:[%s4696_s26 + $0x4f0] sm:$0xff] %v466_v30  ;;  %v472_v33 = vld [vmem:[%s4691_s25 + $0x2808] sm:$0xff]  ;;  %469 = vst [vmem:[%s4696_s26 + $0x4f8] sm:$0xff] %v468_v31  ;;  %v474_v34 = vld [vmem:[%s4691_s25 + $0x2810] sm:$0xff] }
  0x62   : > { %471 = vst [vmem:[%s4696_s26 + $0x500] sm:$0xff] %v470_v32  ;;  %473 = vst [vmem:[%s4696_s26 + $0x508] sm:$0xff] %v472_v33  ;;  %v476_v35 = vld [vmem:[%s4691_s25 + $0x2818] sm:$0xff]  ;;  %v478_v36 = vld [vmem:[%s4691_s25 + $0x2820] sm:$0xff] }
  0x63   : > { %475 = vst [vmem:[%s4696_s26 + $0x510] sm:$0xff] %v474_v34  ;;  %477 = vst [vmem:[%s4696_s26 + $0x518] sm:$0xff] %v476_v35  ;;  %v480_v37 = vld [vmem:[%s4691_s25 + $0x2828] sm:$0xff]  ;;  %v482_v38 = vld [vmem:[%s4691_s25 + $0x2830] sm:$0xff] }
  0x64   : > { %479 = vst [vmem:[%s4696_s26 + $0x520] sm:$0xff] %v478_v36  ;;  %v484_v39 = vld [vmem:[%s4691_s25 + $0x2838] sm:$0xff]  ;;  %481 = vst [vmem:[%s4696_s26 + $0x528] sm:$0xff] %v480_v37  ;;  %v486_v40 = vld [vmem:[%s4691_s25 + $0x2840] sm:$0xff] }
  0x65   : > { %483 = vst [vmem:[%s4696_s26 + $0x530] sm:$0xff] %v482_v38  ;;  %485 = vst [vmem:[%s4696_s26 + $0x538] sm:$0xff] %v484_v39  ;;  %v488_v41 = vld [vmem:[%s4691_s25 + $0x2848] sm:$0xff]  ;;  %v490_v42 = vld [vmem:[%s4691_s25 + $0x2850] sm:$0xff] }
  0x66   : > { %487 = vst [vmem:[%s4696_s26 + $0x540] sm:$0xff] %v486_v40  ;;  %489 = vst [vmem:[%s4696_s26 + $0x548] sm:$0xff] %v488_v41  ;;  %v492_v43 = vld [vmem:[%s4691_s25 + $0x2858] sm:$0xff]  ;;  %v494_v44 = vld [vmem:[%s4691_s25 + $0x2860] sm:$0xff] }
  0x67   : > { %491 = vst [vmem:[%s4696_s26 + $0x550] sm:$0xff] %v490_v42  ;;  %v496_v45 = vld [vmem:[%s4691_s25 + $0x2868] sm:$0xff]  ;;  %493 = vst [vmem:[%s4696_s26 + $0x558] sm:$0xff] %v492_v43  ;;  %v498_v46 = vld [vmem:[%s4691_s25 + $0x2870] sm:$0xff] }
  0x68   : > { %495 = vst [vmem:[%s4696_s26 + $0x560] sm:$0xff] %v494_v44  ;;  %497 = vst [vmem:[%s4696_s26 + $0x568] sm:$0xff] %v496_v45  ;;  %v500_v47 = vld [vmem:[%s4691_s25 + $0x2878] sm:$0xff]  ;;  %v502_v48 = vld [vmem:[%s4691_s25 + $0x2880] sm:$0xff] }
  0x69   : > { %499 = vst [vmem:[%s4696_s26 + $0x570] sm:$0xff] %v498_v46  ;;  %501 = vst [vmem:[%s4696_s26 + $0x578] sm:$0xff] %v500_v47  ;;  %v504_v49 = vld [vmem:[%s4691_s25 + $0x2888] sm:$0xff]  ;;  %v506_v50 = vld [vmem:[%s4691_s25 + $0x2890] sm:$0xff] }
  0x6a   : > { %503 = vst [vmem:[%s4696_s26 + $0x580] sm:$0xff] %v502_v48  ;;  %v508_v51 = vld [vmem:[%s4691_s25 + $0x2898] sm:$0xff]  ;;  %505 = vst [vmem:[%s4696_s26 + $0x588] sm:$0xff] %v504_v49  ;;  %v510_v52 = vld [vmem:[%s4691_s25 + $0x28a0] sm:$0xff] }
  0x6b   : > { %507 = vst [vmem:[%s4696_s26 + $0x590] sm:$0xff] %v506_v50  ;;  %509 = vst [vmem:[%s4696_s26 + $0x598] sm:$0xff] %v508_v51  ;;  %v512_v53 = vld [vmem:[%s4691_s25 + $0x28a8] sm:$0xff]  ;;  %v514_v54 = vld [vmem:[%s4691_s25 + $0x28b0] sm:$0xff] }
  0x6c   : > { %511 = vst [vmem:[%s4696_s26 + $0x5a0] sm:$0xff] %v510_v52  ;;  %513 = vst [vmem:[%s4696_s26 + $0x5a8] sm:$0xff] %v512_v53  ;;  %v516_v55 = vld [vmem:[%s4691_s25 + $0x28b8] sm:$0xff]  ;;  %v518_v56 = vld [vmem:[%s4691_s25 + $0x28c0] sm:$0xff] }
  0x6d   : > { %515 = vst [vmem:[%s4696_s26 + $0x5b0] sm:$0xff] %v514_v54  ;;  %v520_v57 = vld [vmem:[%s4691_s25 + $0x28c8] sm:$0xff]  ;;  %517 = vst [vmem:[%s4696_s26 + $0x5b8] sm:$0xff] %v516_v55  ;;  %v522_v58 = vld [vmem:[%s4691_s25 + $0x28d0] sm:$0xff] }
  0x6e   : > { %519 = vst [vmem:[%s4696_s26 + $0x5c0] sm:$0xff] %v518_v56  ;;  %521 = vst [vmem:[%s4696_s26 + $0x5c8] sm:$0xff] %v520_v57  ;;  %v524_v59 = vld [vmem:[%s4691_s25 + $0x28d8] sm:$0xff]  ;;  %v526_v60 = vld [vmem:[%s4691_s25 + $0x28e0] sm:$0xff] }
  0x6f   : > { %523 = vst [vmem:[%s4696_s26 + $0x5d0] sm:$0xff] %v522_v58  ;;  %525 = vst [vmem:[%s4696_s26 + $0x5d8] sm:$0xff] %v524_v59  ;;  %v528_v61 = vld [vmem:[%s4691_s25 + $0x28e8] sm:$0xff]  ;;  %v530_v62 = vld [vmem:[%s4691_s25 + $0x28f0] sm:$0xff] }
  0x70   : > { %527 = vst [vmem:[%s4696_s26 + $0x5e0] sm:$0xff] %v526_v60  ;;  %v532_v63 = vld [vmem:[%s4691_s25 + $0x28f8] sm:$0xff]  ;;  %529 = vst [vmem:[%s4696_s26 + $0x5e8] sm:$0xff] %v528_v61  ;;  %v534_v0 = vld [vmem:[%s4691_s25 + $0x3000] sm:$0xff] }
  0x71   : > { %531 = vst [vmem:[%s4696_s26 + $0x5f0] sm:$0xff] %v530_v62  ;;  %533 = vst [vmem:[%s4696_s26 + $0x5f8] sm:$0xff] %v532_v63  ;;  %v536_v1 = vld [vmem:[%s4691_s25 + $0x3008] sm:$0xff]  ;;  %v538_v2 = vld [vmem:[%s4691_s25 + $0x3010] sm:$0xff] }
  0x72   : > { %535 = vst [vmem:[%s4696_s26 + $0x600] sm:$0xff] %v534_v0  ;;  %537 = vst [vmem:[%s4696_s26 + $0x608] sm:$0xff] %v536_v1  ;;  %v540_v3 = vld [vmem:[%s4691_s25 + $0x3018] sm:$0xff]  ;;  %v542_v4 = vld [vmem:[%s4691_s25 + $0x3020] sm:$0xff] }
  0x73   : > { %539 = vst [vmem:[%s4696_s26 + $0x610] sm:$0xff] %v538_v2  ;;  %v544_v5 = vld [vmem:[%s4691_s25 + $0x3028] sm:$0xff]  ;;  %541 = vst [vmem:[%s4696_s26 + $0x618] sm:$0xff] %v540_v3  ;;  %v546_v6 = vld [vmem:[%s4691_s25 + $0x3030] sm:$0xff] }
  0x74   : > { %543 = vst [vmem:[%s4696_s26 + $0x620] sm:$0xff] %v542_v4  ;;  %545 = vst [vmem:[%s4696_s26 + $0x628] sm:$0xff] %v544_v5  ;;  %v548_v7 = vld [vmem:[%s4691_s25 + $0x3038] sm:$0xff]  ;;  %v550_v8 = vld [vmem:[%s4691_s25 + $0x3040] sm:$0xff] }
  0x75   : > { %547 = vst [vmem:[%s4696_s26 + $0x630] sm:$0xff] %v546_v6  ;;  %549 = vst [vmem:[%s4696_s26 + $0x638] sm:$0xff] %v548_v7  ;;  %v552_v9 = vld [vmem:[%s4691_s25 + $0x3048] sm:$0xff]  ;;  %v554_v10 = vld [vmem:[%s4691_s25 + $0x3050] sm:$0xff] }
  0x76   : > { %551 = vst [vmem:[%s4696_s26 + $0x640] sm:$0xff] %v550_v8  ;;  %v556_v11 = vld [vmem:[%s4691_s25 + $0x3058] sm:$0xff]  ;;  %553 = vst [vmem:[%s4696_s26 + $0x648] sm:$0xff] %v552_v9  ;;  %v558_v12 = vld [vmem:[%s4691_s25 + $0x3060] sm:$0xff] }
  0x77   : > { %555 = vst [vmem:[%s4696_s26 + $0x650] sm:$0xff] %v554_v10  ;;  %557 = vst [vmem:[%s4696_s26 + $0x658] sm:$0xff] %v556_v11  ;;  %v560_v13 = vld [vmem:[%s4691_s25 + $0x3068] sm:$0xff]  ;;  %v562_v14 = vld [vmem:[%s4691_s25 + $0x3070] sm:$0xff] }
  0x78   : > { %559 = vst [vmem:[%s4696_s26 + $0x660] sm:$0xff] %v558_v12  ;;  %561 = vst [vmem:[%s4696_s26 + $0x668] sm:$0xff] %v560_v13  ;;  %v564_v15 = vld [vmem:[%s4691_s25 + $0x3078] sm:$0xff]  ;;  %v566_v16 = vld [vmem:[%s4691_s25 + $0x3080] sm:$0xff] }
  0x79   : > { %563 = vst [vmem:[%s4696_s26 + $0x670] sm:$0xff] %v562_v14  ;;  %v568_v17 = vld [vmem:[%s4691_s25 + $0x3088] sm:$0xff]  ;;  %565 = vst [vmem:[%s4696_s26 + $0x678] sm:$0xff] %v564_v15  ;;  %v570_v18 = vld [vmem:[%s4691_s25 + $0x3090] sm:$0xff] }
  0x7a   : > { %567 = vst [vmem:[%s4696_s26 + $0x680] sm:$0xff] %v566_v16  ;;  %569 = vst [vmem:[%s4696_s26 + $0x688] sm:$0xff] %v568_v17  ;;  %v572_v19 = vld [vmem:[%s4691_s25 + $0x3098] sm:$0xff]  ;;  %v574_v20 = vld [vmem:[%s4691_s25 + $0x30a0] sm:$0xff] }
  0x7b   : > { %571 = vst [vmem:[%s4696_s26 + $0x690] sm:$0xff] %v570_v18  ;;  %573 = vst [vmem:[%s4696_s26 + $0x698] sm:$0xff] %v572_v19  ;;  %v576_v21 = vld [vmem:[%s4691_s25 + $0x30a8] sm:$0xff]  ;;  %v578_v22 = vld [vmem:[%s4691_s25 + $0x30b0] sm:$0xff] }
  0x7c   : > { %575 = vst [vmem:[%s4696_s26 + $0x6a0] sm:$0xff] %v574_v20  ;;  %v580_v23 = vld [vmem:[%s4691_s25 + $0x30b8] sm:$0xff]  ;;  %577 = vst [vmem:[%s4696_s26 + $0x6a8] sm:$0xff] %v576_v21  ;;  %v582_v24 = vld [vmem:[%s4691_s25 + $0x30c0] sm:$0xff] }
  0x7d   : > { %579 = vst [vmem:[%s4696_s26 + $0x6b0] sm:$0xff] %v578_v22  ;;  %581 = vst [vmem:[%s4696_s26 + $0x6b8] sm:$0xff] %v580_v23  ;;  %v584_v25 = vld [vmem:[%s4691_s25 + $0x30c8] sm:$0xff]  ;;  %v586_v26 = vld [vmem:[%s4691_s25 + $0x30d0] sm:$0xff] }
  0x7e   : > { %583 = vst [vmem:[%s4696_s26 + $0x6c0] sm:$0xff] %v582_v24  ;;  %585 = vst [vmem:[%s4696_s26 + $0x6c8] sm:$0xff] %v584_v25  ;;  %v588_v27 = vld [vmem:[%s4691_s25 + $0x30d8] sm:$0xff]  ;;  %v590_v28 = vld [vmem:[%s4691_s25 + $0x30e0] sm:$0xff] }
  0x7f   : > { %587 = vst [vmem:[%s4696_s26 + $0x6d0] sm:$0xff] %v586_v26  ;;  %v592_v29 = vld [vmem:[%s4691_s25 + $0x30e8] sm:$0xff]  ;;  %589 = vst [vmem:[%s4696_s26 + $0x6d8] sm:$0xff] %v588_v27  ;;  %v594_v30 = vld [vmem:[%s4691_s25 + $0x30f0] sm:$0xff] }
  0x80   : > { %591 = vst [vmem:[%s4696_s26 + $0x6e0] sm:$0xff] %v590_v28  ;;  %593 = vst [vmem:[%s4696_s26 + $0x6e8] sm:$0xff] %v592_v29  ;;  %v596_v31 = vld [vmem:[%s4691_s25 + $0x30f8] sm:$0xff]  ;;  %v598_v32 = vld [vmem:[%s4691_s25 + $0x3800] sm:$0xff] }
  0x81   : > { %595 = vst [vmem:[%s4696_s26 + $0x6f0] sm:$0xff] %v594_v30  ;;  %597 = vst [vmem:[%s4696_s26 + $0x6f8] sm:$0xff] %v596_v31  ;;  %v600_v33 = vld [vmem:[%s4691_s25 + $0x3808] sm:$0xff]  ;;  %v602_v34 = vld [vmem:[%s4691_s25 + $0x3810] sm:$0xff] }
  0x82   : > { %599 = vst [vmem:[%s4696_s26 + $0x700] sm:$0xff] %v598_v32  ;;  %v604_v35 = vld [vmem:[%s4691_s25 + $0x3818] sm:$0xff]  ;;  %601 = vst [vmem:[%s4696_s26 + $0x708] sm:$0xff] %v600_v33  ;;  %v606_v36 = vld [vmem:[%s4691_s25 + $0x3820] sm:$0xff] }
  0x83   : > { %603 = vst [vmem:[%s4696_s26 + $0x710] sm:$0xff] %v602_v34  ;;  %605 = vst [vmem:[%s4696_s26 + $0x718] sm:$0xff] %v604_v35  ;;  %v608_v37 = vld [vmem:[%s4691_s25 + $0x3828] sm:$0xff]  ;;  %v610_v38 = vld [vmem:[%s4691_s25 + $0x3830] sm:$0xff] }
  0x84   : > { %607 = vst [vmem:[%s4696_s26 + $0x720] sm:$0xff] %v606_v36  ;;  %609 = vst [vmem:[%s4696_s26 + $0x728] sm:$0xff] %v608_v37  ;;  %v612_v39 = vld [vmem:[%s4691_s25 + $0x3838] sm:$0xff]  ;;  %v614_v40 = vld [vmem:[%s4691_s25 + $0x3840] sm:$0xff] }
  0x85   : > { %611 = vst [vmem:[%s4696_s26 + $0x730] sm:$0xff] %v610_v38  ;;  %v616_v41 = vld [vmem:[%s4691_s25 + $0x3848] sm:$0xff]  ;;  %613 = vst [vmem:[%s4696_s26 + $0x738] sm:$0xff] %v612_v39  ;;  %v618_v42 = vld [vmem:[%s4691_s25 + $0x3850] sm:$0xff] }
  0x86   : > { %615 = vst [vmem:[%s4696_s26 + $0x740] sm:$0xff] %v614_v40  ;;  %617 = vst [vmem:[%s4696_s26 + $0x748] sm:$0xff] %v616_v41  ;;  %v620_v43 = vld [vmem:[%s4691_s25 + $0x3858] sm:$0xff]  ;;  %v622_v44 = vld [vmem:[%s4691_s25 + $0x3860] sm:$0xff] }
  0x87   : > { %619 = vst [vmem:[%s4696_s26 + $0x750] sm:$0xff] %v618_v42  ;;  %621 = vst [vmem:[%s4696_s26 + $0x758] sm:$0xff] %v620_v43  ;;  %v624_v45 = vld [vmem:[%s4691_s25 + $0x3868] sm:$0xff]  ;;  %v626_v46 = vld [vmem:[%s4691_s25 + $0x3870] sm:$0xff] }
  0x88   : > { %623 = vst [vmem:[%s4696_s26 + $0x760] sm:$0xff] %v622_v44  ;;  %v628_v47 = vld [vmem:[%s4691_s25 + $0x3878] sm:$0xff]  ;;  %625 = vst [vmem:[%s4696_s26 + $0x768] sm:$0xff] %v624_v45  ;;  %v630_v48 = vld [vmem:[%s4691_s25 + $0x3880] sm:$0xff] }
  0x89   : > { %627 = vst [vmem:[%s4696_s26 + $0x770] sm:$0xff] %v626_v46  ;;  %629 = vst [vmem:[%s4696_s26 + $0x778] sm:$0xff] %v628_v47  ;;  %v632_v49 = vld [vmem:[%s4691_s25 + $0x3888] sm:$0xff]  ;;  %v634_v50 = vld [vmem:[%s4691_s25 + $0x3890] sm:$0xff] }
  0x8a   : > { %631 = vst [vmem:[%s4696_s26 + $0x780] sm:$0xff] %v630_v48  ;;  %633 = vst [vmem:[%s4696_s26 + $0x788] sm:$0xff] %v632_v49  ;;  %v636_v51 = vld [vmem:[%s4691_s25 + $0x3898] sm:$0xff]  ;;  %v638_v52 = vld [vmem:[%s4691_s25 + $0x38a0] sm:$0xff] }
  0x8b   : > { %635 = vst [vmem:[%s4696_s26 + $0x790] sm:$0xff] %v634_v50  ;;  %v640_v53 = vld [vmem:[%s4691_s25 + $0x38a8] sm:$0xff]  ;;  %637 = vst [vmem:[%s4696_s26 + $0x798] sm:$0xff] %v636_v51  ;;  %v642_v54 = vld [vmem:[%s4691_s25 + $0x38b0] sm:$0xff] }
  0x8c   : > { %639 = vst [vmem:[%s4696_s26 + $0x7a0] sm:$0xff] %v638_v52  ;;  %641 = vst [vmem:[%s4696_s26 + $0x7a8] sm:$0xff] %v640_v53  ;;  %v644_v55 = vld [vmem:[%s4691_s25 + $0x38b8] sm:$0xff]  ;;  %v646_v56 = vld [vmem:[%s4691_s25 + $0x38c0] sm:$0xff] }
  0x8d   : > { %643 = vst [vmem:[%s4696_s26 + $0x7b0] sm:$0xff] %v642_v54  ;;  %645 = vst [vmem:[%s4696_s26 + $0x7b8] sm:$0xff] %v644_v55  ;;  %v648_v57 = vld [vmem:[%s4691_s25 + $0x38c8] sm:$0xff]  ;;  %v650_v58 = vld [vmem:[%s4691_s25 + $0x38d0] sm:$0xff] }
  0x8e   : > { %647 = vst [vmem:[%s4696_s26 + $0x7c0] sm:$0xff] %v646_v56  ;;  %v652_v59 = vld [vmem:[%s4691_s25 + $0x38d8] sm:$0xff]  ;;  %649 = vst [vmem:[%s4696_s26 + $0x7c8] sm:$0xff] %v648_v57  ;;  %v654_v60 = vld [vmem:[%s4691_s25 + $0x38e0] sm:$0xff] }
  0x8f   : > { %651 = vst [vmem:[%s4696_s26 + $0x7d0] sm:$0xff] %v650_v58  ;;  %653 = vst [vmem:[%s4696_s26 + $0x7d8] sm:$0xff] %v652_v59  ;;  %v656_v61 = vld [vmem:[%s4691_s25 + $0x38e8] sm:$0xff]  ;;  %v658_v62 = vld [vmem:[%s4691_s25 + $0x38f0] sm:$0xff] }
  0x90   : > { %655 = vst [vmem:[%s4696_s26 + $0x7e0] sm:$0xff] %v654_v60  ;;  %657 = vst [vmem:[%s4696_s26 + $0x7e8] sm:$0xff] %v656_v61  ;;  %v660_v63 = vld [vmem:[%s4691_s25 + $0x38f8] sm:$0xff] }
  0x91   : > { %659 = vst [vmem:[%s4696_s26 + $0x7f0] sm:$0xff] %v658_v62  ;;  %661 = vst [vmem:[%s4696_s26 + $0x7f8] sm:$0xff] %v660_v63 }
  0x92 PF: > { %p4256_p5 = scmp.ge.s32.totalorder %s4633_s14, 1  ;;  %p666_p6 = scmp.lt.s32.totalorder %s4633_s14, 9 }
  0x94   : > { %p667_p7 = pnand %p4256_p5, %p666_p6 }
  0x95   : > { %s673_s27 = sand.u32 (!%p667_p7), 1, %s4625_s12   ;;  %v4635_v0 = vmov (!%p667_p7), 0   ;;  %v961_v1 = vld [vmem:[%s5750_s2] sm:$0xf] (!%p667_p7)  ;;  %vm2247_vm0 = vcmask (!%p667_p7), 523264   ;;  %s5540_s9 = sshll.u32 (!%p667_p7), %s4249_s15, 6 }
  0x96   : > { %670 = sbr.rel (%p667_p7) target bundleno = 638 (0x27e), region = 51  ;;  %s4257_s28 = sshll.u32 (!%p667_p7), %s673_s27, 11  ;;  %2283 = vmatprep.mubr.bf16.mxu0 (!%p667_p7), %v4635_v0  ;;  %2324 = vmatprep.mubr.bf16.mxu1 (!%p667_p7), %v4635_v0  ;;  %v5245_v44 = vld [vmem:[%s5748_s0] sm:$0x3] (!%p667_p7) }
  0x97   : > { %4609 = vset.pattern.permute.xlu0 (!%p667_p7), %v4635_v0  ;;  %s5216_s4 = scalar_lea.vmem (!%p667_p7), [#allocation2], %s4257_s28  ;;  %p698_p8 = scmp.lt.s32.totalorder (!%p667_p7), %s5540_s9, 511 }
  0x98   : > { %v705_v2 = vld [vmem:[%s5216_s4] sm:$0xff] (!%p667_p7)  ;;  %v706_v4 = vld [vmem:[%s5216_s4 + $0x8] sm:$0xff] (!%p667_p7)  ;;  %964 = vperm.xlu0 (!%p667_p7), %4609, %v961_v1   ;;  %v707_v32 = vld [vmem:[%s5216_s4 + $0x10] sm:$0xff] (!%p667_p7) }
  0x99   : > { %v737_v3 = vld [vmem:[%s5216_s4 + $0x100] sm:$0xff] (!%p667_p7)  ;;  %v738_v6 = vld [vmem:[%s5216_s4 + $0x108] sm:$0xff] (!%p667_p7)  ;;  %v739_v33 = vld [vmem:[%s5216_s4 + $0x110] sm:$0xff] (!%p667_p7) }
  0x9a   : > { %v4261_v5 = vcombine.high (!%p667_p7), %v705_v2, %v737_v3  ;;  %v4260_v7 = vcombine.low (!%p667_p7), %v705_v2, %v737_v3  ;;  %v769_v8 = vld [vmem:[%s5216_s4 + $0x200] sm:$0xff] (!%p667_p7)  ;;  %v4263_v10 = vcombine.high (!%p667_p7), %v706_v4, %v738_v6  ;;  %v4262_v11 = vcombine.low (!%p667_p7), %v706_v4, %v738_v6  ;;  %v770_v13 = vld [vmem:[%s5216_s4 + $0x208] sm:$0xff] (!%p667_p7)  ;;  %v708_v34 = vld [vmem:[%s5216_s4 + $0x18] sm:$0xff] (!%p667_p7) }
  0x9b   : > { %v801_v9 = vld [vmem:[%s5216_s4 + $0x300] sm:$0xff] (!%p667_p7)  ;;  %v802_v14 = vld [vmem:[%s5216_s4 + $0x308] sm:$0xff] (!%p667_p7)  ;;  %v740_v35 = vld [vmem:[%s5216_s4 + $0x118] sm:$0xff] (!%p667_p7)  ;;  %v4265_v38 = vcombine.high (!%p667_p7), %v707_v32, %v739_v33  ;;  %v4264_v45 = vcombine.low (!%p667_p7), %v707_v32, %v739_v33 }
  0x9c   : > { %v4325_v12 = vcombine.high (!%p667_p7), %v769_v8, %v801_v9  ;;  %v833_v15 = vld [vmem:[%s5216_s4 + $0x400] sm:$0xff] (!%p667_p7)  ;;  %2251 = vmatprep.subr.bf16.mxu0 (!%p667_p7), %v4261_v5  ;;  %v4327_v16 = vcombine.high (!%p667_p7), %v770_v13, %v802_v14  ;;  %v834_v18 = vld [vmem:[%s5216_s4 + $0x408] sm:$0xff] (!%p667_p7)  ;;  %2292 = vmatprep.subr.bf16.mxu1 (!%p667_p7), %v4263_v10  ;;  %v4324_v20 = vcombine.low (!%p667_p7), %v769_v8, %v801_v9  ;;  %v771_v40 = vld [vmem:[%s5216_s4 + $0x210] sm:$0xff] (!%p667_p7) }
  0x9d   : > { %v865_v17 = vld [vmem:[%s5216_s4 + $0x500] sm:$0xff]  ;;  %v866_v19 = vld [vmem:[%s5216_s4 + $0x508] sm:$0xff]  ;;  %2252 = vmatpush1.bf16.msra.mxu0 %v4260_v7  ;;  %2293 = vmatpush1.bf16.msra.mxu1 %v4262_v11  ;;  %v4326_v21 = vcombine.low %v770_v13, %v802_v14  ;;  %v4267_v39 = vcombine.high %v708_v34, %v740_v35  ;;  %v803_v41 = vld [vmem:[%s5216_s4 + $0x310] sm:$0xff]  ;;  %v4266_v46 = vcombine.low %v708_v34, %v740_v35  ;;  %s5756_s9 = smov (!%p698_p8, %s5540_s9), 511 }
  0x9e   : > { %2253 = vmatprep.subr.bf16.mxu0 %v4325_v12  ;;  %v4389_v22 = vcombine.high %v833_v15, %v865_v17  ;;  %2294 = vmatprep.subr.bf16.mxu1 %v4327_v16  ;;  %v4391_v23 = vcombine.high %v834_v18, %v866_v19  ;;  %v897_v24 = vld [vmem:[%s5216_s4 + $0x600] sm:$0xff]  ;;  %v898_v26 = vld [vmem:[%s5216_s4 + $0x608] sm:$0xff]  ;;  %v4388_v28 = vcombine.low %v833_v15, %v865_v17  ;;  %v772_v42 = vld [vmem:[%s5216_s4 + $0x218] sm:$0xff]  ;;  %s4259_s10 = sshll.u32 %s5756_s9, 1 }
  0x9f   : > { %v929_v25 = vld [vmem:[%s5216_s4 + $0x700] sm:$0xff]  ;;  %v930_v27 = vld [vmem:[%s5216_s4 + $0x708] sm:$0xff]  ;;  %v4390_v29 = vcombine.low %v834_v18, %v866_v19  ;;  %v804_v43 = vld [vmem:[%s5216_s4 + $0x318] sm:$0xff]  ;;  %v4329_v47 = vcombine.high %v771_v40, %v803_v41  ;;  %v4328_v53 = vcombine.low %v771_v40, %v803_v41  ;;  %s5612_s14 = scalar_lea.vmem %s5751_s3, %s4259_s10 }
  0xa0   : > { %v4453_v30 = vcombine.high %v897_v24, %v929_v25  ;;  %v4455_v31 = vcombine.high %v898_v26, %v930_v27  ;;  %v4452_v36 = vcombine.low %v897_v24, %v929_v25  ;;  %v4454_v37 = vcombine.low %v898_v26, %v930_v27  ;;  %v835_v49 = vld [vmem:[%s5216_s4 + $0x410] sm:$0xff]  ;;  %v836_v51 = vld [vmem:[%s5216_s4 + $0x418] sm:$0xff]  ;;  %v709_v2 = vld [vmem:[%s5216_s4 + $0x20] sm:$0xff] }
  0xa1   : > { %2254 = vmatpush1.bf16.msra.mxu0 %v4324_v20  ;;  %2295 = vmatpush1.bf16.msra.mxu1 %v4326_v21  ;;  %v4331_v48 = vcombine.high %v772_v42, %v804_v43  ;;  %v867_v50 = vld [vmem:[%s5216_s4 + $0x510] sm:$0xff]  ;;  %v868_v52 = vld [vmem:[%s5216_s4 + $0x518] sm:$0xff]  ;;  %v4330_v54 = vcombine.low %v772_v42, %v804_v43  ;;  %v741_v3 = vld [vmem:[%s5216_s4 + $0x120] sm:$0xff] }
  0xa2   : > { %2255 = vmatprep.subr.bf16.mxu0 %v4389_v22  ;;  %2296 = vmatprep.subr.bf16.mxu1 %v4391_v23  ;;  %v4393_v55 = vcombine.high %v835_v49, %v867_v50  ;;  %v4395_v56 = vcombine.high %v836_v51, %v868_v52  ;;  %v899_v57 = vld [vmem:[%s5216_s4 + $0x610] sm:$0xff]  ;;  %v900_v59 = vld [vmem:[%s5216_s4 + $0x618] sm:$0xff]  ;;  %v4392_v61 = vcombine.low %v835_v49, %v867_v50  ;;  %v710_v4 = vld [vmem:[%s5216_s4 + $0x28] sm:$0xff] }
  0xa3   : > { %v931_v58 = vld [vmem:[%s5216_s4 + $0x710] sm:$0xff]  ;;  %v932_v60 = vld [vmem:[%s5216_s4 + $0x718] sm:$0xff]  ;;  %v4394_v62 = vcombine.low %v836_v51, %v868_v52  ;;  %v742_v5 = vld [vmem:[%s5216_s4 + $0x128] sm:$0xff]  ;;  %v4269_v8 = vcombine.high %v709_v2, %v741_v3  ;;  %v4268_v14 = vcombine.low %v709_v2, %v741_v3 }
  0xa4   : > { %v4457_v63 = vcombine.high %v899_v57, %v931_v58  ;;  %v4459_v1 = vcombine.high %v900_v59, %v932_v60  ;;  %v4456_v6 = vcombine.low %v899_v57, %v931_v58  ;;  %v4458_v7 = vcombine.low %v900_v59, %v932_v60  ;;  %v773_v10 = vld [vmem:[%s5216_s4 + $0x220] sm:$0xff]  ;;  %v774_v12 = vld [vmem:[%s5216_s4 + $0x228] sm:$0xff]  ;;  %v711_v34 = vld [vmem:[%s5216_s4 + $0x30] sm:$0xff] }
  0xa5   : > { %2256 = vmatpush1.bf16.msra.mxu0 %v4388_v28  ;;  %2297 = vmatpush1.bf16.msra.mxu1 %v4390_v29  ;;  %v4271_v9 = vcombine.high %v710_v4, %v742_v5  ;;  %v805_v11 = vld [vmem:[%s5216_s4 + $0x320] sm:$0xff]  ;;  %v806_v13 = vld [vmem:[%s5216_s4 + $0x328] sm:$0xff]  ;;  %v4270_v15 = vcombine.low %v710_v4, %v742_v5  ;;  %v743_v35 = vld [vmem:[%s5216_s4 + $0x130] sm:$0xff] }
  0xa6   : > { %2257 = vmatprep.subr.bf16.mxu0 %v4453_v30  ;;  %2298 = vmatprep.subr.bf16.mxu1 %v4455_v31  ;;  %v4333_v16 = vcombine.high %v773_v10, %v805_v11  ;;  %v4335_v17 = vcombine.high %v774_v12, %v806_v13  ;;  %v837_v18 = vld [vmem:[%s5216_s4 + $0x420] sm:$0xff]  ;;  %v838_v20 = vld [vmem:[%s5216_s4 + $0x428] sm:$0xff]  ;;  %v4332_v22 = vcombine.low %v773_v10, %v805_v11  ;;  %v775_v42 = vld [vmem:[%s5216_s4 + $0x230] sm:$0xff] }
  0xa7   : > { %v869_v19 = vld [vmem:[%s5216_s4 + $0x520] sm:$0xff]  ;;  %v870_v21 = vld [vmem:[%s5216_s4 + $0x528] sm:$0xff]  ;;  %v4334_v23 = vcombine.low %v774_v12, %v806_v13  ;;  %v4273_v40 = vcombine.high %v711_v34, %v743_v35  ;;  %v807_v43 = vld [vmem:[%s5216_s4 + $0x330] sm:$0xff] }
  0xa8   : > { %v4397_v24 = vcombine.high %v837_v18, %v869_v19  ;;  %v4399_v25 = vcombine.high %v838_v20, %v870_v21  ;;  %v901_v26 = vld [vmem:[%s5216_s4 + $0x620] sm:$0xff]  ;;  %v902_v28 = vld [vmem:[%s5216_s4 + $0x628] sm:$0xff]  ;;  %v4396_v30 = vcombine.low %v837_v18, %v869_v19  ;;  %v4398_v31 = vcombine.low %v838_v20, %v870_v21  ;;  %v839_v51 = vld [vmem:[%s5216_s4 + $0x430] sm:$0xff] }
  0xa9   : > { %2258 = vmatpush1.bf16.msra.mxu0 %v4452_v36  ;;  %2299 = vmatpush1.bf16.msra.mxu1 %v4454_v37  ;;  %v933_v27 = vld [vmem:[%s5216_s4 + $0x720] sm:$0xff]  ;;  %v934_v29 = vld [vmem:[%s5216_s4 + $0x728] sm:$0xff]  ;;  %v712_v36 = vld [vmem:[%s5216_s4 + $0x38] sm:$0xff]  ;;  %v4337_v49 = vcombine.high %v775_v42, %v807_v43 }
  0xaa   : > { %2333 = vmatprep.subr.bf16.mxu0 %v4265_v38  ;;  %2374 = vmatprep.subr.bf16.mxu1 %v4267_v39  ;;  %v4461_v32 = vcombine.high %v901_v26, %v933_v27  ;;  %v4463_v33 = vcombine.high %v902_v28, %v934_v29  ;;  %v744_v37 = vld [vmem:[%s5216_s4 + $0x138] sm:$0xff]  ;;  %v4460_v38 = vcombine.low %v901_v26, %v933_v27  ;;  %v871_v52 = vld [vmem:[%s5216_s4 + $0x530] sm:$0xff]  ;;  %v713_v4 = vld [vmem:[%s5216_s4 + $0x40] sm:$0xff] }
  0xab   : > { %v4462_v39 = vcombine.low %v902_v28, %v934_v29  ;;  %v4275_v41 = vcombine.high %v712_v36, %v744_v37  ;;  %v4401_v57 = vcombine.high %v839_v51, %v871_v52  ;;  %v903_v59 = vld [vmem:[%s5216_s4 + $0x630] sm:$0xff]  ;;  %v745_v5 = vld [vmem:[%s5216_s4 + $0x140] sm:$0xff] }
  0xac   : > { %4516 = vmatmul.mubr.msk.bf16.vlgmr.msra.gmra.mrb[0].mxu0 %vm2247_vm0, %v5245_v44  ;;  %4517 = vmatmul.mubr.msk.bf16.vlgmr.msra.gmra.mrb[0].mxu1 %vm2247_vm0, %v5245_v44  ;;  %v935_v60 = vld [vmem:[%s5216_s4 + $0x730] sm:$0xff]  ;;  %v4277_v10 = vcombine.high %v713_v4, %v745_v5  ;;  %v777_v12 = vld [vmem:[%s5216_s4 + $0x240] sm:$0xff] }
  0xad   : > { %2334 = vmatpush1.bf16.msra.mxu0 %v4264_v45  ;;  %2375 = vmatpush1.bf16.msra.mxu1 %v4266_v46  ;;  %v776_v45 = vld [vmem:[%s5216_s4 + $0x238] sm:$0xff]  ;;  %v4465_v2 = vcombine.high %v903_v59, %v935_v60  ;;  %v809_v13 = vld [vmem:[%s5216_s4 + $0x340] sm:$0xff] }
  0xae   : > { %2335 = vmatprep.subr.bf16.mxu0 %v4329_v47  ;;  %2376 = vmatprep.subr.bf16.mxu1 %v4331_v48  ;;  %v808_v46 = vld [vmem:[%s5216_s4 + $0x338] sm:$0xff]  ;;  %v4272_v47 = vcombine.low %v711_v34, %v743_v35  ;;  %v4274_v48 = vcombine.low %v712_v36, %v744_v37  ;;  %v4341_v18 = vcombine.high %v777_v12, %v809_v13  ;;  %v841_v20 = vld [vmem:[%s5216_s4 + $0x440] sm:$0xff]  ;;  %v715_v36 = vld [vmem:[%s5216_s4 + $0x50] sm:$0xff] }
  0xaf   : > { %2365 = vmatprep.mubr.bf16.mxu0 %v4635_v0  ;;  %2406 = vmatprep.mubr.bf16.mxu1 %v4635_v0  ;;  %v4339_v50 = vcombine.high %v776_v45, %v808_v46  ;;  %v873_v21 = vld [vmem:[%s5216_s4 + $0x540] sm:$0xff]  ;;  %v747_v37 = vld [vmem:[%s5216_s4 + $0x150] sm:$0xff] }
  0xb0   : > { %v4405_v26 = vcombine.high %v841_v20, %v873_v21  ;;  %v905_v28 = vld [vmem:[%s5216_s4 + $0x640] sm:$0xff] }
  0xb1   : > { %2336 = vmatpush1.bf16.msra.mxu0 %v4328_v53  ;;  %2377 = vmatpush1.bf16.msra.mxu1 %v4330_v54  ;;  %v840_v53 = vld [vmem:[%s5216_s4 + $0x438] sm:$0xff]  ;;  %v937_v29 = vld [vmem:[%s5216_s4 + $0x740] sm:$0xff] }
  0xb2   : > { %2337 = vmatprep.subr.bf16.mxu0 %v4393_v55  ;;  %2378 = vmatprep.subr.bf16.mxu1 %v4395_v56  ;;  %v872_v54 = vld [vmem:[%s5216_s4 + $0x538] sm:$0xff]  ;;  %v4336_v55 = vcombine.low %v775_v42, %v807_v43  ;;  %v4338_v56 = vcombine.low %v776_v45, %v808_v46  ;;  %v4469_v34 = vcombine.high %v905_v28, %v937_v29  ;;  %v779_v45 = vld [vmem:[%s5216_s4 + $0x250] sm:$0xff] }
  0xb3   : > { %v4403_v58 = vcombine.high %v840_v53, %v872_v54  ;;  %v4281_v42 = vcombine.high %v715_v36, %v747_v37  ;;  %v811_v46 = vld [vmem:[%s5216_s4 + $0x350] sm:$0xff] }
  0xb5   : > { %2338 = vmatpush1.bf16.msra.mxu0 %v4392_v61  ;;  %2379 = vmatpush1.bf16.msra.mxu1 %v4394_v62  ;;  %v904_v61 = vld [vmem:[%s5216_s4 + $0x638] sm:$0xff] }
  0xb6   : > { %2339 = vmatprep.subr.bf16.mxu0 %v4457_v63  ;;  %2380 = vmatprep.subr.bf16.mxu1 %v4459_v1  ;;  %v936_v62 = vld [vmem:[%s5216_s4 + $0x738] sm:$0xff]  ;;  %v4400_v63 = vcombine.low %v839_v51, %v871_v52  ;;  %v4402_v1 = vcombine.low %v840_v53, %v872_v54  ;;  %v4345_v51 = vcombine.high %v779_v45, %v811_v46  ;;  %v843_v53 = vld [vmem:[%s5216_s4 + $0x450] sm:$0xff] }
  0xb7   : > { %v4467_v3 = vcombine.high %v904_v61, %v936_v62  ;;  %v875_v54 = vld [vmem:[%s5216_s4 + $0x550] sm:$0xff] }
  0xb9   : > { %2340 = vmatpush1.bf16.msra.mxu0 %v4456_v6  ;;  %2381 = vmatpush1.bf16.msra.mxu1 %v4458_v7  ;;  %v714_v6 = vld [vmem:[%s5216_s4 + $0x48] sm:$0xff] }
  0xba   : > { %2415 = vmatprep.subr.bf16.mxu0 %v4269_v8  ;;  %2456 = vmatprep.subr.bf16.mxu1 %v4271_v9  ;;  %v746_v7 = vld [vmem:[%s5216_s4 + $0x148] sm:$0xff]  ;;  %v4464_v8 = vcombine.low %v903_v59, %v935_v60  ;;  %v4466_v9 = vcombine.low %v904_v61, %v936_v62  ;;  %v4409_v59 = vcombine.high %v843_v53, %v875_v54  ;;  %v907_v61 = vld [vmem:[%s5216_s4 + $0x650] sm:$0xff] }
  0xbb   : > { %v4279_v11 = vcombine.high %v714_v6, %v746_v7  ;;  %v939_v62 = vld [vmem:[%s5216_s4 + $0x750] sm:$0xff] }
  0xbc   : > { %4518 = vmatmul.mubr.msk.bf16.vlgmr.msra.gmra.mrb[4].mxu0 %vm2247_vm0, %v5245_v44  ;;  %4519 = vmatmul.mubr.msk.bf16.vlgmr.msra.gmra.mrb[4].mxu1 %vm2247_vm0, %v5245_v44 }
  0xbd   : > { %2416 = vmatpush1.bf16.msra.mxu0 %v4268_v14  ;;  %2457 = vmatpush1.bf16.msra.mxu1 %v4270_v15  ;;  %v778_v14 = vld [vmem:[%s5216_s4 + $0x248] sm:$0xff] }
  0xbe   : > { %2417 = vmatprep.subr.bf16.mxu0 %v4333_v16  ;;  %2458 = vmatprep.subr.bf16.mxu1 %v4335_v17  ;;  %v810_v15 = vld [vmem:[%s5216_s4 + $0x348] sm:$0xff]  ;;  %v4276_v16 = vcombine.low %v713_v4, %v745_v5  ;;  %v4278_v17 = vcombine.low %v714_v6, %v746_v7  ;;  %v4473_v4 = vcombine.high %v907_v61, %v939_v62  ;;  %v717_v6 = vld [vmem:[%s5216_s4 + $0x60] sm:$0xff] }
  0xbf   : > { %2447 = vmatprep.mubr.bf16.mxu0 %v4635_v0  ;;  %2488 = vmatprep.mubr.bf16.mxu1 %v4635_v0  ;;  %v4343_v19 = vcombine.high %v778_v14, %v810_v15  ;;  %v749_v7 = vld [vmem:[%s5216_s4 + $0x160] sm:$0xff] }
  0xc1   : > { %2418 = vmatpush1.bf16.msra.mxu0 %v4332_v22  ;;  %2459 = vmatpush1.bf16.msra.mxu1 %v4334_v23  ;;  %v842_v22 = vld [vmem:[%s5216_s4 + $0x448] sm:$0xff] }
  0xc2   : > { %2419 = vmatprep.subr.bf16.mxu0 %v4397_v24  ;;  %2460 = vmatprep.subr.bf16.mxu1 %v4399_v25  ;;  %v874_v23 = vld [vmem:[%s5216_s4 + $0x548] sm:$0xff]  ;;  %v4340_v24 = vcombine.low %v777_v12, %v809_v13  ;;  %v4342_v25 = vcombine.low %v778_v14, %v810_v15  ;;  %v4285_v12 = vcombine.high %v717_v6, %v749_v7  ;;  %v781_v14 = vld [vmem:[%s5216_s4 + $0x260] sm:$0xff] }
  0xc3   : > { %v4407_v27 = vcombine.high %v842_v22, %v874_v23  ;;  %v813_v15 = vld [vmem:[%s5216_s4 + $0x360] sm:$0xff] }
  0xc5   : > { %2420 = vmatpush1.bf16.msra.mxu0 %v4396_v30  ;;  %2461 = vmatpush1.bf16.msra.mxu1 %v4398_v31  ;;  %v906_v30 = vld [vmem:[%s5216_s4 + $0x648] sm:$0xff] }
  0xc6   : > { %2421 = vmatprep.subr.bf16.mxu0 %v4461_v32  ;;  %2462 = vmatprep.subr.bf16.mxu1 %v4463_v33  ;;  %v938_v31 = vld [vmem:[%s5216_s4 + $0x748] sm:$0xff]  ;;  %v4404_v32 = vcombine.low %v841_v20, %v873_v21  ;;  %v4406_v33 = vcombine.low %v842_v22, %v874_v23  ;;  %v4349_v20 = vcombine.high %v781_v14, %v813_v15  ;;  %v845_v22 = vld [vmem:[%s5216_s4 + $0x460] sm:$0xff] }
  0xc7   : > { %v4471_v35 = vcombine.high %v906_v30, %v938_v31  ;;  %v877_v23 = vld [vmem:[%s5216_s4 + $0x560] sm:$0xff] }
  0xc9   : > { %2422 = vmatpush1.bf16.msra.mxu0 %v4460_v38  ;;  %2463 = vmatpush1.bf16.msra.mxu1 %v4462_v39  ;;  %v716_v38 = vld [vmem:[%s5216_s4 + $0x58] sm:$0xff] }
  0xca   : > { %2497 = vmatprep.subr.bf16.mxu0 %v4273_v40  ;;  %2538 = vmatprep.subr.bf16.mxu1 %v4275_v41  ;;  %v748_v39 = vld [vmem:[%s5216_s4 + $0x158] sm:$0xff]  ;;  %v4468_v40 = vcombine.low %v905_v28, %v937_v29  ;;  %v4470_v41 = vcombine.low %v906_v30, %v938_v31  ;;  %v4413_v28 = vcombine.high %v845_v22, %v877_v23  ;;  %v909_v30 = vld [vmem:[%s5216_s4 + $0x660] sm:$0xff] }
  0xcb   : > { %v4283_v43 = vcombine.high %v716_v38, %v748_v39  ;;  %v941_v31 = vld [vmem:[%s5216_s4 + $0x760] sm:$0xff] }
  0xcc   : > { %4520 = vmatmul.mubr.msk.bf16.vlgmr.msra.gmra.mrb[8].mxu0 %vm2247_vm0, %v5245_v44  ;;  %4521 = vmatmul.mubr.msk.bf16.vlgmr.msra.gmra.mrb[8].mxu1 %vm2247_vm0, %v5245_v44 }
  0xcd   : > { %2498 = vmatpush1.bf16.msra.mxu0 %v4272_v47  ;;  %2539 = vmatpush1.bf16.msra.mxu1 %v4274_v48  ;;  %v780_v47 = vld [vmem:[%s5216_s4 + $0x258] sm:$0xff] }
  0xce   : > { %2499 = vmatprep.subr.bf16.mxu0 %v4337_v49  ;;  %2540 = vmatprep.subr.bf16.mxu1 %v4339_v50  ;;  %v812_v48 = vld [vmem:[%s5216_s4 + $0x358] sm:$0xff]  ;;  %v4280_v49 = vcombine.low %v715_v36, %v747_v37  ;;  %v4282_v50 = vcombine.low %v716_v38, %v748_v39  ;;  %v4477_v36 = vcombine.high %v909_v30, %v941_v31  ;;  %v719_v38 = vld [vmem:[%s5216_s4 + $0x70] sm:$0xff] }
  0xcf   : > { %2529 = vmatprep.mubr.bf16.mxu0 %v4635_v0  ;;  %2570 = vmatprep.mubr.bf16.mxu1 %v4635_v0  ;;  %v4347_v52 = vcombine.high %v780_v47, %v812_v48  ;;  %v751_v39 = vld [vmem:[%s5216_s4 + $0x170] sm:$0xff] }
  0xd1   : > { %2500 = vmatpush1.bf16.msra.mxu0 %v4336_v55  ;;  %2541 = vmatpush1.bf16.msra.mxu1 %v4338_v56  ;;  %v844_v55 = vld [vmem:[%s5216_s4 + $0x458] sm:$0xff] }
  0xd2   : > { %2501 = vmatprep.subr.bf16.mxu0 %v4401_v57  ;;  %2542 = vmatprep.subr.bf16.mxu1 %v4403_v58  ;;  %v876_v56 = vld [vmem:[%s5216_s4 + $0x558] sm:$0xff]  ;;  %v4344_v57 = vcombine.low %v779_v45, %v811_v46  ;;  %v4346_v58 = vcombine.low %v780_v47, %v812_v48  ;;  %v4289_v45 = vcombine.high %v719_v38, %v751_v39  ;;  %v783_v47 = vld [vmem:[%s5216_s4 + $0x270] sm:$0xff] }
  0xd3   : > { %v4411_v60 = vcombine.high %v844_v55, %v876_v56  ;;  %v815_v48 = vld [vmem:[%s5216_s4 + $0x370] sm:$0xff] }
  0xd5   : > { %2502 = vmatpush1.bf16.msra.mxu0 %v4400_v63  ;;  %2543 = vmatpush1.bf16.msra.mxu1 %v4402_v1  ;;  %v908_v63 = vld [vmem:[%s5216_s4 + $0x658] sm:$0xff] }
  0xd6   : > { %2503 = vmatprep.subr.bf16.mxu0 %v4465_v2  ;;  %2544 = vmatprep.subr.bf16.mxu1 %v4467_v3  ;;  %v940_v1 = vld [vmem:[%s5216_s4 + $0x758] sm:$0xff]  ;;  %v4408_v2 = vcombine.low %v843_v53, %v875_v54  ;;  %v4410_v3 = vcombine.low %v844_v55, %v876_v56  ;;  %v4353_v53 = vcombine.high %v783_v47, %v815_v48  ;;  %v847_v55 = vld [vmem:[%s5216_s4 + $0x470] sm:$0xff] }
  0xd7   : > { %v4475_v5 = vcombine.high %v908_v63, %v940_v1  ;;  %v879_v56 = vld [vmem:[%s5216_s4 + $0x570] sm:$0xff] }
  0xd9   : > { %2504 = vmatpush1.bf16.msra.mxu0 %v4464_v8  ;;  %2545 = vmatpush1.bf16.msra.mxu1 %v4466_v9  ;;  %v718_v8 = vld [vmem:[%s5216_s4 + $0x68] sm:$0xff] }
  0xda   : > { %2579 = vmatprep.subr.bf16.mxu0 %v4277_v10  ;;  %2620 = vmatprep.subr.bf16.mxu1 %v4279_v11  ;;  %v750_v9 = vld [vmem:[%s5216_s4 + $0x168] sm:$0xff]  ;;  %v4472_v10 = vcombine.low %v907_v61, %v939_v62  ;;  %v4474_v11 = vcombine.low %v908_v63, %v940_v1  ;;  %v4417_v61 = vcombine.high %v847_v55, %v879_v56  ;;  %v911_v63 = vld [vmem:[%s5216_s4 + $0x670] sm:$0xff] }
  0xdb   : > { %v4287_v13 = vcombine.high %v718_v8, %v750_v9  ;;  %v943_v1 = vld [vmem:[%s5216_s4 + $0x770] sm:$0xff] }
  0xdc   : > { %4522 = vmatmul.mubr.msk.bf16.vlgmr.msra.gmra.mrb[12].mxu0 %vm2247_vm0, %v5245_v44  ;;  %4523 = vmatmul.mubr.msk.bf16.vlgmr.msra.gmra.mrb[12].mxu1 %vm2247_vm0, %v5245_v44 }
  0xdd   : > { %2580 = vmatpush1.bf16.msra.mxu0 %v4276_v16  ;;  %2621 = vmatpush1.bf16.msra.mxu1 %v4278_v17  ;;  %v782_v16 = vld [vmem:[%s5216_s4 + $0x268] sm:$0xff] }
  0xde   : > { %2581 = vmatprep.subr.bf16.mxu0 %v4341_v18  ;;  %2622 = vmatprep.subr.bf16.mxu1 %v4343_v19  ;;  %v814_v17 = vld [vmem:[%s5216_s4 + $0x368] sm:$0xff]  ;;  %v4284_v18 = vcombine.low %v717_v6, %v749_v7  ;;  %v4286_v19 = vcombine.low %v718_v8, %v750_v9  ;;  %v4481_v6 = vcombine.high %v911_v63, %v943_v1  ;;  %v721_v8 = vld [vmem:[%s5216_s4 + $0x80] sm:$0xff] }
  0xdf   : > { %2611 = vmatprep.mubr.bf16.mxu0 %v4635_v0  ;;  %2652 = vmatprep.mubr.bf16.mxu1 %v4635_v0  ;;  %v4351_v21 = vcombine.high %v782_v16, %v814_v17  ;;  %v753_v9 = vld [vmem:[%s5216_s4 + $0x180] sm:$0xff] }
  0xe1   : > { %2582 = vmatpush1.bf16.msra.mxu0 %v4340_v24  ;;  %2623 = vmatpush1.bf16.msra.mxu1 %v4342_v25  ;;  %v846_v24 = vld [vmem:[%s5216_s4 + $0x468] sm:$0xff] }
  0xe2   : > { %2583 = vmatprep.subr.bf16.mxu0 %v4405_v26  ;;  %2624 = vmatprep.subr.bf16.mxu1 %v4407_v27  ;;  %v878_v25 = vld [vmem:[%s5216_s4 + $0x568] sm:$0xff]  ;;  %v4348_v26 = vcombine.low %v781_v14, %v813_v15  ;;  %v4350_v27 = vcombine.low %v782_v16, %v814_v17  ;;  %v4293_v14 = vcombine.high %v721_v8, %v753_v9  ;;  %v785_v16 = vld [vmem:[%s5216_s4 + $0x280] sm:$0xff] }
  0xe3   : > { %v4415_v29 = vcombine.high %v846_v24, %v878_v25  ;;  %v817_v17 = vld [vmem:[%s5216_s4 + $0x380] sm:$0xff] }
  0xe5   : > { %2584 = vmatpush1.bf16.msra.mxu0 %v4404_v32  ;;  %2625 = vmatpush1.bf16.msra.mxu1 %v4406_v33  ;;  %v910_v32 = vld [vmem:[%s5216_s4 + $0x668] sm:$0xff] }
  0xe6   : > { %2585 = vmatprep.subr.bf16.mxu0 %v4469_v34  ;;  %2626 = vmatprep.subr.bf16.mxu1 %v4471_v35  ;;  %v942_v33 = vld [vmem:[%s5216_s4 + $0x768] sm:$0xff]  ;;  %v4412_v34 = vcombine.low %v845_v22, %v877_v23  ;;  %v4414_v35 = vcombine.low %v846_v24, %v878_v25  ;;  %v4357_v22 = vcombine.high %v785_v16, %v817_v17  ;;  %v849_v24 = vld [vmem:[%s5216_s4 + $0x480] sm:$0xff] }
  0xe7   : > { %v4479_v37 = vcombine.high %v910_v32, %v942_v33  ;;  %v881_v25 = vld [vmem:[%s5216_s4 + $0x580] sm:$0xff] }
  0xe9   : > { %2586 = vmatpush1.bf16.msra.mxu0 %v4468_v40  ;;  %2627 = vmatpush1.bf16.msra.mxu1 %v4470_v41  ;;  %v720_v40 = vld [vmem:[%s5216_s4 + $0x78] sm:$0xff] }
  0xea   : > { %2661 = vmatprep.subr.bf16.mxu0 %v4281_v42  ;;  %2702 = vmatprep.subr.bf16.mxu1 %v4283_v43  ;;  %v752_v41 = vld [vmem:[%s5216_s4 + $0x178] sm:$0xff]  ;;  %v4476_v42 = vcombine.low %v909_v30, %v941_v31  ;;  %v4478_v43 = vcombine.low %v910_v32, %v942_v33  ;;  %v4421_v30 = vcombine.high %v849_v24, %v881_v25  ;;  %v913_v32 = vld [vmem:[%s5216_s4 + $0x680] sm:$0xff] }
  0xeb   : > { %v4291_v46 = vcombine.high %v720_v40, %v752_v41  ;;  %v945_v33 = vld [vmem:[%s5216_s4 + $0x780] sm:$0xff] }
  0xec   : > { %4524 = vmatmul.mubr.msk.bf16.vlgmr.msra.gmra.mrb[16].mxu0 %vm2247_vm0, %v5245_v44  ;;  %4525 = vmatmul.mubr.msk.bf16.vlgmr.msra.gmra.mrb[16].mxu1 %vm2247_vm0, %v5245_v44 }
  0xed   : > { %2662 = vmatpush1.bf16.msra.mxu0 %v4280_v49  ;;  %2703 = vmatpush1.bf16.msra.mxu1 %v4282_v50  ;;  %v784_v49 = vld [vmem:[%s5216_s4 + $0x278] sm:$0xff] }
  0xee   : > { %2663 = vmatprep.subr.bf16.mxu0 %v4345_v51  ;;  %2704 = vmatprep.subr.bf16.mxu1 %v4347_v52  ;;  %v816_v50 = vld [vmem:[%s5216_s4 + $0x378] sm:$0xff]  ;;  %v4288_v51 = vcombine.low %v719_v38, %v751_v39  ;;  %v4290_v52 = vcombine.low %v720_v40, %v752_v41  ;;  %v4485_v38 = vcombine.high %v913_v32, %v945_v33  ;;  %v723_v40 = vld [vmem:[%s5216_s4 + $0x90] sm:$0xff] }
  0xef   : > { %2693 = vmatprep.mubr.bf16.mxu0 %v4635_v0  ;;  %2734 = vmatprep.mubr.bf16.mxu1 %v4635_v0  ;;  %v4355_v54 = vcombine.high %v784_v49, %v816_v50  ;;  %v755_v41 = vld [vmem:[%s5216_s4 + $0x190] sm:$0xff] }
  0xf1   : > { %2664 = vmatpush1.bf16.msra.mxu0 %v4344_v57  ;;  %2705 = vmatpush1.bf16.msra.mxu1 %v4346_v58  ;;  %v848_v57 = vld [vmem:[%s5216_s4 + $0x478] sm:$0xff] }
  0xf2   : > { %2665 = vmatprep.subr.bf16.mxu0 %v4409_v59  ;;  %2706 = vmatprep.subr.bf16.mxu1 %v4411_v60  ;;  %v880_v58 = vld [vmem:[%s5216_s4 + $0x578] sm:$0xff]  ;;  %v4352_v59 = vcombine.low %v783_v47, %v815_v48  ;;  %v4354_v60 = vcombine.low %v784_v49, %v816_v50  ;;  %v4297_v47 = vcombine.high %v723_v40, %v755_v41  ;;  %v787_v49 = vld [vmem:[%s5216_s4 + $0x290] sm:$0xff] }
  0xf3   : > { %v4419_v62 = vcombine.high %v848_v57, %v880_v58  ;;  %v819_v50 = vld [vmem:[%s5216_s4 + $0x390] sm:$0xff] }
  0xf5   : > { %2666 = vmatpush1.bf16.msra.mxu0 %v4408_v2  ;;  %2707 = vmatpush1.bf16.msra.mxu1 %v4410_v3  ;;  %v912_v2 = vld [vmem:[%s5216_s4 + $0x678] sm:$0xff] }
  0xf6   : > { %2667 = vmatprep.subr.bf16.mxu0 %v4473_v4  ;;  %2708 = vmatprep.subr.bf16.mxu1 %v4475_v5  ;;  %v944_v3 = vld [vmem:[%s5216_s4 + $0x778] sm:$0xff]  ;;  %v4416_v4 = vcombine.low %v847_v55, %v879_v56  ;;  %v4418_v5 = vcombine.low %v848_v57, %v880_v58  ;;  %v4361_v55 = vcombine.high %v787_v49, %v819_v50  ;;  %v851_v57 = vld [vmem:[%s5216_s4 + $0x490] sm:$0xff] }
  0xf7   : > { %v4483_v7 = vcombine.high %v912_v2, %v944_v3  ;;  %v883_v58 = vld [vmem:[%s5216_s4 + $0x590] sm:$0xff] }
  0xf9   : > { %2668 = vmatpush1.bf16.msra.mxu0 %v4472_v10  ;;  %2709 = vmatpush1.bf16.msra.mxu1 %v4474_v11  ;;  %v722_v10 = vld [vmem:[%s5216_s4 + $0x88] sm:$0xff] }
  0xfa   : > { %2743 = vmatprep.subr.bf16.mxu0 %v4285_v12  ;;  %2784 = vmatprep.subr.bf16.mxu1 %v4287_v13  ;;  %v754_v11 = vld [vmem:[%s5216_s4 + $0x188] sm:$0xff]  ;;  %v4480_v12 = vcombine.low %v911_v63, %v943_v1  ;;  %v4482_v13 = vcombine.low %v912_v2, %v944_v3  ;;  %v4425_v63 = vcombine.high %v851_v57, %v883_v58  ;;  %v915_v2 = vld [vmem:[%s5216_s4 + $0x690] sm:$0xff] }
  0xfb   : > { %v4295_v15 = vcombine.high %v722_v10, %v754_v11  ;;  %v947_v3 = vld [vmem:[%s5216_s4 + $0x790] sm:$0xff] }
  0xfc   : > { %4526 = vmatmul.mubr.msk.bf16.vlgmr.msra.gmra.mrb[20].mxu0 %vm2247_vm0, %v5245_v44  ;;  %4527 = vmatmul.mubr.msk.bf16.vlgmr.msra.gmra.mrb[20].mxu1 %vm2247_vm0, %v5245_v44 }
  0xfd   : > { %2744 = vmatpush1.bf16.msra.mxu0 %v4284_v18  ;;  %2785 = vmatpush1.bf16.msra.mxu1 %v4286_v19  ;;  %v786_v18 = vld [vmem:[%s5216_s4 + $0x288] sm:$0xff] }
  0xfe   : > { %2745 = vmatprep.subr.bf16.mxu0 %v4349_v20  ;;  %2786 = vmatprep.subr.bf16.mxu1 %v4351_v21  ;;  %v818_v19 = vld [vmem:[%s5216_s4 + $0x388] sm:$0xff]  ;;  %v4292_v20 = vcombine.low %v721_v8, %v753_v9  ;;  %v4294_v21 = vcombine.low %v722_v10, %v754_v11  ;;  %v4489_v8 = vcombine.high %v915_v2, %v947_v3  ;;  %v725_v10 = vld [vmem:[%s5216_s4 + $0xa0] sm:$0xff] }
  0xff   : > { %2775 = vmatprep.mubr.bf16.mxu0 %v4635_v0  ;;  %2816 = vmatprep.mubr.bf16.mxu1 %v4635_v0  ;;  %v4359_v23 = vcombine.high %v786_v18, %v818_v19  ;;  %v757_v11 = vld [vmem:[%s5216_s4 + $0x1a0] sm:$0xff] }
 0x101   : > { %2746 = vmatpush1.bf16.msra.mxu0 %v4348_v26  ;;  %2787 = vmatpush1.bf16.msra.mxu1 %v4350_v27  ;;  %v850_v26 = vld [vmem:[%s5216_s4 + $0x488] sm:$0xff] }
 0x102   : > { %2747 = vmatprep.subr.bf16.mxu0 %v4413_v28  ;;  %2788 = vmatprep.subr.bf16.mxu1 %v4415_v29  ;;  %v882_v27 = vld [vmem:[%s5216_s4 + $0x588] sm:$0xff]  ;;  %v4356_v28 = vcombine.low %v785_v16, %v817_v17  ;;  %v4358_v29 = vcombine.low %v786_v18, %v818_v19  ;;  %v4301_v16 = vcombine.high %v725_v10, %v757_v11  ;;  %v789_v18 = vld [vmem:[%s5216_s4 + $0x2a0] sm:$0xff] }
 0x103   : > { %v4423_v31 = vcombine.high %v850_v26, %v882_v27  ;;  %v821_v19 = vld [vmem:[%s5216_s4 + $0x3a0] sm:$0xff] }
 0x105   : > { %2748 = vmatpush1.bf16.msra.mxu0 %v4412_v34  ;;  %2789 = vmatpush1.bf16.msra.mxu1 %v4414_v35  ;;  %v914_v34 = vld [vmem:[%s5216_s4 + $0x688] sm:$0xff] }
 0x106   : > { %2749 = vmatprep.subr.bf16.mxu0 %v4477_v36  ;;  %2790 = vmatprep.subr.bf16.mxu1 %v4479_v37  ;;  %v946_v35 = vld [vmem:[%s5216_s4 + $0x788] sm:$0xff]  ;;  %v4420_v36 = vcombine.low %v849_v24, %v881_v25  ;;  %v4422_v37 = vcombine.low %v850_v26, %v882_v27  ;;  %v4365_v24 = vcombine.high %v789_v18, %v821_v19  ;;  %v853_v26 = vld [vmem:[%s5216_s4 + $0x4a0] sm:$0xff] }
 0x107   : > { %v4487_v39 = vcombine.high %v914_v34, %v946_v35  ;;  %v885_v27 = vld [vmem:[%s5216_s4 + $0x5a0] sm:$0xff] }
 0x109   : > { %2750 = vmatpush1.bf16.msra.mxu0 %v4476_v42  ;;  %2791 = vmatpush1.bf16.msra.mxu1 %v4478_v43  ;;  %v724_v42 = vld [vmem:[%s5216_s4 + $0x98] sm:$0xff] }
 0x10a   : > { %2825 = vmatprep.subr.bf16.mxu0 %v4289_v45  ;;  %2866 = vmatprep.subr.bf16.mxu1 %v4291_v46  ;;  %v756_v43 = vld [vmem:[%s5216_s4 + $0x198] sm:$0xff]  ;;  %v4484_v45 = vcombine.low %v913_v32, %v945_v33  ;;  %v4486_v46 = vcombine.low %v914_v34, %v946_v35  ;;  %v4429_v32 = vcombine.high %v853_v26, %v885_v27  ;;  %v917_v34 = vld [vmem:[%s5216_s4 + $0x6a0] sm:$0xff] }
 0x10b   : > { %v4299_v48 = vcombine.high %v724_v42, %v756_v43  ;;  %v949_v35 = vld [vmem:[%s5216_s4 + $0x7a0] sm:$0xff] }
 0x10c   : > { %4528 = vmatmul.mubr.msk.bf16.vlgmr.msra.gmra.mrb[24].mxu0 %vm2247_vm0, %v5245_v44  ;;  %4529 = vmatmul.mubr.msk.bf16.vlgmr.msra.gmra.mrb[24].mxu1 %vm2247_vm0, %v5245_v44 }
 0x10d   : > { %2826 = vmatpush1.bf16.msra.mxu0 %v4288_v51  ;;  %2867 = vmatpush1.bf16.msra.mxu1 %v4290_v52  ;;  %v788_v51 = vld [vmem:[%s5216_s4 + $0x298] sm:$0xff] }
 0x10e   : > { %2827 = vmatprep.subr.bf16.mxu0 %v4353_v53  ;;  %2868 = vmatprep.subr.bf16.mxu1 %v4355_v54  ;;  %v820_v52 = vld [vmem:[%s5216_s4 + $0x398] sm:$0xff]  ;;  %v4296_v53 = vcombine.low %v723_v40, %v755_v41  ;;  %v4298_v54 = vcombine.low %v724_v42, %v756_v43  ;;  %v727_v41 = vld [vmem:[%s5216_s4 + $0xb0] sm:$0xff] }
 0x10f   : > { %2857 = vmatprep.mubr.bf16.mxu0 %v4635_v0  ;;  %2898 = vmatprep.mubr.bf16.mxu1 %v4635_v0  ;;  %v4363_v56 = vcombine.high %v788_v51, %v820_v52  ;;  %v759_v42 = vld [vmem:[%s5216_s4 + $0x1b0] sm:$0xff]  ;;  %v728_v43 = vld [vmem:[%s5216_s4 + $0xb8] sm:$0xff] }
 0x111   : > { %2828 = vmatpush1.bf16.msra.mxu0 %v4352_v59  ;;  %2869 = vmatpush1.bf16.msra.mxu1 %v4354_v60  ;;  %v852_v59 = vld [vmem:[%s5216_s4 + $0x498] sm:$0xff] }
 0x112   : > { %2829 = vmatprep.subr.bf16.mxu0 %v4417_v61  ;;  %2870 = vmatprep.subr.bf16.mxu1 %v4419_v62  ;;  %v884_v60 = vld [vmem:[%s5216_s4 + $0x598] sm:$0xff]  ;;  %v4360_v61 = vcombine.low %v787_v49, %v819_v50  ;;  %v4362_v62 = vcombine.low %v788_v51, %v820_v52  ;;  %v791_v50 = vld [vmem:[%s5216_s4 + $0x2b0] sm:$0xff] }
 0x113   : > { %v4427_v1 = vcombine.high %v852_v59, %v884_v60  ;;  %v823_v51 = vld [vmem:[%s5216_s4 + $0x3b0] sm:$0xff]  ;;  %v792_v52 = vld [vmem:[%s5216_s4 + $0x2b8] sm:$0xff] }
 0x115   : > { %2830 = vmatpush1.bf16.msra.mxu0 %v4416_v4  ;;  %2871 = vmatpush1.bf16.msra.mxu1 %v4418_v5  ;;  %v916_v4 = vld [vmem:[%s5216_s4 + $0x698] sm:$0xff] }
 0x116   : > { %2831 = vmatprep.subr.bf16.mxu0 %v4481_v6  ;;  %2872 = vmatprep.subr.bf16.mxu1 %v4483_v7  ;;  %v948_v5 = vld [vmem:[%s5216_s4 + $0x798] sm:$0xff]  ;;  %v4424_v6 = vcombine.low %v851_v57, %v883_v58  ;;  %v4426_v7 = vcombine.low %v852_v59, %v884_v60  ;;  %v855_v58 = vld [vmem:[%s5216_s4 + $0x4b0] sm:$0xff]  ;;  %v5472_v60 = vld [vmem:[%s5748_s0] sm:$0x3] }
 0x117   : > { %v4491_v9 = vcombine.high %v916_v4, %v948_v5  ;;  %v887_v59 = vld [vmem:[%s5216_s4 + $0x5b0] sm:$0xff] }
 0x119   : > { %2832 = vmatpush1.bf16.msra.mxu0 %v4480_v12  ;;  %2873 = vmatpush1.bf16.msra.mxu1 %v4482_v13  ;;  %v726_v12 = vld [vmem:[%s5216_s4 + $0xa8] sm:$0xff] }
 0x11a   : > { %2907 = vmatprep.subr.bf16.mxu0 %v4293_v14  ;;  %2948 = vmatprep.subr.bf16.mxu1 %v4295_v15  ;;  %v758_v13 = vld [vmem:[%s5216_s4 + $0x1a8] sm:$0xff]  ;;  %v4488_v14 = vcombine.low %v915_v2, %v947_v3  ;;  %v4490_v15 = vcombine.low %v916_v4, %v948_v5  ;;  %v4433_v2 = vcombine.high %v855_v58, %v887_v59  ;;  %v919_v4 = vld [vmem:[%s5216_s4 + $0x6b0] sm:$0xff] }
 0x11b   : > { %v4303_v17 = vcombine.high %v726_v12, %v758_v13  ;;  %v951_v5 = vld [vmem:[%s5216_s4 + $0x7b0] sm:$0xff] }
 0x11c   : > { %4530 = vmatmul.mubr.msk.bf16.vlgmr.msra.gmra.mrb[28].mxu0 %vm2247_vm0, %v5245_v44  ;;  %4531 = vmatmul.mubr.msk.bf16.vlgmr.msra.gmra.mrb[28].mxu1 %vm2247_vm0, %v5245_v44 }
 0x11d   : > { %2908 = vmatpush1.bf16.msra.mxu0 %v4292_v20  ;;  %2949 = vmatpush1.bf16.msra.mxu1 %v4294_v21  ;;  %v790_v20 = vld [vmem:[%s5216_s4 + $0x2a8] sm:$0xff] }
 0x11e   : > { %2909 = vmatprep.subr.bf16.mxu0 %v4357_v22  ;;  %2950 = vmatprep.subr.bf16.mxu1 %v4359_v23  ;;  %v822_v21 = vld [vmem:[%s5216_s4 + $0x3a8] sm:$0xff]  ;;  %v4300_v22 = vcombine.low %v725_v10, %v757_v11  ;;  %v4302_v23 = vcombine.low %v726_v12, %v758_v13  ;;  %v4497_v10 = vcombine.high %v919_v4, %v951_v5  ;;  %v729_v12 = vld [vmem:[%s5216_s4 + $0xc0] sm:$0xff] }
 0x11f   : > { %2939 = vmatprep.mubr.bf16.mxu0 %v4635_v0  ;;  %2980 = vmatprep.mubr.bf16.mxu1 %v4635_v0  ;;  %v4367_v25 = vcombine.high %v790_v20, %v822_v21  ;;  %v761_v13 = vld [vmem:[%s5216_s4 + $0x1c0] sm:$0xff] }
 0x121   : > { %2910 = vmatpush1.bf16.msra.mxu0 %v4356_v28  ;;  %2951 = vmatpush1.bf16.msra.mxu1 %v4358_v29  ;;  %v854_v28 = vld [vmem:[%s5216_s4 + $0x4a8] sm:$0xff] }
 0x122   : > { %2911 = vmatprep.subr.bf16.mxu0 %v4421_v30  ;;  %2952 = vmatprep.subr.bf16.mxu1 %v4423_v31  ;;  %v886_v29 = vld [vmem:[%s5216_s4 + $0x5a8] sm:$0xff]  ;;  %v4364_v30 = vcombine.low %v789_v18, %v821_v19  ;;  %v4366_v31 = vcombine.low %v790_v20, %v822_v21  ;;  %v4309_v18 = vcombine.high %v729_v12, %v761_v13  ;;  %v793_v20 = vld [vmem:[%s5216_s4 + $0x2c0] sm:$0xff] }
 0x123   : > { %v4431_v33 = vcombine.high %v854_v28, %v886_v29  ;;  %v825_v21 = vld [vmem:[%s5216_s4 + $0x3c0] sm:$0xff] }
 0x125   : > { %2912 = vmatpush1.bf16.msra.mxu0 %v4420_v36  ;;  %2953 = vmatpush1.bf16.msra.mxu1 %v4422_v37  ;;  %v918_v36 = vld [vmem:[%s5216_s4 + $0x6a8] sm:$0xff] }
 0x126   : > { %2913 = vmatprep.subr.bf16.mxu0 %v4485_v38  ;;  %2954 = vmatprep.subr.bf16.mxu1 %v4487_v39  ;;  %v950_v37 = vld [vmem:[%s5216_s4 + $0x7a8] sm:$0xff]  ;;  %v4430_v38 = vcombine.low %v854_v28, %v886_v29  ;;  %v4493_v39 = vcombine.high %v917_v34, %v949_v35  ;;  %v857_v28 = vld [vmem:[%s5216_s4 + $0x4c0] sm:$0xff] }
 0x127   : > { %v4495_v40 = vcombine.high %v918_v36, %v950_v37  ;;  %v889_v29 = vld [vmem:[%s5216_s4 + $0x5c0] sm:$0xff] }
 0x129   : > { %2914 = vmatpush1.bf16.msra.mxu0 %v4484_v45  ;;  %2955 = vmatpush1.bf16.msra.mxu1 %v4486_v46  ;;  %v760_v45 = vld [vmem:[%s5216_s4 + $0x1b8] sm:$0xff]  ;;  %v4492_v46 = vcombine.low %v917_v34, %v949_v35  ;;  %v4437_v34 = vcombine.high %v857_v28, %v889_v29 }
 0x12a   : > { %2989 = vmatprep.subr.bf16.mxu0 %v4297_v47  ;;  %3030 = vmatprep.subr.bf16.mxu1 %v4299_v48  ;;  %v4494_v47 = vcombine.low %v918_v36, %v950_v37  ;;  %v4305_v48 = vcombine.high %v727_v41, %v759_v42  ;;  %v4307_v49 = vcombine.high %v728_v43, %v760_v45  ;;  %v921_v36 = vld [vmem:[%s5216_s4 + $0x6c0] sm:$0xff] }
 0x12b   : > { %v953_v37 = vld [vmem:[%s5216_s4 + $0x7c0] sm:$0xff] }
 0x12c   : > { %4532 = vmatmul.mubr.msk.bf16.vlgmr.msra.gmra.mrb[32].mxu0 %vm2247_vm0, %v5245_v44  ;;  %4533 = vmatmul.mubr.msk.bf16.vlgmr.msra.gmra.mrb[32].mxu1 %vm2247_vm0, %v5245_v44 }
 0x12d   : > { %2990 = vmatpush1.bf16.msra.mxu0 %v4296_v53  ;;  %3031 = vmatpush1.bf16.msra.mxu1 %v4298_v54  ;;  %v824_v53 = vld [vmem:[%s5216_s4 + $0x3b8] sm:$0xff]  ;;  %v4304_v54 = vcombine.low %v727_v41, %v759_v42  ;;  %v4501_v41 = vcombine.high %v921_v36, %v953_v37 }
 0x12e   : > { %2991 = vmatprep.subr.bf16.mxu0 %v4361_v55  ;;  %3032 = vmatprep.subr.bf16.mxu1 %v4363_v56  ;;  %v4306_v55 = vcombine.low %v728_v43, %v760_v45  ;;  %v4369_v56 = vcombine.high %v791_v50, %v823_v51  ;;  %v4371_v57 = vcombine.high %v792_v52, %v824_v53  ;;  %v731_v43 = vld [vmem:[%s5216_s4 + $0xd0] sm:$0xff] }
 0x12f   : > { %3021 = vmatprep.mubr.bf16.mxu0 %v4635_v0  ;;  %3062 = vmatprep.mubr.bf16.mxu1 %v4635_v0  ;;  %v763_v45 = vld [vmem:[%s5216_s4 + $0x1d0] sm:$0xff] }
 0x131   : > { %2992 = vmatpush1.bf16.msra.mxu0 %v4360_v61  ;;  %3033 = vmatpush1.bf16.msra.mxu1 %v4362_v62  ;;  %v856_v61 = vld [vmem:[%s5216_s4 + $0x4b8] sm:$0xff] }
 0x132   : > { %2993 = vmatprep.subr.bf16.mxu0 %v4425_v63  ;;  %3034 = vmatprep.subr.bf16.mxu1 %v4427_v1  ;;  %v888_v62 = vld [vmem:[%s5216_s4 + $0x5b8] sm:$0xff]  ;;  %v4368_v63 = vcombine.low %v791_v50, %v823_v51  ;;  %v4370_v1 = vcombine.low %v792_v52, %v824_v53  ;;  %v4313_v50 = vcombine.high %v731_v43, %v763_v45  ;;  %v795_v52 = vld [vmem:[%s5216_s4 + $0x2d0] sm:$0xff] }
 0x133   : > { %v4435_v3 = vcombine.high %v856_v61, %v888_v62  ;;  %v827_v53 = vld [vmem:[%s5216_s4 + $0x3d0] sm:$0xff] }
 0x135   : > { %2994 = vmatpush1.bf16.msra.mxu0 %v4424_v6  ;;  %3035 = vmatpush1.bf16.msra.mxu1 %v4426_v7  ;;  %v920_v6 = vld [vmem:[%s5216_s4 + $0x6b8] sm:$0xff] }
 0x136   : > { %2995 = vmatprep.subr.bf16.mxu0 %v4489_v8  ;;  %3036 = vmatprep.subr.bf16.mxu1 %v4491_v9  ;;  %v952_v7 = vld [vmem:[%s5216_s4 + $0x7b8] sm:$0xff]  ;;  %v4432_v8 = vcombine.low %v855_v58, %v887_v59  ;;  %v4434_v9 = vcombine.low %v856_v61, %v888_v62  ;;  %v4377_v58 = vcombine.high %v795_v52, %v827_v53  ;;  %v859_v61 = vld [vmem:[%s5216_s4 + $0x4d0] sm:$0xff] }
 0x137   : > { %v4499_v11 = vcombine.high %v920_v6, %v952_v7  ;;  %v891_v62 = vld [vmem:[%s5216_s4 + $0x5d0] sm:$0xff] }
 0x139   : > { %2996 = vmatpush1.bf16.msra.mxu0 %v4488_v14  ;;  %3037 = vmatpush1.bf16.msra.mxu1 %v4490_v15  ;;  %v730_v14 = vld [vmem:[%s5216_s4 + $0xc8] sm:$0xff] }
 0x13a   : > { %3071 = vmatprep.subr.bf16.mxu0 %v4301_v16  ;;  %3112 = vmatprep.subr.bf16.mxu1 %v4303_v17  ;;  %v762_v15 = vld [vmem:[%s5216_s4 + $0x1c8] sm:$0xff]  ;;  %v4496_v16 = vcombine.low %v919_v4, %v951_v5  ;;  %v4498_v17 = vcombine.low %v920_v6, %v952_v7  ;;  %v4441_v4 = vcombine.high %v859_v61, %v891_v62  ;;  %v923_v6 = vld [vmem:[%s5216_s4 + $0x6d0] sm:$0xff] }
 0x13b   : > { %v4311_v19 = vcombine.high %v730_v14, %v762_v15  ;;  %v955_v7 = vld [vmem:[%s5216_s4 + $0x7d0] sm:$0xff] }
 0x13c   : > { %4534 = vmatmul.mubr.msk.bf16.vlgmr.msra.gmra.mrb[36].mxu0 %vm2247_vm0, %v5245_v44  ;;  %4535 = vmatmul.mubr.msk.bf16.vlgmr.msra.gmra.mrb[36].mxu1 %vm2247_vm0, %v5245_v44  ;;  %v4428_v44 = vcombine.low %v853_v26, %v885_v27  ;;  %v4373_v26 = vcombine.high %v793_v20, %v825_v21 }
 0x13d   : > { %3072 = vmatpush1.bf16.msra.mxu0 %v4300_v22  ;;  %3113 = vmatpush1.bf16.msra.mxu1 %v4302_v23  ;;  %v794_v22 = vld [vmem:[%s5216_s4 + $0x2c8] sm:$0xff] }
 0x13e   : > { %3073 = vmatprep.subr.bf16.mxu0 %v4365_v24  ;;  %3114 = vmatprep.subr.bf16.mxu1 %v4367_v25  ;;  %v826_v23 = vld [vmem:[%s5216_s4 + $0x3c8] sm:$0xff]  ;;  %v4308_v24 = vcombine.low %v729_v12, %v761_v13  ;;  %v4310_v25 = vcombine.low %v730_v14, %v762_v15  ;;  %v4505_v12 = vcombine.high %v923_v6, %v955_v7  ;;  %v733_v14 = vld [vmem:[%s5216_s4 + $0xe0] sm:$0xff] }
 0x13f   : > { %3103 = vmatprep.mubr.bf16.mxu0 %v4635_v0  ;;  %3144 = vmatprep.mubr.bf16.mxu1 %v4635_v0  ;;  %v4375_v27 = vcombine.high %v794_v22, %v826_v23  ;;  %v765_v15 = vld [vmem:[%s5216_s4 + $0x1e0] sm:$0xff] }
 0x141   : > { %3074 = vmatpush1.bf16.msra.mxu0 %v4364_v30  ;;  %3115 = vmatpush1.bf16.msra.mxu1 %v4366_v31  ;;  %v858_v30 = vld [vmem:[%s5216_s4 + $0x4c8] sm:$0xff] }
 0x142   : > { %3075 = vmatprep.subr.bf16.mxu0 %v4429_v32  ;;  %3116 = vmatprep.subr.bf16.mxu1 %v4431_v33  ;;  %v890_v31 = vld [vmem:[%s5216_s4 + $0x5c8] sm:$0xff]  ;;  %v4372_v32 = vcombine.low %v793_v20, %v825_v21  ;;  %v4374_v33 = vcombine.low %v794_v22, %v826_v23  ;;  %v4317_v20 = vcombine.high %v733_v14, %v765_v15  ;;  %v797_v22 = vld [vmem:[%s5216_s4 + $0x2e0] sm:$0xff] }
 0x143   : > { %v4439_v35 = vcombine.high %v858_v30, %v890_v31  ;;  %v829_v23 = vld [vmem:[%s5216_s4 + $0x3e0] sm:$0xff] }
 0x145   : > { %3076 = vmatpush1.bf16.msra.mxu0 %v4428_v44  ;;  %3117 = vmatpush1.bf16.msra.mxu1 %v4430_v38  ;;  %v922_v44 = vld [vmem:[%s5216_s4 + $0x6c8] sm:$0xff] }
 0x146   : > { %3077 = vmatprep.subr.bf16.mxu0 %v4493_v39  ;;  %3118 = vmatprep.subr.bf16.mxu1 %v4495_v40  ;;  %v954_v38 = vld [vmem:[%s5216_s4 + $0x7c8] sm:$0xff]  ;;  %v4436_v39 = vcombine.low %v857_v28, %v889_v29  ;;  %v4438_v40 = vcombine.low %v858_v30, %v890_v31  ;;  %v4381_v28 = vcombine.high %v797_v22, %v829_v23  ;;  %v5543_v30 = vld [vmem:[%s5216_s4 + $0x4e0] sm:$0xff] }
 0x147   : > { %v4503_v42 = vcombine.high %v922_v44, %v954_v38  ;;  %v5546_v31 = vld [vmem:[%s5216_s4 + $0x5e0] sm:$0xff] }
 0x149   : > { %3078 = vmatpush1.bf16.msra.mxu0 %v4492_v46  ;;  %3119 = vmatpush1.bf16.msra.mxu1 %v4494_v47  ;;  %v732_v46 = vld [vmem:[%s5216_s4 + $0xd8] sm:$0xff] }
 0x14a   : > { %3153 = vmatprep.subr.bf16.mxu0 %v4305_v48  ;;  %3194 = vmatprep.subr.bf16.mxu1 %v4307_v49  ;;  %v764_v47 = vld [vmem:[%s5216_s4 + $0x1d8] sm:$0xff]  ;;  %v4500_v48 = vcombine.low %v921_v36, %v953_v37  ;;  %v4502_v49 = vcombine.low %v922_v44, %v954_v38  ;;  %v5554_v36 = vld [vmem:[%s5216_s4 + $0x5e8] sm:$0xff]  ;;  %v5558_v37 = vpop.permute.xlu0 %964  ;;  %v4380_v44 = vcombine.low %v797_v22, %v829_v23  ;;  %v831_v22 = vld [vmem:[%s5216_s4 + $0x3f0] sm:$0xff] }
 0x14b   : > { %v4315_v51 = vcombine.high %v732_v46, %v764_v47 }
 0x14c   : > { %4536 = vmatmul.mubr.msk.bf16.vlgmr.msra.gmra.mrb[40].mxu0 %vm2247_vm0, %v5472_v60  ;;  %4537 = vmatmul.mubr.msk.bf16.vlgmr.msra.gmra.mrb[40].mxu1 %vm2247_vm0, %v5472_v60 }
 0x14d   : > { %3154 = vmatpush1.bf16.msra.mxu0 %v4304_v54  ;;  %3195 = vmatpush1.bf16.msra.mxu1 %v4306_v55  ;;  %v796_v54 = vld [vmem:[%s5216_s4 + $0x2d8] sm:$0xff] }
 0x14e   : > { %3155 = vmatprep.subr.bf16.mxu0 %v4369_v56  ;;  %3196 = vmatprep.subr.bf16.mxu1 %v4371_v57  ;;  %v828_v55 = vld [vmem:[%s5216_s4 + $0x3d8] sm:$0xff]  ;;  %v4312_v56 = vcombine.low %v731_v43, %v763_v45  ;;  %v4314_v57 = vcombine.low %v732_v46, %v764_v47  ;;  %v5572_v45 = vld [vmem:[%s5216_s4 + $0x6e8] sm:$0xff] }
 0x14f   : > { %3185 = vmatprep.mubr.bf16.mxu0 %v4635_v0  ;;  %3226 = vmatprep.mubr.bf16.mxu1 %v4635_v0  ;;  %v4379_v59 = vcombine.high %v796_v54, %v828_v55  ;;  %v958_v46 = vld [vmem:[%s5216_s4 + $0x7e8] sm:$0xff] }
 0x151   : > { %3156 = vmatpush1.bf16.msra.mxu0 %v4368_v63  ;;  %3197 = vmatpush1.bf16.msra.mxu1 %v4370_v1  ;;  %v860_v63 = vld [vmem:[%s5216_s4 + $0x4d8] sm:$0xff] }
 0x152   : > { %3157 = vmatprep.subr.bf16.mxu0 %v4433_v2  ;;  %3198 = vmatprep.subr.bf16.mxu1 %v4435_v3  ;;  %v892_v1 = vld [vmem:[%s5216_s4 + $0x5d8] sm:$0xff]  ;;  %v4376_v2 = vcombine.low %v795_v52, %v827_v53  ;;  %v4378_v3 = vcombine.low %v796_v54, %v828_v55  ;;  %v4444_v52 = vcombine.low %v5543_v30, %v5546_v31 }
 0x153   : > { %v4443_v5 = vcombine.high %v860_v63, %v892_v1 }
 0x155   : > { %3158 = vmatpush1.bf16.msra.mxu0 %v4432_v8  ;;  %3199 = vmatpush1.bf16.msra.mxu1 %v4434_v9  ;;  %v924_v8 = vld [vmem:[%s5216_s4 + $0x6d8] sm:$0xff] }
 0x156   : > { %3159 = vmatprep.subr.bf16.mxu0 %v4497_v10  ;;  %3200 = vmatprep.subr.bf16.mxu1 %v4499_v11  ;;  %v956_v9 = vld [vmem:[%s5216_s4 + $0x7d8] sm:$0xff]  ;;  %v4440_v10 = vcombine.low %v859_v61, %v891_v62  ;;  %v4442_v11 = vcombine.low %v860_v63, %v892_v1 }
 0x157   : > { %v4507_v13 = vcombine.high %v924_v8, %v956_v9 }
 0x159   : > { %3160 = vmatpush1.bf16.msra.mxu0 %v4496_v16  ;;  %3201 = vmatpush1.bf16.msra.mxu1 %v4498_v17  ;;  %v734_v16 = vld [vmem:[%s5216_s4 + $0xe8] sm:$0xff] }
 0x15a   : > { %3235 = vmatprep.subr.bf16.mxu0 %v4309_v18  ;;  %3276 = vmatprep.subr.bf16.mxu1 %v4311_v19  ;;  %v766_v17 = vld [vmem:[%s5216_s4 + $0x1e8] sm:$0xff]  ;;  %v4504_v18 = vcombine.low %v923_v6, %v955_v7  ;;  %v4506_v19 = vcombine.low %v924_v8, %v956_v9 }
 0x15b   : > { %v4319_v21 = vcombine.high %v734_v16, %v766_v17 }
 0x15c   : > { %4538 = vmatmul.mubr.msk.bf16.vlgmr.msra.gmra.mrb[44].mxu0 %vm2247_vm0, %v5472_v60  ;;  %4539 = vmatmul.mubr.msk.bf16.vlgmr.msra.gmra.mrb[44].mxu1 %vm2247_vm0, %v5472_v60 }
 0x15d   : > { %3236 = vmatpush1.bf16.msra.mxu0 %v4308_v24  ;;  %3277 = vmatpush1.bf16.msra.mxu1 %v4310_v25  ;;  %v798_v24 = vld [vmem:[%s5216_s4 + $0x2e8] sm:$0xff] }
 0x15e   : > { %3237 = vmatprep.subr.bf16.mxu0 %v4373_v26  ;;  %3278 = vmatprep.subr.bf16.mxu1 %v4375_v27  ;;  %v830_v25 = vld [vmem:[%s5216_s4 + $0x3e8] sm:$0xff]  ;;  %v4316_v26 = vcombine.low %v733_v14, %v765_v15  ;;  %v4318_v27 = vcombine.low %v734_v16, %v766_v17  ;;  %v4510_v15 = vcombine.low %v5572_v45, %v958_v46 }
 0x15f   : > { %3267 = vmatprep.mubr.bf16.mxu0 %v4635_v0  ;;  %3308 = vmatprep.mubr.bf16.mxu1 %v4635_v0  ;;  %v4383_v29 = vcombine.high %v798_v24, %v830_v25  ;;  %v4382_v38 = vcombine.low %v798_v24, %v830_v25  ;;  %v800_v24 = vld [vmem:[%s5216_s4 + $0x2f8] sm:$0xff] }
 0x160   : > { %v832_v25 = vld [vmem:[%s5216_s4 + $0x3f8] sm:$0xff] }
 0x161   : > { %3238 = vmatpush1.bf16.msra.mxu0 %v4372_v32  ;;  %3279 = vmatpush1.bf16.msra.mxu1 %v4374_v33  ;;  %v4636_v32 = vmov 1983009808  }
 0x162   : > { %3239 = vmatprep.subr.bf16.mxu0 %v4437_v34  ;;  %3280 = vmatprep.subr.bf16.mxu1 %v4439_v35  ;;  %v3886_v33 = vunpack.c.l.s4 %v4636_v32  ;;  %v3888_v34 = vlaneseq  ;;  %v5551_v35 = vld [vmem:[%s5216_s4 + $0x4e8] sm:$0xff]  ;;  %v863_v32 = vld [vmem:[%s5216_s4 + $0x4f0] sm:$0xff] }
 0x163   : > { %v4447_v43 = vcombine.high %v5551_v35, %v5554_v36 }
 0x165   : > { %3240 = vmatpush1.bf16.msra.mxu0 %v4436_v39  ;;  %3281 = vmatpush1.bf16.msra.mxu1 %v4438_v40  ;;  %v4445_v39 = vcombine.high %v5543_v30, %v5546_v31  ;;  %v5564_v40 = vld [vmem:[%s5216_s4 + $0x6e0] sm:$0xff]  ;;  %v4387_v31 = vcombine.high %v800_v24, %v832_v25 }
 0x166   : > { %3241 = vmatprep.subr.bf16.mxu0 %v4501_v41  ;;  %3282 = vmatprep.subr.bf16.mxu1 %v4503_v42  ;;  %v5567_v41 = vld [vmem:[%s5216_s4 + $0x7e0] sm:$0xff] }
 0x167   : > { %v4508_v14 = vcombine.low %v5564_v40, %v5567_v41 }
 0x169   : > { %3242 = vmatpush1.bf16.msra.mxu0 %v4500_v48  ;;  %3283 = vmatpush1.bf16.msra.mxu1 %v4502_v49 }
 0x16a   : > { %3317 = vmatprep.subr.bf16.mxu0 %v4313_v50  ;;  %3358 = vmatprep.subr.bf16.mxu1 %v4315_v51  ;;  %v3887_v50 = vunpack.c.0.s8 %v3886_v33  ;;  %v3889_v51 = vshrl.u32 %v3888_v34, 7  ;;  %v895_v33 = vld [vmem:[%s5216_s4 + $0x5f0] sm:$0xff]  ;;  %v864_v34 = vld [vmem:[%s5216_s4 + $0x4f8] sm:$0xff] }
 0x16c   : > { %4540 = vmatmul.mubr.msk.bf16.vlgmr.msra.gmra.mrb[48].mxu0 %vm2247_vm0, %v5472_v60  ;;  %4541 = vmatmul.mubr.msk.bf16.vlgmr.msra.gmra.mrb[48].mxu1 %vm2247_vm0, %v5472_v60  ;;  %v5595_v7 = vsub.s32 %v3887_v50, %v3889_v51 }
 0x16d   : > { %3318 = vmatpush1.bf16.msra.mxu0 %v4312_v56  ;;  %3359 = vmatpush1.bf16.msra.mxu1 %v4314_v57  ;;  %v4446_v57 = vcombine.low %v5551_v35, %v5554_v36  ;;  %v896_v35 = vld [vmem:[%s5216_s4 + $0x5f8] sm:$0xff] }
 0x16e   : > { %3319 = vmatprep.subr.bf16.mxu0 %v4377_v58  ;;  %3360 = vmatprep.subr.bf16.mxu1 %v4379_v59  ;;  %v4509_v58 = vcombine.high %v5564_v40, %v5567_v41  ;;  %v735_v59 = vld [vmem:[%s5216_s4 + $0xf0] sm:$0xff] }
 0x16f   : > { %3349 = vmatprep.mubr.bf16.mxu0 %v4635_v0  ;;  %3390 = vmatprep.mubr.bf16.mxu1 %v4635_v0  ;;  %v959_v40 = vld [vmem:[%s5216_s4 + $0x7f0] sm:$0xff] }
 0x171   : > { %3320 = vmatpush1.bf16.msra.mxu0 %v4376_v2  ;;  %3361 = vmatpush1.bf16.msra.mxu1 %v4378_v3  ;;  %v4511_v2 = vcombine.high %v5572_v45, %v958_v46  ;;  %v767_v3 = vld [vmem:[%s5216_s4 + $0x1f0] sm:$0xff]  ;;  %v960_v45 = vld [vmem:[%s5216_s4 + $0x7f8] sm:$0xff] }
 0x172   : > { %3321 = vmatprep.subr.bf16.mxu0 %v4441_v4  ;;  %3362 = vmatprep.subr.bf16.mxu1 %v4443_v5 }
 0x175   : > { %3322 = vmatpush1.bf16.msra.mxu0 %v4440_v10  ;;  %3363 = vmatpush1.bf16.msra.mxu1 %v4442_v11  ;;  %v736_v10 = vld [vmem:[%s5216_s4 + $0xf8] sm:$0xff] }
 0x176   : > { %3323 = vmatprep.subr.bf16.mxu0 %v4505_v12  ;;  %3364 = vmatprep.subr.bf16.mxu1 %v4507_v13  ;;  %v768_v11 = vld [vmem:[%s5216_s4 + $0x1f8] sm:$0xff] }
 0x179   : > { %3324 = vmatpush1.bf16.msra.mxu0 %v4504_v18  ;;  %3365 = vmatpush1.bf16.msra.mxu1 %v4506_v19  ;;  %v4321_v18 = vcombine.high %v735_v59, %v767_v3 }
 0x17a   : > { %3399 = vmatprep.subr.bf16.mxu0 %v4317_v20  ;;  %3440 = vmatprep.subr.bf16.mxu1 %v4319_v21  ;;  %v4323_v20 = vcombine.high %v736_v10, %v768_v11  ;;  %v799_v21 = vld [vmem:[%s5216_s4 + $0x2f0] sm:$0xff] }
 0x17b   : > { %v4384_v36 = vcombine.low %v799_v21, %v831_v22 }
 0x17c   : > { %4542 = vmatmul.mubr.msk.bf16.vlgmr.msra.gmra.mrb[52].mxu0 %vm2247_vm0, %v5472_v60  ;;  %4543 = vmatmul.mubr.msk.bf16.vlgmr.msra.gmra.mrb[52].mxu1 %vm2247_vm0, %v5472_v60 }
 0x17d   : > { %3400 = vmatpush1.bf16.msra.mxu0 %v4316_v26  ;;  %3441 = vmatpush1.bf16.msra.mxu1 %v4318_v27  ;;  %v4320_v27 = vcombine.low %v735_v59, %v767_v3 }
 0x17e   : > { %3401 = vmatprep.subr.bf16.mxu0 %v4381_v28  ;;  %3442 = vmatprep.subr.bf16.mxu1 %v4383_v29  ;;  %v4322_v28 = vcombine.low %v736_v10, %v768_v11  ;;  %v4385_v29 = vcombine.high %v799_v21, %v831_v22 }
 0x17f   : > { %v2285_v42 = vpop.f32.mrb[0].mxu0  ;;  %3431 = vmatprep.mubr.bf16.mxu0 %v4635_v0  ;;  %v2326_v48 = vpop.f32.mrb[0].mxu1  ;;  %3472 = vmatprep.mubr.bf16.mxu1 %v4635_v0 }
 0x180   : > { %v2286_v47 = vadd.f32 %v2285_v42, %v5558_v37  ;;  %v2287_v49 = vpop.f32.mrb[1].mxu0  ;;  %v2327_v53 = vadd.f32 %v2326_v48, %v5558_v37  ;;  %v2328_v55 = vpop.f32.mrb[1].mxu1  ;;  %v4451_v42 = vcombine.high %v864_v34, %v896_v35 }
 0x181   : > { %v2288_v54 = vadd.f32 %v2287_v49, %v5558_v37  ;;  %v2289_v56 = vpop.f32.mrb[2].mxu0  ;;  %3402 = vmatpush1.bf16.msra.mxu0 %v4380_v44  ;;  %v2329_v62 = vadd.f32 %v2328_v55, %v5558_v37  ;;  %v2330_v63 = vpop.f32.mrb[2].mxu1  ;;  %3443 = vmatpush1.bf16.msra.mxu1 %v4382_v38  ;;  %v4386_v44 = vcombine.low %v800_v24, %v832_v25 }
 0x182   : > { %vm3563_vm1 = vcmp.ge.f32.partialorder %v2286_v47, 0.0  ;;  %v3627_v61 = vmul.f32 0.01, %v2286_v47  ;;  %v2290_v1 = vpop.f32.mrb[3].mxu0  ;;  %3403 = vmatprep.subr.bf16.mxu0 %v4445_v39  ;;  %vm3565_vm2 = vcmp.ge.f32.partialorder %v2327_v53, 0.0  ;;  %3444 = vmatprep.subr.bf16.mxu1 %v4447_v43  ;;  %v2331_v9 = vpop.f32.mrb[3].mxu1  ;;  %v4449_v38 = vcombine.high %v863_v32, %v895_v33 }
 0x183   : > { %v3629_v4 = vmul.f32 0.01, %v2327_v53  ;;  %vm3564_vm3 = vcmp.ge.f32.partialorder %v2288_v54, 0.0  ;;  %v3628_v5 = vmul.f32 0.01, %v2288_v54  ;;  %vm3566_vm4 = vcmp.ge.f32.partialorder %v2329_v62, 0.0 }
 0x184   : > { %v3691_v6 = vsel %vm3563_vm1, %v2286_v47, %v3627_v61  ;;  %v3630_v8 = vmul.f32 0.01, %v2329_v62  ;;  %v927_v39 = vld [vmem:[%s5216_s4 + $0x6f0] sm:$0xff]  ;;  %v928_v43 = vld [vmem:[%s5216_s4 + $0x6f8] sm:$0xff]  ;;  %v4448_v49 = vcombine.low %v863_v32, %v895_v33 }
 0x185   : > { %v3693_v12 = vsel %vm3565_vm2, %v2327_v53, %v3629_v4  ;;  %v3692_v13 = vsel %vm3564_vm3, %v2288_v54, %v3628_v5  ;;  %3404 = vmatpush1.bf16.msra.mxu0 %v4444_v52  ;;  %3445 = vmatpush1.bf16.msra.mxu1 %v4446_v57  ;;  %v4450_v54 = vcombine.low %v864_v34, %v896_v35 }
 0x186   : > { %v4548_v16 = vpack.c.bf16 %v3692_v13, %v3691_v6  ;;  %v3694_v17 = vsel %vm3566_vm4, %v2329_v62, %v3630_v8  ;;  %3405 = vmatprep.subr.bf16.mxu0 %v4509_v58  ;;  %3446 = vmatprep.subr.bf16.mxu1 %v4511_v2  ;;  %v4513_v55 = vcombine.high %v927_v39, %v959_v40 }
 0x187   : > { %v4549_v19 = vpack.c.bf16 %v3694_v17, %v3693_v12  ;;  %v4515_v61 = vcombine.high %v928_v43, %v960_v45  ;;  %v4512_v5 = vcombine.low %v927_v39, %v959_v40  ;;  %v4514_v9 = vcombine.low %v928_v43, %v960_v45 }
 0x188   : > { %v3891_v23 = vrot.slane %v4548_v16, %v5595_v7 }
 0x189   : > { %v3898_v26 = vrot.slane %v4549_v19, %v5595_v7  ;;  %3406 = vmatpush1.bf16.msra.mxu0 %v4508_v14  ;;  %3447 = vmatpush1.bf16.msra.mxu1 %v4510_v15 }
 0x18a   : > { %3481 = vmatprep.subr.bf16.mxu0 %v4321_v18  ;;  %3522 = vmatprep.subr.bf16.mxu1 %v4323_v20 }
 0x18b   : > { %v3899_v30 = vcombine.low %v3891_v23, %v3898_v26 }
 0x18c   : > { %4544 = vmatmul.mubr.msk.bf16.vlgmr.msra.gmra.mrb[56].mxu0 %vm2247_vm0, %v5472_v60  ;;  %4545 = vmatmul.mubr.msk.bf16.vlgmr.msra.gmra.mrb[56].mxu1 %vm2247_vm0, %v5472_v60 }
 0x18d   : > { %4171 = vst [vmem:[%s5612_s14] sm:$0xff] %v3899_v30  ;;  %3482 = vmatpush1.bf16.msra.mxu0 %v4320_v27  ;;  %3523 = vmatpush1.bf16.msra.mxu1 %v4322_v28 }
 0x18e   : > { %3483 = vmatprep.subr.bf16.mxu0 %v4385_v29  ;;  %3524 = vmatprep.subr.bf16.mxu1 %v4387_v31 }
 0x18f   : > { %v2367_v41 = vpop.f32.mrb[4].mxu0  ;;  %3513 = vmatprep.mubr.bf16.mxu0 %v4635_v0  ;;  %v2408_v47 = vpop.f32.mrb[4].mxu1  ;;  %3554 = vmatprep.mubr.bf16.mxu1 %v4635_v0 }
 0x190   : > { %v2368_v46 = vadd.f32 %v2367_v41, %v5558_v37  ;;  %v2369_v48 = vpop.f32.mrb[5].mxu0  ;;  %v2409_v50 = vadd.f32 %v2408_v47, %v5558_v37  ;;  %v2410_v52 = vpop.f32.mrb[5].mxu1 }
 0x191   : > { %v2370_v51 = vadd.f32 %v2369_v48, %v5558_v37  ;;  %v2371_v53 = vpop.f32.mrb[6].mxu0  ;;  %3484 = vmatpush1.bf16.msra.mxu0 %v4384_v36  ;;  %v2411_v57 = vadd.f32 %v2410_v52, %v5558_v37  ;;  %v2412_v58 = vpop.f32.mrb[6].mxu1  ;;  %3525 = vmatpush1.bf16.msra.mxu1 %v4386_v44 }
 0x192   : > { %vm3567_vm5 = vcmp.ge.f32.partialorder %v2368_v46, 0.0  ;;  %v3631_v56 = vmul.f32 0.01, %v2368_v46  ;;  %v2372_v59 = vpop.f32.mrb[7].mxu0  ;;  %3485 = vmatprep.subr.bf16.mxu0 %v4449_v38  ;;  %vm3569_vm6 = vcmp.ge.f32.partialorder %v2409_v50, 0.0  ;;  %3526 = vmatprep.subr.bf16.mxu1 %v4451_v42  ;;  %v2413_v2 = vpop.f32.mrb[7].mxu1 }
 0x193   : > { %v3633_v0 = vmul.f32 0.01, %v2409_v50  ;;  %vm3568_vm7 = vcmp.ge.f32.partialorder %v2370_v51, 0.0  ;;  %v3632_v62 = vmul.f32 0.01, %v2370_v51  ;;  %vm3570_vm8 = vcmp.ge.f32.partialorder %v2411_v57, 0.0 }
 0x194   : > { %v3695_v63 = vsel %vm3567_vm5, %v2368_v46, %v3631_v56  ;;  %v3634_v1 = vmul.f32 0.01, %v2411_v57 }
 0x195   : > { %v3697_v3 = vsel %vm3569_vm6, %v2409_v50, %v3633_v0  ;;  %v3696_v4 = vsel %vm3568_vm7, %v2370_v51, %v3632_v62  ;;  %3486 = vmatpush1.bf16.msra.mxu0 %v4448_v49  ;;  %3527 = vmatpush1.bf16.msra.mxu1 %v4450_v54 }
 0x196   : > { %v4550_v6 = vpack.c.bf16 %v3696_v4, %v3695_v63  ;;  %v3698_v8 = vsel %vm3570_vm8, %v2411_v57, %v3634_v1  ;;  %3487 = vmatprep.subr.bf16.mxu0 %v4513_v55  ;;  %3528 = vmatprep.subr.bf16.mxu1 %v4515_v61 }
 0x197   : > { %v4551_v10 = vpack.c.bf16 %v3698_v8, %v3697_v3 }
 0x198   : > { %v3908_v11 = vrot.slane %v4550_v6, %v5595_v7 }
 0x199   : > { %v3915_v12 = vrot.slane %v4551_v10, %v5595_v7  ;;  %3488 = vmatpush1.bf16.msra.mxu0 %v4512_v5  ;;  %3529 = vmatpush1.bf16.msra.mxu1 %v4514_v9 }
 0x19b   : > { %v3916_v13 = vcombine.low %v3908_v11, %v3915_v12 }
 0x19c   : > { %4546 = vmatmul.mubr.msk.bf16.vlgmr.msra.gmra.mrb[60].mxu0 %vm2247_vm0, %v5472_v60  ;;  %4547 = vmatmul.mubr.msk.bf16.vlgmr.msra.gmra.mrb[60].mxu1 %vm2247_vm0, %v5472_v60 }
 0x19d   : > { %4172 = vst [vmem:[%s5612_s14 + $0x8] sm:$0xff] %v3916_v13 }
 0x19f   : > { %v2449_v14 = vpop.f32.mrb[8].mxu0  ;;  %v2490_v16 = vpop.f32.mrb[8].mxu1 }
 0x1a0   : > { %v2450_v15 = vadd.f32 %v2449_v14, %v5558_v37  ;;  %v2451_v17 = vpop.f32.mrb[9].mxu0  ;;  %v2491_v18 = vadd.f32 %v2490_v16, %v5558_v37  ;;  %v2492_v20 = vpop.f32.mrb[9].mxu1 }
 0x1a1   : > { %v2452_v19 = vadd.f32 %v2451_v17, %v5558_v37  ;;  %v2453_v21 = vpop.f32.mrb[10].mxu0  ;;  %v2493_v23 = vadd.f32 %v2492_v20, %v5558_v37  ;;  %v2494_v24 = vpop.f32.mrb[10].mxu1 }
 0x1a2   : > { %vm3571_vm9 = vcmp.ge.f32.partialorder %v2450_v15, 0.0  ;;  %v3635_v22 = vmul.f32 0.01, %v2450_v15  ;;  %v2454_v25 = vpop.f32.mrb[11].mxu0  ;;  %vm3573_vm10 = vcmp.ge.f32.partialorder %v2491_v18, 0.0  ;;  %v2495_v29 = vpop.f32.mrb[11].mxu1 }
 0x1a3   : > { %v3637_v60 = vmul.f32 0.01, %v2491_v18  ;;  %vm3572_vm11 = vcmp.ge.f32.partialorder %v2452_v19, 0.0  ;;  %v3636_v26 = vmul.f32 0.01, %v2452_v19  ;;  %vm3574_vm12 = vcmp.ge.f32.partialorder %v2493_v23, 0.0 }
 0x1a4   : > { %v3699_v27 = vsel %vm3571_vm9, %v2450_v15, %v3635_v22  ;;  %v3638_v28 = vmul.f32 0.01, %v2493_v23 }
 0x1a5   : > { %v3701_v30 = vsel %vm3573_vm10, %v2491_v18, %v3637_v60  ;;  %v3700_v31 = vsel %vm3572_vm11, %v2452_v19, %v3636_v26 }
 0x1a6   : > { %v4552_v32 = vpack.c.bf16 %v3700_v31, %v3699_v27  ;;  %v3702_v33 = vsel %vm3574_vm12, %v2493_v23, %v3638_v28 }
 0x1a7   : > { %v4553_v34 = vpack.c.bf16 %v3702_v33, %v3701_v30 }
 0x1a8   : > { %v3925_v35 = vrot.slane %v4552_v32, %v5595_v7 }
 0x1a9   : > { %v3932_v36 = vrot.slane %v4553_v34, %v5595_v7 }
 0x1ab   : > { %v3933_v44 = vcombine.low %v3925_v35, %v3932_v36 }
 0x1ad   : > { %4173 = vst [vmem:[%s5612_s14 + $0x10] sm:$0xff] %v3933_v44 }
 0x1af   : > { %v2531_v38 = vpop.f32.mrb[12].mxu0  ;;  %v2572_v40 = vpop.f32.mrb[12].mxu1 }
 0x1b0   : > { %v2532_v39 = vadd.f32 %v2531_v38, %v5558_v37  ;;  %v2533_v41 = vpop.f32.mrb[13].mxu0  ;;  %v2573_v42 = vadd.f32 %v2572_v40, %v5558_v37  ;;  %v2574_v45 = vpop.f32.mrb[13].mxu1 }
 0x1b1   : > { %v2534_v43 = vadd.f32 %v2533_v41, %v5558_v37  ;;  %v2535_v46 = vpop.f32.mrb[14].mxu0  ;;  %v2575_v48 = vadd.f32 %v2574_v45, %v5558_v37  ;;  %v2576_v49 = vpop.f32.mrb[14].mxu1 }
 0x1b2   : > { %vm3575_vm13 = vcmp.ge.f32.partialorder %v2532_v39, 0.0  ;;  %v3639_v47 = vmul.f32 0.01, %v2532_v39  ;;  %v2536_v50 = vpop.f32.mrb[15].mxu0  ;;  %vm3577_vm14 = vcmp.ge.f32.partialorder %v2573_v42, 0.0  ;;  %v2577_v55 = vpop.f32.mrb[15].mxu1 }
 0x1b3   : > { %v3641_v51 = vmul.f32 0.01, %v2573_v42  ;;  %vm3576_vm15 = vcmp.ge.f32.partialorder %v2534_v43, 0.0  ;;  %v3640_v52 = vmul.f32 0.01, %v2534_v43  ;;  %vm3578_vm0 = vcmp.ge.f32.partialorder %v2575_v48, 0.0 }
 0x1b4   : > { %v3703_v53 = vsel %vm3575_vm13, %v2532_v39, %v3639_v47  ;;  %v3642_v54 = vmul.f32 0.01, %v2575_v48 }
 0x1b5   : > { %v3705_v56 = vsel %vm3577_vm14, %v2573_v42, %v3641_v51  ;;  %v3704_v57 = vsel %vm3576_vm15, %v2534_v43, %v3640_v52 }
 0x1b6   : > { %v4554_v58 = vpack.c.bf16 %v3704_v57, %v3703_v53  ;;  %v3706_v59 = vsel %vm3578_vm0, %v2575_v48, %v3642_v54 }
 0x1b7   : > { %v4555_v61 = vpack.c.bf16 %v3706_v59, %v3705_v56 }
 0x1b8   : > { %v3942_v0 = vrot.slane %v4554_v58, %v5595_v7 }
 0x1b9   : > { %v3949_v62 = vrot.slane %v4555_v61, %v5595_v7 }
 0x1bb   : > { %v3950_v63 = vcombine.low %v3942_v0, %v3949_v62 }
 0x1bd   : > { %4174 = vst [vmem:[%s5612_s14 + $0x18] sm:$0xff] %v3950_v63 }
 0x1bf   : > { %v2613_v1 = vpop.f32.mrb[16].mxu0  ;;  %v2654_v3 = vpop.f32.mrb[16].mxu1 }
 0x1c0   : > { %v2614_v2 = vadd.f32 %v2613_v1, %v5558_v37  ;;  %v2615_v4 = vpop.f32.mrb[17].mxu0  ;;  %v2655_v5 = vadd.f32 %v2654_v3, %v5558_v37  ;;  %v2656_v8 = vpop.f32.mrb[17].mxu1 }
 0x1c1   : > { %v2616_v6 = vadd.f32 %v2615_v4, %v5558_v37  ;;  %v2617_v9 = vpop.f32.mrb[18].mxu0  ;;  %v2657_v11 = vadd.f32 %v2656_v8, %v5558_v37  ;;  %v2658_v12 = vpop.f32.mrb[18].mxu1 }
 0x1c2   : > { %vm3579_vm1 = vcmp.ge.f32.partialorder %v2614_v2, 0.0  ;;  %v3643_v10 = vmul.f32 0.01, %v2614_v2  ;;  %v2618_v13 = vpop.f32.mrb[19].mxu0  ;;  %vm3581_vm2 = vcmp.ge.f32.partialorder %v2655_v5, 0.0  ;;  %v2659_v18 = vpop.f32.mrb[19].mxu1 }
 0x1c3   : > { %v3645_v14 = vmul.f32 0.01, %v2655_v5  ;;  %vm3580_vm3 = vcmp.ge.f32.partialorder %v2616_v6, 0.0  ;;  %v3644_v15 = vmul.f32 0.01, %v2616_v6  ;;  %vm3582_vm4 = vcmp.ge.f32.partialorder %v2657_v11, 0.0 }
 0x1c4   : > { %v3707_v16 = vsel %vm3579_vm1, %v2614_v2, %v3643_v10  ;;  %v3646_v17 = vmul.f32 0.01, %v2657_v11 }
 0x1c5   : > { %v3709_v19 = vsel %vm3581_vm2, %v2655_v5, %v3645_v14  ;;  %v3708_v20 = vsel %vm3580_vm3, %v2616_v6, %v3644_v15 }
 0x1c6   : > { %v4556_v21 = vpack.c.bf16 %v3708_v20, %v3707_v16  ;;  %v3710_v22 = vsel %vm3582_vm4, %v2657_v11, %v3646_v17 }
 0x1c7   : > { %v4557_v23 = vpack.c.bf16 %v3710_v22, %v3709_v19 }
 0x1c8   : > { %v3959_v24 = vrot.slane %v4556_v21, %v5595_v7 }
 0x1c9   : > { %v3966_v25 = vrot.slane %v4557_v23, %v5595_v7 }
 0x1cb   : > { %v3967_v60 = vcombine.low %v3959_v24, %v3966_v25 }
 0x1cd   : > { %4175 = vst [vmem:[%s5612_s14 + $0x20] sm:$0xff] %v3967_v60 }
 0x1cf   : > { %v2695_v26 = vpop.f32.mrb[20].mxu0  ;;  %v2736_v28 = vpop.f32.mrb[20].mxu1 }
 0x1d0   : > { %v2696_v27 = vadd.f32 %v2695_v26, %v5558_v37  ;;  %v2697_v29 = vpop.f32.mrb[21].mxu0  ;;  %v2737_v30 = vadd.f32 %v2736_v28, %v5558_v37  ;;  %v2738_v32 = vpop.f32.mrb[21].mxu1 }
 0x1d1   : > { %v2698_v31 = vadd.f32 %v2697_v29, %v5558_v37  ;;  %v2699_v33 = vpop.f32.mrb[22].mxu0  ;;  %v2739_v35 = vadd.f32 %v2738_v32, %v5558_v37  ;;  %v2740_v36 = vpop.f32.mrb[22].mxu1 }
 0x1d2   : > { %vm3583_vm5 = vcmp.ge.f32.partialorder %v2696_v27, 0.0  ;;  %v3647_v34 = vmul.f32 0.01, %v2696_v27  ;;  %v2700_v44 = vpop.f32.mrb[23].mxu0  ;;  %vm3585_vm6 = vcmp.ge.f32.partialorder %v2737_v30, 0.0  ;;  %v2741_v42 = vpop.f32.mrb[23].mxu1 }
 0x1d3   : > { %v3649_v38 = vmul.f32 0.01, %v2737_v30  ;;  %vm3584_vm7 = vcmp.ge.f32.partialorder %v2698_v31, 0.0  ;;  %v3648_v39 = vmul.f32 0.01, %v2698_v31  ;;  %vm3586_vm8 = vcmp.ge.f32.partialorder %v2739_v35, 0.0 }
 0x1d4   : > { %v3711_v40 = vsel %vm3583_vm5, %v2696_v27, %v3647_v34  ;;  %v3650_v41 = vmul.f32 0.01, %v2739_v35 }
 0x1d5   : > { %v3713_v43 = vsel %vm3585_vm6, %v2737_v30, %v3649_v38  ;;  %v3712_v45 = vsel %vm3584_vm7, %v2698_v31, %v3648_v39 }
 0x1d6   : > { %v4558_v46 = vpack.c.bf16 %v3712_v45, %v3711_v40  ;;  %v3714_v47 = vsel %vm3586_vm8, %v2739_v35, %v3650_v41 }
 0x1d7   : > { %v4559_v48 = vpack.c.bf16 %v3714_v47, %v3713_v43 }
 0x1d8   : > { %v3976_v49 = vrot.slane %v4558_v46, %v5595_v7 }
 0x1d9   : > { %v3983_v50 = vrot.slane %v4559_v48, %v5595_v7 }
 0x1db   : > { %v3984_v51 = vcombine.low %v3976_v49, %v3983_v50 }
 0x1dd   : > { %4176 = vst [vmem:[%s5612_s14 + $0x28] sm:$0xff] %v3984_v51 }
 0x1df   : > { %v2777_v52 = vpop.f32.mrb[24].mxu0  ;;  %v2818_v54 = vpop.f32.mrb[24].mxu1 }
 0x1e0   : > { %v2778_v53 = vadd.f32 %v2777_v52, %v5558_v37  ;;  %v2779_v55 = vpop.f32.mrb[25].mxu0  ;;  %v2819_v56 = vadd.f32 %v2818_v54, %v5558_v37  ;;  %v2820_v58 = vpop.f32.mrb[25].mxu1 }
 0x1e1   : > { %v2780_v57 = vadd.f32 %v2779_v55, %v5558_v37  ;;  %v2781_v59 = vpop.f32.mrb[26].mxu0  ;;  %v2821_v0 = vadd.f32 %v2820_v58, %v5558_v37  ;;  %v2822_v62 = vpop.f32.mrb[26].mxu1 }
 0x1e2   : > { %vm3587_vm9 = vcmp.ge.f32.partialorder %v2778_v53, 0.0  ;;  %v3651_v61 = vmul.f32 0.01, %v2778_v53  ;;  %v2782_v63 = vpop.f32.mrb[27].mxu0  ;;  %vm3589_vm10 = vcmp.ge.f32.partialorder %v2819_v56, 0.0  ;;  %v2823_v5 = vpop.f32.mrb[27].mxu1 }
 0x1e3   : > { %v3653_v1 = vmul.f32 0.01, %v2819_v56  ;;  %vm3588_vm11 = vcmp.ge.f32.partialorder %v2780_v57, 0.0  ;;  %v3652_v2 = vmul.f32 0.01, %v2780_v57  ;;  %vm3590_vm12 = vcmp.ge.f32.partialorder %v2821_v0, 0.0 }
 0x1e4   : > { %v3715_v3 = vsel %vm3587_vm9, %v2778_v53, %v3651_v61  ;;  %v3654_v4 = vmul.f32 0.01, %v2821_v0 }
 0x1e5   : > { %v3717_v6 = vsel %vm3589_vm10, %v2819_v56, %v3653_v1  ;;  %v3716_v8 = vsel %vm3588_vm11, %v2780_v57, %v3652_v2 }
 0x1e6   : > { %v4560_v9 = vpack.c.bf16 %v3716_v8, %v3715_v3  ;;  %v3718_v10 = vsel %vm3590_vm12, %v2821_v0, %v3654_v4 }
 0x1e7   : > { %v4561_v11 = vpack.c.bf16 %v3718_v10, %v3717_v6 }
 0x1e8   : > { %v3993_v12 = vrot.slane %v4560_v9, %v5595_v7 }
 0x1e9   : > { %v4000_v13 = vrot.slane %v4561_v11, %v5595_v7 }
 0x1eb   : > { %v4001_v14 = vcombine.low %v3993_v12, %v4000_v13 }
 0x1ed   : > { %4177 = vst [vmem:[%s5612_s14 + $0x30] sm:$0xff] %v4001_v14 }
 0x1ef   : > { %v2859_v15 = vpop.f32.mrb[28].mxu0  ;;  %v2900_v17 = vpop.f32.mrb[28].mxu1 }
 0x1f0   : > { %v2860_v16 = vadd.f32 %v2859_v15, %v5558_v37  ;;  %v2861_v18 = vpop.f32.mrb[29].mxu0  ;;  %v2901_v19 = vadd.f32 %v2900_v17, %v5558_v37  ;;  %v2902_v21 = vpop.f32.mrb[29].mxu1 }
 0x1f1   : > { %v2862_v20 = vadd.f32 %v2861_v18, %v5558_v37  ;;  %v2863_v22 = vpop.f32.mrb[30].mxu0  ;;  %v2903_v24 = vadd.f32 %v2902_v21, %v5558_v37  ;;  %v2904_v25 = vpop.f32.mrb[30].mxu1 }
 0x1f2   : > { %vm3591_vm13 = vcmp.ge.f32.partialorder %v2860_v16, 0.0  ;;  %v3655_v23 = vmul.f32 0.01, %v2860_v16  ;;  %v2864_v60 = vpop.f32.mrb[31].mxu0  ;;  %vm3593_vm14 = vcmp.ge.f32.partialorder %v2901_v19, 0.0  ;;  %v2905_v30 = vpop.f32.mrb[31].mxu1 }
 0x1f3   : > { %v3657_v26 = vmul.f32 0.01, %v2901_v19  ;;  %vm3592_vm15 = vcmp.ge.f32.partialorder %v2862_v20, 0.0  ;;  %v3656_v27 = vmul.f32 0.01, %v2862_v20  ;;  %vm3594_vm0 = vcmp.ge.f32.partialorder %v2903_v24, 0.0 }
 0x1f4   : > { %v3719_v28 = vsel %vm3591_vm13, %v2860_v16, %v3655_v23  ;;  %v3658_v29 = vmul.f32 0.01, %v2903_v24 }
 0x1f5   : > { %v3721_v31 = vsel %vm3593_vm14, %v2901_v19, %v3657_v26  ;;  %v3720_v32 = vsel %vm3592_vm15, %v2862_v20, %v3656_v27 }
 0x1f6   : > { %v4562_v33 = vpack.c.bf16 %v3720_v32, %v3719_v28  ;;  %v3722_v34 = vsel %vm3594_vm0, %v2903_v24, %v3658_v29 }
 0x1f7   : > { %v4563_v35 = vpack.c.bf16 %v3722_v34, %v3721_v31 }
 0x1f8   : > { %v4010_v36 = vrot.slane %v4562_v33, %v5595_v7 }
 0x1f9   : > { %v4017_v44 = vrot.slane %v4563_v35, %v5595_v7 }
 0x1fb   : > { %v4018_v38 = vcombine.low %v4010_v36, %v4017_v44 }
 0x1fd   : > { %4178 = vst [vmem:[%s5612_s14 + $0x38] sm:$0xff] %v4018_v38 }
 0x1ff   : > { %v2941_v39 = vpop.f32.mrb[32].mxu0  ;;  %v2982_v41 = vpop.f32.mrb[32].mxu1 }
 0x200   : > { %v2942_v40 = vadd.f32 %v2941_v39, %v5558_v37  ;;  %v2943_v42 = vpop.f32.mrb[33].mxu0  ;;  %v2983_v43 = vadd.f32 %v2982_v41, %v5558_v37  ;;  %v2984_v46 = vpop.f32.mrb[33].mxu1 }
 0x201   : > { %v2944_v45 = vadd.f32 %v2943_v42, %v5558_v37  ;;  %v2945_v47 = vpop.f32.mrb[34].mxu0  ;;  %v2985_v49 = vadd.f32 %v2984_v46, %v5558_v37  ;;  %v2986_v50 = vpop.f32.mrb[34].mxu1 }
 0x202   : > { %vm3595_vm1 = vcmp.ge.f32.partialorder %v2942_v40, 0.0  ;;  %v3659_v48 = vmul.f32 0.01, %v2942_v40  ;;  %v2946_v51 = vpop.f32.mrb[35].mxu0  ;;  %vm3597_vm2 = vcmp.ge.f32.partialorder %v2983_v43, 0.0  ;;  %v2987_v56 = vpop.f32.mrb[35].mxu1 }
 0x203   : > { %v3661_v52 = vmul.f32 0.01, %v2983_v43  ;;  %vm3596_vm3 = vcmp.ge.f32.partialorder %v2944_v45, 0.0  ;;  %v3660_v53 = vmul.f32 0.01, %v2944_v45  ;;  %vm3598_vm4 = vcmp.ge.f32.partialorder %v2985_v49, 0.0 }
 0x204   : > { %v3723_v54 = vsel %vm3595_vm1, %v2942_v40, %v3659_v48  ;;  %v3662_v55 = vmul.f32 0.01, %v2985_v49 }
 0x205   : > { %v3725_v57 = vsel %vm3597_vm2, %v2983_v43, %v3661_v52  ;;  %v3724_v58 = vsel %vm3596_vm3, %v2944_v45, %v3660_v53 }
 0x206   : > { %v4564_v59 = vpack.c.bf16 %v3724_v58, %v3723_v54  ;;  %v3726_v61 = vsel %vm3598_vm4, %v2985_v49, %v3662_v55 }
 0x207   : > { %v4565_v0 = vpack.c.bf16 %v3726_v61, %v3725_v57 }
 0x208   : > { %v4027_v62 = vrot.slane %v4564_v59, %v5595_v7 }
 0x209   : > { %v4034_v63 = vrot.slane %v4565_v0, %v5595_v7 }
 0x20b   : > { %v4035_v1 = vcombine.low %v4027_v62, %v4034_v63 }
 0x20d   : > { %4179 = vst [vmem:[%s5612_s14 + $0x40] sm:$0xff] %v4035_v1 }
 0x20f   : > { %v3023_v2 = vpop.f32.mrb[36].mxu0  ;;  %v3064_v4 = vpop.f32.mrb[36].mxu1 }
 0x210   : > { %v3024_v3 = vadd.f32 %v3023_v2, %v5558_v37  ;;  %v3025_v5 = vpop.f32.mrb[37].mxu0  ;;  %v3065_v6 = vadd.f32 %v3064_v4, %v5558_v37  ;;  %v3066_v9 = vpop.f32.mrb[37].mxu1 }
 0x211   : > { %v3026_v8 = vadd.f32 %v3025_v5, %v5558_v37  ;;  %v3027_v10 = vpop.f32.mrb[38].mxu0  ;;  %v3067_v12 = vadd.f32 %v3066_v9, %v5558_v37  ;;  %v3068_v13 = vpop.f32.mrb[38].mxu1 }
 0x212   : > { %vm3599_vm5 = vcmp.ge.f32.partialorder %v3024_v3, 0.0  ;;  %v3663_v11 = vmul.f32 0.01, %v3024_v3  ;;  %v3028_v14 = vpop.f32.mrb[39].mxu0  ;;  %vm3601_vm6 = vcmp.ge.f32.partialorder %v3065_v6, 0.0  ;;  %v3069_v19 = vpop.f32.mrb[39].mxu1 }
 0x213   : > { %v3665_v15 = vmul.f32 0.01, %v3065_v6  ;;  %vm3600_vm7 = vcmp.ge.f32.partialorder %v3026_v8, 0.0  ;;  %v3664_v16 = vmul.f32 0.01, %v3026_v8  ;;  %vm3602_vm8 = vcmp.ge.f32.partialorder %v3067_v12, 0.0 }
 0x214   : > { %v3727_v17 = vsel %vm3599_vm5, %v3024_v3, %v3663_v11  ;;  %v3666_v18 = vmul.f32 0.01, %v3067_v12 }
 0x215   : > { %v3729_v20 = vsel %vm3601_vm6, %v3065_v6, %v3665_v15  ;;  %v3728_v21 = vsel %vm3600_vm7, %v3026_v8, %v3664_v16 }
 0x216   : > { %v4566_v22 = vpack.c.bf16 %v3728_v21, %v3727_v17  ;;  %v3730_v23 = vsel %vm3602_vm8, %v3067_v12, %v3666_v18 }
 0x217   : > { %v4567_v24 = vpack.c.bf16 %v3730_v23, %v3729_v20 }
 0x218   : > { %v4044_v25 = vrot.slane %v4566_v22, %v5595_v7 }
 0x219   : > { %v4051_v60 = vrot.slane %v4567_v24, %v5595_v7 }
 0x21b   : > { %v4052_v26 = vcombine.low %v4044_v25, %v4051_v60 }
 0x21d   : > { %4180 = vst [vmem:[%s5612_s14 + $0x48] sm:$0xff] %v4052_v26 }
 0x21f   : > { %v3105_v27 = vpop.f32.mrb[40].mxu0  ;;  %v3146_v29 = vpop.f32.mrb[40].mxu1 }
 0x220   : > { %v3106_v28 = vadd.f32 %v3105_v27, %v5558_v37  ;;  %v3107_v30 = vpop.f32.mrb[41].mxu0  ;;  %v3147_v31 = vadd.f32 %v3146_v29, %v5558_v37  ;;  %v3148_v33 = vpop.f32.mrb[41].mxu1 }
 0x221   : > { %v3108_v32 = vadd.f32 %v3107_v30, %v5558_v37  ;;  %v3109_v34 = vpop.f32.mrb[42].mxu0  ;;  %v3149_v36 = vadd.f32 %v3148_v33, %v5558_v37  ;;  %v3150_v44 = vpop.f32.mrb[42].mxu1 }
 0x222   : > { %vm3603_vm9 = vcmp.ge.f32.partialorder %v3106_v28, 0.0  ;;  %v3667_v35 = vmul.f32 0.01, %v3106_v28  ;;  %v3110_v38 = vpop.f32.mrb[43].mxu0  ;;  %vm3605_vm10 = vcmp.ge.f32.partialorder %v3147_v31, 0.0  ;;  %v3151_v43 = vpop.f32.mrb[43].mxu1 }
 0x223   : > { %v3669_v39 = vmul.f32 0.01, %v3147_v31  ;;  %vm3604_vm11 = vcmp.ge.f32.partialorder %v3108_v32, 0.0  ;;  %v3668_v40 = vmul.f32 0.01, %v3108_v32  ;;  %vm3606_vm12 = vcmp.ge.f32.partialorder %v3149_v36, 0.0 }
 0x224   : > { %v3731_v41 = vsel %vm3603_vm9, %v3106_v28, %v3667_v35  ;;  %v3670_v42 = vmul.f32 0.01, %v3149_v36 }
 0x225   : > { %v3733_v45 = vsel %vm3605_vm10, %v3147_v31, %v3669_v39  ;;  %v3732_v46 = vsel %vm3604_vm11, %v3108_v32, %v3668_v40 }
 0x226   : > { %v4568_v47 = vpack.c.bf16 %v3732_v46, %v3731_v41  ;;  %v3734_v48 = vsel %vm3606_vm12, %v3149_v36, %v3670_v42 }
 0x227   : > { %v4569_v49 = vpack.c.bf16 %v3734_v48, %v3733_v45 }
 0x228   : > { %v4061_v50 = vrot.slane %v4568_v47, %v5595_v7 }
 0x229   : > { %v4068_v51 = vrot.slane %v4569_v49, %v5595_v7 }
 0x22b   : > { %v4069_v52 = vcombine.low %v4061_v50, %v4068_v51 }
 0x22d   : > { %4181 = vst [vmem:[%s5612_s14 + $0x50] sm:$0xff] %v4069_v52 }
 0x22f   : > { %v3187_v53 = vpop.f32.mrb[44].mxu0  ;;  %v3228_v55 = vpop.f32.mrb[44].mxu1 }
 0x230   : > { %v3188_v54 = vadd.f32 %v3187_v53, %v5558_v37  ;;  %v3189_v56 = vpop.f32.mrb[45].mxu0  ;;  %v3229_v57 = vadd.f32 %v3228_v55, %v5558_v37  ;;  %v3230_v59 = vpop.f32.mrb[45].mxu1 }
 0x231   : > { %v3190_v58 = vadd.f32 %v3189_v56, %v5558_v37  ;;  %v3191_v61 = vpop.f32.mrb[46].mxu0  ;;  %v3231_v62 = vadd.f32 %v3230_v59, %v5558_v37  ;;  %v3232_v63 = vpop.f32.mrb[46].mxu1 }
 0x232   : > { %vm3607_vm13 = vcmp.ge.f32.partialorder %v3188_v54, 0.0  ;;  %v3671_v0 = vmul.f32 0.01, %v3188_v54  ;;  %v3192_v1 = vpop.f32.mrb[47].mxu0  ;;  %vm3609_vm14 = vcmp.ge.f32.partialorder %v3229_v57, 0.0  ;;  %v3233_v6 = vpop.f32.mrb[47].mxu1 }
 0x233   : > { %v3673_v2 = vmul.f32 0.01, %v3229_v57  ;;  %vm3608_vm15 = vcmp.ge.f32.partialorder %v3190_v58, 0.0  ;;  %v3672_v3 = vmul.f32 0.01, %v3190_v58  ;;  %vm3610_vm0 = vcmp.ge.f32.partialorder %v3231_v62, 0.0 }
 0x234   : > { %v3735_v4 = vsel %vm3607_vm13, %v3188_v54, %v3671_v0  ;;  %v3674_v5 = vmul.f32 0.01, %v3231_v62 }
 0x235   : > { %v3737_v8 = vsel %vm3609_vm14, %v3229_v57, %v3673_v2  ;;  %v3736_v9 = vsel %vm3608_vm15, %v3190_v58, %v3672_v3 }
 0x236   : > { %v4570_v10 = vpack.c.bf16 %v3736_v9, %v3735_v4  ;;  %v3738_v11 = vsel %vm3610_vm0, %v3231_v62, %v3674_v5 }
 0x237   : > { %v4571_v12 = vpack.c.bf16 %v3738_v11, %v3737_v8 }
 0x238   : > { %v4078_v13 = vrot.slane %v4570_v10, %v5595_v7 }
 0x239   : > { %v4085_v14 = vrot.slane %v4571_v12, %v5595_v7 }
 0x23b   : > { %v4086_v15 = vcombine.low %v4078_v13, %v4085_v14 }
 0x23d   : > { %4182 = vst [vmem:[%s5612_s14 + $0x58] sm:$0xff] %v4086_v15 }
 0x23f   : > { %v3269_v16 = vpop.f32.mrb[48].mxu0  ;;  %v3310_v18 = vpop.f32.mrb[48].mxu1 }
 0x240   : > { %v3270_v17 = vadd.f32 %v3269_v16, %v5558_v37  ;;  %v3271_v19 = vpop.f32.mrb[49].mxu0  ;;  %v3311_v20 = vadd.f32 %v3310_v18, %v5558_v37  ;;  %v3312_v22 = vpop.f32.mrb[49].mxu1 }
 0x241   : > { %v3272_v21 = vadd.f32 %v3271_v19, %v5558_v37  ;;  %v3273_v23 = vpop.f32.mrb[50].mxu0  ;;  %v3313_v25 = vadd.f32 %v3312_v22, %v5558_v37  ;;  %v3314_v60 = vpop.f32.mrb[50].mxu1 }
 0x242   : > { %vm3611_vm1 = vcmp.ge.f32.partialorder %v3270_v17, 0.0  ;;  %v3675_v24 = vmul.f32 0.01, %v3270_v17  ;;  %v3274_v26 = vpop.f32.mrb[51].mxu0  ;;  %vm3613_vm2 = vcmp.ge.f32.partialorder %v3311_v20, 0.0  ;;  %v3315_v31 = vpop.f32.mrb[51].mxu1 }
 0x243   : > { %v3677_v27 = vmul.f32 0.01, %v3311_v20  ;;  %vm3612_vm3 = vcmp.ge.f32.partialorder %v3272_v21, 0.0  ;;  %v3676_v28 = vmul.f32 0.01, %v3272_v21  ;;  %vm3614_vm4 = vcmp.ge.f32.partialorder %v3313_v25, 0.0 }
 0x244   : > { %v3739_v29 = vsel %vm3611_vm1, %v3270_v17, %v3675_v24  ;;  %v3678_v30 = vmul.f32 0.01, %v3313_v25 }
 0x245   : > { %v3741_v32 = vsel %vm3613_vm2, %v3311_v20, %v3677_v27  ;;  %v3740_v33 = vsel %vm3612_vm3, %v3272_v21, %v3676_v28 }
 0x246   : > { %v4572_v34 = vpack.c.bf16 %v3740_v33, %v3739_v29  ;;  %v3742_v35 = vsel %vm3614_vm4, %v3313_v25, %v3678_v30 }
 0x247   : > { %v4573_v36 = vpack.c.bf16 %v3742_v35, %v3741_v32 }
 0x248   : > { %v4095_v44 = vrot.slane %v4572_v34, %v5595_v7 }
 0x249   : > { %v4102_v38 = vrot.slane %v4573_v36, %v5595_v7 }
 0x24b   : > { %v4103_v39 = vcombine.low %v4095_v44, %v4102_v38 }
 0x24d   : > { %4183 = vst [vmem:[%s5612_s14 + $0x60] sm:$0xff] %v4103_v39 }
 0x24f   : > { %v3351_v40 = vpop.f32.mrb[52].mxu0  ;;  %v3392_v42 = vpop.f32.mrb[52].mxu1 }
 0x250   : > { %v3352_v41 = vadd.f32 %v3351_v40, %v5558_v37  ;;  %v3353_v43 = vpop.f32.mrb[53].mxu0  ;;  %v3393_v45 = vadd.f32 %v3392_v42, %v5558_v37  ;;  %v3394_v47 = vpop.f32.mrb[53].mxu1 }
 0x251   : > { %v3354_v46 = vadd.f32 %v3353_v43, %v5558_v37  ;;  %v3355_v48 = vpop.f32.mrb[54].mxu0  ;;  %v3395_v50 = vadd.f32 %v3394_v47, %v5558_v37  ;;  %v3396_v51 = vpop.f32.mrb[54].mxu1 }
 0x252   : > { %vm3615_vm5 = vcmp.ge.f32.partialorder %v3352_v41, 0.0  ;;  %v3679_v49 = vmul.f32 0.01, %v3352_v41  ;;  %v3356_v52 = vpop.f32.mrb[55].mxu0  ;;  %vm3617_vm6 = vcmp.ge.f32.partialorder %v3393_v45, 0.0  ;;  %v3397_v57 = vpop.f32.mrb[55].mxu1 }
 0x253   : > { %v3681_v53 = vmul.f32 0.01, %v3393_v45  ;;  %vm3616_vm7 = vcmp.ge.f32.partialorder %v3354_v46, 0.0  ;;  %v3680_v54 = vmul.f32 0.01, %v3354_v46  ;;  %vm3618_vm8 = vcmp.ge.f32.partialorder %v3395_v50, 0.0 }
 0x254   : > { %v3743_v55 = vsel %vm3615_vm5, %v3352_v41, %v3679_v49  ;;  %v3682_v56 = vmul.f32 0.01, %v3395_v50 }
 0x255   : > { %v3745_v58 = vsel %vm3617_vm6, %v3393_v45, %v3681_v53  ;;  %v3744_v59 = vsel %vm3616_vm7, %v3354_v46, %v3680_v54 }
 0x256   : > { %v4574_v61 = vpack.c.bf16 %v3744_v59, %v3743_v55  ;;  %v3746_v0 = vsel %vm3618_vm8, %v3395_v50, %v3682_v56 }
 0x257   : > { %v4575_v62 = vpack.c.bf16 %v3746_v0, %v3745_v58 }
 0x258   : > { %v4112_v63 = vrot.slane %v4574_v61, %v5595_v7 }
 0x259   : > { %v4119_v1 = vrot.slane %v4575_v62, %v5595_v7 }
 0x25b   : > { %v4120_v2 = vcombine.low %v4112_v63, %v4119_v1 }
 0x25d   : > { %4184 = vst [vmem:[%s5612_s14 + $0x68] sm:$0xff] %v4120_v2 }
 0x25f   : > { %v3433_v3 = vpop.f32.mrb[56].mxu0  ;;  %v3474_v5 = vpop.f32.mrb[56].mxu1 }
 0x260   : > { %v3434_v4 = vadd.f32 %v3433_v3, %v5558_v37  ;;  %v3435_v6 = vpop.f32.mrb[57].mxu0  ;;  %v3475_v8 = vadd.f32 %v3474_v5, %v5558_v37  ;;  %v3476_v10 = vpop.f32.mrb[57].mxu1 }
 0x261   : > { %v3436_v9 = vadd.f32 %v3435_v6, %v5558_v37  ;;  %v3437_v11 = vpop.f32.mrb[58].mxu0  ;;  %v3477_v13 = vadd.f32 %v3476_v10, %v5558_v37  ;;  %v3478_v14 = vpop.f32.mrb[58].mxu1 }
 0x262   : > { %vm3619_vm9 = vcmp.ge.f32.partialorder %v3434_v4, 0.0  ;;  %v3683_v12 = vmul.f32 0.01, %v3434_v4  ;;  %v3438_v15 = vpop.f32.mrb[59].mxu0  ;;  %vm3621_vm10 = vcmp.ge.f32.partialorder %v3475_v8, 0.0  ;;  %v3479_v20 = vpop.f32.mrb[59].mxu1 }
 0x263   : > { %v3685_v16 = vmul.f32 0.01, %v3475_v8  ;;  %vm3620_vm11 = vcmp.ge.f32.partialorder %v3436_v9, 0.0  ;;  %v3684_v17 = vmul.f32 0.01, %v3436_v9  ;;  %vm3622_vm12 = vcmp.ge.f32.partialorder %v3477_v13, 0.0 }
 0x264   : > { %v3747_v18 = vsel %vm3619_vm9, %v3434_v4, %v3683_v12  ;;  %v3686_v19 = vmul.f32 0.01, %v3477_v13 }
 0x265   : > { %v3749_v21 = vsel %vm3621_vm10, %v3475_v8, %v3685_v16  ;;  %v3748_v22 = vsel %vm3620_vm11, %v3436_v9, %v3684_v17 }
 0x266   : > { %v4576_v23 = vpack.c.bf16 %v3748_v22, %v3747_v18  ;;  %v3750_v24 = vsel %vm3622_vm12, %v3477_v13, %v3686_v19 }
 0x267   : > { %v4577_v25 = vpack.c.bf16 %v3750_v24, %v3749_v21 }
 0x268   : > { %v4129_v60 = vrot.slane %v4576_v23, %v5595_v7 }
 0x269   : > { %v4136_v26 = vrot.slane %v4577_v25, %v5595_v7 }
 0x26b   : > { %v4137_v27 = vcombine.low %v4129_v60, %v4136_v26 }
 0x26d   : > { %4185 = vst [vmem:[%s5612_s14 + $0x70] sm:$0xff] %v4137_v27 }
 0x26f   : > { %v3515_v28 = vpop.f32.mrb[60].mxu0  ;;  %v3556_v30 = vpop.f32.mrb[60].mxu1 }
 0x270   : > { %v3516_v29 = vadd.f32 %v3515_v28, %v5558_v37  ;;  %v3517_v31 = vpop.f32.mrb[61].mxu0  ;;  %v3557_v32 = vadd.f32 %v3556_v30, %v5558_v37  ;;  %v3558_v34 = vpop.f32.mrb[61].mxu1 }
 0x271   : > { %v3518_v33 = vadd.f32 %v3517_v31, %v5558_v37  ;;  %v3519_v35 = vpop.f32.mrb[62].mxu0  ;;  %v3559_v44 = vadd.f32 %v3558_v34, %v5558_v37  ;;  %v3560_v38 = vpop.f32.mrb[62].mxu1 }
 0x272   : > { %vm3623_vm13 = vcmp.ge.f32.partialorder %v3516_v29, 0.0  ;;  %v3687_v36 = vmul.f32 0.01, %v3516_v29  ;;  %v3520_v39 = vpop.f32.mrb[63].mxu0  ;;  %vm3625_vm14 = vcmp.ge.f32.partialorder %v3557_v32, 0.0  ;;  %v3561_v45 = vpop.f32.mrb[63].mxu1 }
 0x273   : > { %v3689_v40 = vmul.f32 0.01, %v3557_v32  ;;  %vm3624_vm15 = vcmp.ge.f32.partialorder %v3518_v33, 0.0  ;;  %v3688_v41 = vmul.f32 0.01, %v3518_v33  ;;  %vm3626_vm0 = vcmp.ge.f32.partialorder %v3559_v44, 0.0 }
 0x274   : > { %v3751_v42 = vsel %vm3623_vm13, %v3516_v29, %v3687_v36  ;;  %v3690_v43 = vmul.f32 0.01, %v3559_v44 }
 0x275   : > { %v3753_v46 = vsel %vm3625_vm14, %v3557_v32, %v3689_v40  ;;  %v3752_v47 = vsel %vm3624_vm15, %v3518_v33, %v3688_v41 }
 0x276   : > { %v4578_v48 = vpack.c.bf16 %v3752_v47, %v3751_v42  ;;  %v3754_v49 = vsel %vm3626_vm0, %v3559_v44, %v3690_v43 }
 0x277   : > { %v4579_v50 = vpack.c.bf16 %v3754_v49, %v3753_v46 }
 0x278   : > { %v4146_v51 = vrot.slane %v4578_v48, %v5595_v7 }
 0x279   : > { %v4153_v37 = vrot.slane %v4579_v50, %v5595_v7 }
 0x27b   : > { %v4154_v52 = vcombine.low %v4146_v51, %v4153_v37 }
 0x27d   : > { %4186 = vst [vmem:[%s5612_s14 + $0x78] sm:$0xff] %v4154_v52 }
 0x27e PF: > { %p10_p9 = scmp.ge.s32.totalorder %s4674_s16, 10   ;;  %s5752_s12 = smov %s4629_s13 }
 0x27f   : > { %s5753_s13 = smov %s4683_s19  ;;  %s5754_s14 = smov %s4674_s16 }
 0x280   :  { %12 = sbr.rel (!%p10_p9) target bundleno = 2 (0x2), region = 90 }

// kernel: encoder_forward.4
= control target key start
LH: loop header
LB: loop body
LE: loop exit
PB: predicated region body
PF: predicated region fallthrough
CT: control target
= control target key end

     0   :  { %s5892_s12 = smov 0   ;;  %s5894_s13 = smov 0   ;;  %s7591_s0 = inlined_call_operand.vmem [shape: bf16[8,256], index: 0, kind: input, shape index: {}]   ;;  %s7592_s1 = inlined_call_operand.vmem [shape: bf16[256,8192], index: 1, kind: input, shape index: {}]   ;;  %s7593_s2 = inlined_call_operand.vmem [shape: f32[8,1], index: 2, kind: input, shape index: {}]   ;;  %s7594_s3 = inlined_call_operand.vmem [shape: bf16[8,8192], index: 3, kind: output, shape index: {}]  }
   0x1   :  { %s5896_s14 = smov 0  }
   0x2 LB: > { %s5259_s15 = sadd.s32 4294967295, %s5869_s14   ;;  %s5909_s16 = sadd.s32 1, %s5869_s14   ;;  %s5869_s14 = sphi %s5896_s14, %s7597_s14   ;;  %s5865_s13 = sphi %s5894_s13, %s7596_s13   ;;  %s5861_s12 = sphi %s5892_s12, %s7595_s12  }
   0x3   : > { %s38_s17 = ssub.s32 %s5869_s14, %s5909_s16  ;;  %s41_s18 = sadd.s32 1, %s5865_s13 }
   0x4   : > { %p39_p0 = scmp.eq.s32.totalorder %s38_s17, 0  ;;  %p48_p1 = scmp.ne.s32.totalorder %s5865_s13, %s5861_s12 }
   0x5   : > { %p49_p2 = scmp.eq.s32.totalorder %s5869_s14, 0  ;;  %p5262_p4 = scmp.ge.s32.totalorder %s5869_s14, 2 }
   0x6   : > { %s5918_s19 = scalar_select %p39_p0, %s5865_s13, %s41_s18  }
   0x7   : > { %p50_p3 = por %p49_p2, %p48_p1  ;;  %127 = sbr.rel (%p5262_p4) target bundleno = 274 (0x112), region = 24 }
   0xe   : > { %130 = sbr.rel (!%p50_p3) target bundleno = 274 (0x112), region = 28  ;;  %s132_s20 = sand.u32 (%p50_p3), 1, %s5865_s13  }
   0xf   : > { %s5802_s21 = sshll.u32 (%p50_p3), %s5869_s14, 7  ;;  %s5263_s22 = sshll.u32 (%p50_p3), %s132_s20, 12 }
  0x10   : > { %s5926_s25 = scalar_lea.vmem (%p50_p3), %s7592_s1, %s5802_s21  ;;  %s5931_s26 = scalar_lea.vmem (%p50_p3), [#allocation2], %s5263_s22 }
  0x11   : > { %v150_v0 = vld [vmem:[%s5926_s25] sm:$0xff] (%p50_p3)  ;;  %v152_v1 = vld [vmem:[%s5926_s25 + $0x8] sm:$0xff] (%p50_p3)  ;;  %v154_v2 = vld [vmem:[%s5926_s25 + $0x10] sm:$0xff] (%p50_p3) }
  0x12   : > { %151 = vst [vmem:[%s5931_s26] sm:$0xff] (%p50_p3), %v150_v0  ;;  %153 = vst [vmem:[%s5931_s26 + $0x8] sm:$0xff] (%p50_p3), %v152_v1  ;;  %v156_v3 = vld [vmem:[%s5926_s25 + $0x18] sm:$0xff] (%p50_p3)  ;;  %v158_v4 = vld [vmem:[%s5926_s25 + $0x20] sm:$0xff] (%p50_p3) }
  0x13   : > { %155 = vst [vmem:[%s5931_s26 + $0x10] sm:$0xff] (%p50_p3), %v154_v2  ;;  %v160_v5 = vld [vmem:[%s5926_s25 + $0x28] sm:$0xff] (%p50_p3)  ;;  %157 = vst [vmem:[%s5931_s26 + $0x18] sm:$0xff] (%p50_p3), %v156_v3  ;;  %v162_v6 = vld [vmem:[%s5926_s25 + $0x30] sm:$0xff] (%p50_p3) }
  0x14   : > { %159 = vst [vmem:[%s5931_s26 + $0x20] sm:$0xff] (%p50_p3), %v158_v4  ;;  %161 = vst [vmem:[%s5931_s26 + $0x28] sm:$0xff] (%p50_p3), %v160_v5  ;;  %v164_v7 = vld [vmem:[%s5926_s25 + $0x38] sm:$0xff] (%p50_p3)  ;;  %v166_v8 = vld [vmem:[%s5926_s25 + $0x40] sm:$0xff] (%p50_p3) }
  0x15   : > { %163 = vst [vmem:[%s5931_s26 + $0x30] sm:$0xff] %v162_v6  ;;  %165 = vst [vmem:[%s5931_s26 + $0x38] sm:$0xff] %v164_v7  ;;  %v168_v9 = vld [vmem:[%s5926_s25 + $0x48] sm:$0xff]  ;;  %v170_v10 = vld [vmem:[%s5926_s25 + $0x50] sm:$0xff] }
  0x16   : > { %167 = vst [vmem:[%s5931_s26 + $0x40] sm:$0xff] %v166_v8  ;;  %v172_v11 = vld [vmem:[%s5926_s25 + $0x58] sm:$0xff]  ;;  %169 = vst [vmem:[%s5931_s26 + $0x48] sm:$0xff] %v168_v9  ;;  %v174_v12 = vld [vmem:[%s5926_s25 + $0x60] sm:$0xff] }
  0x17   : > { %171 = vst [vmem:[%s5931_s26 + $0x50] sm:$0xff] %v170_v10  ;;  %173 = vst [vmem:[%s5931_s26 + $0x58] sm:$0xff] %v172_v11  ;;  %v176_v13 = vld [vmem:[%s5926_s25 + $0x68] sm:$0xff]  ;;  %v178_v14 = vld [vmem:[%s5926_s25 + $0x70] sm:$0xff] }
  0x18   : > { %175 = vst [vmem:[%s5931_s26 + $0x60] sm:$0xff] %v174_v12  ;;  %177 = vst [vmem:[%s5931_s26 + $0x68] sm:$0xff] %v176_v13  ;;  %v180_v15 = vld [vmem:[%s5926_s25 + $0x78] sm:$0xff]  ;;  %v182_v16 = vld [vmem:[%s5926_s25 + $0x100] sm:$0xff] }
  0x19   : > { %179 = vst [vmem:[%s5931_s26 + $0x70] sm:$0xff] %v178_v14  ;;  %v184_v17 = vld [vmem:[%s5926_s25 + $0x108] sm:$0xff]  ;;  %181 = vst [vmem:[%s5931_s26 + $0x78] sm:$0xff] %v180_v15  ;;  %v186_v18 = vld [vmem:[%s5926_s25 + $0x110] sm:$0xff] }
  0x1a   : > { %183 = vst [vmem:[%s5931_s26 + $0x80] sm:$0xff] %v182_v16  ;;  %185 = vst [vmem:[%s5931_s26 + $0x88] sm:$0xff] %v184_v17  ;;  %v188_v19 = vld [vmem:[%s5926_s25 + $0x118] sm:$0xff]  ;;  %v190_v20 = vld [vmem:[%s5926_s25 + $0x120] sm:$0xff] }
  0x1b   : > { %187 = vst [vmem:[%s5931_s26 + $0x90] sm:$0xff] %v186_v18  ;;  %189 = vst [vmem:[%s5931_s26 + $0x98] sm:$0xff] %v188_v19  ;;  %v192_v21 = vld [vmem:[%s5926_s25 + $0x128] sm:$0xff]  ;;  %v194_v22 = vld [vmem:[%s5926_s25 + $0x130] sm:$0xff] }
  0x1c   : > { %191 = vst [vmem:[%s5931_s26 + $0xa0] sm:$0xff] %v190_v20  ;;  %v196_v23 = vld [vmem:[%s5926_s25 + $0x138] sm:$0xff]  ;;  %193 = vst [vmem:[%s5931_s26 + $0xa8] sm:$0xff] %v192_v21  ;;  %v198_v24 = vld [vmem:[%s5926_s25 + $0x140] sm:$0xff] }
  0x1d   : > { %195 = vst [vmem:[%s5931_s26 + $0xb0] sm:$0xff] %v194_v22  ;;  %197 = vst [vmem:[%s5931_s26 + $0xb8] sm:$0xff] %v196_v23  ;;  %v200_v25 = vld [vmem:[%s5926_s25 + $0x148] sm:$0xff]  ;;  %v202_v26 = vld [vmem:[%s5926_s25 + $0x150] sm:$0xff] }
  0x1e   : > { %199 = vst [vmem:[%s5931_s26 + $0xc0] sm:$0xff] %v198_v24  ;;  %201 = vst [vmem:[%s5931_s26 + $0xc8] sm:$0xff] %v200_v25  ;;  %v204_v27 = vld [vmem:[%s5926_s25 + $0x158] sm:$0xff]  ;;  %v206_v28 = vld [vmem:[%s5926_s25 + $0x160] sm:$0xff] }
  0x1f   : > { %203 = vst [vmem:[%s5931_s26 + $0xd0] sm:$0xff] %v202_v26  ;;  %v208_v29 = vld [vmem:[%s5926_s25 + $0x168] sm:$0xff]  ;;  %205 = vst [vmem:[%s5931_s26 + $0xd8] sm:$0xff] %v204_v27  ;;  %v210_v30 = vld [vmem:[%s5926_s25 + $0x170] sm:$0xff] }
  0x20   : > { %207 = vst [vmem:[%s5931_s26 + $0xe0] sm:$0xff] %v206_v28  ;;  %209 = vst [vmem:[%s5931_s26 + $0xe8] sm:$0xff] %v208_v29  ;;  %v212_v31 = vld [vmem:[%s5926_s25 + $0x178] sm:$0xff]  ;;  %v214_v32 = vld [vmem:[%s5926_s25 + $0x200] sm:$0xff] }
  0x21   : > { %211 = vst [vmem:[%s5931_s26 + $0xf0] sm:$0xff] %v210_v30  ;;  %213 = vst [vmem:[%s5931_s26 + $0xf8] sm:$0xff] %v212_v31  ;;  %v216_v33 = vld [vmem:[%s5926_s25 + $0x208] sm:$0xff]  ;;  %v218_v34 = vld [vmem:[%s5926_s25 + $0x210] sm:$0xff] }
  0x22   : > { %215 = vst [vmem:[%s5931_s26 + $0x100] sm:$0xff] %v214_v32  ;;  %v220_v35 = vld [vmem:[%s5926_s25 + $0x218] sm:$0xff]  ;;  %217 = vst [vmem:[%s5931_s26 + $0x108] sm:$0xff] %v216_v33  ;;  %v222_v36 = vld [vmem:[%s5926_s25 + $0x220] sm:$0xff] }
  0x23   : > { %219 = vst [vmem:[%s5931_s26 + $0x110] sm:$0xff] %v218_v34  ;;  %221 = vst [vmem:[%s5931_s26 + $0x118] sm:$0xff] %v220_v35  ;;  %v224_v37 = vld [vmem:[%s5926_s25 + $0x228] sm:$0xff]  ;;  %v226_v38 = vld [vmem:[%s5926_s25 + $0x230] sm:$0xff] }
  0x24   : > { %223 = vst [vmem:[%s5931_s26 + $0x120] sm:$0xff] %v222_v36  ;;  %225 = vst [vmem:[%s5931_s26 + $0x128] sm:$0xff] %v224_v37  ;;  %v228_v39 = vld [vmem:[%s5926_s25 + $0x238] sm:$0xff]  ;;  %v230_v40 = vld [vmem:[%s5926_s25 + $0x240] sm:$0xff] }
  0x25   : > { %227 = vst [vmem:[%s5931_s26 + $0x130] sm:$0xff] %v226_v38  ;;  %v232_v41 = vld [vmem:[%s5926_s25 + $0x248] sm:$0xff]  ;;  %229 = vst [vmem:[%s5931_s26 + $0x138] sm:$0xff] %v228_v39  ;;  %v234_v42 = vld [vmem:[%s5926_s25 + $0x250] sm:$0xff] }
  0x26   : > { %231 = vst [vmem:[%s5931_s26 + $0x140] sm:$0xff] %v230_v40  ;;  %233 = vst [vmem:[%s5931_s26 + $0x148] sm:$0xff] %v232_v41  ;;  %v236_v43 = vld [vmem:[%s5926_s25 + $0x258] sm:$0xff]  ;;  %v238_v44 = vld [vmem:[%s5926_s25 + $0x260] sm:$0xff] }
  0x27   : > { %235 = vst [vmem:[%s5931_s26 + $0x150] sm:$0xff] %v234_v42  ;;  %237 = vst [vmem:[%s5931_s26 + $0x158] sm:$0xff] %v236_v43  ;;  %v240_v45 = vld [vmem:[%s5926_s25 + $0x268] sm:$0xff]  ;;  %v242_v46 = vld [vmem:[%s5926_s25 + $0x270] sm:$0xff] }
  0x28   : > { %239 = vst [vmem:[%s5931_s26 + $0x160] sm:$0xff] %v238_v44  ;;  %v244_v47 = vld [vmem:[%s5926_s25 + $0x278] sm:$0xff]  ;;  %241 = vst [vmem:[%s5931_s26 + $0x168] sm:$0xff] %v240_v45  ;;  %v246_v48 = vld [vmem:[%s5926_s25 + $0x300] sm:$0xff] }
  0x29   : > { %243 = vst [vmem:[%s5931_s26 + $0x170] sm:$0xff] %v242_v46  ;;  %245 = vst [vmem:[%s5931_s26 + $0x178] sm:$0xff] %v244_v47  ;;  %v248_v49 = vld [vmem:[%s5926_s25 + $0x308] sm:$0xff]  ;;  %v250_v50 = vld [vmem:[%s5926_s25 + $0x310] sm:$0xff] }
  0x2a   : > { %247 = vst [vmem:[%s5931_s26 + $0x180] sm:$0xff] %v246_v48  ;;  %249 = vst [vmem:[%s5931_s26 + $0x188] sm:$0xff] %v248_v49  ;;  %v252_v51 = vld [vmem:[%s5926_s25 + $0x318] sm:$0xff]  ;;  %v254_v52 = vld [vmem:[%s5926_s25 + $0x320] sm:$0xff] }
  0x2b   : > { %251 = vst [vmem:[%s5931_s26 + $0x190] sm:$0xff] %v250_v50  ;;  %v256_v53 = vld [vmem:[%s5926_s25 + $0x328] sm:$0xff]  ;;  %253 = vst [vmem:[%s5931_s26 + $0x198] sm:$0xff] %v252_v51  ;;  %v258_v54 = vld [vmem:[%s5926_s25 + $0x330] sm:$0xff] }
  0x2c   : > { %255 = vst [vmem:[%s5931_s26 + $0x1a0] sm:$0xff] %v254_v52  ;;  %257 = vst [vmem:[%s5931_s26 + $0x1a8] sm:$0xff] %v256_v53  ;;  %v260_v55 = vld [vmem:[%s5926_s25 + $0x338] sm:$0xff]  ;;  %v262_v56 = vld [vmem:[%s5926_s25 + $0x340] sm:$0xff] }
  0x2d   : > { %259 = vst [vmem:[%s5931_s26 + $0x1b0] sm:$0xff] %v258_v54  ;;  %261 = vst [vmem:[%s5931_s26 + $0x1b8] sm:$0xff] %v260_v55  ;;  %v264_v57 = vld [vmem:[%s5926_s25 + $0x348] sm:$0xff]  ;;  %v266_v58 = vld [vmem:[%s5926_s25 + $0x350] sm:$0xff] }
  0x2e   : > { %263 = vst [vmem:[%s5931_s26 + $0x1c0] sm:$0xff] %v262_v56  ;;  %v268_v59 = vld [vmem:[%s5926_s25 + $0x358] sm:$0xff]  ;;  %265 = vst [vmem:[%s5931_s26 + $0x1c8] sm:$0xff] %v264_v57  ;;  %v270_v60 = vld [vmem:[%s5926_s25 + $0x360] sm:$0xff] }
  0x2f   : > { %267 = vst [vmem:[%s5931_s26 + $0x1d0] sm:$0xff] %v266_v58  ;;  %269 = vst [vmem:[%s5931_s26 + $0x1d8] sm:$0xff] %v268_v59  ;;  %v272_v61 = vld [vmem:[%s5926_s25 + $0x368] sm:$0xff]  ;;  %v274_v62 = vld [vmem:[%s5926_s25 + $0x370] sm:$0xff] }
  0x30   : > { %271 = vst [vmem:[%s5931_s26 + $0x1e0] sm:$0xff] %v270_v60  ;;  %273 = vst [vmem:[%s5931_s26 + $0x1e8] sm:$0xff] %v272_v61  ;;  %v276_v63 = vld [vmem:[%s5926_s25 + $0x378] sm:$0xff]  ;;  %v278_v0 = vld [vmem:[%s5926_s25 + $0x400] sm:$0xff] }
  0x31   : > { %275 = vst [vmem:[%s5931_s26 + $0x1f0] sm:$0xff] %v274_v62  ;;  %v280_v1 = vld [vmem:[%s5926_s25 + $0x408] sm:$0xff]  ;;  %277 = vst [vmem:[%s5931_s26 + $0x1f8] sm:$0xff] %v276_v63  ;;  %v282_v2 = vld [vmem:[%s5926_s25 + $0x410] sm:$0xff] }
  0x32   : > { %279 = vst [vmem:[%s5931_s26 + $0x200] sm:$0xff] %v278_v0  ;;  %281 = vst [vmem:[%s5931_s26 + $0x208] sm:$0xff] %v280_v1  ;;  %v284_v3 = vld [vmem:[%s5926_s25 + $0x418] sm:$0xff]  ;;  %v286_v4 = vld [vmem:[%s5926_s25 + $0x420] sm:$0xff] }
  0x33   : > { %283 = vst [vmem:[%s5931_s26 + $0x210] sm:$0xff] %v282_v2  ;;  %285 = vst [vmem:[%s5931_s26 + $0x218] sm:$0xff] %v284_v3  ;;  %v288_v5 = vld [vmem:[%s5926_s25 + $0x428] sm:$0xff]  ;;  %v290_v6 = vld [vmem:[%s5926_s25 + $0x430] sm:$0xff] }
  0x34   : > { %287 = vst [vmem:[%s5931_s26 + $0x220] sm:$0xff] %v286_v4  ;;  %v292_v7 = vld [vmem:[%s5926_s25 + $0x438] sm:$0xff]  ;;  %289 = vst [vmem:[%s5931_s26 + $0x228] sm:$0xff] %v288_v5  ;;  %v294_v8 = vld [vmem:[%s5926_s25 + $0x440] sm:$0xff] }
  0x35   : > { %291 = vst [vmem:[%s5931_s26 + $0x230] sm:$0xff] %v290_v6  ;;  %293 = vst [vmem:[%s5931_s26 + $0x238] sm:$0xff] %v292_v7  ;;  %v296_v9 = vld [vmem:[%s5926_s25 + $0x448] sm:$0xff]  ;;  %v298_v10 = vld [vmem:[%s5926_s25 + $0x450] sm:$0xff] }
  0x36   : > { %295 = vst [vmem:[%s5931_s26 + $0x240] sm:$0xff] %v294_v8  ;;  %297 = vst [vmem:[%s5931_s26 + $0x248] sm:$0xff] %v296_v9  ;;  %v300_v11 = vld [vmem:[%s5926_s25 + $0x458] sm:$0xff]  ;;  %v302_v12 = vld [vmem:[%s5926_s25 + $0x460] sm:$0xff] }
  0x37   : > { %299 = vst [vmem:[%s5931_s26 + $0x250] sm:$0xff] %v298_v10  ;;  %v304_v13 = vld [vmem:[%s5926_s25 + $0x468] sm:$0xff]  ;;  %301 = vst [vmem:[%s5931_s26 + $0x258] sm:$0xff] %v300_v11  ;;  %v306_v14 = vld [vmem:[%s5926_s25 + $0x470] sm:$0xff] }
  0x38   : > { %303 = vst [vmem:[%s5931_s26 + $0x260] sm:$0xff] %v302_v12  ;;  %305 = vst [vmem:[%s5931_s26 + $0x268] sm:$0xff] %v304_v13  ;;  %v308_v15 = vld [vmem:[%s5926_s25 + $0x478] sm:$0xff]  ;;  %v310_v16 = vld [vmem:[%s5926_s25 + $0x500] sm:$0xff] }
  0x39   : > { %307 = vst [vmem:[%s5931_s26 + $0x270] sm:$0xff] %v306_v14  ;;  %309 = vst [vmem:[%s5931_s26 + $0x278] sm:$0xff] %v308_v15  ;;  %v312_v17 = vld [vmem:[%s5926_s25 + $0x508] sm:$0xff]  ;;  %v314_v18 = vld [vmem:[%s5926_s25 + $0x510] sm:$0xff] }
  0x3a   : > { %311 = vst [vmem:[%s5931_s26 + $0x280] sm:$0xff] %v310_v16  ;;  %v316_v19 = vld [vmem:[%s5926_s25 + $0x518] sm:$0xff]  ;;  %313 = vst [vmem:[%s5931_s26 + $0x288] sm:$0xff] %v312_v17  ;;  %v318_v20 = vld [vmem:[%s5926_s25 + $0x520] sm:$0xff] }
  0x3b   : > { %315 = vst [vmem:[%s5931_s26 + $0x290] sm:$0xff] %v314_v18  ;;  %317 = vst [vmem:[%s5931_s26 + $0x298] sm:$0xff] %v316_v19  ;;  %v320_v21 = vld [vmem:[%s5926_s25 + $0x528] sm:$0xff]  ;;  %v322_v22 = vld [vmem:[%s5926_s25 + $0x530] sm:$0xff] }
  0x3c   : > { %319 = vst [vmem:[%s5931_s26 + $0x2a0] sm:$0xff] %v318_v20  ;;  %321 = vst [vmem:[%s5931_s26 + $0x2a8] sm:$0xff] %v320_v21  ;;  %v324_v23 = vld [vmem:[%s5926_s25 + $0x538] sm:$0xff]  ;;  %v326_v24 = vld [vmem:[%s5926_s25 + $0x540] sm:$0xff] }
  0x3d   : > { %323 = vst [vmem:[%s5931_s26 + $0x2b0] sm:$0xff] %v322_v22  ;;  %v328_v25 = vld [vmem:[%s5926_s25 + $0x548] sm:$0xff]  ;;  %325 = vst [vmem:[%s5931_s26 + $0x2b8] sm:$0xff] %v324_v23  ;;  %v330_v26 = vld [vmem:[%s5926_s25 + $0x550] sm:$0xff] }
  0x3e   : > { %327 = vst [vmem:[%s5931_s26 + $0x2c0] sm:$0xff] %v326_v24  ;;  %329 = vst [vmem:[%s5931_s26 + $0x2c8] sm:$0xff] %v328_v25  ;;  %v332_v27 = vld [vmem:[%s5926_s25 + $0x558] sm:$0xff]  ;;  %v334_v28 = vld [vmem:[%s5926_s25 + $0x560] sm:$0xff] }
  0x3f   : > { %331 = vst [vmem:[%s5931_s26 + $0x2d0] sm:$0xff] %v330_v26  ;;  %333 = vst [vmem:[%s5931_s26 + $0x2d8] sm:$0xff] %v332_v27  ;;  %v336_v29 = vld [vmem:[%s5926_s25 + $0x568] sm:$0xff]  ;;  %v338_v30 = vld [vmem:[%s5926_s25 + $0x570] sm:$0xff] }
  0x40   : > { %335 = vst [vmem:[%s5931_s26 + $0x2e0] sm:$0xff] %v334_v28  ;;  %v340_v31 = vld [vmem:[%s5926_s25 + $0x578] sm:$0xff]  ;;  %337 = vst [vmem:[%s5931_s26 + $0x2e8] sm:$0xff] %v336_v29  ;;  %v342_v32 = vld [vmem:[%s5926_s25 + $0x600] sm:$0xff] }
  0x41   : > { %339 = vst [vmem:[%s5931_s26 + $0x2f0] sm:$0xff] %v338_v30  ;;  %341 = vst [vmem:[%s5931_s26 + $0x2f8] sm:$0xff] %v340_v31  ;;  %v344_v33 = vld [vmem:[%s5926_s25 + $0x608] sm:$0xff]  ;;  %v346_v34 = vld [vmem:[%s5926_s25 + $0x610] sm:$0xff] }
  0x42   : > { %343 = vst [vmem:[%s5931_s26 + $0x300] sm:$0xff] %v342_v32  ;;  %345 = vst [vmem:[%s5931_s26 + $0x308] sm:$0xff] %v344_v33  ;;  %v348_v35 = vld [vmem:[%s5926_s25 + $0x618] sm:$0xff]  ;;  %v350_v36 = vld [vmem:[%s5926_s25 + $0x620] sm:$0xff] }
  0x43   : > { %347 = vst [vmem:[%s5931_s26 + $0x310] sm:$0xff] %v346_v34  ;;  %v352_v37 = vld [vmem:[%s5926_s25 + $0x628] sm:$0xff]  ;;  %349 = vst [vmem:[%s5931_s26 + $0x318] sm:$0xff] %v348_v35  ;;  %v354_v38 = vld [vmem:[%s5926_s25 + $0x630] sm:$0xff] }
  0x44   : > { %351 = vst [vmem:[%s5931_s26 + $0x320] sm:$0xff] %v350_v36  ;;  %353 = vst [vmem:[%s5931_s26 + $0x328] sm:$0xff] %v352_v37  ;;  %v356_v39 = vld [vmem:[%s5926_s25 + $0x638] sm:$0xff]  ;;  %v358_v40 = vld [vmem:[%s5926_s25 + $0x640] sm:$0xff] }
  0x45   : > { %355 = vst [vmem:[%s5931_s26 + $0x330] sm:$0xff] %v354_v38  ;;  %357 = vst [vmem:[%s5931_s26 + $0x338] sm:$0xff] %v356_v39  ;;  %v360_v41 = vld [vmem:[%s5926_s25 + $0x648] sm:$0xff]  ;;  %v362_v42 = vld [vmem:[%s5926_s25 + $0x650] sm:$0xff] }
  0x46   : > { %359 = vst [vmem:[%s5931_s26 + $0x340] sm:$0xff] %v358_v40  ;;  %v364_v43 = vld [vmem:[%s5926_s25 + $0x658] sm:$0xff]  ;;  %361 = vst [vmem:[%s5931_s26 + $0x348] sm:$0xff] %v360_v41  ;;  %v366_v44 = vld [vmem:[%s5926_s25 + $0x660] sm:$0xff] }
  0x47   : > { %363 = vst [vmem:[%s5931_s26 + $0x350] sm:$0xff] %v362_v42  ;;  %365 = vst [vmem:[%s5931_s26 + $0x358] sm:$0xff] %v364_v43  ;;  %v368_v45 = vld [vmem:[%s5926_s25 + $0x668] sm:$0xff]  ;;  %v370_v46 = vld [vmem:[%s5926_s25 + $0x670] sm:$0xff] }
  0x48   : > { %367 = vst [vmem:[%s5931_s26 + $0x360] sm:$0xff] %v366_v44  ;;  %369 = vst [vmem:[%s5931_s26 + $0x368] sm:$0xff] %v368_v45  ;;  %v372_v47 = vld [vmem:[%s5926_s25 + $0x678] sm:$0xff]  ;;  %v374_v48 = vld [vmem:[%s5926_s25 + $0x700] sm:$0xff] }
  0x49   : > { %371 = vst [vmem:[%s5931_s26 + $0x370] sm:$0xff] %v370_v46  ;;  %v376_v49 = vld [vmem:[%s5926_s25 + $0x708] sm:$0xff]  ;;  %373 = vst [vmem:[%s5931_s26 + $0x378] sm:$0xff] %v372_v47  ;;  %v378_v50 = vld [vmem:[%s5926_s25 + $0x710] sm:$0xff] }
  0x4a   : > { %375 = vst [vmem:[%s5931_s26 + $0x380] sm:$0xff] %v374_v48  ;;  %377 = vst [vmem:[%s5931_s26 + $0x388] sm:$0xff] %v376_v49  ;;  %v380_v51 = vld [vmem:[%s5926_s25 + $0x718] sm:$0xff]  ;;  %v382_v52 = vld [vmem:[%s5926_s25 + $0x720] sm:$0xff] }
  0x4b   : > { %379 = vst [vmem:[%s5931_s26 + $0x390] sm:$0xff] %v378_v50  ;;  %381 = vst [vmem:[%s5931_s26 + $0x398] sm:$0xff] %v380_v51  ;;  %v384_v53 = vld [vmem:[%s5926_s25 + $0x728] sm:$0xff]  ;;  %v386_v54 = vld [vmem:[%s5926_s25 + $0x730] sm:$0xff] }
  0x4c   : > { %383 = vst [vmem:[%s5931_s26 + $0x3a0] sm:$0xff] %v382_v52  ;;  %v388_v55 = vld [vmem:[%s5926_s25 + $0x738] sm:$0xff]  ;;  %385 = vst [vmem:[%s5931_s26 + $0x3a8] sm:$0xff] %v384_v53  ;;  %v390_v56 = vld [vmem:[%s5926_s25 + $0x740] sm:$0xff] }
  0x4d   : > { %387 = vst [vmem:[%s5931_s26 + $0x3b0] sm:$0xff] %v386_v54  ;;  %389 = vst [vmem:[%s5931_s26 + $0x3b8] sm:$0xff] %v388_v55  ;;  %v392_v57 = vld [vmem:[%s5926_s25 + $0x748] sm:$0xff]  ;;  %v394_v58 = vld [vmem:[%s5926_s25 + $0x750] sm:$0xff] }
  0x4e   : > { %391 = vst [vmem:[%s5931_s26 + $0x3c0] sm:$0xff] %v390_v56  ;;  %393 = vst [vmem:[%s5931_s26 + $0x3c8] sm:$0xff] %v392_v57  ;;  %v396_v59 = vld [vmem:[%s5926_s25 + $0x758] sm:$0xff]  ;;  %v398_v60 = vld [vmem:[%s5926_s25 + $0x760] sm:$0xff] }
  0x4f   : > { %395 = vst [vmem:[%s5931_s26 + $0x3d0] sm:$0xff] %v394_v58  ;;  %v400_v61 = vld [vmem:[%s5926_s25 + $0x768] sm:$0xff]  ;;  %397 = vst [vmem:[%s5931_s26 + $0x3d8] sm:$0xff] %v396_v59  ;;  %v402_v62 = vld [vmem:[%s5926_s25 + $0x770] sm:$0xff] }
  0x50   : > { %399 = vst [vmem:[%s5931_s26 + $0x3e0] sm:$0xff] %v398_v60  ;;  %401 = vst [vmem:[%s5931_s26 + $0x3e8] sm:$0xff] %v400_v61  ;;  %v404_v63 = vld [vmem:[%s5926_s25 + $0x778] sm:$0xff]  ;;  %v406_v0 = vld [vmem:[%s5926_s25 + $0x800] sm:$0xff] }
  0x51   : > { %403 = vst [vmem:[%s5931_s26 + $0x3f0] sm:$0xff] %v402_v62  ;;  %405 = vst [vmem:[%s5931_s26 + $0x3f8] sm:$0xff] %v404_v63  ;;  %v408_v1 = vld [vmem:[%s5926_s25 + $0x808] sm:$0xff]  ;;  %v410_v2 = vld [vmem:[%s5926_s25 + $0x810] sm:$0xff] }
  0x52   : > { %407 = vst [vmem:[%s5931_s26 + $0x400] sm:$0xff] %v406_v0  ;;  %v412_v3 = vld [vmem:[%s5926_s25 + $0x818] sm:$0xff]  ;;  %409 = vst [vmem:[%s5931_s26 + $0x408] sm:$0xff] %v408_v1  ;;  %v414_v4 = vld [vmem:[%s5926_s25 + $0x820] sm:$0xff] }
  0x53   : > { %411 = vst [vmem:[%s5931_s26 + $0x410] sm:$0xff] %v410_v2  ;;  %413 = vst [vmem:[%s5931_s26 + $0x418] sm:$0xff] %v412_v3  ;;  %v416_v5 = vld [vmem:[%s5926_s25 + $0x828] sm:$0xff]  ;;  %v418_v6 = vld [vmem:[%s5926_s25 + $0x830] sm:$0xff] }
  0x54   : > { %415 = vst [vmem:[%s5931_s26 + $0x420] sm:$0xff] %v414_v4  ;;  %417 = vst [vmem:[%s5931_s26 + $0x428] sm:$0xff] %v416_v5  ;;  %v420_v7 = vld [vmem:[%s5926_s25 + $0x838] sm:$0xff]  ;;  %v422_v8 = vld [vmem:[%s5926_s25 + $0x840] sm:$0xff] }
  0x55   : > { %419 = vst [vmem:[%s5931_s26 + $0x430] sm:$0xff] %v418_v6  ;;  %v424_v9 = vld [vmem:[%s5926_s25 + $0x848] sm:$0xff]  ;;  %421 = vst [vmem:[%s5931_s26 + $0x438] sm:$0xff] %v420_v7  ;;  %v426_v10 = vld [vmem:[%s5926_s25 + $0x850] sm:$0xff] }
  0x56   : > { %423 = vst [vmem:[%s5931_s26 + $0x440] sm:$0xff] %v422_v8  ;;  %425 = vst [vmem:[%s5931_s26 + $0x448] sm:$0xff] %v424_v9  ;;  %v428_v11 = vld [vmem:[%s5926_s25 + $0x858] sm:$0xff]  ;;  %v430_v12 = vld [vmem:[%s5926_s25 + $0x860] sm:$0xff] }
  0x57   : > { %427 = vst [vmem:[%s5931_s26 + $0x450] sm:$0xff] %v426_v10  ;;  %429 = vst [vmem:[%s5931_s26 + $0x458] sm:$0xff] %v428_v11  ;;  %v432_v13 = vld [vmem:[%s5926_s25 + $0x868] sm:$0xff]  ;;  %v434_v14 = vld [vmem:[%s5926_s25 + $0x870] sm:$0xff] }
  0x58   : > { %431 = vst [vmem:[%s5931_s26 + $0x460] sm:$0xff] %v430_v12  ;;  %v436_v15 = vld [vmem:[%s5926_s25 + $0x878] sm:$0xff]  ;;  %433 = vst [vmem:[%s5931_s26 + $0x468] sm:$0xff] %v432_v13  ;;  %v438_v16 = vld [vmem:[%s5926_s25 + $0x900] sm:$0xff] }
  0x59   : > { %435 = vst [vmem:[%s5931_s26 + $0x470] sm:$0xff] %v434_v14  ;;  %437 = vst [vmem:[%s5931_s26 + $0x478] sm:$0xff] %v436_v15  ;;  %v440_v17 = vld [vmem:[%s5926_s25 + $0x908] sm:$0xff]  ;;  %v442_v18 = vld [vmem:[%s5926_s25 + $0x910] sm:$0xff] }
  0x5a   : > { %439 = vst [vmem:[%s5931_s26 + $0x480] sm:$0xff] %v438_v16  ;;  %441 = vst [vmem:[%s5931_s26 + $0x488] sm:$0xff] %v440_v17  ;;  %v444_v19 = vld [vmem:[%s5926_s25 + $0x918] sm:$0xff]  ;;  %v446_v20 = vld [vmem:[%s5926_s25 + $0x920] sm:$0xff] }
  0x5b   : > { %443 = vst [vmem:[%s5931_s26 + $0x490] sm:$0xff] %v442_v18  ;;  %v448_v21 = vld [vmem:[%s5926_s25 + $0x928] sm:$0xff]  ;;  %445 = vst [vmem:[%s5931_s26 + $0x498] sm:$0xff] %v444_v19  ;;  %v450_v22 = vld [vmem:[%s5926_s25 + $0x930] sm:$0xff] }
  0x5c   : > { %447 = vst [vmem:[%s5931_s26 + $0x4a0] sm:$0xff] %v446_v20  ;;  %449 = vst [vmem:[%s5931_s26 + $0x4a8] sm:$0xff] %v448_v21  ;;  %v452_v23 = vld [vmem:[%s5926_s25 + $0x938] sm:$0xff]  ;;  %v454_v24 = vld [vmem:[%s5926_s25 + $0x940] sm:$0xff] }
  0x5d   : > { %451 = vst [vmem:[%s5931_s26 + $0x4b0] sm:$0xff] %v450_v22  ;;  %453 = vst [vmem:[%s5931_s26 + $0x4b8] sm:$0xff] %v452_v23  ;;  %v456_v25 = vld [vmem:[%s5926_s25 + $0x948] sm:$0xff]  ;;  %v458_v26 = vld [vmem:[%s5926_s25 + $0x950] sm:$0xff] }
  0x5e   : > { %455 = vst [vmem:[%s5931_s26 + $0x4c0] sm:$0xff] %v454_v24  ;;  %v460_v27 = vld [vmem:[%s5926_s25 + $0x958] sm:$0xff]  ;;  %457 = vst [vmem:[%s5931_s26 + $0x4c8] sm:$0xff] %v456_v25  ;;  %v462_v28 = vld [vmem:[%s5926_s25 + $0x960] sm:$0xff] }
  0x5f   : > { %459 = vst [vmem:[%s5931_s26 + $0x4d0] sm:$0xff] %v458_v26  ;;  %461 = vst [vmem:[%s5931_s26 + $0x4d8] sm:$0xff] %v460_v27  ;;  %v464_v29 = vld [vmem:[%s5926_s25 + $0x968] sm:$0xff]  ;;  %v466_v30 = vld [vmem:[%s5926_s25 + $0x970] sm:$0xff] }
  0x60   : > { %463 = vst [vmem:[%s5931_s26 + $0x4e0] sm:$0xff] %v462_v28  ;;  %465 = vst [vmem:[%s5931_s26 + $0x4e8] sm:$0xff] %v464_v29  ;;  %v468_v31 = vld [vmem:[%s5926_s25 + $0x978] sm:$0xff]  ;;  %v470_v32 = vld [vmem:[%s5926_s25 + $0xa00] sm:$0xff] }
  0x61   : > { %467 = vst [vmem:[%s5931_s26 + $0x4f0] sm:$0xff] %v466_v30  ;;  %v472_v33 = vld [vmem:[%s5926_s25 + $0xa08] sm:$0xff]  ;;  %469 = vst [vmem:[%s5931_s26 + $0x4f8] sm:$0xff] %v468_v31  ;;  %v474_v34 = vld [vmem:[%s5926_s25 + $0xa10] sm:$0xff] }
  0x62   : > { %471 = vst [vmem:[%s5931_s26 + $0x500] sm:$0xff] %v470_v32  ;;  %473 = vst [vmem:[%s5931_s26 + $0x508] sm:$0xff] %v472_v33  ;;  %v476_v35 = vld [vmem:[%s5926_s25 + $0xa18] sm:$0xff]  ;;  %v478_v36 = vld [vmem:[%s5926_s25 + $0xa20] sm:$0xff] }
  0x63   : > { %475 = vst [vmem:[%s5931_s26 + $0x510] sm:$0xff] %v474_v34  ;;  %477 = vst [vmem:[%s5931_s26 + $0x518] sm:$0xff] %v476_v35  ;;  %v480_v37 = vld [vmem:[%s5926_s25 + $0xa28] sm:$0xff]  ;;  %v482_v38 = vld [vmem:[%s5926_s25 + $0xa30] sm:$0xff] }
  0x64   : > { %479 = vst [vmem:[%s5931_s26 + $0x520] sm:$0xff] %v478_v36  ;;  %v484_v39 = vld [vmem:[%s5926_s25 + $0xa38] sm:$0xff]  ;;  %481 = vst [vmem:[%s5931_s26 + $0x528] sm:$0xff] %v480_v37  ;;  %v486_v40 = vld [vmem:[%s5926_s25 + $0xa40] sm:$0xff] }
  0x65   : > { %483 = vst [vmem:[%s5931_s26 + $0x530] sm:$0xff] %v482_v38  ;;  %485 = vst [vmem:[%s5931_s26 + $0x538] sm:$0xff] %v484_v39  ;;  %v488_v41 = vld [vmem:[%s5926_s25 + $0xa48] sm:$0xff]  ;;  %v490_v42 = vld [vmem:[%s5926_s25 + $0xa50] sm:$0xff] }
  0x66   : > { %487 = vst [vmem:[%s5931_s26 + $0x540] sm:$0xff] %v486_v40  ;;  %489 = vst [vmem:[%s5931_s26 + $0x548] sm:$0xff] %v488_v41  ;;  %v492_v43 = vld [vmem:[%s5926_s25 + $0xa58] sm:$0xff]  ;;  %v494_v44 = vld [vmem:[%s5926_s25 + $0xa60] sm:$0xff] }
  0x67   : > { %491 = vst [vmem:[%s5931_s26 + $0x550] sm:$0xff] %v490_v42  ;;  %v496_v45 = vld [vmem:[%s5926_s25 + $0xa68] sm:$0xff]  ;;  %493 = vst [vmem:[%s5931_s26 + $0x558] sm:$0xff] %v492_v43  ;;  %v498_v46 = vld [vmem:[%s5926_s25 + $0xa70] sm:$0xff] }
  0x68   : > { %495 = vst [vmem:[%s5931_s26 + $0x560] sm:$0xff] %v494_v44  ;;  %497 = vst [vmem:[%s5931_s26 + $0x568] sm:$0xff] %v496_v45  ;;  %v500_v47 = vld [vmem:[%s5926_s25 + $0xa78] sm:$0xff]  ;;  %v502_v48 = vld [vmem:[%s5926_s25 + $0xb00] sm:$0xff] }
  0x69   : > { %499 = vst [vmem:[%s5931_s26 + $0x570] sm:$0xff] %v498_v46  ;;  %501 = vst [vmem:[%s5931_s26 + $0x578] sm:$0xff] %v500_v47  ;;  %v504_v49 = vld [vmem:[%s5926_s25 + $0xb08] sm:$0xff]  ;;  %v506_v50 = vld [vmem:[%s5926_s25 + $0xb10] sm:$0xff] }
  0x6a   : > { %503 = vst [vmem:[%s5931_s26 + $0x580] sm:$0xff] %v502_v48  ;;  %v508_v51 = vld [vmem:[%s5926_s25 + $0xb18] sm:$0xff]  ;;  %505 = vst [vmem:[%s5931_s26 + $0x588] sm:$0xff] %v504_v49  ;;  %v510_v52 = vld [vmem:[%s5926_s25 + $0xb20] sm:$0xff] }
  0x6b   : > { %507 = vst [vmem:[%s5931_s26 + $0x590] sm:$0xff] %v506_v50  ;;  %509 = vst [vmem:[%s5931_s26 + $0x598] sm:$0xff] %v508_v51  ;;  %v512_v53 = vld [vmem:[%s5926_s25 + $0xb28] sm:$0xff]  ;;  %v514_v54 = vld [vmem:[%s5926_s25 + $0xb30] sm:$0xff] }
  0x6c   : > { %511 = vst [vmem:[%s5931_s26 + $0x5a0] sm:$0xff] %v510_v52  ;;  %513 = vst [vmem:[%s5931_s26 + $0x5a8] sm:$0xff] %v512_v53  ;;  %v516_v55 = vld [vmem:[%s5926_s25 + $0xb38] sm:$0xff]  ;;  %v518_v56 = vld [vmem:[%s5926_s25 + $0xb40] sm:$0xff] }
  0x6d   : > { %515 = vst [vmem:[%s5931_s26 + $0x5b0] sm:$0xff] %v514_v54  ;;  %v520_v57 = vld [vmem:[%s5926_s25 + $0xb48] sm:$0xff]  ;;  %517 = vst [vmem:[%s5931_s26 + $0x5b8] sm:$0xff] %v516_v55  ;;  %v522_v58 = vld [vmem:[%s5926_s25 + $0xb50] sm:$0xff] }
  0x6e   : > { %519 = vst [vmem:[%s5931_s26 + $0x5c0] sm:$0xff] %v518_v56  ;;  %521 = vst [vmem:[%s5931_s26 + $0x5c8] sm:$0xff] %v520_v57  ;;  %v524_v59 = vld [vmem:[%s5926_s25 + $0xb58] sm:$0xff]  ;;  %v526_v60 = vld [vmem:[%s5926_s25 + $0xb60] sm:$0xff] }
  0x6f   : > { %523 = vst [vmem:[%s5931_s26 + $0x5d0] sm:$0xff] %v522_v58  ;;  %525 = vst [vmem:[%s5931_s26 + $0x5d8] sm:$0xff] %v524_v59  ;;  %v528_v61 = vld [vmem:[%s5926_s25 + $0xb68] sm:$0xff]  ;;  %v530_v62 = vld [vmem:[%s5926_s25 + $0xb70] sm:$0xff] }
  0x70   : > { %527 = vst [vmem:[%s5931_s26 + $0x5e0] sm:$0xff] %v526_v60  ;;  %v532_v63 = vld [vmem:[%s5926_s25 + $0xb78] sm:$0xff]  ;;  %529 = vst [vmem:[%s5931_s26 + $0x5e8] sm:$0xff] %v528_v61  ;;  %v534_v0 = vld [vmem:[%s5926_s25 + $0xc00] sm:$0xff] }
  0x71   : > { %531 = vst [vmem:[%s5931_s26 + $0x5f0] sm:$0xff] %v530_v62  ;;  %533 = vst [vmem:[%s5931_s26 + $0x5f8] sm:$0xff] %v532_v63  ;;  %v536_v1 = vld [vmem:[%s5926_s25 + $0xc08] sm:$0xff]  ;;  %v538_v2 = vld [vmem:[%s5926_s25 + $0xc10] sm:$0xff] }
  0x72   : > { %535 = vst [vmem:[%s5931_s26 + $0x600] sm:$0xff] %v534_v0  ;;  %537 = vst [vmem:[%s5931_s26 + $0x608] sm:$0xff] %v536_v1  ;;  %v540_v3 = vld [vmem:[%s5926_s25 + $0xc18] sm:$0xff]  ;;  %v542_v4 = vld [vmem:[%s5926_s25 + $0xc20] sm:$0xff] }
  0x73   : > { %539 = vst [vmem:[%s5931_s26 + $0x610] sm:$0xff] %v538_v2  ;;  %v544_v5 = vld [vmem:[%s5926_s25 + $0xc28] sm:$0xff]  ;;  %541 = vst [vmem:[%s5931_s26 + $0x618] sm:$0xff] %v540_v3  ;;  %v546_v6 = vld [vmem:[%s5926_s25 + $0xc30] sm:$0xff] }
  0x74   : > { %543 = vst [vmem:[%s5931_s26 + $0x620] sm:$0xff] %v542_v4  ;;  %545 = vst [vmem:[%s5931_s26 + $0x628] sm:$0xff] %v544_v5  ;;  %v548_v7 = vld [vmem:[%s5926_s25 + $0xc38] sm:$0xff]  ;;  %v550_v8 = vld [vmem:[%s5926_s25 + $0xc40] sm:$0xff] }
  0x75   : > { %547 = vst [vmem:[%s5931_s26 + $0x630] sm:$0xff] %v546_v6  ;;  %549 = vst [vmem:[%s5931_s26 + $0x638] sm:$0xff] %v548_v7  ;;  %v552_v9 = vld [vmem:[%s5926_s25 + $0xc48] sm:$0xff]  ;;  %v554_v10 = vld [vmem:[%s5926_s25 + $0xc50] sm:$0xff] }
  0x76   : > { %551 = vst [vmem:[%s5931_s26 + $0x640] sm:$0xff] %v550_v8  ;;  %v556_v11 = vld [vmem:[%s5926_s25 + $0xc58] sm:$0xff]  ;;  %553 = vst [vmem:[%s5931_s26 + $0x648] sm:$0xff] %v552_v9  ;;  %v558_v12 = vld [vmem:[%s5926_s25 + $0xc60] sm:$0xff] }
  0x77   : > { %555 = vst [vmem:[%s5931_s26 + $0x650] sm:$0xff] %v554_v10  ;;  %557 = vst [vmem:[%s5931_s26 + $0x658] sm:$0xff] %v556_v11  ;;  %v560_v13 = vld [vmem:[%s5926_s25 + $0xc68] sm:$0xff]  ;;  %v562_v14 = vld [vmem:[%s5926_s25 + $0xc70] sm:$0xff] }
  0x78   : > { %559 = vst [vmem:[%s5931_s26 + $0x660] sm:$0xff] %v558_v12  ;;  %561 = vst [vmem:[%s5931_s26 + $0x668] sm:$0xff] %v560_v13  ;;  %v564_v15 = vld [vmem:[%s5926_s25 + $0xc78] sm:$0xff]  ;;  %v566_v16 = vld [vmem:[%s5926_s25 + $0xd00] sm:$0xff] }
  0x79   : > { %563 = vst [vmem:[%s5931_s26 + $0x670] sm:$0xff] %v562_v14  ;;  %v568_v17 = vld [vmem:[%s5926_s25 + $0xd08] sm:$0xff]  ;;  %565 = vst [vmem:[%s5931_s26 + $0x678] sm:$0xff] %v564_v15  ;;  %v570_v18 = vld [vmem:[%s5926_s25 + $0xd10] sm:$0xff] }
  0x7a   : > { %567 = vst [vmem:[%s5931_s26 + $0x680] sm:$0xff] %v566_v16  ;;  %569 = vst [vmem:[%s5931_s26 + $0x688] sm:$0xff] %v568_v17  ;;  %v572_v19 = vld [vmem:[%s5926_s25 + $0xd18] sm:$0xff]  ;;  %v574_v20 = vld [vmem:[%s5926_s25 + $0xd20] sm:$0xff] }
  0x7b   : > { %571 = vst [vmem:[%s5931_s26 + $0x690] sm:$0xff] %v570_v18  ;;  %573 = vst [vmem:[%s5931_s26 + $0x698] sm:$0xff] %v572_v19  ;;  %v576_v21 = vld [vmem:[%s5926_s25 + $0xd28] sm:$0xff]  ;;  %v578_v22 = vld [vmem:[%s5926_s25 + $0xd30] sm:$0xff] }
  0x7c   : > { %575 = vst [vmem:[%s5931_s26 + $0x6a0] sm:$0xff] %v574_v20  ;;  %v580_v23 = vld [vmem:[%s5926_s25 + $0xd38] sm:$0xff]  ;;  %577 = vst [vmem:[%s5931_s26 + $0x6a8] sm:$0xff] %v576_v21  ;;  %v582_v24 = vld [vmem:[%s5926_s25 + $0xd40] sm:$0xff] }
  0x7d   : > { %579 = vst [vmem:[%s5931_s26 + $0x6b0] sm:$0xff] %v578_v22  ;;  %581 = vst [vmem:[%s5931_s26 + $0x6b8] sm:$0xff] %v580_v23  ;;  %v584_v25 = vld [vmem:[%s5926_s25 + $0xd48] sm:$0xff]  ;;  %v586_v26 = vld [vmem:[%s5926_s25 + $0xd50] sm:$0xff] }
  0x7e   : > { %583 = vst [vmem:[%s5931_s26 + $0x6c0] sm:$0xff] %v582_v24  ;;  %585 = vst [vmem:[%s5931_s26 + $0x6c8] sm:$0xff] %v584_v25  ;;  %v588_v27 = vld [vmem:[%s5926_s25 + $0xd58] sm:$0xff]  ;;  %v590_v28 = vld [vmem:[%s5926_s25 + $0xd60] sm:$0xff] }
  0x7f   : > { %587 = vst [vmem:[%s5931_s26 + $0x6d0] sm:$0xff] %v586_v26  ;;  %v592_v29 = vld [vmem:[%s5926_s25 + $0xd68] sm:$0xff]  ;;  %589 = vst [vmem:[%s5931_s26 + $0x6d8] sm:$0xff] %v588_v27  ;;  %v594_v30 = vld [vmem:[%s5926_s25 + $0xd70] sm:$0xff] }
  0x80   : > { %591 = vst [vmem:[%s5931_s26 + $0x6e0] sm:$0xff] %v590_v28  ;;  %593 = vst [vmem:[%s5931_s26 + $0x6e8] sm:$0xff] %v592_v29  ;;  %v596_v31 = vld [vmem:[%s5926_s25 + $0xd78] sm:$0xff]  ;;  %v598_v32 = vld [vmem:[%s5926_s25 + $0xe00] sm:$0xff] }
  0x81   : > { %595 = vst [vmem:[%s5931_s26 + $0x6f0] sm:$0xff] %v594_v30  ;;  %597 = vst [vmem:[%s5931_s26 + $0x6f8] sm:$0xff] %v596_v31  ;;  %v600_v33 = vld [vmem:[%s5926_s25 + $0xe08] sm:$0xff]  ;;  %v602_v34 = vld [vmem:[%s5926_s25 + $0xe10] sm:$0xff] }
  0x82   : > { %599 = vst [vmem:[%s5931_s26 + $0x700] sm:$0xff] %v598_v32  ;;  %v604_v35 = vld [vmem:[%s5926_s25 + $0xe18] sm:$0xff]  ;;  %601 = vst [vmem:[%s5931_s26 + $0x708] sm:$0xff] %v600_v33  ;;  %v606_v36 = vld [vmem:[%s5926_s25 + $0xe20] sm:$0xff] }
  0x83   : > { %603 = vst [vmem:[%s5931_s26 + $0x710] sm:$0xff] %v602_v34  ;;  %605 = vst [vmem:[%s5931_s26 + $0x718] sm:$0xff] %v604_v35  ;;  %v608_v37 = vld [vmem:[%s5926_s25 + $0xe28] sm:$0xff]  ;;  %v610_v38 = vld [vmem:[%s5926_s25 + $0xe30] sm:$0xff] }
  0x84   : > { %607 = vst [vmem:[%s5931_s26 + $0x720] sm:$0xff] %v606_v36  ;;  %609 = vst [vmem:[%s5931_s26 + $0x728] sm:$0xff] %v608_v37  ;;  %v612_v39 = vld [vmem:[%s5926_s25 + $0xe38] sm:$0xff]  ;;  %v614_v40 = vld [vmem:[%s5926_s25 + $0xe40] sm:$0xff] }
  0x85   : > { %611 = vst [vmem:[%s5931_s26 + $0x730] sm:$0xff] %v610_v38  ;;  %v616_v41 = vld [vmem:[%s5926_s25 + $0xe48] sm:$0xff]  ;;  %613 = vst [vmem:[%s5931_s26 + $0x738] sm:$0xff] %v612_v39  ;;  %v618_v42 = vld [vmem:[%s5926_s25 + $0xe50] sm:$0xff] }
  0x86   : > { %615 = vst [vmem:[%s5931_s26 + $0x740] sm:$0xff] %v614_v40  ;;  %617 = vst [vmem:[%s5931_s26 + $0x748] sm:$0xff] %v616_v41  ;;  %v620_v43 = vld [vmem:[%s5926_s25 + $0xe58] sm:$0xff]  ;;  %v622_v44 = vld [vmem:[%s5926_s25 + $0xe60] sm:$0xff] }
  0x87   : > { %619 = vst [vmem:[%s5931_s26 + $0x750] sm:$0xff] %v618_v42  ;;  %621 = vst [vmem:[%s5931_s26 + $0x758] sm:$0xff] %v620_v43  ;;  %v624_v45 = vld [vmem:[%s5926_s25 + $0xe68] sm:$0xff]  ;;  %v626_v46 = vld [vmem:[%s5926_s25 + $0xe70] sm:$0xff] }
  0x88   : > { %623 = vst [vmem:[%s5931_s26 + $0x760] sm:$0xff] %v622_v44  ;;  %v628_v47 = vld [vmem:[%s5926_s25 + $0xe78] sm:$0xff]  ;;  %625 = vst [vmem:[%s5931_s26 + $0x768] sm:$0xff] %v624_v45  ;;  %v630_v48 = vld [vmem:[%s5926_s25 + $0xf00] sm:$0xff] }
  0x89   : > { %627 = vst [vmem:[%s5931_s26 + $0x770] sm:$0xff] %v626_v46  ;;  %629 = vst [vmem:[%s5931_s26 + $0x778] sm:$0xff] %v628_v47  ;;  %v632_v49 = vld [vmem:[%s5926_s25 + $0xf08] sm:$0xff]  ;;  %v634_v50 = vld [vmem:[%s5926_s25 + $0xf10] sm:$0xff] }
  0x8a   : > { %631 = vst [vmem:[%s5931_s26 + $0x780] sm:$0xff] %v630_v48  ;;  %633 = vst [vmem:[%s5931_s26 + $0x788] sm:$0xff] %v632_v49  ;;  %v636_v51 = vld [vmem:[%s5926_s25 + $0xf18] sm:$0xff]  ;;  %v638_v52 = vld [vmem:[%s5926_s25 + $0xf20] sm:$0xff] }
  0x8b   : > { %635 = vst [vmem:[%s5931_s26 + $0x790] sm:$0xff] %v634_v50  ;;  %v640_v53 = vld [vmem:[%s5926_s25 + $0xf28] sm:$0xff]  ;;  %637 = vst [vmem:[%s5931_s26 + $0x798] sm:$0xff] %v636_v51  ;;  %v642_v54 = vld [vmem:[%s5926_s25 + $0xf30] sm:$0xff] }
  0x8c   : > { %639 = vst [vmem:[%s5931_s26 + $0x7a0] sm:$0xff] %v638_v52  ;;  %641 = vst [vmem:[%s5931_s26 + $0x7a8] sm:$0xff] %v640_v53  ;;  %v644_v55 = vld [vmem:[%s5926_s25 + $0xf38] sm:$0xff]  ;;  %v646_v56 = vld [vmem:[%s5926_s25 + $0xf40] sm:$0xff] }
  0x8d   : > { %643 = vst [vmem:[%s5931_s26 + $0x7b0] sm:$0xff] %v642_v54  ;;  %645 = vst [vmem:[%s5931_s26 + $0x7b8] sm:$0xff] %v644_v55  ;;  %v648_v57 = vld [vmem:[%s5926_s25 + $0xf48] sm:$0xff]  ;;  %v650_v58 = vld [vmem:[%s5926_s25 + $0xf50] sm:$0xff] }
  0x8e   : > { %647 = vst [vmem:[%s5931_s26 + $0x7c0] sm:$0xff] %v646_v56  ;;  %v652_v59 = vld [vmem:[%s5926_s25 + $0xf58] sm:$0xff]  ;;  %649 = vst [vmem:[%s5931_s26 + $0x7c8] sm:$0xff] %v648_v57  ;;  %v654_v60 = vld [vmem:[%s5926_s25 + $0xf60] sm:$0xff] }
  0x8f   : > { %651 = vst [vmem:[%s5931_s26 + $0x7d0] sm:$0xff] %v650_v58  ;;  %653 = vst [vmem:[%s5931_s26 + $0x7d8] sm:$0xff] %v652_v59  ;;  %v656_v61 = vld [vmem:[%s5926_s25 + $0xf68] sm:$0xff]  ;;  %v658_v62 = vld [vmem:[%s5926_s25 + $0xf70] sm:$0xff] }
  0x90   : > { %655 = vst [vmem:[%s5931_s26 + $0x7e0] sm:$0xff] %v654_v60  ;;  %657 = vst [vmem:[%s5931_s26 + $0x7e8] sm:$0xff] %v656_v61  ;;  %v660_v63 = vld [vmem:[%s5926_s25 + $0xf78] sm:$0xff]  ;;  %v662_v0 = vld [vmem:[%s5926_s25 + $0x1000] sm:$0xff] }
  0x91   : > { %659 = vst [vmem:[%s5931_s26 + $0x7f0] sm:$0xff] %v658_v62  ;;  %v664_v1 = vld [vmem:[%s5926_s25 + $0x1008] sm:$0xff]  ;;  %661 = vst [vmem:[%s5931_s26 + $0x7f8] sm:$0xff] %v660_v63  ;;  %v666_v2 = vld [vmem:[%s5926_s25 + $0x1010] sm:$0xff] }
  0x92   : > { %663 = vst [vmem:[%s5931_s26 + $0x800] sm:$0xff] %v662_v0  ;;  %665 = vst [vmem:[%s5931_s26 + $0x808] sm:$0xff] %v664_v1  ;;  %v668_v3 = vld [vmem:[%s5926_s25 + $0x1018] sm:$0xff]  ;;  %v670_v4 = vld [vmem:[%s5926_s25 + $0x1020] sm:$0xff] }
  0x93   : > { %667 = vst [vmem:[%s5931_s26 + $0x810] sm:$0xff] %v666_v2  ;;  %669 = vst [vmem:[%s5931_s26 + $0x818] sm:$0xff] %v668_v3  ;;  %v672_v5 = vld [vmem:[%s5926_s25 + $0x1028] sm:$0xff]  ;;  %v674_v6 = vld [vmem:[%s5926_s25 + $0x1030] sm:$0xff] }
  0x94   : > { %671 = vst [vmem:[%s5931_s26 + $0x820] sm:$0xff] %v670_v4  ;;  %v676_v7 = vld [vmem:[%s5926_s25 + $0x1038] sm:$0xff]  ;;  %673 = vst [vmem:[%s5931_s26 + $0x828] sm:$0xff] %v672_v5  ;;  %v678_v8 = vld [vmem:[%s5926_s25 + $0x1040] sm:$0xff] }
  0x95   : > { %675 = vst [vmem:[%s5931_s26 + $0x830] sm:$0xff] %v674_v6  ;;  %677 = vst [vmem:[%s5931_s26 + $0x838] sm:$0xff] %v676_v7  ;;  %v680_v9 = vld [vmem:[%s5926_s25 + $0x1048] sm:$0xff]  ;;  %v682_v10 = vld [vmem:[%s5926_s25 + $0x1050] sm:$0xff] }
  0x96   : > { %679 = vst [vmem:[%s5931_s26 + $0x840] sm:$0xff] %v678_v8  ;;  %681 = vst [vmem:[%s5931_s26 + $0x848] sm:$0xff] %v680_v9  ;;  %v684_v11 = vld [vmem:[%s5926_s25 + $0x1058] sm:$0xff]  ;;  %v686_v12 = vld [vmem:[%s5926_s25 + $0x1060] sm:$0xff] }
  0x97   : > { %683 = vst [vmem:[%s5931_s26 + $0x850] sm:$0xff] %v682_v10  ;;  %v688_v13 = vld [vmem:[%s5926_s25 + $0x1068] sm:$0xff]  ;;  %685 = vst [vmem:[%s5931_s26 + $0x858] sm:$0xff] %v684_v11  ;;  %v690_v14 = vld [vmem:[%s5926_s25 + $0x1070] sm:$0xff] }
  0x98   : > { %687 = vst [vmem:[%s5931_s26 + $0x860] sm:$0xff] %v686_v12  ;;  %689 = vst [vmem:[%s5931_s26 + $0x868] sm:$0xff] %v688_v13  ;;  %v692_v15 = vld [vmem:[%s5926_s25 + $0x1078] sm:$0xff]  ;;  %v694_v16 = vld [vmem:[%s5926_s25 + $0x1100] sm:$0xff] }
  0x99   : > { %691 = vst [vmem:[%s5931_s26 + $0x870] sm:$0xff] %v690_v14  ;;  %693 = vst [vmem:[%s5931_s26 + $0x878] sm:$0xff] %v692_v15  ;;  %v696_v17 = vld [vmem:[%s5926_s25 + $0x1108] sm:$0xff]  ;;  %v698_v18 = vld [vmem:[%s5926_s25 + $0x1110] sm:$0xff] }
  0x9a   : > { %695 = vst [vmem:[%s5931_s26 + $0x880] sm:$0xff] %v694_v16  ;;  %v700_v19 = vld [vmem:[%s5926_s25 + $0x1118] sm:$0xff]  ;;  %697 = vst [vmem:[%s5931_s26 + $0x888] sm:$0xff] %v696_v17  ;;  %v702_v20 = vld [vmem:[%s5926_s25 + $0x1120] sm:$0xff] }
  0x9b   : > { %699 = vst [vmem:[%s5931_s26 + $0x890] sm:$0xff] %v698_v18  ;;  %701 = vst [vmem:[%s5931_s26 + $0x898] sm:$0xff] %v700_v19  ;;  %v704_v21 = vld [vmem:[%s5926_s25 + $0x1128] sm:$0xff]  ;;  %v706_v22 = vld [vmem:[%s5926_s25 + $0x1130] sm:$0xff] }
  0x9c   : > { %703 = vst [vmem:[%s5931_s26 + $0x8a0] sm:$0xff] %v702_v20  ;;  %705 = vst [vmem:[%s5931_s26 + $0x8a8] sm:$0xff] %v704_v21  ;;  %v708_v23 = vld [vmem:[%s5926_s25 + $0x1138] sm:$0xff]  ;;  %v710_v24 = vld [vmem:[%s5926_s25 + $0x1140] sm:$0xff] }
  0x9d   : > { %707 = vst [vmem:[%s5931_s26 + $0x8b0] sm:$0xff] %v706_v22  ;;  %v712_v25 = vld [vmem:[%s5926_s25 + $0x1148] sm:$0xff]  ;;  %709 = vst [vmem:[%s5931_s26 + $0x8b8] sm:$0xff] %v708_v23  ;;  %v714_v26 = vld [vmem:[%s5926_s25 + $0x1150] sm:$0xff] }
  0x9e   : > { %711 = vst [vmem:[%s5931_s26 + $0x8c0] sm:$0xff] %v710_v24  ;;  %713 = vst [vmem:[%s5931_s26 + $0x8c8] sm:$0xff] %v712_v25  ;;  %v716_v27 = vld [vmem:[%s5926_s25 + $0x1158] sm:$0xff]  ;;  %v718_v28 = vld [vmem:[%s5926_s25 + $0x1160] sm:$0xff] }
  0x9f   : > { %715 = vst [vmem:[%s5931_s26 + $0x8d0] sm:$0xff] %v714_v26  ;;  %717 = vst [vmem:[%s5931_s26 + $0x8d8] sm:$0xff] %v716_v27  ;;  %v720_v29 = vld [vmem:[%s5926_s25 + $0x1168] sm:$0xff]  ;;  %v722_v30 = vld [vmem:[%s5926_s25 + $0x1170] sm:$0xff] }
  0xa0   : > { %719 = vst [vmem:[%s5931_s26 + $0x8e0] sm:$0xff] %v718_v28  ;;  %v724_v31 = vld [vmem:[%s5926_s25 + $0x1178] sm:$0xff]  ;;  %721 = vst [vmem:[%s5931_s26 + $0x8e8] sm:$0xff] %v720_v29  ;;  %v726_v32 = vld [vmem:[%s5926_s25 + $0x1200] sm:$0xff] }
  0xa1   : > { %723 = vst [vmem:[%s5931_s26 + $0x8f0] sm:$0xff] %v722_v30  ;;  %725 = vst [vmem:[%s5931_s26 + $0x8f8] sm:$0xff] %v724_v31  ;;  %v728_v33 = vld [vmem:[%s5926_s25 + $0x1208] sm:$0xff]  ;;  %v730_v34 = vld [vmem:[%s5926_s25 + $0x1210] sm:$0xff] }
  0xa2   : > { %727 = vst [vmem:[%s5931_s26 + $0x900] sm:$0xff] %v726_v32  ;;  %729 = vst [vmem:[%s5931_s26 + $0x908] sm:$0xff] %v728_v33  ;;  %v732_v35 = vld [vmem:[%s5926_s25 + $0x1218] sm:$0xff]  ;;  %v734_v36 = vld [vmem:[%s5926_s25 + $0x1220] sm:$0xff] }
  0xa3   : > { %731 = vst [vmem:[%s5931_s26 + $0x910] sm:$0xff] %v730_v34  ;;  %v736_v37 = vld [vmem:[%s5926_s25 + $0x1228] sm:$0xff]  ;;  %733 = vst [vmem:[%s5931_s26 + $0x918] sm:$0xff] %v732_v35  ;;  %v738_v38 = vld [vmem:[%s5926_s25 + $0x1230] sm:$0xff] }
  0xa4   : > { %735 = vst [vmem:[%s5931_s26 + $0x920] sm:$0xff] %v734_v36  ;;  %737 = vst [vmem:[%s5931_s26 + $0x928] sm:$0xff] %v736_v37  ;;  %v740_v39 = vld [vmem:[%s5926_s25 + $0x1238] sm:$0xff]  ;;  %v742_v40 = vld [vmem:[%s5926_s25 + $0x1240] sm:$0xff] }
  0xa5   : > { %739 = vst [vmem:[%s5931_s26 + $0x930] sm:$0xff] %v738_v38  ;;  %741 = vst [vmem:[%s5931_s26 + $0x938] sm:$0xff] %v740_v39  ;;  %v744_v41 = vld [vmem:[%s5926_s25 + $0x1248] sm:$0xff]  ;;  %v746_v42 = vld [vmem:[%s5926_s25 + $0x1250] sm:$0xff] }
  0xa6   : > { %743 = vst [vmem:[%s5931_s26 + $0x940] sm:$0xff] %v742_v40  ;;  %v748_v43 = vld [vmem:[%s5926_s25 + $0x1258] sm:$0xff]  ;;  %745 = vst [vmem:[%s5931_s26 + $0x948] sm:$0xff] %v744_v41  ;;  %v750_v44 = vld [vmem:[%s5926_s25 + $0x1260] sm:$0xff] }
  0xa7   : > { %747 = vst [vmem:[%s5931_s26 + $0x950] sm:$0xff] %v746_v42  ;;  %749 = vst [vmem:[%s5931_s26 + $0x958] sm:$0xff] %v748_v43  ;;  %v752_v45 = vld [vmem:[%s5926_s25 + $0x1268] sm:$0xff]  ;;  %v754_v46 = vld [vmem:[%s5926_s25 + $0x1270] sm:$0xff] }
  0xa8   : > { %751 = vst [vmem:[%s5931_s26 + $0x960] sm:$0xff] %v750_v44  ;;  %753 = vst [vmem:[%s5931_s26 + $0x968] sm:$0xff] %v752_v45  ;;  %v756_v47 = vld [vmem:[%s5926_s25 + $0x1278] sm:$0xff]  ;;  %v758_v48 = vld [vmem:[%s5926_s25 + $0x1300] sm:$0xff] }
  0xa9   : > { %755 = vst [vmem:[%s5931_s26 + $0x970] sm:$0xff] %v754_v46  ;;  %v760_v49 = vld [vmem:[%s5926_s25 + $0x1308] sm:$0xff]  ;;  %757 = vst [vmem:[%s5931_s26 + $0x978] sm:$0xff] %v756_v47  ;;  %v762_v50 = vld [vmem:[%s5926_s25 + $0x1310] sm:$0xff] }
  0xaa   : > { %759 = vst [vmem:[%s5931_s26 + $0x980] sm:$0xff] %v758_v48  ;;  %761 = vst [vmem:[%s5931_s26 + $0x988] sm:$0xff] %v760_v49  ;;  %v764_v51 = vld [vmem:[%s5926_s25 + $0x1318] sm:$0xff]  ;;  %v766_v52 = vld [vmem:[%s5926_s25 + $0x1320] sm:$0xff] }
  0xab   : > { %763 = vst [vmem:[%s5931_s26 + $0x990] sm:$0xff] %v762_v50  ;;  %765 = vst [vmem:[%s5931_s26 + $0x998] sm:$0xff] %v764_v51  ;;  %v768_v53 = vld [vmem:[%s5926_s25 + $0x1328] sm:$0xff]  ;;  %v770_v54 = vld [vmem:[%s5926_s25 + $0x1330] sm:$0xff] }
  0xac   : > { %767 = vst [vmem:[%s5931_s26 + $0x9a0] sm:$0xff] %v766_v52  ;;  %v772_v55 = vld [vmem:[%s5926_s25 + $0x1338] sm:$0xff]  ;;  %769 = vst [vmem:[%s5931_s26 + $0x9a8] sm:$0xff] %v768_v53  ;;  %v774_v56 = vld [vmem:[%s5926_s25 + $0x1340] sm:$0xff] }
  0xad   : > { %771 = vst [vmem:[%s5931_s26 + $0x9b0] sm:$0xff] %v770_v54  ;;  %773 = vst [vmem:[%s5931_s26 + $0x9b8] sm:$0xff] %v772_v55  ;;  %v776_v57 = vld [vmem:[%s5926_s25 + $0x1348] sm:$0xff]  ;;  %v778_v58 = vld [vmem:[%s5926_s25 + $0x1350] sm:$0xff] }
  0xae   : > { %775 = vst [vmem:[%s5931_s26 + $0x9c0] sm:$0xff] %v774_v56  ;;  %777 = vst [vmem:[%s5931_s26 + $0x9c8] sm:$0xff] %v776_v57  ;;  %v780_v59 = vld [vmem:[%s5926_s25 + $0x1358] sm:$0xff]  ;;  %v782_v60 = vld [vmem:[%s5926_s25 + $0x1360] sm:$0xff] }
  0xaf   : > { %779 = vst [vmem:[%s5931_s26 + $0x9d0] sm:$0xff] %v778_v58  ;;  %v784_v61 = vld [vmem:[%s5926_s25 + $0x1368] sm:$0xff]  ;;  %781 = vst [vmem:[%s5931_s26 + $0x9d8] sm:$0xff] %v780_v59  ;;  %v786_v62 = vld [vmem:[%s5926_s25 + $0x1370] sm:$0xff] }
  0xb0   : > { %783 = vst [vmem:[%s5931_s26 + $0x9e0] sm:$0xff] %v782_v60  ;;  %785 = vst [vmem:[%s5931_s26 + $0x9e8] sm:$0xff] %v784_v61  ;;  %v788_v63 = vld [vmem:[%s5926_s25 + $0x1378] sm:$0xff]  ;;  %v790_v0 = vld [vmem:[%s5926_s25 + $0x1400] sm:$0xff] }
  0xb1   : > { %787 = vst [vmem:[%s5931_s26 + $0x9f0] sm:$0xff] %v786_v62  ;;  %789 = vst [vmem:[%s5931_s26 + $0x9f8] sm:$0xff] %v788_v63  ;;  %v792_v1 = vld [vmem:[%s5926_s25 + $0x1408] sm:$0xff]  ;;  %v794_v2 = vld [vmem:[%s5926_s25 + $0x1410] sm:$0xff] }
  0xb2   : > { %791 = vst [vmem:[%s5931_s26 + $0xa00] sm:$0xff] %v790_v0  ;;  %v796_v3 = vld [vmem:[%s5926_s25 + $0x1418] sm:$0xff]  ;;  %793 = vst [vmem:[%s5931_s26 + $0xa08] sm:$0xff] %v792_v1  ;;  %v798_v4 = vld [vmem:[%s5926_s25 + $0x1420] sm:$0xff] }
  0xb3   : > { %795 = vst [vmem:[%s5931_s26 + $0xa10] sm:$0xff] %v794_v2  ;;  %797 = vst [vmem:[%s5931_s26 + $0xa18] sm:$0xff] %v796_v3  ;;  %v800_v5 = vld [vmem:[%s5926_s25 + $0x1428] sm:$0xff]  ;;  %v802_v6 = vld [vmem:[%s5926_s25 + $0x1430] sm:$0xff] }
  0xb4   : > { %799 = vst [vmem:[%s5931_s26 + $0xa20] sm:$0xff] %v798_v4  ;;  %801 = vst [vmem:[%s5931_s26 + $0xa28] sm:$0xff] %v800_v5  ;;  %v804_v7 = vld [vmem:[%s5926_s25 + $0x1438] sm:$0xff]  ;;  %v806_v8 = vld [vmem:[%s5926_s25 + $0x1440] sm:$0xff] }
  0xb5   : > { %803 = vst [vmem:[%s5931_s26 + $0xa30] sm:$0xff] %v802_v6  ;;  %v808_v9 = vld [vmem:[%s5926_s25 + $0x1448] sm:$0xff]  ;;  %805 = vst [vmem:[%s5931_s26 + $0xa38] sm:$0xff] %v804_v7  ;;  %v810_v10 = vld [vmem:[%s5926_s25 + $0x1450] sm:$0xff] }
  0xb6   : > { %807 = vst [vmem:[%s5931_s26 + $0xa40] sm:$0xff] %v806_v8  ;;  %809 = vst [vmem:[%s5931_s26 + $0xa48] sm:$0xff] %v808_v9  ;;  %v812_v11 = vld [vmem:[%s5926_s25 + $0x1458] sm:$0xff]  ;;  %v814_v12 = vld [vmem:[%s5926_s25 + $0x1460] sm:$0xff] }
  0xb7   : > { %811 = vst [vmem:[%s5931_s26 + $0xa50] sm:$0xff] %v810_v10  ;;  %813 = vst [vmem:[%s5931_s26 + $0xa58] sm:$0xff] %v812_v11  ;;  %v816_v13 = vld [vmem:[%s5926_s25 + $0x1468] sm:$0xff]  ;;  %v818_v14 = vld [vmem:[%s5926_s25 + $0x1470] sm:$0xff] }
  0xb8   : > { %815 = vst [vmem:[%s5931_s26 + $0xa60] sm:$0xff] %v814_v12  ;;  %v820_v15 = vld [vmem:[%s5926_s25 + $0x1478] sm:$0xff]  ;;  %817 = vst [vmem:[%s5931_s26 + $0xa68] sm:$0xff] %v816_v13  ;;  %v822_v16 = vld [vmem:[%s5926_s25 + $0x1500] sm:$0xff] }
  0xb9   : > { %819 = vst [vmem:[%s5931_s26 + $0xa70] sm:$0xff] %v818_v14  ;;  %821 = vst [vmem:[%s5931_s26 + $0xa78] sm:$0xff] %v820_v15  ;;  %v824_v17 = vld [vmem:[%s5926_s25 + $0x1508] sm:$0xff]  ;;  %v826_v18 = vld [vmem:[%s5926_s25 + $0x1510] sm:$0xff] }
  0xba   : > { %823 = vst [vmem:[%s5931_s26 + $0xa80] sm:$0xff] %v822_v16  ;;  %825 = vst [vmem:[%s5931_s26 + $0xa88] sm:$0xff] %v824_v17  ;;  %v828_v19 = vld [vmem:[%s5926_s25 + $0x1518] sm:$0xff]  ;;  %v830_v20 = vld [vmem:[%s5926_s25 + $0x1520] sm:$0xff] }
  0xbb   : > { %827 = vst [vmem:[%s5931_s26 + $0xa90] sm:$0xff] %v826_v18  ;;  %v832_v21 = vld [vmem:[%s5926_s25 + $0x1528] sm:$0xff]  ;;  %829 = vst [vmem:[%s5931_s26 + $0xa98] sm:$0xff] %v828_v19  ;;  %v834_v22 = vld [vmem:[%s5926_s25 + $0x1530] sm:$0xff] }
  0xbc   : > { %831 = vst [vmem:[%s5931_s26 + $0xaa0] sm:$0xff] %v830_v20  ;;  %833 = vst [vmem:[%s5931_s26 + $0xaa8] sm:$0xff] %v832_v21  ;;  %v836_v23 = vld [vmem:[%s5926_s25 + $0x1538] sm:$0xff]  ;;  %v838_v24 = vld [vmem:[%s5926_s25 + $0x1540] sm:$0xff] }
  0xbd   : > { %835 = vst [vmem:[%s5931_s26 + $0xab0] sm:$0xff] %v834_v22  ;;  %837 = vst [vmem:[%s5931_s26 + $0xab8] sm:$0xff] %v836_v23  ;;  %v840_v25 = vld [vmem:[%s5926_s25 + $0x1548] sm:$0xff]  ;;  %v842_v26 = vld [vmem:[%s5926_s25 + $0x1550] sm:$0xff] }
  0xbe   : > { %839 = vst [vmem:[%s5931_s26 + $0xac0] sm:$0xff] %v838_v24  ;;  %v844_v27 = vld [vmem:[%s5926_s25 + $0x1558] sm:$0xff]  ;;  %841 = vst [vmem:[%s5931_s26 + $0xac8] sm:$0xff] %v840_v25  ;;  %v846_v28 = vld [vmem:[%s5926_s25 + $0x1560] sm:$0xff] }
  0xbf   : > { %843 = vst [vmem:[%s5931_s26 + $0xad0] sm:$0xff] %v842_v26  ;;  %845 = vst [vmem:[%s5931_s26 + $0xad8] sm:$0xff] %v844_v27  ;;  %v848_v29 = vld [vmem:[%s5926_s25 + $0x1568] sm:$0xff]  ;;  %v850_v30 = vld [vmem:[%s5926_s25 + $0x1570] sm:$0xff] }
  0xc0   : > { %847 = vst [vmem:[%s5931_s26 + $0xae0] sm:$0xff] %v846_v28  ;;  %849 = vst [vmem:[%s5931_s26 + $0xae8] sm:$0xff] %v848_v29  ;;  %v852_v31 = vld [vmem:[%s5926_s25 + $0x1578] sm:$0xff]  ;;  %v854_v32 = vld [vmem:[%s5926_s25 + $0x1600] sm:$0xff] }
  0xc1   : > { %851 = vst [vmem:[%s5931_s26 + $0xaf0] sm:$0xff] %v850_v30  ;;  %v856_v33 = vld [vmem:[%s5926_s25 + $0x1608] sm:$0xff]  ;;  %853 = vst [vmem:[%s5931_s26 + $0xaf8] sm:$0xff] %v852_v31  ;;  %v858_v34 = vld [vmem:[%s5926_s25 + $0x1610] sm:$0xff] }
  0xc2   : > { %855 = vst [vmem:[%s5931_s26 + $0xb00] sm:$0xff] %v854_v32  ;;  %857 = vst [vmem:[%s5931_s26 + $0xb08] sm:$0xff] %v856_v33  ;;  %v860_v35 = vld [vmem:[%s5926_s25 + $0x1618] sm:$0xff]  ;;  %v862_v36 = vld [vmem:[%s5926_s25 + $0x1620] sm:$0xff] }
  0xc3   : > { %859 = vst [vmem:[%s5931_s26 + $0xb10] sm:$0xff] %v858_v34  ;;  %861 = vst [vmem:[%s5931_s26 + $0xb18] sm:$0xff] %v860_v35  ;;  %v864_v37 = vld [vmem:[%s5926_s25 + $0x1628] sm:$0xff]  ;;  %v866_v38 = vld [vmem:[%s5926_s25 + $0x1630] sm:$0xff] }
  0xc4   : > { %863 = vst [vmem:[%s5931_s26 + $0xb20] sm:$0xff] %v862_v36  ;;  %v868_v39 = vld [vmem:[%s5926_s25 + $0x1638] sm:$0xff]  ;;  %865 = vst [vmem:[%s5931_s26 + $0xb28] sm:$0xff] %v864_v37  ;;  %v870_v40 = vld [vmem:[%s5926_s25 + $0x1640] sm:$0xff] }
  0xc5   : > { %867 = vst [vmem:[%s5931_s26 + $0xb30] sm:$0xff] %v866_v38  ;;  %869 = vst [vmem:[%s5931_s26 + $0xb38] sm:$0xff] %v868_v39  ;;  %v872_v41 = vld [vmem:[%s5926_s25 + $0x1648] sm:$0xff]  ;;  %v874_v42 = vld [vmem:[%s5926_s25 + $0x1650] sm:$0xff] }
  0xc6   : > { %871 = vst [vmem:[%s5931_s26 + $0xb40] sm:$0xff] %v870_v40  ;;  %873 = vst [vmem:[%s5931_s26 + $0xb48] sm:$0xff] %v872_v41  ;;  %v876_v43 = vld [vmem:[%s5926_s25 + $0x1658] sm:$0xff]  ;;  %v878_v44 = vld [vmem:[%s5926_s25 + $0x1660] sm:$0xff] }
  0xc7   : > { %875 = vst [vmem:[%s5931_s26 + $0xb50] sm:$0xff] %v874_v42  ;;  %v880_v45 = vld [vmem:[%s5926_s25 + $0x1668] sm:$0xff]  ;;  %877 = vst [vmem:[%s5931_s26 + $0xb58] sm:$0xff] %v876_v43  ;;  %v882_v46 = vld [vmem:[%s5926_s25 + $0x1670] sm:$0xff] }
  0xc8   : > { %879 = vst [vmem:[%s5931_s26 + $0xb60] sm:$0xff] %v878_v44  ;;  %881 = vst [vmem:[%s5931_s26 + $0xb68] sm:$0xff] %v880_v45  ;;  %v884_v47 = vld [vmem:[%s5926_s25 + $0x1678] sm:$0xff]  ;;  %v886_v48 = vld [vmem:[%s5926_s25 + $0x1700] sm:$0xff] }
  0xc9   : > { %883 = vst [vmem:[%s5931_s26 + $0xb70] sm:$0xff] %v882_v46  ;;  %885 = vst [vmem:[%s5931_s26 + $0xb78] sm:$0xff] %v884_v47  ;;  %v888_v49 = vld [vmem:[%s5926_s25 + $0x1708] sm:$0xff]  ;;  %v890_v50 = vld [vmem:[%s5926_s25 + $0x1710] sm:$0xff] }
  0xca   : > { %887 = vst [vmem:[%s5931_s26 + $0xb80] sm:$0xff] %v886_v48  ;;  %v892_v51 = vld [vmem:[%s5926_s25 + $0x1718] sm:$0xff]  ;;  %889 = vst [vmem:[%s5931_s26 + $0xb88] sm:$0xff] %v888_v49  ;;  %v894_v52 = vld [vmem:[%s5926_s25 + $0x1720] sm:$0xff] }
  0xcb   : > { %891 = vst [vmem:[%s5931_s26 + $0xb90] sm:$0xff] %v890_v50  ;;  %893 = vst [vmem:[%s5931_s26 + $0xb98] sm:$0xff] %v892_v51  ;;  %v896_v53 = vld [vmem:[%s5926_s25 + $0x1728] sm:$0xff]  ;;  %v898_v54 = vld [vmem:[%s5926_s25 + $0x1730] sm:$0xff] }
  0xcc   : > { %895 = vst [vmem:[%s5931_s26 + $0xba0] sm:$0xff] %v894_v52  ;;  %897 = vst [vmem:[%s5931_s26 + $0xba8] sm:$0xff] %v896_v53  ;;  %v900_v55 = vld [vmem:[%s5926_s25 + $0x1738] sm:$0xff]  ;;  %v902_v56 = vld [vmem:[%s5926_s25 + $0x1740] sm:$0xff] }
  0xcd   : > { %899 = vst [vmem:[%s5931_s26 + $0xbb0] sm:$0xff] %v898_v54  ;;  %v904_v57 = vld [vmem:[%s5926_s25 + $0x1748] sm:$0xff]  ;;  %901 = vst [vmem:[%s5931_s26 + $0xbb8] sm:$0xff] %v900_v55  ;;  %v906_v58 = vld [vmem:[%s5926_s25 + $0x1750] sm:$0xff] }
  0xce   : > { %903 = vst [vmem:[%s5931_s26 + $0xbc0] sm:$0xff] %v902_v56  ;;  %905 = vst [vmem:[%s5931_s26 + $0xbc8] sm:$0xff] %v904_v57  ;;  %v908_v59 = vld [vmem:[%s5926_s25 + $0x1758] sm:$0xff]  ;;  %v910_v60 = vld [vmem:[%s5926_s25 + $0x1760] sm:$0xff] }
  0xcf   : > { %907 = vst [vmem:[%s5931_s26 + $0xbd0] sm:$0xff] %v906_v58  ;;  %909 = vst [vmem:[%s5931_s26 + $0xbd8] sm:$0xff] %v908_v59  ;;  %v912_v61 = vld [vmem:[%s5926_s25 + $0x1768] sm:$0xff]  ;;  %v914_v62 = vld [vmem:[%s5926_s25 + $0x1770] sm:$0xff] }
  0xd0   : > { %911 = vst [vmem:[%s5931_s26 + $0xbe0] sm:$0xff] %v910_v60  ;;  %v916_v63 = vld [vmem:[%s5926_s25 + $0x1778] sm:$0xff]  ;;  %913 = vst [vmem:[%s5931_s26 + $0xbe8] sm:$0xff] %v912_v61  ;;  %v918_v0 = vld [vmem:[%s5926_s25 + $0x1800] sm:$0xff] }
  0xd1   : > { %915 = vst [vmem:[%s5931_s26 + $0xbf0] sm:$0xff] %v914_v62  ;;  %917 = vst [vmem:[%s5931_s26 + $0xbf8] sm:$0xff] %v916_v63  ;;  %v920_v1 = vld [vmem:[%s5926_s25 + $0x1808] sm:$0xff]  ;;  %v922_v2 = vld [vmem:[%s5926_s25 + $0x1810] sm:$0xff] }
  0xd2   : > { %919 = vst [vmem:[%s5931_s26 + $0xc00] sm:$0xff] %v918_v0  ;;  %921 = vst [vmem:[%s5931_s26 + $0xc08] sm:$0xff] %v920_v1  ;;  %v924_v3 = vld [vmem:[%s5926_s25 + $0x1818] sm:$0xff]  ;;  %v926_v4 = vld [vmem:[%s5926_s25 + $0x1820] sm:$0xff] }
  0xd3   : > { %923 = vst [vmem:[%s5931_s26 + $0xc10] sm:$0xff] %v922_v2  ;;  %v928_v5 = vld [vmem:[%s5926_s25 + $0x1828] sm:$0xff]  ;;  %925 = vst [vmem:[%s5931_s26 + $0xc18] sm:$0xff] %v924_v3  ;;  %v930_v6 = vld [vmem:[%s5926_s25 + $0x1830] sm:$0xff] }
  0xd4   : > { %927 = vst [vmem:[%s5931_s26 + $0xc20] sm:$0xff] %v926_v4  ;;  %929 = vst [vmem:[%s5931_s26 + $0xc28] sm:$0xff] %v928_v5  ;;  %v932_v7 = vld [vmem:[%s5926_s25 + $0x1838] sm:$0xff]  ;;  %v934_v8 = vld [vmem:[%s5926_s25 + $0x1840] sm:$0xff] }
  0xd5   : > { %931 = vst [vmem:[%s5931_s26 + $0xc30] sm:$0xff] %v930_v6  ;;  %933 = vst [vmem:[%s5931_s26 + $0xc38] sm:$0xff] %v932_v7  ;;  %v936_v9 = vld [vmem:[%s5926_s25 + $0x1848] sm:$0xff]  ;;  %v938_v10 = vld [vmem:[%s5926_s25 + $0x1850] sm:$0xff] }
  0xd6   : > { %935 = vst [vmem:[%s5931_s26 + $0xc40] sm:$0xff] %v934_v8  ;;  %v940_v11 = vld [vmem:[%s5926_s25 + $0x1858] sm:$0xff]  ;;  %937 = vst [vmem:[%s5931_s26 + $0xc48] sm:$0xff] %v936_v9  ;;  %v942_v12 = vld [vmem:[%s5926_s25 + $0x1860] sm:$0xff] }
  0xd7   : > { %939 = vst [vmem:[%s5931_s26 + $0xc50] sm:$0xff] %v938_v10  ;;  %941 = vst [vmem:[%s5931_s26 + $0xc58] sm:$0xff] %v940_v11  ;;  %v944_v13 = vld [vmem:[%s5926_s25 + $0x1868] sm:$0xff]  ;;  %v946_v14 = vld [vmem:[%s5926_s25 + $0x1870] sm:$0xff] }
  0xd8   : > { %943 = vst [vmem:[%s5931_s26 + $0xc60] sm:$0xff] %v942_v12  ;;  %945 = vst [vmem:[%s5931_s26 + $0xc68] sm:$0xff] %v944_v13  ;;  %v948_v15 = vld [vmem:[%s5926_s25 + $0x1878] sm:$0xff]  ;;  %v950_v16 = vld [vmem:[%s5926_s25 + $0x1900] sm:$0xff] }
  0xd9   : > { %947 = vst [vmem:[%s5931_s26 + $0xc70] sm:$0xff] %v946_v14  ;;  %v952_v17 = vld [vmem:[%s5926_s25 + $0x1908] sm:$0xff]  ;;  %949 = vst [vmem:[%s5931_s26 + $0xc78] sm:$0xff] %v948_v15  ;;  %v954_v18 = vld [vmem:[%s5926_s25 + $0x1910] sm:$0xff] }
  0xda   : > { %951 = vst [vmem:[%s5931_s26 + $0xc80] sm:$0xff] %v950_v16  ;;  %953 = vst [vmem:[%s5931_s26 + $0xc88] sm:$0xff] %v952_v17  ;;  %v956_v19 = vld [vmem:[%s5926_s25 + $0x1918] sm:$0xff]  ;;  %v958_v20 = vld [vmem:[%s5926_s25 + $0x1920] sm:$0xff] }
  0xdb   : > { %955 = vst [vmem:[%s5931_s26 + $0xc90] sm:$0xff] %v954_v18  ;;  %957 = vst [vmem:[%s5931_s26 + $0xc98] sm:$0xff] %v956_v19  ;;  %v960_v21 = vld [vmem:[%s5926_s25 + $0x1928] sm:$0xff]  ;;  %v962_v22 = vld [vmem:[%s5926_s25 + $0x1930] sm:$0xff] }
  0xdc   : > { %959 = vst [vmem:[%s5931_s26 + $0xca0] sm:$0xff] %v958_v20  ;;  %v964_v23 = vld [vmem:[%s5926_s25 + $0x1938] sm:$0xff]  ;;  %961 = vst [vmem:[%s5931_s26 + $0xca8] sm:$0xff] %v960_v21  ;;  %v966_v24 = vld [vmem:[%s5926_s25 + $0x1940] sm:$0xff] }
  0xdd   : > { %963 = vst [vmem:[%s5931_s26 + $0xcb0] sm:$0xff] %v962_v22  ;;  %965 = vst [vmem:[%s5931_s26 + $0xcb8] sm:$0xff] %v964_v23  ;;  %v968_v25 = vld [vmem:[%s5926_s25 + $0x1948] sm:$0xff]  ;;  %v970_v26 = vld [vmem:[%s5926_s25 + $0x1950] sm:$0xff] }
  0xde   : > { %967 = vst [vmem:[%s5931_s26 + $0xcc0] sm:$0xff] %v966_v24  ;;  %969 = vst [vmem:[%s5931_s26 + $0xcc8] sm:$0xff] %v968_v25  ;;  %v972_v27 = vld [vmem:[%s5926_s25 + $0x1958] sm:$0xff]  ;;  %v974_v28 = vld [vmem:[%s5926_s25 + $0x1960] sm:$0xff] }
  0xdf   : > { %971 = vst [vmem:[%s5931_s26 + $0xcd0] sm:$0xff] %v970_v26  ;;  %v976_v29 = vld [vmem:[%s5926_s25 + $0x1968] sm:$0xff]  ;;  %973 = vst [vmem:[%s5931_s26 + $0xcd8] sm:$0xff] %v972_v27  ;;  %v978_v30 = vld [vmem:[%s5926_s25 + $0x1970] sm:$0xff] }
  0xe0   : > { %975 = vst [vmem:[%s5931_s26 + $0xce0] sm:$0xff] %v974_v28  ;;  %977 = vst [vmem:[%s5931_s26 + $0xce8] sm:$0xff] %v976_v29  ;;  %v980_v31 = vld [vmem:[%s5926_s25 + $0x1978] sm:$0xff]  ;;  %v982_v32 = vld [vmem:[%s5926_s25 + $0x1a00] sm:$0xff] }
  0xe1   : > { %979 = vst [vmem:[%s5931_s26 + $0xcf0] sm:$0xff] %v978_v30  ;;  %981 = vst [vmem:[%s5931_s26 + $0xcf8] sm:$0xff] %v980_v31  ;;  %v984_v33 = vld [vmem:[%s5926_s25 + $0x1a08] sm:$0xff]  ;;  %v986_v34 = vld [vmem:[%s5926_s25 + $0x1a10] sm:$0xff] }
  0xe2   : > { %983 = vst [vmem:[%s5931_s26 + $0xd00] sm:$0xff] %v982_v32  ;;  %v988_v35 = vld [vmem:[%s5926_s25 + $0x1a18] sm:$0xff]  ;;  %985 = vst [vmem:[%s5931_s26 + $0xd08] sm:$0xff] %v984_v33  ;;  %v990_v36 = vld [vmem:[%s5926_s25 + $0x1a20] sm:$0xff] }
  0xe3   : > { %987 = vst [vmem:[%s5931_s26 + $0xd10] sm:$0xff] %v986_v34  ;;  %989 = vst [vmem:[%s5931_s26 + $0xd18] sm:$0xff] %v988_v35  ;;  %v992_v37 = vld [vmem:[%s5926_s25 + $0x1a28] sm:$0xff]  ;;  %v994_v38 = vld [vmem:[%s5926_s25 + $0x1a30] sm:$0xff] }
  0xe4   : > { %991 = vst [vmem:[%s5931_s26 + $0xd20] sm:$0xff] %v990_v36  ;;  %993 = vst [vmem:[%s5931_s26 + $0xd28] sm:$0xff] %v992_v37  ;;  %v996_v39 = vld [vmem:[%s5926_s25 + $0x1a38] sm:$0xff]  ;;  %v998_v40 = vld [vmem:[%s5926_s25 + $0x1a40] sm:$0xff] }
  0xe5   : > { %995 = vst [vmem:[%s5931_s26 + $0xd30] sm:$0xff] %v994_v38  ;;  %v1000_v41 = vld [vmem:[%s5926_s25 + $0x1a48] sm:$0xff]  ;;  %997 = vst [vmem:[%s5931_s26 + $0xd38] sm:$0xff] %v996_v39  ;;  %v1002_v42 = vld [vmem:[%s5926_s25 + $0x1a50] sm:$0xff] }
  0xe6   : > { %999 = vst [vmem:[%s5931_s26 + $0xd40] sm:$0xff] %v998_v40  ;;  %1001 = vst [vmem:[%s5931_s26 + $0xd48] sm:$0xff] %v1000_v41  ;;  %v1004_v43 = vld [vmem:[%s5926_s25 + $0x1a58] sm:$0xff]  ;;  %v1006_v44 = vld [vmem:[%s5926_s25 + $0x1a60] sm:$0xff] }
  0xe7   : > { %1003 = vst [vmem:[%s5931_s26 + $0xd50] sm:$0xff] %v1002_v42  ;;  %1005 = vst [vmem:[%s5931_s26 + $0xd58] sm:$0xff] %v1004_v43  ;;  %v1008_v45 = vld [vmem:[%s5926_s25 + $0x1a68] sm:$0xff]  ;;  %v1010_v46 = vld [vmem:[%s5926_s25 + $0x1a70] sm:$0xff] }
  0xe8   : > { %1007 = vst [vmem:[%s5931_s26 + $0xd60] sm:$0xff] %v1006_v44  ;;  %v1012_v47 = vld [vmem:[%s5926_s25 + $0x1a78] sm:$0xff]  ;;  %1009 = vst [vmem:[%s5931_s26 + $0xd68] sm:$0xff] %v1008_v45  ;;  %v1014_v48 = vld [vmem:[%s5926_s25 + $0x1b00] sm:$0xff] }
  0xe9   : > { %1011 = vst [vmem:[%s5931_s26 + $0xd70] sm:$0xff] %v1010_v46  ;;  %1013 = vst [vmem:[%s5931_s26 + $0xd78] sm:$0xff] %v1012_v47  ;;  %v1016_v49 = vld [vmem:[%s5926_s25 + $0x1b08] sm:$0xff]  ;;  %v1018_v50 = vld [vmem:[%s5926_s25 + $0x1b10] sm:$0xff] }
  0xea   : > { %1015 = vst [vmem:[%s5931_s26 + $0xd80] sm:$0xff] %v1014_v48  ;;  %1017 = vst [vmem:[%s5931_s26 + $0xd88] sm:$0xff] %v1016_v49  ;;  %v1020_v51 = vld [vmem:[%s5926_s25 + $0x1b18] sm:$0xff]  ;;  %v1022_v52 = vld [vmem:[%s5926_s25 + $0x1b20] sm:$0xff] }
  0xeb   : > { %1019 = vst [vmem:[%s5931_s26 + $0xd90] sm:$0xff] %v1018_v50  ;;  %v1024_v53 = vld [vmem:[%s5926_s25 + $0x1b28] sm:$0xff]  ;;  %1021 = vst [vmem:[%s5931_s26 + $0xd98] sm:$0xff] %v1020_v51  ;;  %v1026_v54 = vld [vmem:[%s5926_s25 + $0x1b30] sm:$0xff] }
  0xec   : > { %1023 = vst [vmem:[%s5931_s26 + $0xda0] sm:$0xff] %v1022_v52  ;;  %1025 = vst [vmem:[%s5931_s26 + $0xda8] sm:$0xff] %v1024_v53  ;;  %v1028_v55 = vld [vmem:[%s5926_s25 + $0x1b38] sm:$0xff]  ;;  %v1030_v56 = vld [vmem:[%s5926_s25 + $0x1b40] sm:$0xff] }
  0xed   : > { %1027 = vst [vmem:[%s5931_s26 + $0xdb0] sm:$0xff] %v1026_v54  ;;  %1029 = vst [vmem:[%s5931_s26 + $0xdb8] sm:$0xff] %v1028_v55  ;;  %v1032_v57 = vld [vmem:[%s5926_s25 + $0x1b48] sm:$0xff]  ;;  %v1034_v58 = vld [vmem:[%s5926_s25 + $0x1b50] sm:$0xff] }
  0xee   : > { %1031 = vst [vmem:[%s5931_s26 + $0xdc0] sm:$0xff] %v1030_v56  ;;  %v1036_v59 = vld [vmem:[%s5926_s25 + $0x1b58] sm:$0xff]  ;;  %1033 = vst [vmem:[%s5931_s26 + $0xdc8] sm:$0xff] %v1032_v57  ;;  %v1038_v60 = vld [vmem:[%s5926_s25 + $0x1b60] sm:$0xff] }
  0xef   : > { %1035 = vst [vmem:[%s5931_s26 + $0xdd0] sm:$0xff] %v1034_v58  ;;  %1037 = vst [vmem:[%s5931_s26 + $0xdd8] sm:$0xff] %v1036_v59  ;;  %v1040_v61 = vld [vmem:[%s5926_s25 + $0x1b68] sm:$0xff]  ;;  %v1042_v62 = vld [vmem:[%s5926_s25 + $0x1b70] sm:$0xff] }
  0xf0   : > { %1039 = vst [vmem:[%s5931_s26 + $0xde0] sm:$0xff] %v1038_v60  ;;  %1041 = vst [vmem:[%s5931_s26 + $0xde8] sm:$0xff] %v1040_v61  ;;  %v1044_v63 = vld [vmem:[%s5926_s25 + $0x1b78] sm:$0xff]  ;;  %v1046_v0 = vld [vmem:[%s5926_s25 + $0x1c00] sm:$0xff] }
  0xf1   : > { %1043 = vst [vmem:[%s5931_s26 + $0xdf0] sm:$0xff] %v1042_v62  ;;  %v1048_v1 = vld [vmem:[%s5926_s25 + $0x1c08] sm:$0xff]  ;;  %1045 = vst [vmem:[%s5931_s26 + $0xdf8] sm:$0xff] %v1044_v63  ;;  %v1050_v2 = vld [vmem:[%s5926_s25 + $0x1c10] sm:$0xff] }
  0xf2   : > { %1047 = vst [vmem:[%s5931_s26 + $0xe00] sm:$0xff] %v1046_v0  ;;  %1049 = vst [vmem:[%s5931_s26 + $0xe08] sm:$0xff] %v1048_v1  ;;  %v1052_v3 = vld [vmem:[%s5926_s25 + $0x1c18] sm:$0xff]  ;;  %v1054_v4 = vld [vmem:[%s5926_s25 + $0x1c20] sm:$0xff] }
  0xf3   : > { %1051 = vst [vmem:[%s5931_s26 + $0xe10] sm:$0xff] %v1050_v2  ;;  %1053 = vst [vmem:[%s5931_s26 + $0xe18] sm:$0xff] %v1052_v3  ;;  %v1056_v5 = vld [vmem:[%s5926_s25 + $0x1c28] sm:$0xff]  ;;  %v1058_v6 = vld [vmem:[%s5926_s25 + $0x1c30] sm:$0xff] }
  0xf4   : > { %1055 = vst [vmem:[%s5931_s26 + $0xe20] sm:$0xff] %v1054_v4  ;;  %v1060_v7 = vld [vmem:[%s5926_s25 + $0x1c38] sm:$0xff]  ;;  %1057 = vst [vmem:[%s5931_s26 + $0xe28] sm:$0xff] %v1056_v5  ;;  %v1062_v8 = vld [vmem:[%s5926_s25 + $0x1c40] sm:$0xff] }
  0xf5   : > { %1059 = vst [vmem:[%s5931_s26 + $0xe30] sm:$0xff] %v1058_v6  ;;  %1061 = vst [vmem:[%s5931_s26 + $0xe38] sm:$0xff] %v1060_v7  ;;  %v1064_v9 = vld [vmem:[%s5926_s25 + $0x1c48] sm:$0xff]  ;;  %v1066_v10 = vld [vmem:[%s5926_s25 + $0x1c50] sm:$0xff] }
  0xf6   : > { %1063 = vst [vmem:[%s5931_s26 + $0xe40] sm:$0xff] %v1062_v8  ;;  %1065 = vst [vmem:[%s5931_s26 + $0xe48] sm:$0xff] %v1064_v9  ;;  %v1068_v11 = vld [vmem:[%s5926_s25 + $0x1c58] sm:$0xff]  ;;  %v1070_v12 = vld [vmem:[%s5926_s25 + $0x1c60] sm:$0xff] }
  0xf7   : > { %1067 = vst [vmem:[%s5931_s26 + $0xe50] sm:$0xff] %v1066_v10  ;;  %v1072_v13 = vld [vmem:[%s5926_s25 + $0x1c68] sm:$0xff]  ;;  %1069 = vst [vmem:[%s5931_s26 + $0xe58] sm:$0xff] %v1068_v11  ;;  %v1074_v14 = vld [vmem:[%s5926_s25 + $0x1c70] sm:$0xff] }
  0xf8   : > { %1071 = vst [vmem:[%s5931_s26 + $0xe60] sm:$0xff] %v1070_v12  ;;  %1073 = vst [vmem:[%s5931_s26 + $0xe68] sm:$0xff] %v1072_v13  ;;  %v1076_v15 = vld [vmem:[%s5926_s25 + $0x1c78] sm:$0xff]  ;;  %v1078_v16 = vld [vmem:[%s5926_s25 + $0x1d00] sm:$0xff] }
  0xf9   : > { %1075 = vst [vmem:[%s5931_s26 + $0xe70] sm:$0xff] %v1074_v14  ;;  %1077 = vst [vmem:[%s5931_s26 + $0xe78] sm:$0xff] %v1076_v15  ;;  %v1080_v17 = vld [vmem:[%s5926_s25 + $0x1d08] sm:$0xff]  ;;  %v1082_v18 = vld [vmem:[%s5926_s25 + $0x1d10] sm:$0xff] }
  0xfa   : > { %1079 = vst [vmem:[%s5931_s26 + $0xe80] sm:$0xff] %v1078_v16  ;;  %v1084_v19 = vld [vmem:[%s5926_s25 + $0x1d18] sm:$0xff]  ;;  %1081 = vst [vmem:[%s5931_s26 + $0xe88] sm:$0xff] %v1080_v17  ;;  %v1086_v20 = vld [vmem:[%s5926_s25 + $0x1d20] sm:$0xff] }
  0xfb   : > { %1083 = vst [vmem:[%s5931_s26 + $0xe90] sm:$0xff] %v1082_v18  ;;  %1085 = vst [vmem:[%s5931_s26 + $0xe98] sm:$0xff] %v1084_v19  ;;  %v1088_v21 = vld [vmem:[%s5926_s25 + $0x1d28] sm:$0xff]  ;;  %v1090_v22 = vld [vmem:[%s5926_s25 + $0x1d30] sm:$0xff] }
  0xfc   : > { %1087 = vst [vmem:[%s5931_s26 + $0xea0] sm:$0xff] %v1086_v20  ;;  %1089 = vst [vmem:[%s5931_s26 + $0xea8] sm:$0xff] %v1088_v21  ;;  %v1092_v23 = vld [vmem:[%s5926_s25 + $0x1d38] sm:$0xff]  ;;  %v1094_v24 = vld [vmem:[%s5926_s25 + $0x1d40] sm:$0xff] }
  0xfd   : > { %1091 = vst [vmem:[%s5931_s26 + $0xeb0] sm:$0xff] %v1090_v22  ;;  %v1096_v25 = vld [vmem:[%s5926_s25 + $0x1d48] sm:$0xff]  ;;  %1093 = vst [vmem:[%s5931_s26 + $0xeb8] sm:$0xff] %v1092_v23  ;;  %v1098_v26 = vld [vmem:[%s5926_s25 + $0x1d50] sm:$0xff] }
  0xfe   : > { %1095 = vst [vmem:[%s5931_s26 + $0xec0] sm:$0xff] %v1094_v24  ;;  %1097 = vst [vmem:[%s5931_s26 + $0xec8] sm:$0xff] %v1096_v25  ;;  %v1100_v27 = vld [vmem:[%s5926_s25 + $0x1d58] sm:$0xff]  ;;  %v1102_v28 = vld [vmem:[%s5926_s25 + $0x1d60] sm:$0xff] }
  0xff   : > { %1099 = vst [vmem:[%s5931_s26 + $0xed0] sm:$0xff] %v1098_v26  ;;  %1101 = vst [vmem:[%s5931_s26 + $0xed8] sm:$0xff] %v1100_v27  ;;  %v1104_v29 = vld [vmem:[%s5926_s25 + $0x1d68] sm:$0xff]  ;;  %v1106_v30 = vld [vmem:[%s5926_s25 + $0x1d70] sm:$0xff] }
 0x100   : > { %1103 = vst [vmem:[%s5931_s26 + $0xee0] sm:$0xff] %v1102_v28  ;;  %v1108_v31 = vld [vmem:[%s5926_s25 + $0x1d78] sm:$0xff]  ;;  %1105 = vst [vmem:[%s5931_s26 + $0xee8] sm:$0xff] %v1104_v29  ;;  %v1110_v32 = vld [vmem:[%s5926_s25 + $0x1e00] sm:$0xff] }
 0x101   : > { %1107 = vst [vmem:[%s5931_s26 + $0xef0] sm:$0xff] %v1106_v30  ;;  %1109 = vst [vmem:[%s5931_s26 + $0xef8] sm:$0xff] %v1108_v31  ;;  %v1112_v33 = vld [vmem:[%s5926_s25 + $0x1e08] sm:$0xff]  ;;  %v1114_v34 = vld [vmem:[%s5926_s25 + $0x1e10] sm:$0xff] }
 0x102   : > { %1111 = vst [vmem:[%s5931_s26 + $0xf00] sm:$0xff] %v1110_v32  ;;  %1113 = vst [vmem:[%s5931_s26 + $0xf08] sm:$0xff] %v1112_v33  ;;  %v1116_v35 = vld [vmem:[%s5926_s25 + $0x1e18] sm:$0xff]  ;;  %v1118_v36 = vld [vmem:[%s5926_s25 + $0x1e20] sm:$0xff] }
 0x103   : > { %1115 = vst [vmem:[%s5931_s26 + $0xf10] sm:$0xff] %v1114_v34  ;;  %v1120_v37 = vld [vmem:[%s5926_s25 + $0x1e28] sm:$0xff]  ;;  %1117 = vst [vmem:[%s5931_s26 + $0xf18] sm:$0xff] %v1116_v35  ;;  %v1122_v38 = vld [vmem:[%s5926_s25 + $0x1e30] sm:$0xff] }
 0x104   : > { %1119 = vst [vmem:[%s5931_s26 + $0xf20] sm:$0xff] %v1118_v36  ;;  %1121 = vst [vmem:[%s5931_s26 + $0xf28] sm:$0xff] %v1120_v37  ;;  %v1124_v39 = vld [vmem:[%s5926_s25 + $0x1e38] sm:$0xff]  ;;  %v1126_v40 = vld [vmem:[%s5926_s25 + $0x1e40] sm:$0xff] }
 0x105   : > { %1123 = vst [vmem:[%s5931_s26 + $0xf30] sm:$0xff] %v1122_v38  ;;  %1125 = vst [vmem:[%s5931_s26 + $0xf38] sm:$0xff] %v1124_v39  ;;  %v1128_v41 = vld [vmem:[%s5926_s25 + $0x1e48] sm:$0xff]  ;;  %v1130_v42 = vld [vmem:[%s5926_s25 + $0x1e50] sm:$0xff] }
 0x106   : > { %1127 = vst [vmem:[%s5931_s26 + $0xf40] sm:$0xff] %v1126_v40  ;;  %v1132_v43 = vld [vmem:[%s5926_s25 + $0x1e58] sm:$0xff]  ;;  %1129 = vst [vmem:[%s5931_s26 + $0xf48] sm:$0xff] %v1128_v41  ;;  %v1134_v44 = vld [vmem:[%s5926_s25 + $0x1e60] sm:$0xff] }
 0x107   : > { %1131 = vst [vmem:[%s5931_s26 + $0xf50] sm:$0xff] %v1130_v42  ;;  %1133 = vst [vmem:[%s5931_s26 + $0xf58] sm:$0xff] %v1132_v43  ;;  %v1136_v45 = vld [vmem:[%s5926_s25 + $0x1e68] sm:$0xff]  ;;  %v1138_v46 = vld [vmem:[%s5926_s25 + $0x1e70] sm:$0xff] }
 0x108   : > { %1135 = vst [vmem:[%s5931_s26 + $0xf60] sm:$0xff] %v1134_v44  ;;  %1137 = vst [vmem:[%s5931_s26 + $0xf68] sm:$0xff] %v1136_v45  ;;  %v1140_v47 = vld [vmem:[%s5926_s25 + $0x1e78] sm:$0xff]  ;;  %v1142_v48 = vld [vmem:[%s5926_s25 + $0x1f00] sm:$0xff] }
 0x109   : > { %1139 = vst [vmem:[%s5931_s26 + $0xf70] sm:$0xff] %v1138_v46  ;;  %v1144_v49 = vld [vmem:[%s5926_s25 + $0x1f08] sm:$0xff]  ;;  %1141 = vst [vmem:[%s5931_s26 + $0xf78] sm:$0xff] %v1140_v47  ;;  %v1146_v50 = vld [vmem:[%s5926_s25 + $0x1f10] sm:$0xff] }
 0x10a   : > { %1143 = vst [vmem:[%s5931_s26 + $0xf80] sm:$0xff] %v1142_v48  ;;  %1145 = vst [vmem:[%s5931_s26 + $0xf88] sm:$0xff] %v1144_v49  ;;  %v1148_v51 = vld [vmem:[%s5926_s25 + $0x1f18] sm:$0xff]  ;;  %v1150_v52 = vld [vmem:[%s5926_s25 + $0x1f20] sm:$0xff] }
 0x10b   : > { %1147 = vst [vmem:[%s5931_s26 + $0xf90] sm:$0xff] %v1146_v50  ;;  %1149 = vst [vmem:[%s5931_s26 + $0xf98] sm:$0xff] %v1148_v51  ;;  %v1152_v53 = vld [vmem:[%s5926_s25 + $0x1f28] sm:$0xff]  ;;  %v1154_v54 = vld [vmem:[%s5926_s25 + $0x1f30] sm:$0xff] }
 0x10c   : > { %1151 = vst [vmem:[%s5931_s26 + $0xfa0] sm:$0xff] %v1150_v52  ;;  %v1156_v55 = vld [vmem:[%s5926_s25 + $0x1f38] sm:$0xff]  ;;  %1153 = vst [vmem:[%s5931_s26 + $0xfa8] sm:$0xff] %v1152_v53  ;;  %v1158_v56 = vld [vmem:[%s5926_s25 + $0x1f40] sm:$0xff] }
 0x10d   : > { %1155 = vst [vmem:[%s5931_s26 + $0xfb0] sm:$0xff] %v1154_v54  ;;  %1157 = vst [vmem:[%s5931_s26 + $0xfb8] sm:$0xff] %v1156_v55  ;;  %v1160_v57 = vld [vmem:[%s5926_s25 + $0x1f48] sm:$0xff]  ;;  %v1162_v58 = vld [vmem:[%s5926_s25 + $0x1f50] sm:$0xff] }
 0x10e   : > { %1159 = vst [vmem:[%s5931_s26 + $0xfc0] sm:$0xff] %v1158_v56  ;;  %1161 = vst [vmem:[%s5931_s26 + $0xfc8] sm:$0xff] %v1160_v57  ;;  %v1164_v59 = vld [vmem:[%s5926_s25 + $0x1f58] sm:$0xff]  ;;  %v1166_v60 = vld [vmem:[%s5926_s25 + $0x1f60] sm:$0xff] }
 0x10f   : > { %1163 = vst [vmem:[%s5931_s26 + $0xfd0] sm:$0xff] %v1162_v58  ;;  %v1168_v61 = vld [vmem:[%s5926_s25 + $0x1f68] sm:$0xff]  ;;  %1165 = vst [vmem:[%s5931_s26 + $0xfd8] sm:$0xff] %v1164_v59  ;;  %v1170_v62 = vld [vmem:[%s5926_s25 + $0x1f70] sm:$0xff] }
 0x110   : > { %1167 = vst [vmem:[%s5931_s26 + $0xfe0] sm:$0xff] %v1166_v60  ;;  %1169 = vst [vmem:[%s5931_s26 + $0xfe8] sm:$0xff] %v1168_v61  ;;  %v1172_v63 = vld [vmem:[%s5926_s25 + $0x1f78] sm:$0xff] }
 0x111   : > { %1171 = vst [vmem:[%s5931_s26 + $0xff0] sm:$0xff] %v1170_v62  ;;  %1173 = vst [vmem:[%s5931_s26 + $0xff8] sm:$0xff] %v1172_v63 }
 0x112 PF: > { %p5266_p5 = scmp.ge.s32.totalorder %s5869_s14, 1  ;;  %p1178_p6 = scmp.lt.s32.totalorder %s5869_s14, 3 }
 0x114   : > { %p1179_p7 = pnand %p5266_p5, %p1178_p6 }
 0x115   : > { %s1185_s27 = sand.u32 (!%p1179_p7), 1, %s5861_s12   ;;  %v6960_v0 = vld [vmem:[%s7591_s0] sm:$0xff] (!%p1179_p7)  ;;  %v5871_v60 = vmov (!%p1179_p7), 0   ;;  %s5268_s7 = sshll.u32 (!%p1179_p7), %s5259_s15, 5 }
 0x116   : > { %1182 = sbr.rel (%p1179_p7) target bundleno = 1018 (0x3fa), region = 51  ;;  %s5267_s30 = sshll.u32 (!%p1179_p7), %s1185_s27, 12  ;;  %v6964_v1 = vcombine.high (!%p1179_p7), %v6960_v0, %v6960_v0  ;;  %5844 = vset.pattern.permute.xlu0 (!%p1179_p7), %v5871_v60 }
 0x117   : > { %s6966_s4 = scalar_lea.vmem (!%p1179_p7), [#allocation2], %s5267_s30  ;;  %p1210_p8 = scmp.lt.s32.totalorder (!%p1179_p7), %s5268_s7, 63 }
 0x118   : > { %v1216_v2 = vld [vmem:[%s6966_s4] sm:$0xff] (!%p1179_p7)  ;;  %v1217_v4 = vld [vmem:[%s6966_s4 + $0x8] sm:$0xff] (!%p1179_p7)  ;;  %4333 = vmatprep.mubr.bf16.mxu0 (!%p1179_p7), %v6964_v1  ;;  %4374 = vmatprep.mubr.bf16.mxu1 (!%p1179_p7), %v6964_v1 }
 0x119   : > { %v1232_v3 = vld [vmem:[%s6966_s4 + $0x80] sm:$0xff] (!%p1179_p7)  ;;  %v1233_v6 = vld [vmem:[%s6966_s4 + $0x88] sm:$0xff] (!%p1179_p7) }
 0x11a   : > { %v5273_v5 = vcombine.high (!%p1179_p7), %v1216_v2, %v1232_v3  ;;  %v5272_v7 = vcombine.low (!%p1179_p7), %v1216_v2, %v1232_v3  ;;  %v1248_v8 = vld [vmem:[%s6966_s4 + $0x100] sm:$0xff] (!%p1179_p7)  ;;  %v5275_v10 = vcombine.high (!%p1179_p7), %v1217_v4, %v1233_v6  ;;  %v5274_v11 = vcombine.low (!%p1179_p7), %v1217_v4, %v1233_v6  ;;  %v1249_v13 = vld [vmem:[%s6966_s4 + $0x108] sm:$0xff] (!%p1179_p7) }
 0x11b   : > { %v1264_v9 = vld [vmem:[%s6966_s4 + $0x180] sm:$0xff] (!%p1179_p7)  ;;  %v1265_v14 = vld [vmem:[%s6966_s4 + $0x188] sm:$0xff] (!%p1179_p7) }
 0x11c   : > { %v5305_v12 = vcombine.high (!%p1179_p7), %v1248_v8, %v1264_v9  ;;  %v1280_v15 = vld [vmem:[%s6966_s4 + $0x200] sm:$0xff] (!%p1179_p7)  ;;  %4301 = vmatprep.subr.bf16.mxu0 (!%p1179_p7), %v5273_v5  ;;  %v5307_v16 = vcombine.high (!%p1179_p7), %v1249_v13, %v1265_v14  ;;  %v1281_v18 = vld [vmem:[%s6966_s4 + $0x208] sm:$0xff] (!%p1179_p7)  ;;  %4342 = vmatprep.subr.bf16.mxu1 (!%p1179_p7), %v5275_v10  ;;  %v5304_v20 = vcombine.low (!%p1179_p7), %v1248_v8, %v1264_v9 }
 0x11d   : > { %v1296_v17 = vld [vmem:[%s6966_s4 + $0x280] sm:$0xff]  ;;  %v1297_v19 = vld [vmem:[%s6966_s4 + $0x288] sm:$0xff]  ;;  %4302 = vmatpush1.bf16.msra.mxu0 %v5272_v7  ;;  %4343 = vmatpush1.bf16.msra.mxu1 %v5274_v11  ;;  %v5306_v21 = vcombine.low %v1249_v13, %v1265_v14  ;;  %s7599_s7 = smov (!%p1210_p8, %s5268_s7), 63 }
 0x11e   : > { %4303 = vmatprep.subr.bf16.mxu0 %v5305_v12  ;;  %v5337_v22 = vcombine.high %v1280_v15, %v1296_v17  ;;  %4344 = vmatprep.subr.bf16.mxu1 %v5307_v16  ;;  %v5339_v23 = vcombine.high %v1281_v18, %v1297_v19  ;;  %v1312_v24 = vld [vmem:[%s6966_s4 + $0x300] sm:$0xff]  ;;  %v1313_v26 = vld [vmem:[%s6966_s4 + $0x308] sm:$0xff]  ;;  %v5336_v28 = vcombine.low %v1280_v15, %v1296_v17  ;;  %s5269_s8 = sshll.u32 %s7599_s7, 2 }
 0x11f   : > { %v1328_v25 = vld [vmem:[%s6966_s4 + $0x380] sm:$0xff]  ;;  %v1329_v27 = vld [vmem:[%s6966_s4 + $0x388] sm:$0xff]  ;;  %v5338_v29 = vcombine.low %v1281_v18, %v1297_v19  ;;  %s7301_s11 = scalar_lea.vmem %s7594_s3, %s5269_s8 }
 0x120   : > { %v5369_v30 = vcombine.high %v1312_v24, %v1328_v25  ;;  %v5371_v31 = vcombine.high %v1313_v26, %v1329_v27  ;;  %v1344_v32 = vld [vmem:[%s6966_s4 + $0x400] sm:$0xff]  ;;  %v1345_v34 = vld [vmem:[%s6966_s4 + $0x408] sm:$0xff]  ;;  %v5368_v36 = vcombine.low %v1312_v24, %v1328_v25  ;;  %v5370_v37 = vcombine.low %v1313_v26, %v1329_v27 }
 0x121   : > { %4304 = vmatpush1.bf16.msra.mxu0 %v5304_v20  ;;  %4345 = vmatpush1.bf16.msra.mxu1 %v5306_v21  ;;  %v1360_v33 = vld [vmem:[%s6966_s4 + $0x480] sm:$0xff]  ;;  %v1361_v35 = vld [vmem:[%s6966_s4 + $0x488] sm:$0xff] }
 0x122   : > { %4305 = vmatprep.subr.bf16.mxu0 %v5337_v22  ;;  %4346 = vmatprep.subr.bf16.mxu1 %v5339_v23  ;;  %v5401_v38 = vcombine.high %v1344_v32, %v1360_v33  ;;  %v5403_v39 = vcombine.high %v1345_v34, %v1361_v35  ;;  %v1376_v40 = vld [vmem:[%s6966_s4 + $0x500] sm:$0xff]  ;;  %v1377_v42 = vld [vmem:[%s6966_s4 + $0x508] sm:$0xff]  ;;  %v5400_v44 = vcombine.low %v1344_v32, %v1360_v33 }
 0x123   : > { %v1392_v41 = vld [vmem:[%s6966_s4 + $0x580] sm:$0xff]  ;;  %v1393_v43 = vld [vmem:[%s6966_s4 + $0x588] sm:$0xff]  ;;  %v5402_v45 = vcombine.low %v1345_v34, %v1361_v35 }
 0x124   : > { %v5433_v46 = vcombine.high %v1376_v40, %v1392_v41  ;;  %v5435_v47 = vcombine.high %v1377_v42, %v1393_v43  ;;  %v1408_v48 = vld [vmem:[%s6966_s4 + $0x600] sm:$0xff]  ;;  %v1409_v50 = vld [vmem:[%s6966_s4 + $0x608] sm:$0xff]  ;;  %v5432_v52 = vcombine.low %v1376_v40, %v1392_v41  ;;  %v5434_v53 = vcombine.low %v1377_v42, %v1393_v43 }
 0x125   : > { %4306 = vmatpush1.bf16.msra.mxu0 %v5336_v28  ;;  %4347 = vmatpush1.bf16.msra.mxu1 %v5338_v29  ;;  %v1424_v49 = vld [vmem:[%s6966_s4 + $0x680] sm:$0xff]  ;;  %v1425_v51 = vld [vmem:[%s6966_s4 + $0x688] sm:$0xff] }
 0x126   : > { %4307 = vmatprep.subr.bf16.mxu0 %v5369_v30  ;;  %4348 = vmatprep.subr.bf16.mxu1 %v5371_v31  ;;  %v5465_v54 = vcombine.high %v1408_v48, %v1424_v49  ;;  %v5467_v55 = vcombine.high %v1409_v50, %v1425_v51  ;;  %v1440_v56 = vld [vmem:[%s6966_s4 + $0x700] sm:$0xff]  ;;  %v1441_v58 = vld [vmem:[%s6966_s4 + $0x708] sm:$0xff]  ;;  %v5464_v61 = vcombine.low %v1408_v48, %v1424_v49 }
 0x127   : > { %v1456_v57 = vld [vmem:[%s6966_s4 + $0x780] sm:$0xff]  ;;  %v1457_v59 = vld [vmem:[%s6966_s4 + $0x788] sm:$0xff]  ;;  %v5466_v62 = vcombine.low %v1409_v50, %v1425_v51 }
 0x128   : > { %v5497_v63 = vcombine.high %v1440_v56, %v1456_v57  ;;  %v5499_v2 = vcombine.high %v1441_v58, %v1457_v59  ;;  %v1472_v3 = vld [vmem:[%s6966_s4 + $0x800] sm:$0xff]  ;;  %v1473_v5 = vld [vmem:[%s6966_s4 + $0x808] sm:$0xff]  ;;  %v5496_v7 = vcombine.low %v1440_v56, %v1456_v57  ;;  %v5498_v8 = vcombine.low %v1441_v58, %v1457_v59 }
 0x129   : > { %4308 = vmatpush1.bf16.msra.mxu0 %v5368_v36  ;;  %4349 = vmatpush1.bf16.msra.mxu1 %v5370_v37  ;;  %v1488_v4 = vld [vmem:[%s6966_s4 + $0x880] sm:$0xff]  ;;  %v1489_v6 = vld [vmem:[%s6966_s4 + $0x888] sm:$0xff] }
 0x12a   : > { %4309 = vmatprep.subr.bf16.mxu0 %v5401_v38  ;;  %4350 = vmatprep.subr.bf16.mxu1 %v5403_v39  ;;  %v5529_v9 = vcombine.high %v1472_v3, %v1488_v4  ;;  %v5531_v10 = vcombine.high %v1473_v5, %v1489_v6  ;;  %v1504_v11 = vld [vmem:[%s6966_s4 + $0x900] sm:$0xff]  ;;  %v1505_v13 = vld [vmem:[%s6966_s4 + $0x908] sm:$0xff]  ;;  %v5528_v15 = vcombine.low %v1472_v3, %v1488_v4 }
 0x12b   : > { %v1520_v12 = vld [vmem:[%s6966_s4 + $0x980] sm:$0xff]  ;;  %v1521_v14 = vld [vmem:[%s6966_s4 + $0x988] sm:$0xff]  ;;  %v5530_v16 = vcombine.low %v1473_v5, %v1489_v6  ;;  %v1218_v6 = vld [vmem:[%s6966_s4 + $0x10] sm:$0xff] }
 0x12c   : > { %v5561_v17 = vcombine.high %v1504_v11, %v1520_v12  ;;  %v5563_v18 = vcombine.high %v1505_v13, %v1521_v14  ;;  %v1536_v19 = vld [vmem:[%s6966_s4 + $0xa00] sm:$0xff]  ;;  %v1537_v21 = vld [vmem:[%s6966_s4 + $0xa08] sm:$0xff]  ;;  %v5560_v23 = vcombine.low %v1504_v11, %v1520_v12  ;;  %v5562_v24 = vcombine.low %v1505_v13, %v1521_v14  ;;  %v1250_v14 = vld [vmem:[%s6966_s4 + $0x110] sm:$0xff] }
 0x12d   : > { %4310 = vmatpush1.bf16.msra.mxu0 %v5400_v44  ;;  %4351 = vmatpush1.bf16.msra.mxu1 %v5402_v45  ;;  %v1552_v20 = vld [vmem:[%s6966_s4 + $0xa80] sm:$0xff]  ;;  %v1553_v22 = vld [vmem:[%s6966_s4 + $0xa88] sm:$0xff] }
 0x12e   : > { %4311 = vmatprep.subr.bf16.mxu0 %v5433_v46  ;;  %4352 = vmatprep.subr.bf16.mxu1 %v5435_v47  ;;  %v5593_v25 = vcombine.high %v1536_v19, %v1552_v20  ;;  %v5595_v26 = vcombine.high %v1537_v21, %v1553_v22  ;;  %v1568_v27 = vld [vmem:[%s6966_s4 + $0xb00] sm:$0xff]  ;;  %v1569_v29 = vld [vmem:[%s6966_s4 + $0xb08] sm:$0xff]  ;;  %v5592_v31 = vcombine.low %v1536_v19, %v1552_v20 }
 0x12f   : > { %v1584_v28 = vld [vmem:[%s6966_s4 + $0xb80] sm:$0xff]  ;;  %v1585_v30 = vld [vmem:[%s6966_s4 + $0xb88] sm:$0xff]  ;;  %v5594_v32 = vcombine.low %v1537_v21, %v1553_v22 }
 0x130   : > { %v5625_v33 = vcombine.high %v1568_v27, %v1584_v28  ;;  %v5627_v34 = vcombine.high %v1569_v29, %v1585_v30  ;;  %v1600_v35 = vld [vmem:[%s6966_s4 + $0xc00] sm:$0xff]  ;;  %v1601_v37 = vld [vmem:[%s6966_s4 + $0xc08] sm:$0xff]  ;;  %v5624_v39 = vcombine.low %v1568_v27, %v1584_v28  ;;  %v5626_v40 = vcombine.low %v1569_v29, %v1585_v30  ;;  %v1314_v30 = vld [vmem:[%s6966_s4 + $0x310] sm:$0xff] }
 0x131   : > { %4312 = vmatpush1.bf16.msra.mxu0 %v5432_v52  ;;  %4353 = vmatpush1.bf16.msra.mxu1 %v5434_v53  ;;  %v1616_v36 = vld [vmem:[%s6966_s4 + $0xc80] sm:$0xff]  ;;  %v1617_v38 = vld [vmem:[%s6966_s4 + $0xc88] sm:$0xff] }
 0x132   : > { %4313 = vmatprep.subr.bf16.mxu0 %v5465_v54  ;;  %4354 = vmatprep.subr.bf16.mxu1 %v5467_v55  ;;  %v5657_v41 = vcombine.high %v1600_v35, %v1616_v36  ;;  %v5659_v42 = vcombine.high %v1601_v37, %v1617_v38  ;;  %v1632_v43 = vld [vmem:[%s6966_s4 + $0xd00] sm:$0xff]  ;;  %v1633_v45 = vld [vmem:[%s6966_s4 + $0xd08] sm:$0xff]  ;;  %v5656_v47 = vcombine.low %v1600_v35, %v1616_v36 }
 0x133   : > { %v1648_v44 = vld [vmem:[%s6966_s4 + $0xd80] sm:$0xff]  ;;  %v1649_v46 = vld [vmem:[%s6966_s4 + $0xd88] sm:$0xff]  ;;  %v5658_v48 = vcombine.low %v1601_v37, %v1617_v38  ;;  %v1346_v38 = vld [vmem:[%s6966_s4 + $0x410] sm:$0xff] }
 0x134   : > { %v5689_v49 = vcombine.high %v1632_v43, %v1648_v44  ;;  %v1728_v50 = vld [vmem:[%s7593_s2] sm:$0xff]  ;;  %v5691_v51 = vcombine.high %v1633_v45, %v1649_v46  ;;  %v1665_v54 = vld [vmem:[%s6966_s4 + $0xe08] sm:$0xff]  ;;  %v5688_v56 = vcombine.low %v1632_v43, %v1648_v44  ;;  %v5690_v57 = vcombine.low %v1633_v45, %v1649_v46  ;;  %v1378_v46 = vld [vmem:[%s6966_s4 + $0x510] sm:$0xff] }
 0x135   : > { %4314 = vmatpush1.bf16.msra.mxu0 %v5464_v61  ;;  %4355 = vmatpush1.bf16.msra.mxu1 %v5466_v62  ;;  %v1664_v52 = vld [vmem:[%s6966_s4 + $0xe00] sm:$0xff]  ;;  %v1681_v55 = vld [vmem:[%s6966_s4 + $0xe88] sm:$0xff] }
 0x136   : > { %4315 = vmatprep.subr.bf16.mxu0 %v5497_v63  ;;  %4356 = vmatprep.subr.bf16.mxu1 %v5499_v2  ;;  %v1680_v53 = vld [vmem:[%s6966_s4 + $0xe80] sm:$0xff]  ;;  %v5723_v59 = vcombine.high %v1665_v54, %v1681_v55  ;;  %v1697_v62 = vld [vmem:[%s6966_s4 + $0xf08] sm:$0xff]  ;;  %v5722_v3 = vcombine.low %v1665_v54, %v1681_v55  ;;  %v1410_v54 = vld [vmem:[%s6966_s4 + $0x610] sm:$0xff] }
 0x137   : > { %1731 = vperm.xlu0 %5844, %v1728_v50   ;;  %v5721_v58 = vcombine.high %v1664_v52, %v1680_v53  ;;  %v1696_v60 = vld [vmem:[%s6966_s4 + $0xf00] sm:$0xff]  ;;  %v1713_v63 = vld [vmem:[%s6966_s4 + $0xf88] sm:$0xff]  ;;  %v5720_v2 = vcombine.low %v1664_v52, %v1680_v53  ;;  %v1426_v55 = vld [vmem:[%s6966_s4 + $0x690] sm:$0xff] }
 0x138   : > { %v1712_v61 = vld [vmem:[%s6966_s4 + $0xf80] sm:$0xff]  ;;  %v5755_v5 = vcombine.high %v1697_v62, %v1713_v63  ;;  %v5754_v11 = vcombine.low %v1697_v62, %v1713_v63  ;;  %v1442_v62 = vld [vmem:[%s6966_s4 + $0x710] sm:$0xff] }
 0x139   : > { %4316 = vmatpush1.bf16.msra.mxu0 %v5496_v7  ;;  %4357 = vmatpush1.bf16.msra.mxu1 %v5498_v8  ;;  %v5753_v4 = vcombine.high %v1696_v60, %v1712_v61  ;;  %v1234_v7 = vld [vmem:[%s6966_s4 + $0x90] sm:$0xff]  ;;  %v1219_v8 = vld [vmem:[%s6966_s4 + $0x18] sm:$0xff] }
 0x13a   : > { %4317 = vmatprep.subr.bf16.mxu0 %v5529_v9  ;;  %4358 = vmatprep.subr.bf16.mxu1 %v5531_v10  ;;  %v1235_v9 = vld [vmem:[%s6966_s4 + $0x98] sm:$0xff]  ;;  %v5752_v10 = vcombine.low %v1696_v60, %v1712_v61  ;;  %v5277_v12 = vcombine.high %v1218_v6, %v1234_v7  ;;  %v5276_v19 = vcombine.low %v1218_v6, %v1234_v7  ;;  %v1458_v63 = vld [vmem:[%s6966_s4 + $0x790] sm:$0xff] }
 0x13b   : > { %v5279_v13 = vcombine.high %v1219_v8, %v1235_v9  ;;  %v5278_v20 = vcombine.low %v1219_v8, %v1235_v9  ;;  %v5469_v60 = vcombine.high %v1410_v54, %v1426_v55  ;;  %v5501_v6 = vcombine.high %v1442_v62, %v1458_v63  ;;  %v1474_v8 = vld [vmem:[%s6966_s4 + $0x810] sm:$0xff] }
 0x13c   : > { %v1490_v9 = vld [vmem:[%s6966_s4 + $0x890] sm:$0xff] }
 0x13d   : > { %4318 = vmatpush1.bf16.msra.mxu0 %v5528_v15  ;;  %4359 = vmatpush1.bf16.msra.mxu1 %v5530_v16  ;;  %v1266_v15 = vld [vmem:[%s6966_s4 + $0x190] sm:$0xff]  ;;  %v7045_v16 = vcombine.low %v6960_v0, %v6960_v0  ;;  %v1283_v0 = vld [vmem:[%s6966_s4 + $0x218] sm:$0xff] }
 0x13e   : > { %4319 = vmatprep.subr.bf16.mxu0 %v5561_v17  ;;  %4360 = vmatprep.subr.bf16.mxu1 %v5563_v18  ;;  %v1251_v17 = vld [vmem:[%s6966_s4 + $0x118] sm:$0xff]  ;;  %v5309_v21 = vcombine.high %v1250_v14, %v1266_v15 }
 0x13f   : > { %v1267_v18 = vld [vmem:[%s6966_s4 + $0x198] sm:$0xff] }
 0x140   : > { %v5311_v22 = vcombine.high %v1251_v17, %v1267_v18  ;;  %v5310_v27 = vcombine.low %v1251_v17, %v1267_v18  ;;  %v1506_v17 = vld [vmem:[%s6966_s4 + $0x910] sm:$0xff] }
 0x141   : > { %4320 = vmatpush1.bf16.msra.mxu0 %v5560_v23  ;;  %4361 = vmatpush1.bf16.msra.mxu1 %v5562_v24  ;;  %v1282_v23 = vld [vmem:[%s6966_s4 + $0x210] sm:$0xff] }
 0x142   : > { %4321 = vmatprep.subr.bf16.mxu0 %v5593_v25  ;;  %4362 = vmatprep.subr.bf16.mxu1 %v5595_v26  ;;  %v1298_v24 = vld [vmem:[%s6966_s4 + $0x290] sm:$0xff]  ;;  %v1299_v25 = vld [vmem:[%s6966_s4 + $0x298] sm:$0xff]  ;;  %v5308_v26 = vcombine.low %v1250_v14, %v1266_v15  ;;  %v5533_v14 = vcombine.high %v1474_v8, %v1490_v9 }
 0x143   : > { %v5341_v28 = vcombine.high %v1282_v23, %v1298_v24  ;;  %v5343_v29 = vcombine.high %v1283_v0, %v1299_v25  ;;  %v5342_v35 = vcombine.low %v1283_v0, %v1299_v25  ;;  %v1522_v18 = vld [vmem:[%s6966_s4 + $0x990] sm:$0xff] }
 0x144   : > { %v1538_v0 = vld [vmem:[%s6966_s4 + $0xa10] sm:$0xff] }
 0x145   : > { %4322 = vmatpush1.bf16.msra.mxu0 %v5592_v31  ;;  %4363 = vmatpush1.bf16.msra.mxu1 %v5594_v32  ;;  %v1330_v31 = vld [vmem:[%s6966_s4 + $0x390] sm:$0xff]  ;;  %v1315_v32 = vld [vmem:[%s6966_s4 + $0x318] sm:$0xff] }
 0x146   : > { %4323 = vmatprep.subr.bf16.mxu0 %v5625_v33  ;;  %4364 = vmatprep.subr.bf16.mxu1 %v5627_v34  ;;  %v1331_v33 = vld [vmem:[%s6966_s4 + $0x398] sm:$0xff]  ;;  %v5340_v34 = vcombine.low %v1282_v23, %v1298_v24  ;;  %v5373_v36 = vcombine.high %v1314_v30, %v1330_v31  ;;  %v5565_v23 = vcombine.high %v1506_v17, %v1522_v18  ;;  %v1554_v25 = vld [vmem:[%s6966_s4 + $0xa90] sm:$0xff] }
 0x147   : > { %v5375_v37 = vcombine.high %v1315_v32, %v1331_v33  ;;  %v5374_v43 = vcombine.low %v1315_v32, %v1331_v33  ;;  %v1570_v32 = vld [vmem:[%s6966_s4 + $0xb10] sm:$0xff] }
 0x148   : > { %v1586_v33 = vld [vmem:[%s6966_s4 + $0xb90] sm:$0xff] }
 0x149   : > { %4324 = vmatpush1.bf16.msra.mxu0 %v5624_v39  ;;  %4365 = vmatpush1.bf16.msra.mxu1 %v5626_v40  ;;  %v1362_v39 = vld [vmem:[%s6966_s4 + $0x490] sm:$0xff]  ;;  %v1347_v40 = vld [vmem:[%s6966_s4 + $0x418] sm:$0xff] }
 0x14a   : > { %4325 = vmatprep.subr.bf16.mxu0 %v5657_v41  ;;  %4366 = vmatprep.subr.bf16.mxu1 %v5659_v42  ;;  %v1363_v41 = vld [vmem:[%s6966_s4 + $0x498] sm:$0xff]  ;;  %v5372_v42 = vcombine.low %v1314_v30, %v1330_v31  ;;  %v5405_v44 = vcombine.high %v1346_v38, %v1362_v39  ;;  %v5404_v50 = vcombine.low %v1346_v38, %v1362_v39 }
 0x14b   : > { %v5407_v45 = vcombine.high %v1347_v40, %v1363_v41  ;;  %v5597_v30 = vcombine.high %v1538_v0, %v1554_v25  ;;  %v5629_v38 = vcombine.high %v1570_v32, %v1586_v33 }
 0x14d   : > { %4326 = vmatpush1.bf16.msra.mxu0 %v5656_v47  ;;  %4367 = vmatpush1.bf16.msra.mxu1 %v5658_v48  ;;  %v1394_v47 = vld [vmem:[%s6966_s4 + $0x590] sm:$0xff]  ;;  %v1379_v48 = vld [vmem:[%s6966_s4 + $0x518] sm:$0xff] }
 0x14e   : > { %4327 = vmatprep.subr.bf16.mxu0 %v5689_v49  ;;  %4368 = vmatprep.subr.bf16.mxu1 %v5691_v51  ;;  %v1395_v49 = vld [vmem:[%s6966_s4 + $0x598] sm:$0xff]  ;;  %v5406_v51 = vcombine.low %v1347_v40, %v1363_v41  ;;  %v5437_v52 = vcombine.high %v1378_v46, %v1394_v47  ;;  %v1602_v40 = vld [vmem:[%s6966_s4 + $0xc10] sm:$0xff] }
 0x14f   : > { %v5439_v53 = vcombine.high %v1379_v48, %v1395_v49  ;;  %v1618_v41 = vld [vmem:[%s6966_s4 + $0xc90] sm:$0xff] }
 0x151   : > { %4328 = vmatpush1.bf16.msra.mxu0 %v5688_v56  ;;  %4369 = vmatpush1.bf16.msra.mxu1 %v5690_v57  ;;  %v1411_v56 = vld [vmem:[%s6966_s4 + $0x618] sm:$0xff] }
 0x152   : > { %4329 = vmatprep.subr.bf16.mxu0 %v5721_v58  ;;  %4370 = vmatprep.subr.bf16.mxu1 %v5723_v59  ;;  %v1427_v57 = vld [vmem:[%s6966_s4 + $0x698] sm:$0xff]  ;;  %v5436_v58 = vcombine.low %v1378_v46, %v1394_v47  ;;  %v5438_v59 = vcombine.low %v1379_v48, %v1395_v49  ;;  %v5661_v46 = vcombine.high %v1602_v40, %v1618_v41  ;;  %v1634_v48 = vld [vmem:[%s6966_s4 + $0xd10] sm:$0xff] }
 0x153   : > { %v5471_v61 = vcombine.high %v1411_v56, %v1427_v57  ;;  %v1650_v49 = vld [vmem:[%s6966_s4 + $0xd90] sm:$0xff] }
 0x155   : > { %4330 = vmatpush1.bf16.msra.mxu0 %v5720_v2  ;;  %4371 = vmatpush1.bf16.msra.mxu1 %v5722_v3  ;;  %v1443_v2 = vld [vmem:[%s6966_s4 + $0x718] sm:$0xff] }
 0x156   : > { %4331 = vmatprep.subr.bf16.mxu0 %v5753_v4  ;;  %4372 = vmatprep.subr.bf16.mxu1 %v5755_v5  ;;  %v1459_v3 = vld [vmem:[%s6966_s4 + $0x798] sm:$0xff]  ;;  %v5468_v4 = vcombine.low %v1410_v54, %v1426_v55  ;;  %v5470_v5 = vcombine.low %v1411_v56, %v1427_v57  ;;  %v5693_v54 = vcombine.high %v1634_v48, %v1650_v49  ;;  %v1666_v56 = vld [vmem:[%s6966_s4 + $0xe10] sm:$0xff] }
 0x157   : > { %v5503_v7 = vcombine.high %v1443_v2, %v1459_v3  ;;  %v1682_v57 = vld [vmem:[%s6966_s4 + $0xe90] sm:$0xff] }
 0x159   : > { %4332 = vmatpush1.bf16.msra.mxu0 %v5752_v10  ;;  %4373 = vmatpush1.bf16.msra.mxu1 %v5754_v11  ;;  %v1475_v10 = vld [vmem:[%s6966_s4 + $0x818] sm:$0xff] }
 0x15a   : > { %4383 = vmatprep.subr.bf16.mxu0 %v5277_v12  ;;  %4424 = vmatprep.subr.bf16.mxu1 %v5279_v13  ;;  %v1491_v11 = vld [vmem:[%s6966_s4 + $0x898] sm:$0xff]  ;;  %v5500_v12 = vcombine.low %v1442_v62, %v1458_v63  ;;  %v5502_v13 = vcombine.low %v1443_v2, %v1459_v3  ;;  %v5725_v62 = vcombine.high %v1666_v56, %v1682_v57  ;;  %v1698_v2 = vld [vmem:[%s6966_s4 + $0xf10] sm:$0xff] }
 0x15b   : > { %v5535_v15 = vcombine.high %v1475_v10, %v1491_v11  ;;  %v1714_v3 = vld [vmem:[%s6966_s4 + $0xf90] sm:$0xff] }
 0x15c   : > { %4334 = vmatmul.mubr.bf16.vlgmr.msra.gmra.mrb[0].mxu0 %v7045_v16  ;;  %4375 = vmatmul.mubr.bf16.vlgmr.msra.gmra.mrb[0].mxu1 %v7045_v16 }
 0x15d   : > { %4384 = vmatpush1.bf16.msra.mxu0 %v5276_v19  ;;  %4425 = vmatpush1.bf16.msra.mxu1 %v5278_v20  ;;  %v1507_v19 = vld [vmem:[%s6966_s4 + $0x918] sm:$0xff] }
 0x15e   : > { %4385 = vmatprep.subr.bf16.mxu0 %v5309_v21  ;;  %4426 = vmatprep.subr.bf16.mxu1 %v5311_v22  ;;  %v1523_v20 = vld [vmem:[%s6966_s4 + $0x998] sm:$0xff]  ;;  %v5532_v21 = vcombine.low %v1474_v8, %v1490_v9  ;;  %v5534_v22 = vcombine.low %v1475_v10, %v1491_v11  ;;  %v5757_v8 = vcombine.high %v1698_v2, %v1714_v3  ;;  %v1220_v10 = vld [vmem:[%s6966_s4 + $0x20] sm:$0xff] }
 0x15f   : > { %4415 = vmatprep.mubr.bf16.mxu0 %v6964_v1  ;;  %4456 = vmatprep.mubr.bf16.mxu1 %v6964_v1  ;;  %v5567_v24 = vcombine.high %v1507_v19, %v1523_v20  ;;  %v1236_v11 = vld [vmem:[%s6966_s4 + $0xa0] sm:$0xff] }
 0x161   : > { %4386 = vmatpush1.bf16.msra.mxu0 %v5308_v26  ;;  %4427 = vmatpush1.bf16.msra.mxu1 %v5310_v27  ;;  %v1539_v26 = vld [vmem:[%s6966_s4 + $0xa18] sm:$0xff] }
 0x162   : > { %4387 = vmatprep.subr.bf16.mxu0 %v5341_v28  ;;  %4428 = vmatprep.subr.bf16.mxu1 %v5343_v29  ;;  %v1555_v27 = vld [vmem:[%s6966_s4 + $0xa98] sm:$0xff]  ;;  %v5564_v28 = vcombine.low %v1506_v17, %v1522_v18  ;;  %v5566_v29 = vcombine.low %v1507_v19, %v1523_v20  ;;  %v5281_v17 = vcombine.high %v1220_v10, %v1236_v11  ;;  %v1252_v19 = vld [vmem:[%s6966_s4 + $0x120] sm:$0xff] }
 0x163   : > { %v5599_v31 = vcombine.high %v1539_v26, %v1555_v27  ;;  %v1268_v20 = vld [vmem:[%s6966_s4 + $0x1a0] sm:$0xff] }
 0x165   : > { %4388 = vmatpush1.bf16.msra.mxu0 %v5340_v34  ;;  %4429 = vmatpush1.bf16.msra.mxu1 %v5342_v35  ;;  %v1571_v34 = vld [vmem:[%s6966_s4 + $0xb18] sm:$0xff] }
 0x166   : > { %4389 = vmatprep.subr.bf16.mxu0 %v5373_v36  ;;  %4430 = vmatprep.subr.bf16.mxu1 %v5375_v37  ;;  %v1587_v35 = vld [vmem:[%s6966_s4 + $0xb98] sm:$0xff]  ;;  %v5596_v36 = vcombine.low %v1538_v0, %v1554_v25  ;;  %v5598_v37 = vcombine.low %v1539_v26, %v1555_v27  ;;  %v5313_v0 = vcombine.high %v1252_v19, %v1268_v20  ;;  %v1284_v26 = vld [vmem:[%s6966_s4 + $0x220] sm:$0xff] }
 0x167   : > { %v5631_v39 = vcombine.high %v1571_v34, %v1587_v35  ;;  %v1300_v27 = vld [vmem:[%s6966_s4 + $0x2a0] sm:$0xff] }
 0x169   : > { %4390 = vmatpush1.bf16.msra.mxu0 %v5372_v42  ;;  %4431 = vmatpush1.bf16.msra.mxu1 %v5374_v43  ;;  %v1603_v42 = vld [vmem:[%s6966_s4 + $0xc18] sm:$0xff] }
 0x16a   : > { %4391 = vmatprep.subr.bf16.mxu0 %v5405_v44  ;;  %4432 = vmatprep.subr.bf16.mxu1 %v5407_v45  ;;  %v1619_v43 = vld [vmem:[%s6966_s4 + $0xc98] sm:$0xff]  ;;  %v5628_v44 = vcombine.low %v1570_v32, %v1586_v33  ;;  %v5630_v45 = vcombine.low %v1571_v34, %v1587_v35  ;;  %v5345_v32 = vcombine.high %v1284_v26, %v1300_v27  ;;  %v1316_v34 = vld [vmem:[%s6966_s4 + $0x320] sm:$0xff] }
 0x16b   : > { %v5663_v47 = vcombine.high %v1603_v42, %v1619_v43  ;;  %v1332_v35 = vld [vmem:[%s6966_s4 + $0x3a0] sm:$0xff] }
 0x16d   : > { %4392 = vmatpush1.bf16.msra.mxu0 %v5404_v50  ;;  %4433 = vmatpush1.bf16.msra.mxu1 %v5406_v51  ;;  %v1635_v50 = vld [vmem:[%s6966_s4 + $0xd18] sm:$0xff] }
 0x16e   : > { %4393 = vmatprep.subr.bf16.mxu0 %v5437_v52  ;;  %4434 = vmatprep.subr.bf16.mxu1 %v5439_v53  ;;  %v1651_v51 = vld [vmem:[%s6966_s4 + $0xd98] sm:$0xff]  ;;  %v5660_v52 = vcombine.low %v1602_v40, %v1618_v41  ;;  %v5662_v53 = vcombine.low %v1603_v42, %v1619_v43  ;;  %v5377_v40 = vcombine.high %v1316_v34, %v1332_v35  ;;  %v1348_v42 = vld [vmem:[%s6966_s4 + $0x420] sm:$0xff] }
 0x16f   : > { %v5695_v55 = vcombine.high %v1635_v50, %v1651_v51  ;;  %v1364_v43 = vld [vmem:[%s6966_s4 + $0x4a0] sm:$0xff] }
 0x171   : > { %4394 = vmatpush1.bf16.msra.mxu0 %v5436_v58  ;;  %4435 = vmatpush1.bf16.msra.mxu1 %v5438_v59  ;;  %v1667_v58 = vld [vmem:[%s6966_s4 + $0xe18] sm:$0xff] }
 0x172   : > { %4395 = vmatprep.subr.bf16.mxu0 %v5469_v60  ;;  %4436 = vmatprep.subr.bf16.mxu1 %v5471_v61  ;;  %v1683_v59 = vld [vmem:[%s6966_s4 + $0xe98] sm:$0xff]  ;;  %v5692_v60 = vcombine.low %v1634_v48, %v1650_v49  ;;  %v5694_v61 = vcombine.low %v1635_v50, %v1651_v51  ;;  %v5409_v48 = vcombine.high %v1348_v42, %v1364_v43  ;;  %v1380_v50 = vld [vmem:[%s6966_s4 + $0x520] sm:$0xff] }
 0x173   : > { %v5727_v63 = vcombine.high %v1667_v58, %v1683_v59  ;;  %v1396_v51 = vld [vmem:[%s6966_s4 + $0x5a0] sm:$0xff] }
 0x175   : > { %4396 = vmatpush1.bf16.msra.mxu0 %v5468_v4  ;;  %4437 = vmatpush1.bf16.msra.mxu1 %v5470_v5  ;;  %v1699_v4 = vld [vmem:[%s6966_s4 + $0xf18] sm:$0xff] }
 0x176   : > { %4397 = vmatprep.subr.bf16.mxu0 %v5501_v6  ;;  %4438 = vmatprep.subr.bf16.mxu1 %v5503_v7  ;;  %v1715_v5 = vld [vmem:[%s6966_s4 + $0xf98] sm:$0xff]  ;;  %v5724_v6 = vcombine.low %v1666_v56, %v1682_v57  ;;  %v5726_v7 = vcombine.low %v1667_v58, %v1683_v59  ;;  %v5441_v56 = vcombine.high %v1380_v50, %v1396_v51  ;;  %v1412_v58 = vld [vmem:[%s6966_s4 + $0x620] sm:$0xff] }
 0x177   : > { %v5759_v9 = vcombine.high %v1699_v4, %v1715_v5  ;;  %v1428_v59 = vld [vmem:[%s6966_s4 + $0x6a0] sm:$0xff] }
 0x179   : > { %4398 = vmatpush1.bf16.msra.mxu0 %v5500_v12  ;;  %4439 = vmatpush1.bf16.msra.mxu1 %v5502_v13  ;;  %v1221_v12 = vld [vmem:[%s6966_s4 + $0x28] sm:$0xff] }
 0x17a   : > { %4399 = vmatprep.subr.bf16.mxu0 %v5533_v14  ;;  %4440 = vmatprep.subr.bf16.mxu1 %v5535_v15  ;;  %v1237_v13 = vld [vmem:[%s6966_s4 + $0xa8] sm:$0xff]  ;;  %v5756_v14 = vcombine.low %v1698_v2, %v1714_v3  ;;  %v5758_v15 = vcombine.low %v1699_v4, %v1715_v5  ;;  %v5473_v2 = vcombine.high %v1412_v58, %v1428_v59  ;;  %v1444_v4 = vld [vmem:[%s6966_s4 + $0x720] sm:$0xff] }
 0x17b   : > { %v5283_v18 = vcombine.high %v1221_v12, %v1237_v13  ;;  %v1460_v5 = vld [vmem:[%s6966_s4 + $0x7a0] sm:$0xff] }
 0x17d   : > { %4400 = vmatpush1.bf16.msra.mxu0 %v5532_v21  ;;  %4441 = vmatpush1.bf16.msra.mxu1 %v5534_v22  ;;  %v1253_v21 = vld [vmem:[%s6966_s4 + $0x128] sm:$0xff] }
 0x17e   : > { %4401 = vmatprep.subr.bf16.mxu0 %v5565_v23  ;;  %4442 = vmatprep.subr.bf16.mxu1 %v5567_v24  ;;  %v1269_v22 = vld [vmem:[%s6966_s4 + $0x1a8] sm:$0xff]  ;;  %v5280_v23 = vcombine.low %v1220_v10, %v1236_v11  ;;  %v5282_v24 = vcombine.low %v1221_v12, %v1237_v13  ;;  %v5505_v10 = vcombine.high %v1444_v4, %v1460_v5  ;;  %v1476_v12 = vld [vmem:[%s6966_s4 + $0x820] sm:$0xff] }
 0x17f   : > { %v5315_v25 = vcombine.high %v1253_v21, %v1269_v22  ;;  %v1492_v13 = vld [vmem:[%s6966_s4 + $0x8a0] sm:$0xff] }
 0x181   : > { %4402 = vmatpush1.bf16.msra.mxu0 %v5564_v28  ;;  %4443 = vmatpush1.bf16.msra.mxu1 %v5566_v29  ;;  %v1285_v28 = vld [vmem:[%s6966_s4 + $0x228] sm:$0xff] }
 0x182   : > { %4403 = vmatprep.subr.bf16.mxu0 %v5597_v30  ;;  %4444 = vmatprep.subr.bf16.mxu1 %v5599_v31  ;;  %v1301_v29 = vld [vmem:[%s6966_s4 + $0x2a8] sm:$0xff]  ;;  %v5312_v30 = vcombine.low %v1252_v19, %v1268_v20  ;;  %v5314_v31 = vcombine.low %v1253_v21, %v1269_v22  ;;  %v5537_v19 = vcombine.high %v1476_v12, %v1492_v13  ;;  %v1508_v21 = vld [vmem:[%s6966_s4 + $0x920] sm:$0xff] }
 0x183   : > { %v5347_v33 = vcombine.high %v1285_v28, %v1301_v29  ;;  %v1524_v22 = vld [vmem:[%s6966_s4 + $0x9a0] sm:$0xff] }
 0x185   : > { %4404 = vmatpush1.bf16.msra.mxu0 %v5596_v36  ;;  %4445 = vmatpush1.bf16.msra.mxu1 %v5598_v37  ;;  %v1317_v36 = vld [vmem:[%s6966_s4 + $0x328] sm:$0xff] }
 0x186   : > { %4405 = vmatprep.subr.bf16.mxu0 %v5629_v38  ;;  %4446 = vmatprep.subr.bf16.mxu1 %v5631_v39  ;;  %v1333_v37 = vld [vmem:[%s6966_s4 + $0x3a8] sm:$0xff]  ;;  %v5344_v38 = vcombine.low %v1284_v26, %v1300_v27  ;;  %v5346_v39 = vcombine.low %v1285_v28, %v1301_v29  ;;  %v5569_v26 = vcombine.high %v1508_v21, %v1524_v22  ;;  %v1540_v28 = vld [vmem:[%s6966_s4 + $0xa20] sm:$0xff] }
 0x187   : > { %v5379_v41 = vcombine.high %v1317_v36, %v1333_v37  ;;  %v1556_v29 = vld [vmem:[%s6966_s4 + $0xaa0] sm:$0xff] }
 0x189   : > { %4406 = vmatpush1.bf16.msra.mxu0 %v5628_v44  ;;  %4447 = vmatpush1.bf16.msra.mxu1 %v5630_v45  ;;  %v1349_v44 = vld [vmem:[%s6966_s4 + $0x428] sm:$0xff] }
 0x18a   : > { %4407 = vmatprep.subr.bf16.mxu0 %v5661_v46  ;;  %4448 = vmatprep.subr.bf16.mxu1 %v5663_v47  ;;  %v1365_v45 = vld [vmem:[%s6966_s4 + $0x4a8] sm:$0xff]  ;;  %v5376_v46 = vcombine.low %v1316_v34, %v1332_v35  ;;  %v5378_v47 = vcombine.low %v1317_v36, %v1333_v37  ;;  %v5601_v34 = vcombine.high %v1540_v28, %v1556_v29  ;;  %v1572_v36 = vld [vmem:[%s6966_s4 + $0xb20] sm:$0xff] }
 0x18b   : > { %v5411_v49 = vcombine.high %v1349_v44, %v1365_v45  ;;  %v1588_v37 = vld [vmem:[%s6966_s4 + $0xba0] sm:$0xff] }
 0x18d   : > { %4408 = vmatpush1.bf16.msra.mxu0 %v5660_v52  ;;  %4449 = vmatpush1.bf16.msra.mxu1 %v5662_v53  ;;  %v1381_v52 = vld [vmem:[%s6966_s4 + $0x528] sm:$0xff] }
 0x18e   : > { %4409 = vmatprep.subr.bf16.mxu0 %v5693_v54  ;;  %4450 = vmatprep.subr.bf16.mxu1 %v5695_v55  ;;  %v1397_v53 = vld [vmem:[%s6966_s4 + $0x5a8] sm:$0xff]  ;;  %v5408_v54 = vcombine.low %v1348_v42, %v1364_v43  ;;  %v5410_v55 = vcombine.low %v1349_v44, %v1365_v45  ;;  %v5633_v42 = vcombine.high %v1572_v36, %v1588_v37  ;;  %v1604_v44 = vld [vmem:[%s6966_s4 + $0xc20] sm:$0xff] }
 0x18f   : > { %v5443_v57 = vcombine.high %v1381_v52, %v1397_v53  ;;  %v1620_v45 = vld [vmem:[%s6966_s4 + $0xca0] sm:$0xff] }
 0x191   : > { %4410 = vmatpush1.bf16.msra.mxu0 %v5692_v60  ;;  %4451 = vmatpush1.bf16.msra.mxu1 %v5694_v61  ;;  %v1413_v60 = vld [vmem:[%s6966_s4 + $0x628] sm:$0xff] }
 0x192   : > { %4411 = vmatprep.subr.bf16.mxu0 %v5725_v62  ;;  %4452 = vmatprep.subr.bf16.mxu1 %v5727_v63  ;;  %v1429_v61 = vld [vmem:[%s6966_s4 + $0x6a8] sm:$0xff]  ;;  %v5440_v62 = vcombine.low %v1380_v50, %v1396_v51  ;;  %v5442_v63 = vcombine.low %v1381_v52, %v1397_v53  ;;  %v5665_v50 = vcombine.high %v1604_v44, %v1620_v45  ;;  %v1636_v52 = vld [vmem:[%s6966_s4 + $0xd20] sm:$0xff] }
 0x193   : > { %v5475_v3 = vcombine.high %v1413_v60, %v1429_v61  ;;  %v1652_v53 = vld [vmem:[%s6966_s4 + $0xda0] sm:$0xff] }
 0x195   : > { %4412 = vmatpush1.bf16.msra.mxu0 %v5724_v6  ;;  %4453 = vmatpush1.bf16.msra.mxu1 %v5726_v7  ;;  %v1445_v6 = vld [vmem:[%s6966_s4 + $0x728] sm:$0xff] }
 0x196   : > { %4413 = vmatprep.subr.bf16.mxu0 %v5757_v8  ;;  %4454 = vmatprep.subr.bf16.mxu1 %v5759_v9  ;;  %v1461_v7 = vld [vmem:[%s6966_s4 + $0x7a8] sm:$0xff]  ;;  %v5472_v8 = vcombine.low %v1412_v58, %v1428_v59  ;;  %v5474_v9 = vcombine.low %v1413_v60, %v1429_v61  ;;  %v5697_v58 = vcombine.high %v1636_v52, %v1652_v53  ;;  %v1668_v60 = vld [vmem:[%s6966_s4 + $0xe20] sm:$0xff] }
 0x197   : > { %v5507_v11 = vcombine.high %v1445_v6, %v1461_v7  ;;  %v1684_v61 = vld [vmem:[%s6966_s4 + $0xea0] sm:$0xff] }
 0x199   : > { %4414 = vmatpush1.bf16.msra.mxu0 %v5756_v14  ;;  %4455 = vmatpush1.bf16.msra.mxu1 %v5758_v15  ;;  %v1477_v14 = vld [vmem:[%s6966_s4 + $0x828] sm:$0xff] }
 0x19a   : > { %4465 = vmatprep.subr.bf16.mxu0 %v5281_v17  ;;  %4506 = vmatprep.subr.bf16.mxu1 %v5283_v18  ;;  %v1493_v15 = vld [vmem:[%s6966_s4 + $0x8a8] sm:$0xff]  ;;  %v5504_v17 = vcombine.low %v1444_v4, %v1460_v5  ;;  %v5506_v18 = vcombine.low %v1445_v6, %v1461_v7  ;;  %v5729_v4 = vcombine.high %v1668_v60, %v1684_v61  ;;  %v1700_v6 = vld [vmem:[%s6966_s4 + $0xf20] sm:$0xff] }
 0x19b   : > { %v5539_v20 = vcombine.high %v1477_v14, %v1493_v15  ;;  %v1716_v7 = vld [vmem:[%s6966_s4 + $0xfa0] sm:$0xff] }
 0x19c   : > { %4416 = vmatmul.mubr.bf16.vlgmr.msra.gmra.mrb[4].mxu0 %v7045_v16  ;;  %4457 = vmatmul.mubr.bf16.vlgmr.msra.gmra.mrb[4].mxu1 %v7045_v16 }
 0x19d   : > { %4466 = vmatpush1.bf16.msra.mxu0 %v5280_v23  ;;  %4507 = vmatpush1.bf16.msra.mxu1 %v5282_v24  ;;  %v1509_v23 = vld [vmem:[%s6966_s4 + $0x928] sm:$0xff] }
 0x19e   : > { %4467 = vmatprep.subr.bf16.mxu0 %v5313_v0  ;;  %4508 = vmatprep.subr.bf16.mxu1 %v5315_v25  ;;  %v1525_v24 = vld [vmem:[%s6966_s4 + $0x9a8] sm:$0xff]  ;;  %v5536_v0 = vcombine.low %v1476_v12, %v1492_v13  ;;  %v5538_v25 = vcombine.low %v1477_v14, %v1493_v15  ;;  %v5761_v12 = vcombine.high %v1700_v6, %v1716_v7  ;;  %v1222_v14 = vld [vmem:[%s6966_s4 + $0x30] sm:$0xff] }
 0x19f   : > { %4497 = vmatprep.mubr.bf16.mxu0 %v6964_v1  ;;  %4538 = vmatprep.mubr.bf16.mxu1 %v6964_v1  ;;  %v5571_v27 = vcombine.high %v1509_v23, %v1525_v24  ;;  %v1238_v15 = vld [vmem:[%s6966_s4 + $0xb0] sm:$0xff] }
 0x1a1   : > { %4468 = vmatpush1.bf16.msra.mxu0 %v5312_v30  ;;  %4509 = vmatpush1.bf16.msra.mxu1 %v5314_v31  ;;  %v1541_v30 = vld [vmem:[%s6966_s4 + $0xa28] sm:$0xff] }
 0x1a2   : > { %4469 = vmatprep.subr.bf16.mxu0 %v5345_v32  ;;  %4510 = vmatprep.subr.bf16.mxu1 %v5347_v33  ;;  %v1557_v31 = vld [vmem:[%s6966_s4 + $0xaa8] sm:$0xff]  ;;  %v5568_v32 = vcombine.low %v1508_v21, %v1524_v22  ;;  %v5570_v33 = vcombine.low %v1509_v23, %v1525_v24  ;;  %v5285_v21 = vcombine.high %v1222_v14, %v1238_v15  ;;  %v1254_v23 = vld [vmem:[%s6966_s4 + $0x130] sm:$0xff] }
 0x1a3   : > { %v5603_v35 = vcombine.high %v1541_v30, %v1557_v31  ;;  %v1270_v24 = vld [vmem:[%s6966_s4 + $0x1b0] sm:$0xff] }
 0x1a5   : > { %4470 = vmatpush1.bf16.msra.mxu0 %v5344_v38  ;;  %4511 = vmatpush1.bf16.msra.mxu1 %v5346_v39  ;;  %v1573_v38 = vld [vmem:[%s6966_s4 + $0xb28] sm:$0xff] }
 0x1a6   : > { %4471 = vmatprep.subr.bf16.mxu0 %v5377_v40  ;;  %4512 = vmatprep.subr.bf16.mxu1 %v5379_v41  ;;  %v1589_v39 = vld [vmem:[%s6966_s4 + $0xba8] sm:$0xff]  ;;  %v5600_v40 = vcombine.low %v1540_v28, %v1556_v29  ;;  %v5602_v41 = vcombine.low %v1541_v30, %v1557_v31  ;;  %v5317_v28 = vcombine.high %v1254_v23, %v1270_v24  ;;  %v1286_v30 = vld [vmem:[%s6966_s4 + $0x230] sm:$0xff] }
 0x1a7   : > { %v5635_v43 = vcombine.high %v1573_v38, %v1589_v39  ;;  %v1302_v31 = vld [vmem:[%s6966_s4 + $0x2b0] sm:$0xff] }
 0x1a9   : > { %4472 = vmatpush1.bf16.msra.mxu0 %v5376_v46  ;;  %4513 = vmatpush1.bf16.msra.mxu1 %v5378_v47  ;;  %v1605_v46 = vld [vmem:[%s6966_s4 + $0xc28] sm:$0xff] }
 0x1aa   : > { %4473 = vmatprep.subr.bf16.mxu0 %v5409_v48  ;;  %4514 = vmatprep.subr.bf16.mxu1 %v5411_v49  ;;  %v1621_v47 = vld [vmem:[%s6966_s4 + $0xca8] sm:$0xff]  ;;  %v5632_v48 = vcombine.low %v1572_v36, %v1588_v37  ;;  %v5634_v49 = vcombine.low %v1573_v38, %v1589_v39  ;;  %v5349_v36 = vcombine.high %v1286_v30, %v1302_v31  ;;  %v1318_v38 = vld [vmem:[%s6966_s4 + $0x330] sm:$0xff] }
 0x1ab   : > { %v5667_v51 = vcombine.high %v1605_v46, %v1621_v47  ;;  %v1334_v39 = vld [vmem:[%s6966_s4 + $0x3b0] sm:$0xff] }
 0x1ad   : > { %4474 = vmatpush1.bf16.msra.mxu0 %v5408_v54  ;;  %4515 = vmatpush1.bf16.msra.mxu1 %v5410_v55  ;;  %v1637_v54 = vld [vmem:[%s6966_s4 + $0xd28] sm:$0xff] }
 0x1ae   : > { %4475 = vmatprep.subr.bf16.mxu0 %v5441_v56  ;;  %4516 = vmatprep.subr.bf16.mxu1 %v5443_v57  ;;  %v1653_v55 = vld [vmem:[%s6966_s4 + $0xda8] sm:$0xff]  ;;  %v5664_v56 = vcombine.low %v1604_v44, %v1620_v45  ;;  %v5666_v57 = vcombine.low %v1605_v46, %v1621_v47  ;;  %v5381_v44 = vcombine.high %v1318_v38, %v1334_v39  ;;  %v1350_v46 = vld [vmem:[%s6966_s4 + $0x430] sm:$0xff] }
 0x1af   : > { %v5699_v59 = vcombine.high %v1637_v54, %v1653_v55  ;;  %v1366_v47 = vld [vmem:[%s6966_s4 + $0x4b0] sm:$0xff] }
 0x1b1   : > { %4476 = vmatpush1.bf16.msra.mxu0 %v5440_v62  ;;  %4517 = vmatpush1.bf16.msra.mxu1 %v5442_v63  ;;  %v1669_v62 = vld [vmem:[%s6966_s4 + $0xe28] sm:$0xff] }
 0x1b2   : > { %4477 = vmatprep.subr.bf16.mxu0 %v5473_v2  ;;  %4518 = vmatprep.subr.bf16.mxu1 %v5475_v3  ;;  %v1685_v63 = vld [vmem:[%s6966_s4 + $0xea8] sm:$0xff]  ;;  %v5696_v2 = vcombine.low %v1636_v52, %v1652_v53  ;;  %v5698_v3 = vcombine.low %v1637_v54, %v1653_v55  ;;  %v5413_v52 = vcombine.high %v1350_v46, %v1366_v47  ;;  %v1382_v54 = vld [vmem:[%s6966_s4 + $0x530] sm:$0xff] }
 0x1b3   : > { %v5731_v5 = vcombine.high %v1669_v62, %v1685_v63  ;;  %v1398_v55 = vld [vmem:[%s6966_s4 + $0x5b0] sm:$0xff] }
 0x1b5   : > { %4478 = vmatpush1.bf16.msra.mxu0 %v5472_v8  ;;  %4519 = vmatpush1.bf16.msra.mxu1 %v5474_v9  ;;  %v1701_v8 = vld [vmem:[%s6966_s4 + $0xf28] sm:$0xff] }
 0x1b6   : > { %4479 = vmatprep.subr.bf16.mxu0 %v5505_v10  ;;  %4520 = vmatprep.subr.bf16.mxu1 %v5507_v11  ;;  %v1717_v9 = vld [vmem:[%s6966_s4 + $0xfa8] sm:$0xff]  ;;  %v5728_v10 = vcombine.low %v1668_v60, %v1684_v61  ;;  %v5730_v11 = vcombine.low %v1669_v62, %v1685_v63  ;;  %v5445_v60 = vcombine.high %v1382_v54, %v1398_v55  ;;  %v1414_v62 = vld [vmem:[%s6966_s4 + $0x630] sm:$0xff] }
 0x1b7   : > { %v5763_v13 = vcombine.high %v1701_v8, %v1717_v9  ;;  %v1430_v63 = vld [vmem:[%s6966_s4 + $0x6b0] sm:$0xff] }
 0x1b9   : > { %4480 = vmatpush1.bf16.msra.mxu0 %v5504_v17  ;;  %4521 = vmatpush1.bf16.msra.mxu1 %v5506_v18  ;;  %v1223_v17 = vld [vmem:[%s6966_s4 + $0x38] sm:$0xff] }
 0x1ba   : > { %4481 = vmatprep.subr.bf16.mxu0 %v5537_v19  ;;  %4522 = vmatprep.subr.bf16.mxu1 %v5539_v20  ;;  %v1239_v18 = vld [vmem:[%s6966_s4 + $0xb8] sm:$0xff]  ;;  %v5760_v19 = vcombine.low %v1700_v6, %v1716_v7  ;;  %v5762_v20 = vcombine.low %v1701_v8, %v1717_v9  ;;  %v5477_v6 = vcombine.high %v1414_v62, %v1430_v63  ;;  %v1446_v8 = vld [vmem:[%s6966_s4 + $0x730] sm:$0xff] }
 0x1bb   : > { %v5287_v22 = vcombine.high %v1223_v17, %v1239_v18  ;;  %v1462_v9 = vld [vmem:[%s6966_s4 + $0x7b0] sm:$0xff] }
 0x1bd   : > { %4482 = vmatpush1.bf16.msra.mxu0 %v5536_v0  ;;  %4523 = vmatpush1.bf16.msra.mxu1 %v5538_v25  ;;  %v1255_v0 = vld [vmem:[%s6966_s4 + $0x138] sm:$0xff] }
 0x1be   : > { %4483 = vmatprep.subr.bf16.mxu0 %v5569_v26  ;;  %4524 = vmatprep.subr.bf16.mxu1 %v5571_v27  ;;  %v1271_v25 = vld [vmem:[%s6966_s4 + $0x1b8] sm:$0xff]  ;;  %v5284_v26 = vcombine.low %v1222_v14, %v1238_v15  ;;  %v5286_v27 = vcombine.low %v1223_v17, %v1239_v18  ;;  %v5509_v14 = vcombine.high %v1446_v8, %v1462_v9  ;;  %v1478_v17 = vld [vmem:[%s6966_s4 + $0x830] sm:$0xff] }
 0x1bf   : > { %v5319_v29 = vcombine.high %v1255_v0, %v1271_v25  ;;  %v1494_v18 = vld [vmem:[%s6966_s4 + $0x8b0] sm:$0xff] }
 0x1c1   : > { %4484 = vmatpush1.bf16.msra.mxu0 %v5568_v32  ;;  %4525 = vmatpush1.bf16.msra.mxu1 %v5570_v33  ;;  %v1287_v32 = vld [vmem:[%s6966_s4 + $0x238] sm:$0xff] }
 0x1c2   : > { %4485 = vmatprep.subr.bf16.mxu0 %v5601_v34  ;;  %4526 = vmatprep.subr.bf16.mxu1 %v5603_v35  ;;  %v1303_v33 = vld [vmem:[%s6966_s4 + $0x2b8] sm:$0xff]  ;;  %v5316_v34 = vcombine.low %v1254_v23, %v1270_v24  ;;  %v5318_v35 = vcombine.low %v1255_v0, %v1271_v25  ;;  %v5541_v23 = vcombine.high %v1478_v17, %v1494_v18  ;;  %v1510_v0 = vld [vmem:[%s6966_s4 + $0x930] sm:$0xff] }
 0x1c3   : > { %v5351_v37 = vcombine.high %v1287_v32, %v1303_v33  ;;  %v1526_v25 = vld [vmem:[%s6966_s4 + $0x9b0] sm:$0xff] }
 0x1c5   : > { %4486 = vmatpush1.bf16.msra.mxu0 %v5600_v40  ;;  %4527 = vmatpush1.bf16.msra.mxu1 %v5602_v41  ;;  %v1319_v40 = vld [vmem:[%s6966_s4 + $0x338] sm:$0xff] }
 0x1c6   : > { %4487 = vmatprep.subr.bf16.mxu0 %v5633_v42  ;;  %4528 = vmatprep.subr.bf16.mxu1 %v5635_v43  ;;  %v1335_v41 = vld [vmem:[%s6966_s4 + $0x3b8] sm:$0xff]  ;;  %v5348_v42 = vcombine.low %v1286_v30, %v1302_v31  ;;  %v5350_v43 = vcombine.low %v1287_v32, %v1303_v33  ;;  %v5573_v30 = vcombine.high %v1510_v0, %v1526_v25  ;;  %v1542_v32 = vld [vmem:[%s6966_s4 + $0xa30] sm:$0xff] }
 0x1c7   : > { %v5383_v45 = vcombine.high %v1319_v40, %v1335_v41  ;;  %v1558_v33 = vld [vmem:[%s6966_s4 + $0xab0] sm:$0xff] }
 0x1c9   : > { %4488 = vmatpush1.bf16.msra.mxu0 %v5632_v48  ;;  %4529 = vmatpush1.bf16.msra.mxu1 %v5634_v49  ;;  %v1351_v48 = vld [vmem:[%s6966_s4 + $0x438] sm:$0xff] }
 0x1ca   : > { %4489 = vmatprep.subr.bf16.mxu0 %v5665_v50  ;;  %4530 = vmatprep.subr.bf16.mxu1 %v5667_v51  ;;  %v1367_v49 = vld [vmem:[%s6966_s4 + $0x4b8] sm:$0xff]  ;;  %v5380_v50 = vcombine.low %v1318_v38, %v1334_v39  ;;  %v5382_v51 = vcombine.low %v1319_v40, %v1335_v41  ;;  %v5605_v38 = vcombine.high %v1542_v32, %v1558_v33  ;;  %v1574_v40 = vld [vmem:[%s6966_s4 + $0xb30] sm:$0xff] }
 0x1cb   : > { %v5415_v53 = vcombine.high %v1351_v48, %v1367_v49  ;;  %v1590_v41 = vld [vmem:[%s6966_s4 + $0xbb0] sm:$0xff] }
 0x1cd   : > { %4490 = vmatpush1.bf16.msra.mxu0 %v5664_v56  ;;  %4531 = vmatpush1.bf16.msra.mxu1 %v5666_v57  ;;  %v1383_v56 = vld [vmem:[%s6966_s4 + $0x538] sm:$0xff] }
 0x1ce   : > { %4491 = vmatprep.subr.bf16.mxu0 %v5697_v58  ;;  %4532 = vmatprep.subr.bf16.mxu1 %v5699_v59  ;;  %v1399_v57 = vld [vmem:[%s6966_s4 + $0x5b8] sm:$0xff]  ;;  %v5412_v58 = vcombine.low %v1350_v46, %v1366_v47  ;;  %v5414_v59 = vcombine.low %v1351_v48, %v1367_v49  ;;  %v5637_v46 = vcombine.high %v1574_v40, %v1590_v41  ;;  %v1606_v48 = vld [vmem:[%s6966_s4 + $0xc30] sm:$0xff] }
 0x1cf   : > { %v5447_v61 = vcombine.high %v1383_v56, %v1399_v57  ;;  %v1622_v49 = vld [vmem:[%s6966_s4 + $0xcb0] sm:$0xff] }
 0x1d1   : > { %4492 = vmatpush1.bf16.msra.mxu0 %v5696_v2  ;;  %4533 = vmatpush1.bf16.msra.mxu1 %v5698_v3  ;;  %v1415_v2 = vld [vmem:[%s6966_s4 + $0x638] sm:$0xff] }
 0x1d2   : > { %4493 = vmatprep.subr.bf16.mxu0 %v5729_v4  ;;  %4534 = vmatprep.subr.bf16.mxu1 %v5731_v5  ;;  %v1431_v3 = vld [vmem:[%s6966_s4 + $0x6b8] sm:$0xff]  ;;  %v5444_v4 = vcombine.low %v1382_v54, %v1398_v55  ;;  %v5446_v5 = vcombine.low %v1383_v56, %v1399_v57  ;;  %v5669_v54 = vcombine.high %v1606_v48, %v1622_v49  ;;  %v1638_v56 = vld [vmem:[%s6966_s4 + $0xd30] sm:$0xff] }
 0x1d3   : > { %v5479_v7 = vcombine.high %v1415_v2, %v1431_v3  ;;  %v1654_v57 = vld [vmem:[%s6966_s4 + $0xdb0] sm:$0xff] }
 0x1d5   : > { %4494 = vmatpush1.bf16.msra.mxu0 %v5728_v10  ;;  %4535 = vmatpush1.bf16.msra.mxu1 %v5730_v11  ;;  %v1447_v10 = vld [vmem:[%s6966_s4 + $0x738] sm:$0xff] }
 0x1d6   : > { %4495 = vmatprep.subr.bf16.mxu0 %v5761_v12  ;;  %4536 = vmatprep.subr.bf16.mxu1 %v5763_v13  ;;  %v1463_v11 = vld [vmem:[%s6966_s4 + $0x7b8] sm:$0xff]  ;;  %v5476_v12 = vcombine.low %v1414_v62, %v1430_v63  ;;  %v5478_v13 = vcombine.low %v1415_v2, %v1431_v3  ;;  %v5701_v62 = vcombine.high %v1638_v56, %v1654_v57  ;;  %v1670_v2 = vld [vmem:[%s6966_s4 + $0xe30] sm:$0xff] }
 0x1d7   : > { %v5511_v15 = vcombine.high %v1447_v10, %v1463_v11  ;;  %v1686_v3 = vld [vmem:[%s6966_s4 + $0xeb0] sm:$0xff] }
 0x1d9   : > { %4496 = vmatpush1.bf16.msra.mxu0 %v5760_v19  ;;  %4537 = vmatpush1.bf16.msra.mxu1 %v5762_v20  ;;  %v1479_v19 = vld [vmem:[%s6966_s4 + $0x838] sm:$0xff] }
 0x1da   : > { %4547 = vmatprep.subr.bf16.mxu0 %v5285_v21  ;;  %4588 = vmatprep.subr.bf16.mxu1 %v5287_v22  ;;  %v1495_v20 = vld [vmem:[%s6966_s4 + $0x8b8] sm:$0xff]  ;;  %v5508_v21 = vcombine.low %v1446_v8, %v1462_v9  ;;  %v5510_v22 = vcombine.low %v1447_v10, %v1463_v11  ;;  %v5733_v8 = vcombine.high %v1670_v2, %v1686_v3  ;;  %v1702_v10 = vld [vmem:[%s6966_s4 + $0xf30] sm:$0xff] }
 0x1db   : > { %v5543_v24 = vcombine.high %v1479_v19, %v1495_v20  ;;  %v1718_v11 = vld [vmem:[%s6966_s4 + $0xfb0] sm:$0xff] }
 0x1dc   : > { %4498 = vmatmul.mubr.bf16.vlgmr.msra.gmra.mrb[8].mxu0 %v7045_v16  ;;  %4539 = vmatmul.mubr.bf16.vlgmr.msra.gmra.mrb[8].mxu1 %v7045_v16 }
 0x1dd   : > { %4548 = vmatpush1.bf16.msra.mxu0 %v5284_v26  ;;  %4589 = vmatpush1.bf16.msra.mxu1 %v5286_v27  ;;  %v1511_v26 = vld [vmem:[%s6966_s4 + $0x938] sm:$0xff] }
 0x1de   : > { %4549 = vmatprep.subr.bf16.mxu0 %v5317_v28  ;;  %4590 = vmatprep.subr.bf16.mxu1 %v5319_v29  ;;  %v1527_v27 = vld [vmem:[%s6966_s4 + $0x9b8] sm:$0xff]  ;;  %v5540_v28 = vcombine.low %v1478_v17, %v1494_v18  ;;  %v5542_v29 = vcombine.low %v1479_v19, %v1495_v20  ;;  %v5765_v17 = vcombine.high %v1702_v10, %v1718_v11  ;;  %v1224_v19 = vld [vmem:[%s6966_s4 + $0x40] sm:$0xff] }
 0x1df   : > { %4579 = vmatprep.mubr.bf16.mxu0 %v6964_v1  ;;  %4620 = vmatprep.mubr.bf16.mxu1 %v6964_v1  ;;  %v5575_v31 = vcombine.high %v1511_v26, %v1527_v27  ;;  %v1240_v20 = vld [vmem:[%s6966_s4 + $0xc0] sm:$0xff] }
 0x1e1   : > { %4550 = vmatpush1.bf16.msra.mxu0 %v5316_v34  ;;  %4591 = vmatpush1.bf16.msra.mxu1 %v5318_v35  ;;  %v1543_v34 = vld [vmem:[%s6966_s4 + $0xa38] sm:$0xff] }
 0x1e2   : > { %4551 = vmatprep.subr.bf16.mxu0 %v5349_v36  ;;  %4592 = vmatprep.subr.bf16.mxu1 %v5351_v37  ;;  %v1559_v35 = vld [vmem:[%s6966_s4 + $0xab8] sm:$0xff]  ;;  %v5572_v36 = vcombine.low %v1510_v0, %v1526_v25  ;;  %v5574_v37 = vcombine.low %v1511_v26, %v1527_v27  ;;  %v5289_v0 = vcombine.high %v1224_v19, %v1240_v20  ;;  %v1256_v26 = vld [vmem:[%s6966_s4 + $0x140] sm:$0xff] }
 0x1e3   : > { %v5607_v39 = vcombine.high %v1543_v34, %v1559_v35  ;;  %v1272_v27 = vld [vmem:[%s6966_s4 + $0x1c0] sm:$0xff] }
 0x1e5   : > { %4552 = vmatpush1.bf16.msra.mxu0 %v5348_v42  ;;  %4593 = vmatpush1.bf16.msra.mxu1 %v5350_v43  ;;  %v1575_v42 = vld [vmem:[%s6966_s4 + $0xb38] sm:$0xff] }
 0x1e6   : > { %4553 = vmatprep.subr.bf16.mxu0 %v5381_v44  ;;  %4594 = vmatprep.subr.bf16.mxu1 %v5383_v45  ;;  %v1591_v43 = vld [vmem:[%s6966_s4 + $0xbb8] sm:$0xff]  ;;  %v5604_v44 = vcombine.low %v1542_v32, %v1558_v33  ;;  %v5606_v45 = vcombine.low %v1543_v34, %v1559_v35  ;;  %v5321_v32 = vcombine.high %v1256_v26, %v1272_v27  ;;  %v1288_v34 = vld [vmem:[%s6966_s4 + $0x240] sm:$0xff] }
 0x1e7   : > { %v5639_v47 = vcombine.high %v1575_v42, %v1591_v43  ;;  %v1304_v35 = vld [vmem:[%s6966_s4 + $0x2c0] sm:$0xff] }
 0x1e9   : > { %4554 = vmatpush1.bf16.msra.mxu0 %v5380_v50  ;;  %4595 = vmatpush1.bf16.msra.mxu1 %v5382_v51  ;;  %v1607_v50 = vld [vmem:[%s6966_s4 + $0xc38] sm:$0xff] }
 0x1ea   : > { %4555 = vmatprep.subr.bf16.mxu0 %v5413_v52  ;;  %4596 = vmatprep.subr.bf16.mxu1 %v5415_v53  ;;  %v1623_v51 = vld [vmem:[%s6966_s4 + $0xcb8] sm:$0xff]  ;;  %v5636_v52 = vcombine.low %v1574_v40, %v1590_v41  ;;  %v5638_v53 = vcombine.low %v1575_v42, %v1591_v43  ;;  %v5353_v40 = vcombine.high %v1288_v34, %v1304_v35  ;;  %v1320_v42 = vld [vmem:[%s6966_s4 + $0x340] sm:$0xff] }
 0x1eb   : > { %v5671_v55 = vcombine.high %v1607_v50, %v1623_v51  ;;  %v1336_v43 = vld [vmem:[%s6966_s4 + $0x3c0] sm:$0xff] }
 0x1ed   : > { %4556 = vmatpush1.bf16.msra.mxu0 %v5412_v58  ;;  %4597 = vmatpush1.bf16.msra.mxu1 %v5414_v59  ;;  %v1639_v58 = vld [vmem:[%s6966_s4 + $0xd38] sm:$0xff] }
 0x1ee   : > { %4557 = vmatprep.subr.bf16.mxu0 %v5445_v60  ;;  %4598 = vmatprep.subr.bf16.mxu1 %v5447_v61  ;;  %v1655_v59 = vld [vmem:[%s6966_s4 + $0xdb8] sm:$0xff]  ;;  %v5668_v60 = vcombine.low %v1606_v48, %v1622_v49  ;;  %v5670_v61 = vcombine.low %v1607_v50, %v1623_v51  ;;  %v5385_v48 = vcombine.high %v1320_v42, %v1336_v43  ;;  %v1352_v50 = vld [vmem:[%s6966_s4 + $0x440] sm:$0xff] }
 0x1ef   : > { %v5703_v63 = vcombine.high %v1639_v58, %v1655_v59  ;;  %v1368_v51 = vld [vmem:[%s6966_s4 + $0x4c0] sm:$0xff] }
 0x1f1   : > { %4558 = vmatpush1.bf16.msra.mxu0 %v5444_v4  ;;  %4599 = vmatpush1.bf16.msra.mxu1 %v5446_v5  ;;  %v1671_v4 = vld [vmem:[%s6966_s4 + $0xe38] sm:$0xff] }
 0x1f2   : > { %4559 = vmatprep.subr.bf16.mxu0 %v5477_v6  ;;  %4600 = vmatprep.subr.bf16.mxu1 %v5479_v7  ;;  %v1687_v5 = vld [vmem:[%s6966_s4 + $0xeb8] sm:$0xff]  ;;  %v5700_v6 = vcombine.low %v1638_v56, %v1654_v57  ;;  %v5702_v7 = vcombine.low %v1639_v58, %v1655_v59  ;;  %v5417_v56 = vcombine.high %v1352_v50, %v1368_v51  ;;  %v1384_v58 = vld [vmem:[%s6966_s4 + $0x540] sm:$0xff] }
 0x1f3   : > { %v5735_v9 = vcombine.high %v1671_v4, %v1687_v5  ;;  %v1400_v59 = vld [vmem:[%s6966_s4 + $0x5c0] sm:$0xff] }
 0x1f5   : > { %4560 = vmatpush1.bf16.msra.mxu0 %v5476_v12  ;;  %4601 = vmatpush1.bf16.msra.mxu1 %v5478_v13  ;;  %v1703_v12 = vld [vmem:[%s6966_s4 + $0xf38] sm:$0xff] }
 0x1f6   : > { %4561 = vmatprep.subr.bf16.mxu0 %v5509_v14  ;;  %4602 = vmatprep.subr.bf16.mxu1 %v5511_v15  ;;  %v1719_v13 = vld [vmem:[%s6966_s4 + $0xfb8] sm:$0xff]  ;;  %v5732_v14 = vcombine.low %v1670_v2, %v1686_v3  ;;  %v5734_v15 = vcombine.low %v1671_v4, %v1687_v5  ;;  %v5449_v2 = vcombine.high %v1384_v58, %v1400_v59  ;;  %v1416_v4 = vld [vmem:[%s6966_s4 + $0x640] sm:$0xff] }
 0x1f7   : > { %v5767_v18 = vcombine.high %v1703_v12, %v1719_v13  ;;  %v1432_v5 = vld [vmem:[%s6966_s4 + $0x6c0] sm:$0xff] }
 0x1f9   : > { %4562 = vmatpush1.bf16.msra.mxu0 %v5508_v21  ;;  %4603 = vmatpush1.bf16.msra.mxu1 %v5510_v22  ;;  %v1225_v21 = vld [vmem:[%s6966_s4 + $0x48] sm:$0xff] }
 0x1fa   : > { %4563 = vmatprep.subr.bf16.mxu0 %v5541_v23  ;;  %4604 = vmatprep.subr.bf16.mxu1 %v5543_v24  ;;  %v1241_v22 = vld [vmem:[%s6966_s4 + $0xc8] sm:$0xff]  ;;  %v5764_v23 = vcombine.low %v1702_v10, %v1718_v11  ;;  %v5766_v24 = vcombine.low %v1703_v12, %v1719_v13  ;;  %v5481_v11 = vcombine.high %v1416_v4, %v1432_v5  ;;  %v1448_v12 = vld [vmem:[%s6966_s4 + $0x740] sm:$0xff] }
 0x1fb   : > { %v5291_v25 = vcombine.high %v1225_v21, %v1241_v22  ;;  %v1464_v13 = vld [vmem:[%s6966_s4 + $0x7c0] sm:$0xff] }
 0x1fd   : > { %4564 = vmatpush1.bf16.msra.mxu0 %v5540_v28  ;;  %4605 = vmatpush1.bf16.msra.mxu1 %v5542_v29  ;;  %v1257_v28 = vld [vmem:[%s6966_s4 + $0x148] sm:$0xff] }
 0x1fe   : > { %4565 = vmatprep.subr.bf16.mxu0 %v5573_v30  ;;  %4606 = vmatprep.subr.bf16.mxu1 %v5575_v31  ;;  %v1273_v29 = vld [vmem:[%s6966_s4 + $0x1c8] sm:$0xff]  ;;  %v5288_v30 = vcombine.low %v1224_v19, %v1240_v20  ;;  %v5290_v31 = vcombine.low %v1225_v21, %v1241_v22  ;;  %v5480_v22 = vcombine.low %v1416_v4, %v1432_v5  ;;  %v1576_v5 = vld [vmem:[%s6966_s4 + $0xb40] sm:$0xff] }
 0x1ff   : > { %v5323_v33 = vcombine.high %v1257_v28, %v1273_v29 }
 0x201   : > { %4566 = vmatpush1.bf16.msra.mxu0 %v5572_v36  ;;  %4607 = vmatpush1.bf16.msra.mxu1 %v5574_v37  ;;  %v1289_v36 = vld [vmem:[%s6966_s4 + $0x248] sm:$0xff] }
 0x202   : > { %4567 = vmatprep.subr.bf16.mxu0 %v5605_v38  ;;  %4608 = vmatprep.subr.bf16.mxu1 %v5607_v39  ;;  %v1305_v37 = vld [vmem:[%s6966_s4 + $0x2c8] sm:$0xff]  ;;  %v5320_v38 = vcombine.low %v1256_v26, %v1272_v27  ;;  %v5322_v39 = vcombine.low %v1257_v28, %v1273_v29  ;;  %v5513_v27 = vcombine.high %v1448_v12, %v1464_v13  ;;  %v1480_v28 = vld [vmem:[%s6966_s4 + $0x840] sm:$0xff] }
 0x203   : > { %v5355_v41 = vcombine.high %v1289_v36, %v1305_v37 }
 0x205   : > { %4568 = vmatpush1.bf16.msra.mxu0 %v5604_v44  ;;  %4609 = vmatpush1.bf16.msra.mxu1 %v5606_v45  ;;  %v1321_v44 = vld [vmem:[%s6966_s4 + $0x348] sm:$0xff] }
 0x206   : > { %4569 = vmatprep.subr.bf16.mxu0 %v5637_v46  ;;  %4610 = vmatprep.subr.bf16.mxu1 %v5639_v47  ;;  %v1337_v45 = vld [vmem:[%s6966_s4 + $0x3c8] sm:$0xff]  ;;  %v5352_v46 = vcombine.low %v1288_v34, %v1304_v35  ;;  %v5354_v47 = vcombine.low %v1289_v36, %v1305_v37  ;;  %v1496_v34 = vld [vmem:[%s6966_s4 + $0x8c0] sm:$0xff] }
 0x207   : > { %v5387_v49 = vcombine.high %v1321_v44, %v1337_v45 }
 0x209   : > { %4570 = vmatpush1.bf16.msra.mxu0 %v5636_v52  ;;  %4611 = vmatpush1.bf16.msra.mxu1 %v5638_v53  ;;  %v1353_v52 = vld [vmem:[%s6966_s4 + $0x448] sm:$0xff] }
 0x20a   : > { %4571 = vmatprep.subr.bf16.mxu0 %v5669_v54  ;;  %4612 = vmatprep.subr.bf16.mxu1 %v5671_v55  ;;  %v1369_v53 = vld [vmem:[%s6966_s4 + $0x4c8] sm:$0xff]  ;;  %v5384_v54 = vcombine.low %v1320_v42, %v1336_v43  ;;  %v5386_v55 = vcombine.low %v1321_v44, %v1337_v45  ;;  %v5512_v44 = vcombine.low %v1448_v12, %v1464_v13 }
 0x20b   : > { %v5419_v57 = vcombine.high %v1353_v52, %v1369_v53 }
 0x20d   : > { %4572 = vmatpush1.bf16.msra.mxu0 %v5668_v60  ;;  %4613 = vmatpush1.bf16.msra.mxu1 %v5670_v61  ;;  %v1385_v60 = vld [vmem:[%s6966_s4 + $0x548] sm:$0xff] }
 0x20e   : > { %4573 = vmatprep.subr.bf16.mxu0 %v5701_v62  ;;  %4614 = vmatprep.subr.bf16.mxu1 %v5703_v63  ;;  %v1401_v61 = vld [vmem:[%s6966_s4 + $0x5c8] sm:$0xff]  ;;  %v5416_v62 = vcombine.low %v1352_v50, %v1368_v51  ;;  %v5418_v63 = vcombine.low %v1353_v52, %v1369_v53  ;;  %v1512_v51 = vld [vmem:[%s6966_s4 + $0x940] sm:$0xff] }
 0x20f   : > { %v5451_v3 = vcombine.high %v1385_v60, %v1401_v61  ;;  %v5450_v10 = vcombine.low %v1385_v60, %v1401_v61  ;;  %v1528_v52 = vld [vmem:[%s6966_s4 + $0x9c0] sm:$0xff]  ;;  %v1513_v53 = vld [vmem:[%s6966_s4 + $0x948] sm:$0xff] }
 0x210   : > { %v1560_v60 = vld [vmem:[%s6966_s4 + $0xac0] sm:$0xff]  ;;  %v1545_v61 = vld [vmem:[%s6966_s4 + $0xa48] sm:$0xff] }
 0x211   : > { %4574 = vmatpush1.bf16.msra.mxu0 %v5700_v6  ;;  %4615 = vmatpush1.bf16.msra.mxu1 %v5702_v7  ;;  %v1417_v6 = vld [vmem:[%s6966_s4 + $0x648] sm:$0xff] }
 0x212   : > { %4575 = vmatprep.subr.bf16.mxu0 %v5733_v8  ;;  %4616 = vmatprep.subr.bf16.mxu1 %v5735_v9  ;;  %v1433_v7 = vld [vmem:[%s6966_s4 + $0x6c8] sm:$0xff]  ;;  %v7279_v8 = vpop.permute.xlu0 %1731  ;;  %v5448_v9 = vcombine.low %v1384_v58, %v1400_v59  ;;  %v1544_v59 = vld [vmem:[%s6966_s4 + $0xa40] sm:$0xff] }
 0x213   : > { %v5482_v26 = vcombine.low %v1417_v6, %v1433_v7 }
 0x215   : > { %4576 = vmatpush1.bf16.msra.mxu0 %v5732_v14  ;;  %4617 = vmatpush1.bf16.msra.mxu1 %v5734_v15  ;;  %v5483_v15 = vcombine.high %v1417_v6, %v1433_v7  ;;  %v1592_v6 = vld [vmem:[%s6966_s4 + $0xbc0] sm:$0xff]  ;;  %v1577_v7 = vld [vmem:[%s6966_s4 + $0xb48] sm:$0xff] }
 0x216   : > { %4577 = vmatprep.subr.bf16.mxu0 %v5765_v17  ;;  %4618 = vmatprep.subr.bf16.mxu1 %v5767_v18  ;;  %v1449_v17 = vld [vmem:[%s6966_s4 + $0x748] sm:$0xff]  ;;  %v5641_v12 = vcombine.high %v1576_v5, %v1592_v6 }
 0x217   : > { %v1465_v18 = vld [vmem:[%s6966_s4 + $0x7c8] sm:$0xff] }
 0x218   : > { %v5514_v45 = vcombine.low %v1449_v17, %v1465_v18 }
 0x219   : > { %4578 = vmatpush1.bf16.msra.mxu0 %v5764_v23  ;;  %4619 = vmatpush1.bf16.msra.mxu1 %v5766_v24 }
 0x21a   : > { %4629 = vmatprep.subr.bf16.mxu0 %v5289_v0  ;;  %4670 = vmatprep.subr.bf16.mxu1 %v5291_v25 }
 0x21c   : > { %4580 = vmatmul.mubr.bf16.vlgmr.msra.gmra.mrb[12].mxu0 %v7045_v16  ;;  %4621 = vmatmul.mubr.bf16.vlgmr.msra.gmra.mrb[12].mxu1 %v7045_v16 }
 0x21d   : > { %4630 = vmatpush1.bf16.msra.mxu0 %v5288_v30  ;;  %4671 = vmatpush1.bf16.msra.mxu1 %v5290_v31 }
 0x21e   : > { %4631 = vmatprep.subr.bf16.mxu0 %v5321_v32  ;;  %4672 = vmatprep.subr.bf16.mxu1 %v5323_v33  ;;  %v5515_v33 = vcombine.high %v1449_v17, %v1465_v18  ;;  %v1609_v17 = vld [vmem:[%s6966_s4 + $0xc48] sm:$0xff] }
 0x21f   : > { %4661 = vmatprep.mubr.bf16.mxu0 %v6964_v1  ;;  %4702 = vmatprep.mubr.bf16.mxu1 %v6964_v1  ;;  %v1625_v18 = vld [vmem:[%s6966_s4 + $0xcc8] sm:$0xff] }
 0x221   : > { %4632 = vmatpush1.bf16.msra.mxu0 %v5320_v38  ;;  %4673 = vmatpush1.bf16.msra.mxu1 %v5322_v39 }
 0x222   : > { %4633 = vmatprep.subr.bf16.mxu0 %v5353_v40  ;;  %4674 = vmatprep.subr.bf16.mxu1 %v5355_v41  ;;  %v1481_v40 = vld [vmem:[%s6966_s4 + $0x848] sm:$0xff] }
 0x223   : > { %v1497_v41 = vld [vmem:[%s6966_s4 + $0x8c8] sm:$0xff] }
 0x224   : > { %v5547_v50 = vcombine.high %v1481_v40, %v1497_v41 }
 0x225   : > { %4634 = vmatpush1.bf16.msra.mxu0 %v5352_v46  ;;  %4675 = vmatpush1.bf16.msra.mxu1 %v5354_v47 }
 0x226   : > { %4635 = vmatprep.subr.bf16.mxu0 %v5385_v48  ;;  %4676 = vmatprep.subr.bf16.mxu1 %v5387_v49  ;;  %v5545_v48 = vcombine.high %v1480_v28, %v1496_v34 }
 0x229   : > { %4636 = vmatpush1.bf16.msra.mxu0 %v5384_v54  ;;  %4677 = vmatpush1.bf16.msra.mxu1 %v5386_v55  ;;  %v1529_v54 = vld [vmem:[%s6966_s4 + $0x9c8] sm:$0xff]  ;;  %v5544_v55 = vcombine.low %v1480_v28, %v1496_v34 }
 0x22a   : > { %4637 = vmatprep.subr.bf16.mxu0 %v5417_v56  ;;  %4678 = vmatprep.subr.bf16.mxu1 %v5419_v57  ;;  %v5546_v56 = vcombine.low %v1481_v40, %v1497_v41  ;;  %v5577_v57 = vcombine.high %v1512_v51, %v1528_v52  ;;  %v5579_v58 = vcombine.high %v1513_v53, %v1529_v54  ;;  %v1705_v40 = vld [vmem:[%s6966_s4 + $0xf48] sm:$0xff] }
 0x22b   : > { %v1721_v41 = vld [vmem:[%s6966_s4 + $0xfc8] sm:$0xff] }
 0x22d   : > { %4638 = vmatpush1.bf16.msra.mxu0 %v5416_v62  ;;  %4679 = vmatpush1.bf16.msra.mxu1 %v5418_v63  ;;  %v1561_v62 = vld [vmem:[%s6966_s4 + $0xac8] sm:$0xff]  ;;  %v5576_v63 = vcombine.low %v1512_v51, %v1528_v52  ;;  %v5770_v51 = vcombine.low %v1705_v40, %v1721_v41 }
 0x22e   : > { %4639 = vmatprep.subr.bf16.mxu0 %v5449_v2  ;;  %4680 = vmatprep.subr.bf16.mxu1 %v5451_v3  ;;  %v5578_v2 = vcombine.low %v1513_v53, %v1529_v54  ;;  %v5609_v3 = vcombine.high %v1544_v59, %v1560_v60  ;;  %v5611_v4 = vcombine.high %v1545_v61, %v1561_v62  ;;  %v1258_v54 = vld [vmem:[%s6966_s4 + $0x150] sm:$0xff] }
 0x22f   : > { %v4335_v14 = vpop.f32.mrb[0].mxu0  ;;  %v4376_v20 = vpop.f32.mrb[0].mxu1 }
 0x230   : > { %v4336_v19 = vadd.f32 %v4335_v14, %v7279_v8  ;;  %v4337_v21 = vpop.f32.mrb[1].mxu0  ;;  %v4377_v23 = vadd.f32 %v4376_v20, %v7279_v8  ;;  %v4378_v0 = vpop.f32.mrb[1].mxu1  ;;  %v1608_v14 = vld [vmem:[%s6966_s4 + $0xc40] sm:$0xff] }
 0x231   : > { %v4338_v24 = vadd.f32 %v4337_v21, %v7279_v8  ;;  %v4339_v25 = vpop.f32.mrb[2].mxu0  ;;  %4640 = vmatpush1.bf16.msra.mxu0 %v5448_v9  ;;  %v4379_v30 = vadd.f32 %v4378_v0, %v7279_v8  ;;  %v4380_v31 = vpop.f32.mrb[2].mxu1  ;;  %4681 = vmatpush1.bf16.msra.mxu1 %v5450_v10  ;;  %v1593_v9 = vld [vmem:[%s6966_s4 + $0xbc8] sm:$0xff]  ;;  %v5608_v10 = vcombine.low %v1544_v59, %v1560_v60 }
 0x232   : > { %vm4957_vm0 = vcmp.ge.f32.partialorder %v4336_v19, 0.0  ;;  %v4989_v29 = vmul.f32 0.01, %v4336_v19  ;;  %v4340_v32 = vpop.f32.mrb[3].mxu0  ;;  %4641 = vmatprep.subr.bf16.mxu0 %v5481_v11  ;;  %vm4959_vm1 = vcmp.ge.f32.partialorder %v4377_v23, 0.0  ;;  %4682 = vmatprep.subr.bf16.mxu1 %v5483_v15  ;;  %v4381_v39 = vpop.f32.mrb[3].mxu1  ;;  %v5610_v11 = vcombine.low %v1545_v61, %v1561_v62 }
 0x233   : > { %v4991_v35 = vmul.f32 0.01, %v4377_v23  ;;  %vm4958_vm2 = vcmp.ge.f32.partialorder %v4338_v24, 0.0  ;;  %v4990_v36 = vmul.f32 0.01, %v4338_v24  ;;  %vm4960_vm3 = vcmp.ge.f32.partialorder %v4379_v30, 0.0 }
 0x234   : > { %v5021_v37 = vsel %vm4957_vm0, %v4336_v19, %v4989_v29  ;;  %v4992_v38 = vmul.f32 0.01, %v4379_v30  ;;  %v5643_v13 = vcombine.high %v1577_v7, %v1593_v9  ;;  %v1624_v15 = vld [vmem:[%s6966_s4 + $0xcc0] sm:$0xff]  ;;  %v5640_v19 = vcombine.low %v1576_v5, %v1592_v6  ;;  %v1641_v0 = vld [vmem:[%s6966_s4 + $0xd48] sm:$0xff]  ;;  %v1290_v62 = vld [vmem:[%s6966_s4 + $0x250] sm:$0xff] }
 0x235   : > { %v5023_v42 = vsel %vm4959_vm1, %v4377_v23, %v4991_v35  ;;  %v5022_v43 = vsel %vm4958_vm2, %v4338_v24, %v4990_v36  ;;  %4642 = vmatpush1.bf16.msra.mxu0 %v5480_v22  ;;  %4683 = vmatpush1.bf16.msra.mxu1 %v5482_v26  ;;  %v5642_v20 = vcombine.low %v1577_v7, %v1593_v9  ;;  %v1640_v23 = vld [vmem:[%s6966_s4 + $0xd40] sm:$0xff]  ;;  %v1657_v25 = vld [vmem:[%s6966_s4 + $0xdc8] sm:$0xff]  ;;  %v1322_v9 = vld [vmem:[%s6966_s4 + $0x350] sm:$0xff] }
 0x236   : > { %v5803_v46 = vpack.c.bf16 %v5022_v43, %v5021_v37  ;;  %v5024_v47 = vsel %vm4960_vm3, %v4379_v30, %v4992_v38  ;;  %4643 = vmatprep.subr.bf16.mxu0 %v5513_v27  ;;  %4684 = vmatprep.subr.bf16.mxu1 %v5515_v33  ;;  %v5673_v21 = vcombine.high %v1608_v14, %v1624_v15  ;;  %v1656_v24 = vld [vmem:[%s6966_s4 + $0xdc0] sm:$0xff]  ;;  %v1673_v32 = vld [vmem:[%s6966_s4 + $0xe48] sm:$0xff] }
 0x237   : > { %v5804_v49 = vpack.c.bf16 %v5024_v47, %v5023_v42  ;;  %v5675_v22 = vcombine.high %v1609_v17, %v1625_v18  ;;  %v5672_v26 = vcombine.low %v1608_v14, %v1624_v15  ;;  %v5674_v27 = vcombine.low %v1609_v17, %v1625_v18  ;;  %v1672_v30 = vld [vmem:[%s6966_s4 + $0xe40] sm:$0xff]  ;;  %v1689_v33 = vld [vmem:[%s6966_s4 + $0xec8] sm:$0xff]  ;;  %v1242_v47 = vld [vmem:[%s6966_s4 + $0xd0] sm:$0xff] }
 0x238   : > { %5181 = vst [vmem:[%s7301_s11] sm:$0xff] %v5803_v46  ;;  %v5705_v28 = vcombine.high %v1640_v23, %v1656_v24  ;;  %v5707_v29 = vcombine.high %v1641_v0, %v1657_v25  ;;  %v1688_v31 = vld [vmem:[%s6966_s4 + $0xec0] sm:$0xff]  ;;  %v5704_v34 = vcombine.low %v1640_v23, %v1656_v24  ;;  %v5706_v35 = vcombine.low %v1641_v0, %v1657_v25  ;;  %v1226_v46 = vld [vmem:[%s6966_s4 + $0x50] sm:$0xff] }
 0x239   : > { %5182 = vst [vmem:[%s7301_s11 + $0x8] sm:$0xff] %v5804_v49  ;;  %4644 = vmatpush1.bf16.msra.mxu0 %v5512_v44  ;;  %4685 = vmatpush1.bf16.msra.mxu1 %v5514_v45  ;;  %v5737_v36 = vcombine.high %v1672_v30, %v1688_v31  ;;  %v5739_v37 = vcombine.high %v1673_v32, %v1689_v33  ;;  %v1704_v38 = vld [vmem:[%s6966_s4 + $0xf40] sm:$0xff]  ;;  %v1243_v49 = vld [vmem:[%s6966_s4 + $0xd8] sm:$0xff]  ;;  %v1354_v18 = vld [vmem:[%s6966_s4 + $0x450] sm:$0xff] }
 0x23a   : > { %4645 = vmatprep.subr.bf16.mxu0 %v5545_v48  ;;  %4686 = vmatprep.subr.bf16.mxu1 %v5547_v50  ;;  %v1720_v39 = vld [vmem:[%s6966_s4 + $0xfc0] sm:$0xff]  ;;  %v5736_v42 = vcombine.low %v1672_v30, %v1688_v31  ;;  %v5738_v43 = vcombine.low %v1673_v32, %v1689_v33  ;;  %v5771_v45 = vcombine.high %v1705_v40, %v1721_v41  ;;  %v1227_v48 = vld [vmem:[%s6966_s4 + $0x58] sm:$0xff]  ;;  %v1386_v25 = vld [vmem:[%s6966_s4 + $0x550] sm:$0xff] }
 0x23b   : > { %v5769_v44 = vcombine.high %v1704_v38, %v1720_v39  ;;  %v5768_v50 = vcombine.low %v1704_v38, %v1720_v39  ;;  %v5293_v52 = vcombine.high %v1226_v46, %v1242_v47  ;;  %v5295_v53 = vcombine.high %v1227_v48, %v1243_v49  ;;  %v1418_v33 = vld [vmem:[%s6966_s4 + $0x650] sm:$0xff] }
 0x23c   : > { %v5294_v59 = vcombine.low %v1227_v48, %v1243_v49  ;;  %v1450_v40 = vld [vmem:[%s6966_s4 + $0x750] sm:$0xff] }
 0x23d   : > { %4646 = vmatpush1.bf16.msra.mxu0 %v5544_v55  ;;  %4687 = vmatpush1.bf16.msra.mxu1 %v5546_v56  ;;  %v1274_v55 = vld [vmem:[%s6966_s4 + $0x1d0] sm:$0xff]  ;;  %v1259_v56 = vld [vmem:[%s6966_s4 + $0x158] sm:$0xff] }
 0x23e   : > { %4647 = vmatprep.subr.bf16.mxu0 %v5577_v57  ;;  %4688 = vmatprep.subr.bf16.mxu1 %v5579_v58  ;;  %v1275_v57 = vld [vmem:[%s6966_s4 + $0x1d8] sm:$0xff]  ;;  %v5292_v58 = vcombine.low %v1226_v46, %v1242_v47  ;;  %v5325_v60 = vcombine.high %v1258_v54, %v1274_v55  ;;  %v1466_v41 = vld [vmem:[%s6966_s4 + $0x7d0] sm:$0xff] }
 0x23f   : > { %v5327_v61 = vcombine.high %v1259_v56, %v1275_v57  ;;  %v5326_v5 = vcombine.low %v1259_v56, %v1275_v57  ;;  %v1482_v56 = vld [vmem:[%s6966_s4 + $0x850] sm:$0xff] }
 0x241   : > { %4648 = vmatpush1.bf16.msra.mxu0 %v5576_v63  ;;  %4689 = vmatpush1.bf16.msra.mxu1 %v5578_v2  ;;  %v1306_v63 = vld [vmem:[%s6966_s4 + $0x2d0] sm:$0xff]  ;;  %v1291_v2 = vld [vmem:[%s6966_s4 + $0x258] sm:$0xff] }
 0x242   : > { %4649 = vmatprep.subr.bf16.mxu0 %v5609_v3  ;;  %4690 = vmatprep.subr.bf16.mxu1 %v5611_v4  ;;  %v1307_v3 = vld [vmem:[%s6966_s4 + $0x2d8] sm:$0xff]  ;;  %v5324_v4 = vcombine.low %v1258_v54, %v1274_v55  ;;  %v5357_v6 = vcombine.high %v1290_v62, %v1306_v63  ;;  %v5517_v55 = vcombine.high %v1450_v40, %v1466_v41 }
 0x243   : > { %v5359_v7 = vcombine.high %v1291_v2, %v1307_v3  ;;  %v5358_v14 = vcombine.low %v1291_v2, %v1307_v3 }
 0x245   : > { %4650 = vmatpush1.bf16.msra.mxu0 %v5608_v10  ;;  %4691 = vmatpush1.bf16.msra.mxu1 %v5610_v11  ;;  %v1338_v10 = vld [vmem:[%s6966_s4 + $0x3d0] sm:$0xff]  ;;  %v1323_v11 = vld [vmem:[%s6966_s4 + $0x358] sm:$0xff] }
 0x246   : > { %4651 = vmatprep.subr.bf16.mxu0 %v5641_v12  ;;  %4692 = vmatprep.subr.bf16.mxu1 %v5643_v13  ;;  %v1339_v12 = vld [vmem:[%s6966_s4 + $0x3d8] sm:$0xff]  ;;  %v5356_v13 = vcombine.low %v1290_v62, %v1306_v63  ;;  %v5389_v15 = vcombine.high %v1322_v9, %v1338_v10  ;;  %v1498_v62 = vld [vmem:[%s6966_s4 + $0x8d0] sm:$0xff] }
 0x247   : > { %v5391_v17 = vcombine.high %v1323_v11, %v1339_v12  ;;  %v5390_v23 = vcombine.low %v1323_v11, %v1339_v12  ;;  %v5516_v11 = vcombine.low %v1450_v40, %v1466_v41 }
 0x249   : > { %4652 = vmatpush1.bf16.msra.mxu0 %v5640_v19  ;;  %4693 = vmatpush1.bf16.msra.mxu1 %v5642_v20  ;;  %v1370_v19 = vld [vmem:[%s6966_s4 + $0x4d0] sm:$0xff]  ;;  %v1355_v20 = vld [vmem:[%s6966_s4 + $0x458] sm:$0xff] }
 0x24a   : > { %4653 = vmatprep.subr.bf16.mxu0 %v5673_v21  ;;  %4694 = vmatprep.subr.bf16.mxu1 %v5675_v22  ;;  %v1371_v21 = vld [vmem:[%s6966_s4 + $0x4d8] sm:$0xff]  ;;  %v5388_v22 = vcombine.low %v1322_v9, %v1338_v10  ;;  %v5421_v24 = vcombine.high %v1354_v18, %v1370_v19 }
 0x24b   : > { %v5423_v0 = vcombine.high %v1355_v20, %v1371_v21  ;;  %v5422_v30 = vcombine.low %v1355_v20, %v1371_v21  ;;  %v1530_v20 = vld [vmem:[%s6966_s4 + $0x9d0] sm:$0xff]  ;;  %v1515_v21 = vld [vmem:[%s6966_s4 + $0x958] sm:$0xff] }
 0x24d   : > { %4654 = vmatpush1.bf16.msra.mxu0 %v5672_v26  ;;  %4695 = vmatpush1.bf16.msra.mxu1 %v5674_v27  ;;  %v1402_v26 = vld [vmem:[%s6966_s4 + $0x5d0] sm:$0xff]  ;;  %v1387_v27 = vld [vmem:[%s6966_s4 + $0x558] sm:$0xff] }
 0x24e   : > { %4655 = vmatprep.subr.bf16.mxu0 %v5705_v28  ;;  %4696 = vmatprep.subr.bf16.mxu1 %v5707_v29  ;;  %v1403_v28 = vld [vmem:[%s6966_s4 + $0x5d8] sm:$0xff]  ;;  %v5420_v29 = vcombine.low %v1354_v18, %v1370_v19  ;;  %v5453_v31 = vcombine.high %v1386_v25, %v1402_v26  ;;  %v1514_v19 = vld [vmem:[%s6966_s4 + $0x950] sm:$0xff] }
 0x24f   : > { %v5455_v32 = vcombine.high %v1387_v27, %v1403_v28  ;;  %v5454_v38 = vcombine.low %v1387_v27, %v1403_v28  ;;  %v1562_v27 = vld [vmem:[%s6966_s4 + $0xad0] sm:$0xff]  ;;  %v1547_v28 = vld [vmem:[%s6966_s4 + $0xa58] sm:$0xff] }
 0x251   : > { %4656 = vmatpush1.bf16.msra.mxu0 %v5704_v34  ;;  %4697 = vmatpush1.bf16.msra.mxu1 %v5706_v35  ;;  %v1434_v34 = vld [vmem:[%s6966_s4 + $0x6d0] sm:$0xff]  ;;  %v1419_v35 = vld [vmem:[%s6966_s4 + $0x658] sm:$0xff] }
 0x252   : > { %4657 = vmatprep.subr.bf16.mxu0 %v5737_v36  ;;  %4698 = vmatprep.subr.bf16.mxu1 %v5739_v37  ;;  %v1435_v36 = vld [vmem:[%s6966_s4 + $0x6d8] sm:$0xff]  ;;  %v5452_v37 = vcombine.low %v1386_v25, %v1402_v26  ;;  %v5485_v39 = vcombine.high %v1418_v33, %v1434_v34  ;;  %v5484_v49 = vcombine.low %v1418_v33, %v1434_v34  ;;  %v1546_v26 = vld [vmem:[%s6966_s4 + $0xa50] sm:$0xff] }
 0x253   : > { %v5486_v54 = vcombine.low %v1419_v35, %v1435_v36  ;;  %v1578_v34 = vld [vmem:[%s6966_s4 + $0xb50] sm:$0xff] }
 0x255   : > { %4658 = vmatpush1.bf16.msra.mxu0 %v5736_v42  ;;  %4699 = vmatpush1.bf16.msra.mxu1 %v5738_v43  ;;  %v5487_v43 = vcombine.high %v1419_v35, %v1435_v36  ;;  %v1594_v35 = vld [vmem:[%s6966_s4 + $0xbd0] sm:$0xff]  ;;  %v1579_v36 = vld [vmem:[%s6966_s4 + $0xb58] sm:$0xff] }
 0x256   : > { %4659 = vmatprep.subr.bf16.mxu0 %v5769_v44  ;;  %4700 = vmatprep.subr.bf16.mxu1 %v5771_v45  ;;  %v1451_v44 = vld [vmem:[%s6966_s4 + $0x758] sm:$0xff]  ;;  %v5645_v40 = vcombine.high %v1578_v34, %v1594_v35 }
 0x257   : > { %v1467_v45 = vld [vmem:[%s6966_s4 + $0x7d8] sm:$0xff] }
 0x258   : > { %v5518_v12 = vcombine.low %v1451_v44, %v1467_v45 }
 0x259   : > { %4660 = vmatpush1.bf16.msra.mxu0 %v5768_v50  ;;  %4701 = vmatpush1.bf16.msra.mxu1 %v5770_v51 }
 0x25a   : > { %4711 = vmatprep.subr.bf16.mxu0 %v5293_v52  ;;  %4752 = vmatprep.subr.bf16.mxu1 %v5295_v53 }
 0x25c   : > { %4662 = vmatmul.mubr.bf16.vlgmr.msra.gmra.mrb[16].mxu0 %v7045_v16  ;;  %4703 = vmatmul.mubr.bf16.vlgmr.msra.gmra.mrb[16].mxu1 %v7045_v16 }
 0x25d   : > { %4712 = vmatpush1.bf16.msra.mxu0 %v5292_v58  ;;  %4753 = vmatpush1.bf16.msra.mxu1 %v5294_v59 }
 0x25e   : > { %4713 = vmatprep.subr.bf16.mxu0 %v5325_v60  ;;  %4754 = vmatprep.subr.bf16.mxu1 %v5327_v61  ;;  %v5519_v61 = vcombine.high %v1451_v44, %v1467_v45  ;;  %v1611_v44 = vld [vmem:[%s6966_s4 + $0xc58] sm:$0xff] }
 0x25f   : > { %4743 = vmatprep.mubr.bf16.mxu0 %v6964_v1  ;;  %4784 = vmatprep.mubr.bf16.mxu1 %v6964_v1  ;;  %v1627_v45 = vld [vmem:[%s6966_s4 + $0xcd8] sm:$0xff] }
 0x261   : > { %4714 = vmatpush1.bf16.msra.mxu0 %v5324_v4  ;;  %4755 = vmatpush1.bf16.msra.mxu1 %v5326_v5 }
 0x262   : > { %4715 = vmatprep.subr.bf16.mxu0 %v5357_v6  ;;  %4756 = vmatprep.subr.bf16.mxu1 %v5359_v7  ;;  %v1483_v6 = vld [vmem:[%s6966_s4 + $0x858] sm:$0xff] }
 0x263   : > { %v1499_v7 = vld [vmem:[%s6966_s4 + $0x8d8] sm:$0xff] }
 0x264   : > { %v5551_v18 = vcombine.high %v1483_v6, %v1499_v7 }
 0x265   : > { %4716 = vmatpush1.bf16.msra.mxu0 %v5356_v13  ;;  %4757 = vmatpush1.bf16.msra.mxu1 %v5358_v14 }
 0x266   : > { %4717 = vmatprep.subr.bf16.mxu0 %v5389_v15  ;;  %4758 = vmatprep.subr.bf16.mxu1 %v5391_v17  ;;  %v5549_v15 = vcombine.high %v1482_v56, %v1498_v62 }
 0x269   : > { %4718 = vmatpush1.bf16.msra.mxu0 %v5388_v22  ;;  %4759 = vmatpush1.bf16.msra.mxu1 %v5390_v23  ;;  %v1531_v22 = vld [vmem:[%s6966_s4 + $0x9d8] sm:$0xff]  ;;  %v5548_v23 = vcombine.low %v1482_v56, %v1498_v62 }
 0x26a   : > { %4719 = vmatprep.subr.bf16.mxu0 %v5421_v24  ;;  %4760 = vmatprep.subr.bf16.mxu1 %v5423_v0  ;;  %v5550_v24 = vcombine.low %v1483_v6, %v1499_v7  ;;  %v5581_v0 = vcombine.high %v1514_v19, %v1530_v20  ;;  %v5583_v25 = vcombine.high %v1515_v21, %v1531_v22  ;;  %v1707_v6 = vld [vmem:[%s6966_s4 + $0xf58] sm:$0xff] }
 0x26b   : > { %v1723_v7 = vld [vmem:[%s6966_s4 + $0xfd8] sm:$0xff] }
 0x26d   : > { %4720 = vmatpush1.bf16.msra.mxu0 %v5420_v29  ;;  %4761 = vmatpush1.bf16.msra.mxu1 %v5422_v30  ;;  %v1563_v29 = vld [vmem:[%s6966_s4 + $0xad8] sm:$0xff]  ;;  %v5580_v30 = vcombine.low %v1514_v19, %v1530_v20  ;;  %v5774_v19 = vcombine.low %v1707_v6, %v1723_v7 }
 0x26e   : > { %4721 = vmatprep.subr.bf16.mxu0 %v5453_v31  ;;  %4762 = vmatprep.subr.bf16.mxu1 %v5455_v32  ;;  %v5582_v31 = vcombine.low %v1515_v21, %v1531_v22  ;;  %v5613_v32 = vcombine.high %v1546_v26, %v1562_v27  ;;  %v5615_v33 = vcombine.high %v1547_v28, %v1563_v29  ;;  %v1260_v22 = vld [vmem:[%s6966_s4 + $0x160] sm:$0xff] }
 0x26f   : > { %v4417_v42 = vpop.f32.mrb[4].mxu0  ;;  %v4458_v47 = vpop.f32.mrb[4].mxu1 }
 0x270   : > { %v4418_v46 = vadd.f32 %v4417_v42, %v7279_v8  ;;  %v4419_v48 = vpop.f32.mrb[5].mxu0  ;;  %v4459_v50 = vadd.f32 %v4458_v47, %v7279_v8  ;;  %v4460_v52 = vpop.f32.mrb[5].mxu1  ;;  %v1610_v42 = vld [vmem:[%s6966_s4 + $0xc50] sm:$0xff] }
 0x271   : > { %v4420_v51 = vadd.f32 %v4419_v48, %v7279_v8  ;;  %v4421_v53 = vpop.f32.mrb[6].mxu0  ;;  %4722 = vmatpush1.bf16.msra.mxu0 %v5452_v37  ;;  %v4461_v58 = vadd.f32 %v4460_v52, %v7279_v8  ;;  %v4462_v59 = vpop.f32.mrb[6].mxu1  ;;  %4763 = vmatpush1.bf16.msra.mxu1 %v5454_v38  ;;  %v1595_v37 = vld [vmem:[%s6966_s4 + $0xbd8] sm:$0xff]  ;;  %v5612_v38 = vcombine.low %v1546_v26, %v1562_v27 }
 0x272   : > { %vm4961_vm4 = vcmp.ge.f32.partialorder %v4418_v46, 0.0  ;;  %v4993_v57 = vmul.f32 0.01, %v4418_v46  ;;  %v4422_v60 = vpop.f32.mrb[7].mxu0  ;;  %4723 = vmatprep.subr.bf16.mxu0 %v5485_v39  ;;  %vm4963_vm5 = vcmp.ge.f32.partialorder %v4459_v50, 0.0  ;;  %4764 = vmatprep.subr.bf16.mxu1 %v5487_v43  ;;  %v4463_v5 = vpop.f32.mrb[7].mxu1  ;;  %v5614_v39 = vcombine.low %v1547_v28, %v1563_v29 }
 0x273   : > { %v4995_v63 = vmul.f32 0.01, %v4459_v50  ;;  %vm4962_vm6 = vcmp.ge.f32.partialorder %v4420_v51, 0.0  ;;  %v4994_v2 = vmul.f32 0.01, %v4420_v51  ;;  %vm4964_vm7 = vcmp.ge.f32.partialorder %v4461_v58, 0.0 }
 0x274   : > { %v5025_v3 = vsel %vm4961_vm4, %v4418_v46, %v4993_v57  ;;  %v4996_v4 = vmul.f32 0.01, %v4461_v58  ;;  %v5647_v41 = vcombine.high %v1579_v36, %v1595_v37  ;;  %v1626_v43 = vld [vmem:[%s6966_s4 + $0xcd0] sm:$0xff]  ;;  %v5644_v46 = vcombine.low %v1578_v34, %v1594_v35  ;;  %v1643_v52 = vld [vmem:[%s6966_s4 + $0xd58] sm:$0xff]  ;;  %v1292_v29 = vld [vmem:[%s6966_s4 + $0x260] sm:$0xff] }
 0x275   : > { %v5027_v9 = vsel %vm4963_vm5, %v4459_v50, %v4995_v63  ;;  %v5026_v10 = vsel %vm4962_vm6, %v4420_v51, %v4994_v2  ;;  %4724 = vmatpush1.bf16.msra.mxu0 %v5484_v49  ;;  %4765 = vmatpush1.bf16.msra.mxu1 %v5486_v54  ;;  %v5646_v47 = vcombine.low %v1579_v36, %v1595_v37  ;;  %v1642_v50 = vld [vmem:[%s6966_s4 + $0xd50] sm:$0xff]  ;;  %v1659_v53 = vld [vmem:[%s6966_s4 + $0xdd8] sm:$0xff]  ;;  %v1324_v37 = vld [vmem:[%s6966_s4 + $0x360] sm:$0xff] }
 0x276   : > { %v5805_v13 = vpack.c.bf16 %v5026_v10, %v5025_v3  ;;  %v5028_v14 = vsel %vm4964_vm7, %v4461_v58, %v4996_v4  ;;  %4725 = vmatprep.subr.bf16.mxu0 %v5517_v55  ;;  %4766 = vmatprep.subr.bf16.mxu1 %v5519_v61  ;;  %v5677_v48 = vcombine.high %v1610_v42, %v1626_v43  ;;  %v1658_v51 = vld [vmem:[%s6966_s4 + $0xdd0] sm:$0xff]  ;;  %v1675_v60 = vld [vmem:[%s6966_s4 + $0xe58] sm:$0xff] }
 0x277   : > { %v5806_v17 = vpack.c.bf16 %v5028_v14, %v5027_v9  ;;  %v5679_v49 = vcombine.high %v1611_v44, %v1627_v45  ;;  %v5676_v54 = vcombine.low %v1610_v42, %v1626_v43  ;;  %v5678_v55 = vcombine.low %v1611_v44, %v1627_v45  ;;  %v1674_v58 = vld [vmem:[%s6966_s4 + $0xe50] sm:$0xff]  ;;  %v1691_v61 = vld [vmem:[%s6966_s4 + $0xed8] sm:$0xff]  ;;  %v1244_v14 = vld [vmem:[%s6966_s4 + $0xe0] sm:$0xff] }
 0x278   : > { %5183 = vst [vmem:[%s7301_s11 + $0x10] sm:$0xff] %v5805_v13  ;;  %v5709_v56 = vcombine.high %v1642_v50, %v1658_v51  ;;  %v5711_v57 = vcombine.high %v1643_v52, %v1659_v53  ;;  %v1690_v59 = vld [vmem:[%s6966_s4 + $0xed0] sm:$0xff]  ;;  %v5708_v62 = vcombine.low %v1642_v50, %v1658_v51  ;;  %v5710_v63 = vcombine.low %v1643_v52, %v1659_v53  ;;  %v1228_v13 = vld [vmem:[%s6966_s4 + $0x60] sm:$0xff] }
 0x279   : > { %5184 = vst [vmem:[%s7301_s11 + $0x18] sm:$0xff] %v5806_v17  ;;  %4726 = vmatpush1.bf16.msra.mxu0 %v5516_v11  ;;  %4767 = vmatpush1.bf16.msra.mxu1 %v5518_v12  ;;  %v5741_v2 = vcombine.high %v1674_v58, %v1690_v59  ;;  %v5743_v3 = vcombine.high %v1675_v60, %v1691_v61  ;;  %v1706_v4 = vld [vmem:[%s6966_s4 + $0xf50] sm:$0xff]  ;;  %v1245_v17 = vld [vmem:[%s6966_s4 + $0xe8] sm:$0xff]  ;;  %v1356_v45 = vld [vmem:[%s6966_s4 + $0x460] sm:$0xff] }
 0x27a   : > { %4727 = vmatprep.subr.bf16.mxu0 %v5549_v15  ;;  %4768 = vmatprep.subr.bf16.mxu1 %v5551_v18  ;;  %v1722_v5 = vld [vmem:[%s6966_s4 + $0xfd0] sm:$0xff]  ;;  %v5740_v9 = vcombine.low %v1674_v58, %v1690_v59  ;;  %v5742_v10 = vcombine.low %v1675_v60, %v1691_v61  ;;  %v5775_v12 = vcombine.high %v1707_v6, %v1723_v7  ;;  %v1229_v15 = vld [vmem:[%s6966_s4 + $0x68] sm:$0xff]  ;;  %v1388_v53 = vld [vmem:[%s6966_s4 + $0x560] sm:$0xff] }
 0x27b   : > { %v5773_v11 = vcombine.high %v1706_v4, %v1722_v5  ;;  %v5772_v18 = vcombine.low %v1706_v4, %v1722_v5  ;;  %v5297_v20 = vcombine.high %v1228_v13, %v1244_v14  ;;  %v5299_v21 = vcombine.high %v1229_v15, %v1245_v17  ;;  %v1420_v61 = vld [vmem:[%s6966_s4 + $0x660] sm:$0xff] }
 0x27c   : > { %v5298_v26 = vcombine.low %v1229_v15, %v1245_v17  ;;  %v1452_v6 = vld [vmem:[%s6966_s4 + $0x760] sm:$0xff] }
 0x27d   : > { %4728 = vmatpush1.bf16.msra.mxu0 %v5548_v23  ;;  %4769 = vmatpush1.bf16.msra.mxu1 %v5550_v24  ;;  %v1276_v23 = vld [vmem:[%s6966_s4 + $0x1e0] sm:$0xff]  ;;  %v1261_v24 = vld [vmem:[%s6966_s4 + $0x168] sm:$0xff] }
 0x27e   : > { %4729 = vmatprep.subr.bf16.mxu0 %v5581_v0  ;;  %4770 = vmatprep.subr.bf16.mxu1 %v5583_v25  ;;  %v1277_v0 = vld [vmem:[%s6966_s4 + $0x1e8] sm:$0xff]  ;;  %v5296_v25 = vcombine.low %v1228_v13, %v1244_v14  ;;  %v5329_v27 = vcombine.high %v1260_v22, %v1276_v23  ;;  %v1468_v7 = vld [vmem:[%s6966_s4 + $0x7e0] sm:$0xff] }
 0x27f   : > { %v5331_v28 = vcombine.high %v1261_v24, %v1277_v0  ;;  %v5330_v34 = vcombine.low %v1261_v24, %v1277_v0  ;;  %v1484_v24 = vld [vmem:[%s6966_s4 + $0x860] sm:$0xff] }
 0x281   : > { %4730 = vmatpush1.bf16.msra.mxu0 %v5580_v30  ;;  %4771 = vmatpush1.bf16.msra.mxu1 %v5582_v31  ;;  %v1308_v30 = vld [vmem:[%s6966_s4 + $0x2e0] sm:$0xff]  ;;  %v1293_v31 = vld [vmem:[%s6966_s4 + $0x268] sm:$0xff] }
 0x282   : > { %4731 = vmatprep.subr.bf16.mxu0 %v5613_v32  ;;  %4772 = vmatprep.subr.bf16.mxu1 %v5615_v33  ;;  %v1309_v32 = vld [vmem:[%s6966_s4 + $0x2e8] sm:$0xff]  ;;  %v5328_v33 = vcombine.low %v1260_v22, %v1276_v23  ;;  %v5361_v35 = vcombine.high %v1292_v29, %v1308_v30  ;;  %v5521_v23 = vcombine.high %v1452_v6, %v1468_v7 }
 0x283   : > { %v5363_v36 = vcombine.high %v1293_v31, %v1309_v32  ;;  %v5362_v42 = vcombine.low %v1293_v31, %v1309_v32 }
 0x285   : > { %4732 = vmatpush1.bf16.msra.mxu0 %v5612_v38  ;;  %4773 = vmatpush1.bf16.msra.mxu1 %v5614_v39  ;;  %v1340_v38 = vld [vmem:[%s6966_s4 + $0x3e0] sm:$0xff]  ;;  %v1325_v39 = vld [vmem:[%s6966_s4 + $0x368] sm:$0xff] }
 0x286   : > { %4733 = vmatprep.subr.bf16.mxu0 %v5645_v40  ;;  %4774 = vmatprep.subr.bf16.mxu1 %v5647_v41  ;;  %v1341_v40 = vld [vmem:[%s6966_s4 + $0x3e8] sm:$0xff]  ;;  %v5360_v41 = vcombine.low %v1292_v29, %v1308_v30  ;;  %v5393_v43 = vcombine.high %v1324_v37, %v1340_v38  ;;  %v1500_v29 = vld [vmem:[%s6966_s4 + $0x8e0] sm:$0xff] }
 0x287   : > { %v5395_v44 = vcombine.high %v1325_v39, %v1341_v40  ;;  %v5394_v50 = vcombine.low %v1325_v39, %v1341_v40  ;;  %v5520_v39 = vcombine.low %v1452_v6, %v1468_v7 }
 0x289   : > { %4734 = vmatpush1.bf16.msra.mxu0 %v5644_v46  ;;  %4775 = vmatpush1.bf16.msra.mxu1 %v5646_v47  ;;  %v1372_v46 = vld [vmem:[%s6966_s4 + $0x4e0] sm:$0xff]  ;;  %v1357_v47 = vld [vmem:[%s6966_s4 + $0x468] sm:$0xff] }
 0x28a   : > { %4735 = vmatprep.subr.bf16.mxu0 %v5677_v48  ;;  %4776 = vmatprep.subr.bf16.mxu1 %v5679_v49  ;;  %v1373_v48 = vld [vmem:[%s6966_s4 + $0x4e8] sm:$0xff]  ;;  %v5392_v49 = vcombine.low %v1324_v37, %v1340_v38  ;;  %v5425_v51 = vcombine.high %v1356_v45, %v1372_v46 }
 0x28b   : > { %v5427_v52 = vcombine.high %v1357_v47, %v1373_v48  ;;  %v5426_v58 = vcombine.low %v1357_v47, %v1373_v48  ;;  %v1532_v47 = vld [vmem:[%s6966_s4 + $0x9e0] sm:$0xff]  ;;  %v1517_v48 = vld [vmem:[%s6966_s4 + $0x968] sm:$0xff] }
 0x28d   : > { %4736 = vmatpush1.bf16.msra.mxu0 %v5676_v54  ;;  %4777 = vmatpush1.bf16.msra.mxu1 %v5678_v55  ;;  %v1404_v54 = vld [vmem:[%s6966_s4 + $0x5e0] sm:$0xff]  ;;  %v1389_v55 = vld [vmem:[%s6966_s4 + $0x568] sm:$0xff] }
 0x28e   : > { %4737 = vmatprep.subr.bf16.mxu0 %v5709_v56  ;;  %4778 = vmatprep.subr.bf16.mxu1 %v5711_v57  ;;  %v1405_v56 = vld [vmem:[%s6966_s4 + $0x5e8] sm:$0xff]  ;;  %v5424_v57 = vcombine.low %v1356_v45, %v1372_v46  ;;  %v5457_v59 = vcombine.high %v1388_v53, %v1404_v54  ;;  %v1516_v46 = vld [vmem:[%s6966_s4 + $0x960] sm:$0xff] }
 0x28f   : > { %v5459_v60 = vcombine.high %v1389_v55, %v1405_v56  ;;  %v5458_v4 = vcombine.low %v1389_v55, %v1405_v56  ;;  %v1564_v55 = vld [vmem:[%s6966_s4 + $0xae0] sm:$0xff]  ;;  %v1549_v56 = vld [vmem:[%s6966_s4 + $0xa68] sm:$0xff] }
 0x291   : > { %4738 = vmatpush1.bf16.msra.mxu0 %v5708_v62  ;;  %4779 = vmatpush1.bf16.msra.mxu1 %v5710_v63  ;;  %v1436_v62 = vld [vmem:[%s6966_s4 + $0x6e0] sm:$0xff]  ;;  %v1421_v63 = vld [vmem:[%s6966_s4 + $0x668] sm:$0xff] }
 0x292   : > { %4739 = vmatprep.subr.bf16.mxu0 %v5741_v2  ;;  %4780 = vmatprep.subr.bf16.mxu1 %v5743_v3  ;;  %v1437_v2 = vld [vmem:[%s6966_s4 + $0x6e8] sm:$0xff]  ;;  %v5456_v3 = vcombine.low %v1388_v53, %v1404_v54  ;;  %v5489_v5 = vcombine.high %v1420_v61, %v1436_v62  ;;  %v5488_v17 = vcombine.low %v1420_v61, %v1436_v62  ;;  %v1548_v54 = vld [vmem:[%s6966_s4 + $0xa60] sm:$0xff] }
 0x293   : > { %v5490_v22 = vcombine.low %v1421_v63, %v1437_v2  ;;  %v1580_v62 = vld [vmem:[%s6966_s4 + $0xb60] sm:$0xff] }
 0x295   : > { %4740 = vmatpush1.bf16.msra.mxu0 %v5740_v9  ;;  %4781 = vmatpush1.bf16.msra.mxu1 %v5742_v10  ;;  %v5491_v10 = vcombine.high %v1421_v63, %v1437_v2  ;;  %v1596_v63 = vld [vmem:[%s6966_s4 + $0xbe0] sm:$0xff]  ;;  %v1581_v2 = vld [vmem:[%s6966_s4 + $0xb68] sm:$0xff] }
 0x296   : > { %4741 = vmatprep.subr.bf16.mxu0 %v5773_v11  ;;  %4782 = vmatprep.subr.bf16.mxu1 %v5775_v12  ;;  %v1453_v11 = vld [vmem:[%s6966_s4 + $0x768] sm:$0xff]  ;;  %v5649_v6 = vcombine.high %v1580_v62, %v1596_v63 }
 0x297   : > { %v1469_v12 = vld [vmem:[%s6966_s4 + $0x7e8] sm:$0xff] }
 0x298   : > { %v5522_v40 = vcombine.low %v1453_v11, %v1469_v12 }
 0x299   : > { %4742 = vmatpush1.bf16.msra.mxu0 %v5772_v18  ;;  %4783 = vmatpush1.bf16.msra.mxu1 %v5774_v19 }
 0x29a   : > { %4793 = vmatprep.subr.bf16.mxu0 %v5297_v20  ;;  %4834 = vmatprep.subr.bf16.mxu1 %v5299_v21 }
 0x29c   : > { %4744 = vmatmul.mubr.bf16.vlgmr.msra.gmra.mrb[20].mxu0 %v7045_v16  ;;  %4785 = vmatmul.mubr.bf16.vlgmr.msra.gmra.mrb[20].mxu1 %v7045_v16 }
 0x29d   : > { %4794 = vmatpush1.bf16.msra.mxu0 %v5296_v25  ;;  %4835 = vmatpush1.bf16.msra.mxu1 %v5298_v26 }
 0x29e   : > { %4795 = vmatprep.subr.bf16.mxu0 %v5329_v27  ;;  %4836 = vmatprep.subr.bf16.mxu1 %v5331_v28  ;;  %v5523_v28 = vcombine.high %v1453_v11, %v1469_v12  ;;  %v1613_v11 = vld [vmem:[%s6966_s4 + $0xc68] sm:$0xff] }
 0x29f   : > { %4825 = vmatprep.mubr.bf16.mxu0 %v6964_v1  ;;  %4866 = vmatprep.mubr.bf16.mxu1 %v6964_v1  ;;  %v1629_v12 = vld [vmem:[%s6966_s4 + $0xce8] sm:$0xff] }
 0x2a1   : > { %4796 = vmatpush1.bf16.msra.mxu0 %v5328_v33  ;;  %4837 = vmatpush1.bf16.msra.mxu1 %v5330_v34 }
 0x2a2   : > { %4797 = vmatprep.subr.bf16.mxu0 %v5361_v35  ;;  %4838 = vmatprep.subr.bf16.mxu1 %v5363_v36  ;;  %v1485_v35 = vld [vmem:[%s6966_s4 + $0x868] sm:$0xff] }
 0x2a3   : > { %v1501_v36 = vld [vmem:[%s6966_s4 + $0x8e8] sm:$0xff] }
 0x2a4   : > { %v5555_v45 = vcombine.high %v1485_v35, %v1501_v36 }
 0x2a5   : > { %4798 = vmatpush1.bf16.msra.mxu0 %v5360_v41  ;;  %4839 = vmatpush1.bf16.msra.mxu1 %v5362_v42 }
 0x2a6   : > { %4799 = vmatprep.subr.bf16.mxu0 %v5393_v43  ;;  %4840 = vmatprep.subr.bf16.mxu1 %v5395_v44  ;;  %v5553_v43 = vcombine.high %v1484_v24, %v1500_v29 }
 0x2a9   : > { %4800 = vmatpush1.bf16.msra.mxu0 %v5392_v49  ;;  %4841 = vmatpush1.bf16.msra.mxu1 %v5394_v50  ;;  %v1533_v49 = vld [vmem:[%s6966_s4 + $0x9e8] sm:$0xff]  ;;  %v5552_v50 = vcombine.low %v1484_v24, %v1500_v29 }
 0x2aa   : > { %4801 = vmatprep.subr.bf16.mxu0 %v5425_v51  ;;  %4842 = vmatprep.subr.bf16.mxu1 %v5427_v52  ;;  %v5554_v51 = vcombine.low %v1485_v35, %v1501_v36  ;;  %v5585_v52 = vcombine.high %v1516_v46, %v1532_v47  ;;  %v5587_v53 = vcombine.high %v1517_v48, %v1533_v49  ;;  %v1709_v35 = vld [vmem:[%s6966_s4 + $0xf68] sm:$0xff] }
 0x2ab   : > { %v1725_v36 = vld [vmem:[%s6966_s4 + $0xfe8] sm:$0xff] }
 0x2ad   : > { %4802 = vmatpush1.bf16.msra.mxu0 %v5424_v57  ;;  %4843 = vmatpush1.bf16.msra.mxu1 %v5426_v58  ;;  %v1565_v57 = vld [vmem:[%s6966_s4 + $0xae8] sm:$0xff]  ;;  %v5584_v58 = vcombine.low %v1516_v46, %v1532_v47  ;;  %v5778_v46 = vcombine.low %v1709_v35, %v1725_v36 }
 0x2ae   : > { %4803 = vmatprep.subr.bf16.mxu0 %v5457_v59  ;;  %4844 = vmatprep.subr.bf16.mxu1 %v5459_v60  ;;  %v5586_v59 = vcombine.low %v1517_v48, %v1533_v49  ;;  %v5617_v60 = vcombine.high %v1548_v54, %v1564_v55  ;;  %v5619_v61 = vcombine.high %v1549_v56, %v1565_v57  ;;  %v1262_v49 = vld [vmem:[%s6966_s4 + $0x170] sm:$0xff] }
 0x2af   : > { %v4499_v9 = vpop.f32.mrb[8].mxu0  ;;  %v4540_v14 = vpop.f32.mrb[8].mxu1 }
 0x2b0   : > { %v4500_v13 = vadd.f32 %v4499_v9, %v7279_v8  ;;  %v4501_v15 = vpop.f32.mrb[9].mxu0  ;;  %v4541_v18 = vadd.f32 %v4540_v14, %v7279_v8  ;;  %v4542_v20 = vpop.f32.mrb[9].mxu1  ;;  %v1612_v9 = vld [vmem:[%s6966_s4 + $0xc60] sm:$0xff] }
 0x2b1   : > { %v4502_v19 = vadd.f32 %v4501_v15, %v7279_v8  ;;  %v4503_v21 = vpop.f32.mrb[10].mxu0  ;;  %4804 = vmatpush1.bf16.msra.mxu0 %v5456_v3  ;;  %v4543_v25 = vadd.f32 %v4542_v20, %v7279_v8  ;;  %v4544_v26 = vpop.f32.mrb[10].mxu1  ;;  %4845 = vmatpush1.bf16.msra.mxu1 %v5458_v4  ;;  %v1597_v3 = vld [vmem:[%s6966_s4 + $0xbe8] sm:$0xff]  ;;  %v5616_v4 = vcombine.low %v1548_v54, %v1564_v55 }
 0x2b2   : > { %vm4965_vm8 = vcmp.ge.f32.partialorder %v4500_v13, 0.0  ;;  %v4997_v0 = vmul.f32 0.01, %v4500_v13  ;;  %v4504_v27 = vpop.f32.mrb[11].mxu0  ;;  %4805 = vmatprep.subr.bf16.mxu0 %v5489_v5  ;;  %vm4967_vm9 = vcmp.ge.f32.partialorder %v4541_v18, 0.0  ;;  %4846 = vmatprep.subr.bf16.mxu1 %v5491_v10  ;;  %v4545_v34 = vpop.f32.mrb[11].mxu1  ;;  %v5618_v5 = vcombine.low %v1549_v56, %v1565_v57 }
 0x2b3   : > { %v4999_v30 = vmul.f32 0.01, %v4541_v18  ;;  %vm4966_vm10 = vcmp.ge.f32.partialorder %v4502_v19, 0.0  ;;  %v4998_v31 = vmul.f32 0.01, %v4502_v19  ;;  %vm4968_vm11 = vcmp.ge.f32.partialorder %v4543_v25, 0.0 }
 0x2b4   : > { %v5029_v32 = vsel %vm4965_vm8, %v4500_v13, %v4997_v0  ;;  %v5000_v33 = vmul.f32 0.01, %v4543_v25  ;;  %v5651_v7 = vcombine.high %v1581_v2, %v1597_v3  ;;  %v1628_v10 = vld [vmem:[%s6966_s4 + $0xce0] sm:$0xff]  ;;  %v5648_v13 = vcombine.low %v1580_v62, %v1596_v63  ;;  %v1645_v20 = vld [vmem:[%s6966_s4 + $0xd68] sm:$0xff]  ;;  %v1294_v57 = vld [vmem:[%s6966_s4 + $0x270] sm:$0xff] }
 0x2b5   : > { %v5031_v37 = vsel %vm4967_vm9, %v4541_v18, %v4999_v30  ;;  %v5030_v38 = vsel %vm4966_vm10, %v4502_v19, %v4998_v31  ;;  %4806 = vmatpush1.bf16.msra.mxu0 %v5488_v17  ;;  %4847 = vmatpush1.bf16.msra.mxu1 %v5490_v22  ;;  %v5650_v14 = vcombine.low %v1581_v2, %v1597_v3  ;;  %v1644_v18 = vld [vmem:[%s6966_s4 + $0xd60] sm:$0xff]  ;;  %v1661_v21 = vld [vmem:[%s6966_s4 + $0xde8] sm:$0xff]  ;;  %v1326_v3 = vld [vmem:[%s6966_s4 + $0x370] sm:$0xff] }
 0x2b6   : > { %v5807_v41 = vpack.c.bf16 %v5030_v38, %v5029_v32  ;;  %v5032_v42 = vsel %vm4968_vm11, %v4543_v25, %v5000_v33  ;;  %4807 = vmatprep.subr.bf16.mxu0 %v5521_v23  ;;  %4848 = vmatprep.subr.bf16.mxu1 %v5523_v28  ;;  %v5681_v15 = vcombine.high %v1612_v9, %v1628_v10  ;;  %v1660_v19 = vld [vmem:[%s6966_s4 + $0xde0] sm:$0xff]  ;;  %v1677_v27 = vld [vmem:[%s6966_s4 + $0xe68] sm:$0xff] }
 0x2b7   : > { %v5808_v44 = vpack.c.bf16 %v5032_v42, %v5031_v37  ;;  %v5683_v17 = vcombine.high %v1613_v11, %v1629_v12  ;;  %v5680_v22 = vcombine.low %v1612_v9, %v1628_v10  ;;  %v5682_v23 = vcombine.low %v1613_v11, %v1629_v12  ;;  %v1676_v25 = vld [vmem:[%s6966_s4 + $0xe60] sm:$0xff]  ;;  %v1693_v28 = vld [vmem:[%s6966_s4 + $0xee8] sm:$0xff]  ;;  %v1246_v42 = vld [vmem:[%s6966_s4 + $0xf0] sm:$0xff] }
 0x2b8   : > { %5185 = vst [vmem:[%s7301_s11 + $0x20] sm:$0xff] %v5807_v41  ;;  %v5713_v24 = vcombine.high %v1644_v18, %v1660_v19  ;;  %v5715_v0 = vcombine.high %v1645_v20, %v1661_v21  ;;  %v1692_v26 = vld [vmem:[%s6966_s4 + $0xee0] sm:$0xff]  ;;  %v5712_v29 = vcombine.low %v1644_v18, %v1660_v19  ;;  %v5714_v30 = vcombine.low %v1645_v20, %v1661_v21  ;;  %v1230_v41 = vld [vmem:[%s6966_s4 + $0x70] sm:$0xff] }
 0x2b9   : > { %5186 = vst [vmem:[%s7301_s11 + $0x28] sm:$0xff] %v5808_v44  ;;  %4808 = vmatpush1.bf16.msra.mxu0 %v5520_v39  ;;  %4849 = vmatpush1.bf16.msra.mxu1 %v5522_v40  ;;  %v5745_v31 = vcombine.high %v1676_v25, %v1692_v26  ;;  %v5747_v32 = vcombine.high %v1677_v27, %v1693_v28  ;;  %v1708_v33 = vld [vmem:[%s6966_s4 + $0xf60] sm:$0xff]  ;;  %v1247_v44 = vld [vmem:[%s6966_s4 + $0xf8] sm:$0xff]  ;;  %v1358_v12 = vld [vmem:[%s6966_s4 + $0x470] sm:$0xff] }
 0x2ba   : > { %4809 = vmatprep.subr.bf16.mxu0 %v5553_v43  ;;  %4850 = vmatprep.subr.bf16.mxu1 %v5555_v45  ;;  %v1724_v34 = vld [vmem:[%s6966_s4 + $0xfe0] sm:$0xff]  ;;  %v5744_v37 = vcombine.low %v1676_v25, %v1692_v26  ;;  %v5746_v38 = vcombine.low %v1677_v27, %v1693_v28  ;;  %v5779_v40 = vcombine.high %v1709_v35, %v1725_v36  ;;  %v1231_v43 = vld [vmem:[%s6966_s4 + $0x78] sm:$0xff]  ;;  %v1390_v20 = vld [vmem:[%s6966_s4 + $0x570] sm:$0xff] }
 0x2bb   : > { %v5777_v39 = vcombine.high %v1708_v33, %v1724_v34  ;;  %v5776_v45 = vcombine.low %v1708_v33, %v1724_v34  ;;  %v5301_v47 = vcombine.high %v1230_v41, %v1246_v42  ;;  %v5303_v48 = vcombine.high %v1231_v43, %v1247_v44  ;;  %v1406_v21 = vld [vmem:[%s6966_s4 + $0x5f0] sm:$0xff] }
 0x2bc   : > { %v5302_v54 = vcombine.low %v1231_v43, %v1247_v44  ;;  %v5461_v25 = vcombine.high %v1390_v20, %v1406_v21  ;;  %v1422_v27 = vld [vmem:[%s6966_s4 + $0x670] sm:$0xff] }
 0x2bd   : > { %4810 = vmatpush1.bf16.msra.mxu0 %v5552_v50  ;;  %4851 = vmatpush1.bf16.msra.mxu1 %v5554_v51  ;;  %v1278_v50 = vld [vmem:[%s6966_s4 + $0x1f0] sm:$0xff]  ;;  %v1263_v51 = vld [vmem:[%s6966_s4 + $0x178] sm:$0xff] }
 0x2be   : > { %4811 = vmatprep.subr.bf16.mxu0 %v5585_v52  ;;  %4852 = vmatprep.subr.bf16.mxu1 %v5587_v53  ;;  %v1279_v52 = vld [vmem:[%s6966_s4 + $0x1f8] sm:$0xff]  ;;  %v5300_v53 = vcombine.low %v1230_v41, %v1246_v42  ;;  %v5333_v55 = vcombine.high %v1262_v49, %v1278_v50  ;;  %v1438_v28 = vld [vmem:[%s6966_s4 + $0x6f0] sm:$0xff] }
 0x2bf   : > { %v5335_v56 = vcombine.high %v1263_v51, %v1279_v52  ;;  %v5334_v62 = vcombine.low %v1263_v51, %v1279_v52  ;;  %v5493_v33 = vcombine.high %v1422_v27, %v1438_v28  ;;  %v1454_v34 = vld [vmem:[%s6966_s4 + $0x770] sm:$0xff]  ;;  %v5492_v43 = vcombine.low %v1422_v27, %v1438_v28 }
 0x2c0   : > { %v1470_v35 = vld [vmem:[%s6966_s4 + $0x7f0] sm:$0xff] }
 0x2c1   : > { %4812 = vmatpush1.bf16.msra.mxu0 %v5584_v58  ;;  %4853 = vmatpush1.bf16.msra.mxu1 %v5586_v59  ;;  %v1310_v58 = vld [vmem:[%s6966_s4 + $0x2f0] sm:$0xff]  ;;  %v1295_v59 = vld [vmem:[%s6966_s4 + $0x278] sm:$0xff] }
 0x2c2   : > { %4813 = vmatprep.subr.bf16.mxu0 %v5617_v60  ;;  %4854 = vmatprep.subr.bf16.mxu1 %v5619_v61  ;;  %v1311_v60 = vld [vmem:[%s6966_s4 + $0x2f8] sm:$0xff]  ;;  %v5332_v61 = vcombine.low %v1262_v49, %v1278_v50  ;;  %v5365_v63 = vcombine.high %v1294_v57, %v1310_v58  ;;  %v5525_v49 = vcombine.high %v1454_v34, %v1470_v35  ;;  %v1486_v50 = vld [vmem:[%s6966_s4 + $0x870] sm:$0xff] }
 0x2c3   : > { %v5367_v2 = vcombine.high %v1295_v59, %v1311_v60  ;;  %v5366_v9 = vcombine.low %v1295_v59, %v1311_v60  ;;  %v1582_v27 = vld [vmem:[%s6966_s4 + $0xb70] sm:$0xff] }
 0x2c4   : > { %v1598_v28 = vld [vmem:[%s6966_s4 + $0xbf0] sm:$0xff] }
 0x2c5   : > { %4814 = vmatpush1.bf16.msra.mxu0 %v5616_v4  ;;  %4855 = vmatpush1.bf16.msra.mxu1 %v5618_v5  ;;  %v1342_v4 = vld [vmem:[%s6966_s4 + $0x3f0] sm:$0xff]  ;;  %v1327_v5 = vld [vmem:[%s6966_s4 + $0x378] sm:$0xff] }
 0x2c6   : > { %4815 = vmatprep.subr.bf16.mxu0 %v5649_v6  ;;  %4856 = vmatprep.subr.bf16.mxu1 %v5651_v7  ;;  %v1343_v6 = vld [vmem:[%s6966_s4 + $0x3f8] sm:$0xff]  ;;  %v5364_v7 = vcombine.low %v1294_v57, %v1310_v58  ;;  %v5397_v10 = vcombine.high %v1326_v3, %v1342_v4 }
 0x2c7   : > { %v5399_v11 = vcombine.high %v1327_v5, %v1343_v6 }
 0x2c9   : > { %4816 = vmatpush1.bf16.msra.mxu0 %v5648_v13  ;;  %4857 = vmatpush1.bf16.msra.mxu1 %v5650_v14  ;;  %v1374_v13 = vld [vmem:[%s6966_s4 + $0x4f0] sm:$0xff]  ;;  %v1359_v14 = vld [vmem:[%s6966_s4 + $0x478] sm:$0xff] }
 0x2ca   : > { %4817 = vmatprep.subr.bf16.mxu0 %v5681_v15  ;;  %4858 = vmatprep.subr.bf16.mxu1 %v5683_v17  ;;  %v1375_v15 = vld [vmem:[%s6966_s4 + $0x4f8] sm:$0xff]  ;;  %v5396_v17 = vcombine.low %v1326_v3, %v1342_v4  ;;  %v5429_v18 = vcombine.high %v1358_v12, %v1374_v13  ;;  %v5524_v4 = vcombine.low %v1454_v34, %v1470_v35  ;;  %v1614_v35 = vld [vmem:[%s6966_s4 + $0xc70] sm:$0xff] }
 0x2cb   : > { %v5431_v19 = vcombine.high %v1359_v14, %v1375_v15 }
 0x2cd   : > { %4818 = vmatpush1.bf16.msra.mxu0 %v5680_v22  ;;  %4859 = vmatpush1.bf16.msra.mxu1 %v5682_v23  ;;  %v1391_v22 = vld [vmem:[%s6966_s4 + $0x578] sm:$0xff] }
 0x2ce   : > { %4819 = vmatprep.subr.bf16.mxu0 %v5713_v24  ;;  %4860 = vmatprep.subr.bf16.mxu1 %v5715_v0  ;;  %v1407_v23 = vld [vmem:[%s6966_s4 + $0x5f8] sm:$0xff]  ;;  %v5428_v24 = vcombine.low %v1358_v12, %v1374_v13  ;;  %v5430_v0 = vcombine.low %v1359_v14, %v1375_v15  ;;  %v1518_v12 = vld [vmem:[%s6966_s4 + $0x970] sm:$0xff] }
 0x2cf   : > { %v5463_v26 = vcombine.high %v1391_v22, %v1407_v23  ;;  %v1534_v13 = vld [vmem:[%s6966_s4 + $0x9f0] sm:$0xff]  ;;  %v1519_v14 = vld [vmem:[%s6966_s4 + $0x978] sm:$0xff] }
 0x2d0   : > { %v1535_v15 = vld [vmem:[%s6966_s4 + $0x9f8] sm:$0xff] }
 0x2d1   : > { %4820 = vmatpush1.bf16.msra.mxu0 %v5712_v29  ;;  %4861 = vmatpush1.bf16.msra.mxu1 %v5714_v30  ;;  %v1423_v29 = vld [vmem:[%s6966_s4 + $0x678] sm:$0xff] }
 0x2d2   : > { %4821 = vmatprep.subr.bf16.mxu0 %v5745_v31  ;;  %4862 = vmatprep.subr.bf16.mxu1 %v5747_v32  ;;  %v1439_v30 = vld [vmem:[%s6966_s4 + $0x6f8] sm:$0xff]  ;;  %v5460_v31 = vcombine.low %v1390_v20, %v1406_v21  ;;  %v5462_v32 = vcombine.low %v1391_v22, %v1407_v23  ;;  %v1550_v20 = vld [vmem:[%s6966_s4 + $0xa70] sm:$0xff] }
 0x2d3   : > { %v1566_v21 = vld [vmem:[%s6966_s4 + $0xaf0] sm:$0xff]  ;;  %v1551_v22 = vld [vmem:[%s6966_s4 + $0xa78] sm:$0xff] }
 0x2d4   : > { %v1567_v23 = vld [vmem:[%s6966_s4 + $0xaf8] sm:$0xff] }
 0x2d5   : > { %4822 = vmatpush1.bf16.msra.mxu0 %v5744_v37  ;;  %4863 = vmatpush1.bf16.msra.mxu1 %v5746_v38  ;;  %v5495_v37 = vcombine.high %v1423_v29, %v1439_v30  ;;  %v1455_v38 = vld [vmem:[%s6966_s4 + $0x778] sm:$0xff] }
 0x2d6   : > { %4823 = vmatprep.subr.bf16.mxu0 %v5777_v39  ;;  %4864 = vmatprep.subr.bf16.mxu1 %v5779_v40  ;;  %v1471_v39 = vld [vmem:[%s6966_s4 + $0x7f8] sm:$0xff] }
 0x2d9   : > { %4824 = vmatpush1.bf16.msra.mxu0 %v5776_v45  ;;  %4865 = vmatpush1.bf16.msra.mxu1 %v5778_v46 }
 0x2da   : > { %4875 = vmatprep.subr.bf16.mxu0 %v5301_v47  ;;  %4916 = vmatprep.subr.bf16.mxu1 %v5303_v48  ;;  %v5494_v48 = vcombine.low %v1423_v29, %v1439_v30  ;;  %v1583_v29 = vld [vmem:[%s6966_s4 + $0xb78] sm:$0xff] }
 0x2db   : > { %v1599_v30 = vld [vmem:[%s6966_s4 + $0xbf8] sm:$0xff] }
 0x2dc   : > { %4826 = vmatmul.mubr.bf16.vlgmr.msra.gmra.mrb[24].mxu0 %v7045_v16  ;;  %4867 = vmatmul.mubr.bf16.vlgmr.msra.gmra.mrb[24].mxu1 %v7045_v16  ;;  %v5655_v34 = vcombine.high %v1583_v29, %v1599_v30 }
 0x2dd   : > { %4876 = vmatpush1.bf16.msra.mxu0 %v5300_v53  ;;  %4917 = vmatpush1.bf16.msra.mxu1 %v5302_v54 }
 0x2de   : > { %4877 = vmatprep.subr.bf16.mxu0 %v5333_v55  ;;  %4918 = vmatprep.subr.bf16.mxu1 %v5335_v56  ;;  %v5527_v55 = vcombine.high %v1455_v38, %v1471_v39  ;;  %v1502_v56 = vld [vmem:[%s6966_s4 + $0x8f0] sm:$0xff] }
 0x2df   : > { %4907 = vmatprep.mubr.bf16.mxu0 %v6964_v1  ;;  %4948 = vmatprep.mubr.bf16.mxu1 %v6964_v1  ;;  %v5398_v1 = vcombine.low %v1327_v5, %v1343_v6  ;;  %v5526_v5 = vcombine.low %v1455_v38, %v1471_v39  ;;  %v1631_v38 = vld [vmem:[%s6966_s4 + $0xcf8] sm:$0xff]  ;;  %v5652_v39 = vcombine.low %v1582_v27, %v1598_v28 }
 0x2e1   : > { %4878 = vmatpush1.bf16.msra.mxu0 %v5332_v61  ;;  %4919 = vmatpush1.bf16.msra.mxu1 %v5334_v62  ;;  %v1487_v62 = vld [vmem:[%s6966_s4 + $0x878] sm:$0xff] }
 0x2e2   : > { %4879 = vmatprep.subr.bf16.mxu0 %v5365_v63  ;;  %4920 = vmatprep.subr.bf16.mxu1 %v5367_v2  ;;  %v1503_v63 = vld [vmem:[%s6966_s4 + $0x8f8] sm:$0xff] }
 0x2e5   : > { %4880 = vmatpush1.bf16.msra.mxu0 %v5364_v7  ;;  %4921 = vmatpush1.bf16.msra.mxu1 %v5366_v9  ;;  %v5557_v9 = vcombine.high %v1486_v50, %v1502_v56 }
 0x2e6   : > { %4881 = vmatprep.subr.bf16.mxu0 %v5397_v10  ;;  %4922 = vmatprep.subr.bf16.mxu1 %v5399_v11  ;;  %v5559_v11 = vcombine.high %v1487_v62, %v1503_v63 }
 0x2e9   : > { %4882 = vmatpush1.bf16.msra.mxu0 %v5396_v17  ;;  %4923 = vmatpush1.bf16.msra.mxu1 %v5398_v1  ;;  %v5556_v17 = vcombine.low %v1486_v50, %v1502_v56  ;;  %v5558_v1 = vcombine.low %v1487_v62, %v1503_v63  ;;  %v1727_v62 = vld [vmem:[%s6966_s4 + $0xff8] sm:$0xff] }
 0x2ea   : > { %4883 = vmatprep.subr.bf16.mxu0 %v5429_v18  ;;  %4924 = vmatprep.subr.bf16.mxu1 %v5431_v19  ;;  %v5589_v18 = vcombine.high %v1518_v12, %v1534_v13  ;;  %v5591_v19 = vcombine.high %v1519_v14, %v1535_v15 }
 0x2ed   : > { %4884 = vmatpush1.bf16.msra.mxu0 %v5428_v24  ;;  %4925 = vmatpush1.bf16.msra.mxu1 %v5430_v0  ;;  %v5588_v24 = vcombine.low %v1518_v12, %v1534_v13  ;;  %v5590_v0 = vcombine.low %v1519_v14, %v1535_v15 }
 0x2ee   : > { %4885 = vmatprep.subr.bf16.mxu0 %v5461_v25  ;;  %4926 = vmatprep.subr.bf16.mxu1 %v5463_v26  ;;  %v5621_v25 = vcombine.high %v1550_v20, %v1566_v21  ;;  %v5623_v26 = vcombine.high %v1551_v22, %v1567_v23 }
 0x2ef   : > { %v4581_v36 = vpop.f32.mrb[12].mxu0  ;;  %v4622_v41 = vpop.f32.mrb[12].mxu1 }
 0x2f0   : > { %v4582_v40 = vadd.f32 %v4581_v36, %v7279_v8  ;;  %v4583_v42 = vpop.f32.mrb[13].mxu0  ;;  %v4623_v44 = vadd.f32 %v4622_v41, %v7279_v8  ;;  %v4624_v46 = vpop.f32.mrb[13].mxu1  ;;  %v1630_v36 = vld [vmem:[%s6966_s4 + $0xcf0] sm:$0xff] }
 0x2f1   : > { %v4584_v45 = vadd.f32 %v4583_v42, %v7279_v8  ;;  %v4585_v47 = vpop.f32.mrb[14].mxu0  ;;  %4886 = vmatpush1.bf16.msra.mxu0 %v5460_v31  ;;  %v4625_v52 = vadd.f32 %v4624_v46, %v7279_v8  ;;  %v4626_v53 = vpop.f32.mrb[14].mxu1  ;;  %4927 = vmatpush1.bf16.msra.mxu1 %v5462_v32  ;;  %v5620_v31 = vcombine.low %v1550_v20, %v1566_v21  ;;  %v1663_v46 = vld [vmem:[%s6966_s4 + $0xdf8] sm:$0xff] }
 0x2f2   : > { %vm4969_vm12 = vcmp.ge.f32.partialorder %v4582_v40, 0.0  ;;  %v5001_v51 = vmul.f32 0.01, %v4582_v40  ;;  %v4586_v54 = vpop.f32.mrb[15].mxu0  ;;  %4887 = vmatprep.subr.bf16.mxu0 %v5493_v33  ;;  %vm4971_vm13 = vcmp.ge.f32.partialorder %v4623_v44, 0.0  ;;  %4928 = vmatprep.subr.bf16.mxu1 %v5495_v37  ;;  %v4627_v61 = vpop.f32.mrb[15].mxu1  ;;  %v5622_v32 = vcombine.low %v1551_v22, %v1567_v23 }
 0x2f3   : > { %v5003_v57 = vmul.f32 0.01, %v4623_v44  ;;  %vm4970_vm14 = vcmp.ge.f32.partialorder %v4584_v45, 0.0  ;;  %v5002_v58 = vmul.f32 0.01, %v4584_v45  ;;  %vm4972_vm15 = vcmp.ge.f32.partialorder %v4625_v52, 0.0 }
 0x2f4   : > { %v5033_v59 = vsel %vm4969_vm12, %v4582_v40, %v5001_v51  ;;  %v5004_v60 = vmul.f32 0.01, %v4625_v52  ;;  %v5653_v33 = vcombine.high %v1582_v27, %v1598_v28  ;;  %v1615_v37 = vld [vmem:[%s6966_s4 + $0xc78] sm:$0xff]  ;;  %v5654_v40 = vcombine.low %v1583_v29, %v1599_v30  ;;  %v1678_v51 = vld [vmem:[%s6966_s4 + $0xe70] sm:$0xff] }
 0x2f5   : > { %v5035_v2 = vsel %vm4971_vm13, %v4623_v44, %v5003_v57  ;;  %v5034_v3 = vsel %vm4970_vm14, %v4584_v45, %v5002_v58  ;;  %4888 = vmatpush1.bf16.msra.mxu0 %v5492_v43  ;;  %4929 = vmatpush1.bf16.msra.mxu1 %v5494_v48  ;;  %v5685_v41 = vcombine.high %v1614_v35, %v1630_v36  ;;  %v1646_v43 = vld [vmem:[%s6966_s4 + $0xd70] sm:$0xff]  ;;  %v1647_v45 = vld [vmem:[%s6966_s4 + $0xd78] sm:$0xff] }
 0x2f6   : > { %v5809_v6 = vpack.c.bf16 %v5034_v3, %v5033_v59  ;;  %v5036_v7 = vsel %vm4972_vm15, %v4625_v52, %v5004_v60  ;;  %4889 = vmatprep.subr.bf16.mxu0 %v5525_v49  ;;  %4930 = vmatprep.subr.bf16.mxu1 %v5527_v55  ;;  %v5687_v42 = vcombine.high %v1615_v37, %v1631_v38  ;;  %v1662_v44 = vld [vmem:[%s6966_s4 + $0xdf0] sm:$0xff]  ;;  %v1679_v53 = vld [vmem:[%s6966_s4 + $0xe78] sm:$0xff] }
 0x2f7   : > { %v5810_v10 = vpack.c.bf16 %v5036_v7, %v5035_v2  ;;  %v5684_v47 = vcombine.low %v1614_v35, %v1630_v36  ;;  %v5686_v48 = vcombine.low %v1615_v37, %v1631_v38  ;;  %v5717_v49 = vcombine.high %v1646_v43, %v1662_v44  ;;  %v1694_v52 = vld [vmem:[%s6966_s4 + $0xef0] sm:$0xff]  ;;  %v1695_v54 = vld [vmem:[%s6966_s4 + $0xef8] sm:$0xff] }
 0x2f8   : > { %5187 = vst [vmem:[%s7301_s11 + $0x30] sm:$0xff] %v5809_v6  ;;  %v5719_v50 = vcombine.high %v1647_v45, %v1663_v46  ;;  %v5716_v55 = vcombine.low %v1646_v43, %v1662_v44  ;;  %v5718_v56 = vcombine.low %v1647_v45, %v1663_v46  ;;  %v5749_v57 = vcombine.high %v1678_v51, %v1694_v52  ;;  %v1710_v59 = vld [vmem:[%s6966_s4 + $0xf70] sm:$0xff]  ;;  %v1711_v61 = vld [vmem:[%s6966_s4 + $0xf78] sm:$0xff] }
 0x2f9   : > { %5188 = vst [vmem:[%s7301_s11 + $0x38] sm:$0xff] %v5810_v10  ;;  %4890 = vmatpush1.bf16.msra.mxu0 %v5524_v4  ;;  %4931 = vmatpush1.bf16.msra.mxu1 %v5526_v5  ;;  %v5751_v58 = vcombine.high %v1679_v53, %v1695_v54  ;;  %v1726_v60 = vld [vmem:[%s6966_s4 + $0xff0] sm:$0xff]  ;;  %v5748_v63 = vcombine.low %v1678_v51, %v1694_v52 }
 0x2fa   : > { %4891 = vmatprep.subr.bf16.mxu0 %v5557_v9  ;;  %4932 = vmatprep.subr.bf16.mxu1 %v5559_v11  ;;  %v5750_v2 = vcombine.low %v1679_v53, %v1695_v54  ;;  %v5781_v3 = vcombine.high %v1710_v59, %v1726_v60  ;;  %v5783_v4 = vcombine.high %v1711_v61, %v1727_v62 }
 0x2fb   : > { %v5780_v5 = vcombine.low %v1710_v59, %v1726_v60  ;;  %v5782_v6 = vcombine.low %v1711_v61, %v1727_v62 }
 0x2fd   : > { %4892 = vmatpush1.bf16.msra.mxu0 %v5556_v17  ;;  %4933 = vmatpush1.bf16.msra.mxu1 %v5558_v1 }
 0x2fe   : > { %4893 = vmatprep.subr.bf16.mxu0 %v5589_v18  ;;  %4934 = vmatprep.subr.bf16.mxu1 %v5591_v19 }
 0x301   : > { %4894 = vmatpush1.bf16.msra.mxu0 %v5588_v24  ;;  %4935 = vmatpush1.bf16.msra.mxu1 %v5590_v0 }
 0x302   : > { %4895 = vmatprep.subr.bf16.mxu0 %v5621_v25  ;;  %4936 = vmatprep.subr.bf16.mxu1 %v5623_v26 }
 0x305   : > { %4896 = vmatpush1.bf16.msra.mxu0 %v5620_v31  ;;  %4937 = vmatpush1.bf16.msra.mxu1 %v5622_v32 }
 0x306   : > { %4897 = vmatprep.subr.bf16.mxu0 %v5653_v33  ;;  %4938 = vmatprep.subr.bf16.mxu1 %v5655_v34 }
 0x309   : > { %4898 = vmatpush1.bf16.msra.mxu0 %v5652_v39  ;;  %4939 = vmatpush1.bf16.msra.mxu1 %v5654_v40 }
 0x30a   : > { %4899 = vmatprep.subr.bf16.mxu0 %v5685_v41  ;;  %4940 = vmatprep.subr.bf16.mxu1 %v5687_v42 }
 0x30d   : > { %4900 = vmatpush1.bf16.msra.mxu0 %v5684_v47  ;;  %4941 = vmatpush1.bf16.msra.mxu1 %v5686_v48 }
 0x30e   : > { %4901 = vmatprep.subr.bf16.mxu0 %v5717_v49  ;;  %4942 = vmatprep.subr.bf16.mxu1 %v5719_v50 }
 0x311   : > { %4902 = vmatpush1.bf16.msra.mxu0 %v5716_v55  ;;  %4943 = vmatpush1.bf16.msra.mxu1 %v5718_v56 }
 0x312   : > { %4903 = vmatprep.subr.bf16.mxu0 %v5749_v57  ;;  %4944 = vmatprep.subr.bf16.mxu1 %v5751_v58 }
 0x315   : > { %4904 = vmatpush1.bf16.msra.mxu0 %v5748_v63  ;;  %4945 = vmatpush1.bf16.msra.mxu1 %v5750_v2 }
 0x316   : > { %4905 = vmatprep.subr.bf16.mxu0 %v5781_v3  ;;  %4946 = vmatprep.subr.bf16.mxu1 %v5783_v4 }
 0x319   : > { %4906 = vmatpush1.bf16.msra.mxu0 %v5780_v5  ;;  %4947 = vmatpush1.bf16.msra.mxu1 %v5782_v6 }
 0x31c   : > { %4908 = vmatmul.mubr.bf16.vlgmr.msra.gmra.mrb[28].mxu0 %v7045_v16  ;;  %4949 = vmatmul.mubr.bf16.vlgmr.msra.gmra.mrb[28].mxu1 %v7045_v16 }
 0x32f   : > { %v4663_v7 = vpop.f32.mrb[16].mxu0  ;;  %v4704_v10 = vpop.f32.mrb[16].mxu1 }
 0x330   : > { %v4664_v9 = vadd.f32 %v4663_v7, %v7279_v8  ;;  %v4665_v11 = vpop.f32.mrb[17].mxu0  ;;  %v4705_v12 = vadd.f32 %v4704_v10, %v7279_v8  ;;  %v4706_v14 = vpop.f32.mrb[17].mxu1 }
 0x331   : > { %v4666_v13 = vadd.f32 %v4665_v11, %v7279_v8  ;;  %v4667_v15 = vpop.f32.mrb[18].mxu0  ;;  %v4707_v1 = vadd.f32 %v4706_v14, %v7279_v8  ;;  %v4708_v18 = vpop.f32.mrb[18].mxu1 }
 0x332   : > { %vm4973_vm0 = vcmp.ge.f32.partialorder %v4664_v9, 0.0  ;;  %v5005_v17 = vmul.f32 0.01, %v4664_v9  ;;  %v4668_v19 = vpop.f32.mrb[19].mxu0  ;;  %vm4975_vm1 = vcmp.ge.f32.partialorder %v4705_v12, 0.0  ;;  %v4709_v23 = vpop.f32.mrb[19].mxu1 }
 0x333   : > { %v5007_v16 = vmul.f32 0.01, %v4705_v12  ;;  %vm4974_vm2 = vcmp.ge.f32.partialorder %v4666_v13, 0.0  ;;  %v5006_v20 = vmul.f32 0.01, %v4666_v13  ;;  %vm4976_vm3 = vcmp.ge.f32.partialorder %v4707_v1, 0.0 }
 0x334   : > { %v5037_v21 = vsel %vm4973_vm0, %v4664_v9, %v5005_v17  ;;  %v5008_v22 = vmul.f32 0.01, %v4707_v1 }
 0x335   : > { %v5039_v24 = vsel %vm4975_vm1, %v4705_v12, %v5007_v16  ;;  %v5038_v0 = vsel %vm4974_vm2, %v4666_v13, %v5006_v20 }
 0x336   : > { %v5811_v25 = vpack.c.bf16 %v5038_v0, %v5037_v21  ;;  %v5040_v26 = vsel %vm4976_vm3, %v4707_v1, %v5008_v22 }
 0x337   : > { %v5812_v27 = vpack.c.bf16 %v5040_v26, %v5039_v24 }
 0x338   : > { %5189 = vst [vmem:[%s7301_s11 + $0x40] sm:$0xff] %v5811_v25 }
 0x339   : > { %5190 = vst [vmem:[%s7301_s11 + $0x48] sm:$0xff] %v5812_v27 }
 0x36f   : > { %v4745_v28 = vpop.f32.mrb[20].mxu0  ;;  %v4786_v30 = vpop.f32.mrb[20].mxu1 }
 0x370   : > { %v4746_v29 = vadd.f32 %v4745_v28, %v7279_v8  ;;  %v4747_v31 = vpop.f32.mrb[21].mxu0  ;;  %v4787_v32 = vadd.f32 %v4786_v30, %v7279_v8  ;;  %v4788_v34 = vpop.f32.mrb[21].mxu1 }
 0x371   : > { %v4748_v33 = vadd.f32 %v4747_v31, %v7279_v8  ;;  %v4749_v35 = vpop.f32.mrb[22].mxu0  ;;  %v4789_v37 = vadd.f32 %v4788_v34, %v7279_v8  ;;  %v4790_v38 = vpop.f32.mrb[22].mxu1 }
 0x372   : > { %vm4977_vm4 = vcmp.ge.f32.partialorder %v4746_v29, 0.0  ;;  %v5009_v36 = vmul.f32 0.01, %v4746_v29  ;;  %v4750_v39 = vpop.f32.mrb[23].mxu0  ;;  %vm4979_vm5 = vcmp.ge.f32.partialorder %v4787_v32, 0.0  ;;  %v4791_v44 = vpop.f32.mrb[23].mxu1 }
 0x373   : > { %v5011_v40 = vmul.f32 0.01, %v4787_v32  ;;  %vm4978_vm6 = vcmp.ge.f32.partialorder %v4748_v33, 0.0  ;;  %v5010_v41 = vmul.f32 0.01, %v4748_v33  ;;  %vm4980_vm7 = vcmp.ge.f32.partialorder %v4789_v37, 0.0 }
 0x374   : > { %v5041_v42 = vsel %vm4977_vm4, %v4746_v29, %v5009_v36  ;;  %v5012_v43 = vmul.f32 0.01, %v4789_v37 }
 0x375   : > { %v5043_v45 = vsel %vm4979_vm5, %v4787_v32, %v5011_v40  ;;  %v5042_v46 = vsel %vm4978_vm6, %v4748_v33, %v5010_v41 }
 0x376   : > { %v5813_v47 = vpack.c.bf16 %v5042_v46, %v5041_v42  ;;  %v5044_v48 = vsel %vm4980_vm7, %v4789_v37, %v5012_v43 }
 0x377   : > { %v5814_v49 = vpack.c.bf16 %v5044_v48, %v5043_v45 }
 0x378   : > { %5191 = vst [vmem:[%s7301_s11 + $0x50] sm:$0xff] %v5813_v47 }
 0x379   : > { %5192 = vst [vmem:[%s7301_s11 + $0x58] sm:$0xff] %v5814_v49 }
 0x3af   : > { %v4827_v50 = vpop.f32.mrb[24].mxu0  ;;  %v4868_v52 = vpop.f32.mrb[24].mxu1 }
 0x3b0   : > { %v4828_v51 = vadd.f32 %v4827_v50, %v7279_v8  ;;  %v4829_v53 = vpop.f32.mrb[25].mxu0  ;;  %v4869_v54 = vadd.f32 %v4868_v52, %v7279_v8  ;;  %v4870_v56 = vpop.f32.mrb[25].mxu1 }
 0x3b1   : > { %v4830_v55 = vadd.f32 %v4829_v53, %v7279_v8  ;;  %v4831_v57 = vpop.f32.mrb[26].mxu0  ;;  %v4871_v59 = vadd.f32 %v4870_v56, %v7279_v8  ;;  %v4872_v60 = vpop.f32.mrb[26].mxu1 }
 0x3b2   : > { %vm4981_vm8 = vcmp.ge.f32.partialorder %v4828_v51, 0.0  ;;  %v5013_v58 = vmul.f32 0.01, %v4828_v51  ;;  %v4832_v61 = vpop.f32.mrb[27].mxu0  ;;  %vm4983_vm9 = vcmp.ge.f32.partialorder %v4869_v54, 0.0  ;;  %v4873_v4 = vpop.f32.mrb[27].mxu1 }
 0x3b3   : > { %v5015_v62 = vmul.f32 0.01, %v4869_v54  ;;  %vm4982_vm10 = vcmp.ge.f32.partialorder %v4830_v55, 0.0  ;;  %v5014_v63 = vmul.f32 0.01, %v4830_v55  ;;  %vm4984_vm11 = vcmp.ge.f32.partialorder %v4871_v59, 0.0 }
 0x3b4   : > { %v5045_v2 = vsel %vm4981_vm8, %v4828_v51, %v5013_v58  ;;  %v5016_v3 = vmul.f32 0.01, %v4871_v59 }
 0x3b5   : > { %v5047_v5 = vsel %vm4983_vm9, %v4869_v54, %v5015_v62  ;;  %v5046_v6 = vsel %vm4982_vm10, %v4830_v55, %v5014_v63 }
 0x3b6   : > { %v5815_v7 = vpack.c.bf16 %v5046_v6, %v5045_v2  ;;  %v5048_v9 = vsel %vm4984_vm11, %v4871_v59, %v5016_v3 }
 0x3b7   : > { %v5816_v10 = vpack.c.bf16 %v5048_v9, %v5047_v5 }
 0x3b8   : > { %5193 = vst [vmem:[%s7301_s11 + $0x60] sm:$0xff] %v5815_v7 }
 0x3b9   : > { %5194 = vst [vmem:[%s7301_s11 + $0x68] sm:$0xff] %v5816_v10 }
 0x3ef   : > { %v4909_v11 = vpop.f32.mrb[28].mxu0  ;;  %v4950_v13 = vpop.f32.mrb[28].mxu1 }
 0x3f0   : > { %v4910_v12 = vadd.f32 %v4909_v11, %v7279_v8  ;;  %v4911_v14 = vpop.f32.mrb[29].mxu0  ;;  %v4951_v15 = vadd.f32 %v4950_v13, %v7279_v8  ;;  %v4952_v1 = vpop.f32.mrb[29].mxu1 }
 0x3f1   : > { %v4912_v17 = vadd.f32 %v4911_v14, %v7279_v8  ;;  %v4913_v18 = vpop.f32.mrb[30].mxu0  ;;  %v4953_v16 = vadd.f32 %v4952_v1, %v7279_v8  ;;  %v4954_v20 = vpop.f32.mrb[30].mxu1 }
 0x3f2   : > { %vm4985_vm12 = vcmp.ge.f32.partialorder %v4910_v12, 0.0  ;;  %v5017_v19 = vmul.f32 0.01, %v4910_v12  ;;  %v4914_v21 = vpop.f32.mrb[31].mxu0  ;;  %vm4987_vm13 = vcmp.ge.f32.partialorder %v4951_v15, 0.0  ;;  %v4955_v25 = vpop.f32.mrb[31].mxu1 }
 0x3f3   : > { %v5019_v22 = vmul.f32 0.01, %v4951_v15  ;;  %vm4986_vm14 = vcmp.ge.f32.partialorder %v4912_v17, 0.0  ;;  %v5018_v23 = vmul.f32 0.01, %v4912_v17  ;;  %vm4988_vm15 = vcmp.ge.f32.partialorder %v4953_v16, 0.0 }
 0x3f4   : > { %v5049_v24 = vsel %vm4985_vm12, %v4910_v12, %v5017_v19  ;;  %v5020_v0 = vmul.f32 0.01, %v4953_v16 }
 0x3f5   : > { %v5051_v26 = vsel %vm4987_vm13, %v4951_v15, %v5019_v22  ;;  %v5050_v27 = vsel %vm4986_vm14, %v4912_v17, %v5018_v23 }
 0x3f6   : > { %v5817_v28 = vpack.c.bf16 %v5050_v27, %v5049_v24  ;;  %v5052_v29 = vsel %vm4988_vm15, %v4953_v16, %v5020_v0 }
 0x3f7   : > { %v5818_v30 = vpack.c.bf16 %v5052_v29, %v5051_v26 }
 0x3f8   : > { %5195 = vst [vmem:[%s7301_s11 + $0x70] sm:$0xff] %v5817_v28 }
 0x3f9   : > { %5196 = vst [vmem:[%s7301_s11 + $0x78] sm:$0xff] %v5818_v30 }
 0x3fa PF: > { %p10_p9 = scmp.ge.s32.totalorder %s5909_s16, 4   ;;  %s7595_s12 = smov %s5865_s13 }
 0x3fb   : > { %s7596_s13 = smov %s5918_s19  ;;  %s7597_s14 = smov %s5909_s16 }
 0x3fc   :  { %12 = sbr.rel (!%p10_p9) target bundleno = 2 (0x2), region = 90 }

// kernel: encoder_forward.5
= control target key start
LH: loop header
LB: loop body
LE: loop exit
PB: predicated region body
PF: predicated region fallthrough
CT: control target
= control target key end

     0   :  { %s2000_s12 = smov 0   ;;  %s2002_s13 = smov 0   ;;  %s2475_s0 = inlined_call_operand.vmem [shape: bf16[16,512], index: 0, kind: input, shape index: {}]   ;;  %s2476_s1 = inlined_call_operand.vmem [shape: bf16[512,1024], index: 1, kind: input, shape index: {}]   ;;  %s2477_s2 = inlined_call_operand.vmem [shape: f32[16,1], index: 2, kind: input, shape index: {}]   ;;  %s2478_s3 = inlined_call_operand.vmem [shape: bf16[16,1024], index: 3, kind: output, shape index: {}]  }
   0x1   :  { %s2004_s14 = smov 0  }
   0x2 LB: > { %s1558_s15 = sadd.s32 4294967295, %s1977_s14   ;;  %s2017_s16 = sadd.s32 1, %s1977_s14   ;;  %s1977_s14 = sphi %s2004_s14, %s2482_s14   ;;  %s1973_s13 = sphi %s2002_s13, %s2481_s13   ;;  %s1969_s12 = sphi %s2000_s12, %s2480_s12  }
   0x3   : > { %s38_s17 = ssub.s32 %s1977_s14, %s2017_s16  ;;  %s41_s18 = sadd.s32 1, %s1973_s13 }
   0x4   : > { %p39_p0 = scmp.eq.s32.totalorder %s38_s17, 0  ;;  %p48_p1 = scmp.ne.s32.totalorder %s1973_s13, %s1969_s12 }
   0x5   : > { %p49_p2 = scmp.eq.s32.totalorder %s1977_s14, 0  ;;  %p99_p3 = scmp.eq.s32.totalorder %s1558_s15, 1 }
   0x6   : > { %s2028_s19 = scalar_select %p39_p0, %s1973_s13, %s41_s18  }
   0x7   : > { %p50_p4 = por %p49_p2, %p48_p1  ;;  %p2030_p5 = por %p99_p3, %p48_p1 }
   0x8   : > { %p1561_p6 = scmp.ge.s32.totalorder %s1977_s14, 2 }
   0xa   : > { %127 = sbr.rel (%p1561_p6) target bundleno = 85 (0x55), region = 24 }
  0x11   : > { %130 = sbr.rel (!%p50_p4) target bundleno = 85 (0x55), region = 28  ;;  %s132_s21 = sand.u32 (%p50_p4), 1, %s1973_s13  }
  0x12   : > { %s1709_s22 = sshll.u32 (%p50_p4), %s1977_s14, 4  ;;  %s1562_s23 = sshll.u32 (%p50_p4), %s132_s21, 10 }
  0x13   : > { %s2040_s26 = scalar_lea.vmem (%p50_p4), %s2476_s1, %s1709_s22  ;;  %s2045_s27 = scalar_lea.vmem (%p50_p4), [#allocation2], %s1562_s23 }
  0x14   : > { %v150_v0 = vld [vmem:[%s2040_s26] sm:$0xff] (%p50_p4)  ;;  %v152_v1 = vld [vmem:[%s2040_s26 + $0x8] sm:$0xff] (%p50_p4) }
  0x15   : > { %v154_v2 = vld [vmem:[%s2040_s26 + $0x20] sm:$0xff] (%p50_p4)  ;;  %151 = vst [vmem:[%s2045_s27] sm:$0xff] (%p50_p4), %v150_v0  ;;  %153 = vst [vmem:[%s2045_s27 + $0x8] sm:$0xff] (%p50_p4), %v152_v1  ;;  %v156_v3 = vld [vmem:[%s2040_s26 + $0x28] sm:$0xff] (%p50_p4) }
  0x16   : > { %155 = vst [vmem:[%s2045_s27 + $0x10] sm:$0xff] (%p50_p4), %v154_v2  ;;  %v158_v4 = vld [vmem:[%s2040_s26 + $0x40] sm:$0xff] (%p50_p4)  ;;  %v160_v5 = vld [vmem:[%s2040_s26 + $0x48] sm:$0xff] (%p50_p4)  ;;  %157 = vst [vmem:[%s2045_s27 + $0x18] sm:$0xff] (%p50_p4), %v156_v3 }
  0x17   : > { %159 = vst [vmem:[%s2045_s27 + $0x20] sm:$0xff] (%p50_p4), %v158_v4  ;;  %161 = vst [vmem:[%s2045_s27 + $0x28] sm:$0xff] (%p50_p4), %v160_v5  ;;  %v162_v6 = vld [vmem:[%s2040_s26 + $0x60] sm:$0xff] (%p50_p4)  ;;  %v164_v7 = vld [vmem:[%s2040_s26 + $0x68] sm:$0xff] (%p50_p4) }
  0x18   : > { %v166_v8 = vld [vmem:[%s2040_s26 + $0x80] sm:$0xff]  ;;  %163 = vst [vmem:[%s2045_s27 + $0x30] sm:$0xff] %v162_v6  ;;  %165 = vst [vmem:[%s2045_s27 + $0x38] sm:$0xff] %v164_v7  ;;  %v168_v9 = vld [vmem:[%s2040_s26 + $0x88] sm:$0xff] }
  0x19   : > { %167 = vst [vmem:[%s2045_s27 + $0x40] sm:$0xff] %v166_v8  ;;  %v170_v10 = vld [vmem:[%s2040_s26 + $0xa0] sm:$0xff]  ;;  %v172_v11 = vld [vmem:[%s2040_s26 + $0xa8] sm:$0xff]  ;;  %169 = vst [vmem:[%s2045_s27 + $0x48] sm:$0xff] %v168_v9 }
  0x1a   : > { %171 = vst [vmem:[%s2045_s27 + $0x50] sm:$0xff] %v170_v10  ;;  %173 = vst [vmem:[%s2045_s27 + $0x58] sm:$0xff] %v172_v11  ;;  %v174_v12 = vld [vmem:[%s2040_s26 + $0xc0] sm:$0xff]  ;;  %v176_v13 = vld [vmem:[%s2040_s26 + $0xc8] sm:$0xff] }
  0x1b   : > { %v178_v14 = vld [vmem:[%s2040_s26 + $0xe0] sm:$0xff]  ;;  %175 = vst [vmem:[%s2045_s27 + $0x60] sm:$0xff] %v174_v12  ;;  %177 = vst [vmem:[%s2045_s27 + $0x68] sm:$0xff] %v176_v13  ;;  %v180_v15 = vld [vmem:[%s2040_s26 + $0xe8] sm:$0xff] }
  0x1c   : > { %179 = vst [vmem:[%s2045_s27 + $0x70] sm:$0xff] %v178_v14  ;;  %v182_v16 = vld [vmem:[%s2040_s26 + $0x100] sm:$0xff]  ;;  %v184_v17 = vld [vmem:[%s2040_s26 + $0x108] sm:$0xff]  ;;  %181 = vst [vmem:[%s2045_s27 + $0x78] sm:$0xff] %v180_v15 }
  0x1d   : > { %183 = vst [vmem:[%s2045_s27 + $0x80] sm:$0xff] %v182_v16  ;;  %185 = vst [vmem:[%s2045_s27 + $0x88] sm:$0xff] %v184_v17  ;;  %v186_v18 = vld [vmem:[%s2040_s26 + $0x120] sm:$0xff]  ;;  %v188_v19 = vld [vmem:[%s2040_s26 + $0x128] sm:$0xff] }
  0x1e   : > { %v190_v20 = vld [vmem:[%s2040_s26 + $0x140] sm:$0xff]  ;;  %187 = vst [vmem:[%s2045_s27 + $0x90] sm:$0xff] %v186_v18  ;;  %189 = vst [vmem:[%s2045_s27 + $0x98] sm:$0xff] %v188_v19  ;;  %v192_v21 = vld [vmem:[%s2040_s26 + $0x148] sm:$0xff] }
  0x1f   : > { %191 = vst [vmem:[%s2045_s27 + $0xa0] sm:$0xff] %v190_v20  ;;  %v194_v22 = vld [vmem:[%s2040_s26 + $0x160] sm:$0xff]  ;;  %v196_v23 = vld [vmem:[%s2040_s26 + $0x168] sm:$0xff]  ;;  %193 = vst [vmem:[%s2045_s27 + $0xa8] sm:$0xff] %v192_v21 }
  0x20   : > { %195 = vst [vmem:[%s2045_s27 + $0xb0] sm:$0xff] %v194_v22  ;;  %197 = vst [vmem:[%s2045_s27 + $0xb8] sm:$0xff] %v196_v23  ;;  %v198_v24 = vld [vmem:[%s2040_s26 + $0x180] sm:$0xff]  ;;  %v200_v25 = vld [vmem:[%s2040_s26 + $0x188] sm:$0xff] }
  0x21   : > { %v202_v26 = vld [vmem:[%s2040_s26 + $0x1a0] sm:$0xff]  ;;  %199 = vst [vmem:[%s2045_s27 + $0xc0] sm:$0xff] %v198_v24  ;;  %201 = vst [vmem:[%s2045_s27 + $0xc8] sm:$0xff] %v200_v25  ;;  %v204_v27 = vld [vmem:[%s2040_s26 + $0x1a8] sm:$0xff] }
  0x22   : > { %203 = vst [vmem:[%s2045_s27 + $0xd0] sm:$0xff] %v202_v26  ;;  %v206_v28 = vld [vmem:[%s2040_s26 + $0x1c0] sm:$0xff]  ;;  %v208_v29 = vld [vmem:[%s2040_s26 + $0x1c8] sm:$0xff]  ;;  %205 = vst [vmem:[%s2045_s27 + $0xd8] sm:$0xff] %v204_v27 }
  0x23   : > { %207 = vst [vmem:[%s2045_s27 + $0xe0] sm:$0xff] %v206_v28  ;;  %209 = vst [vmem:[%s2045_s27 + $0xe8] sm:$0xff] %v208_v29  ;;  %v210_v30 = vld [vmem:[%s2040_s26 + $0x1e0] sm:$0xff]  ;;  %v212_v31 = vld [vmem:[%s2040_s26 + $0x1e8] sm:$0xff] }
  0x24   : > { %v214_v32 = vld [vmem:[%s2040_s26 + $0x200] sm:$0xff]  ;;  %211 = vst [vmem:[%s2045_s27 + $0xf0] sm:$0xff] %v210_v30  ;;  %213 = vst [vmem:[%s2045_s27 + $0xf8] sm:$0xff] %v212_v31  ;;  %v216_v33 = vld [vmem:[%s2040_s26 + $0x208] sm:$0xff] }
  0x25   : > { %215 = vst [vmem:[%s2045_s27 + $0x100] sm:$0xff] %v214_v32  ;;  %v218_v34 = vld [vmem:[%s2040_s26 + $0x220] sm:$0xff]  ;;  %v220_v35 = vld [vmem:[%s2040_s26 + $0x228] sm:$0xff]  ;;  %217 = vst [vmem:[%s2045_s27 + $0x108] sm:$0xff] %v216_v33 }
  0x26   : > { %219 = vst [vmem:[%s2045_s27 + $0x110] sm:$0xff] %v218_v34  ;;  %221 = vst [vmem:[%s2045_s27 + $0x118] sm:$0xff] %v220_v35  ;;  %v222_v36 = vld [vmem:[%s2040_s26 + $0x240] sm:$0xff]  ;;  %v224_v37 = vld [vmem:[%s2040_s26 + $0x248] sm:$0xff] }
  0x27   : > { %v226_v38 = vld [vmem:[%s2040_s26 + $0x260] sm:$0xff]  ;;  %223 = vst [vmem:[%s2045_s27 + $0x120] sm:$0xff] %v222_v36  ;;  %225 = vst [vmem:[%s2045_s27 + $0x128] sm:$0xff] %v224_v37  ;;  %v228_v39 = vld [vmem:[%s2040_s26 + $0x268] sm:$0xff] }
  0x28   : > { %227 = vst [vmem:[%s2045_s27 + $0x130] sm:$0xff] %v226_v38  ;;  %v230_v40 = vld [vmem:[%s2040_s26 + $0x280] sm:$0xff]  ;;  %v232_v41 = vld [vmem:[%s2040_s26 + $0x288] sm:$0xff]  ;;  %229 = vst [vmem:[%s2045_s27 + $0x138] sm:$0xff] %v228_v39 }
  0x29   : > { %231 = vst [vmem:[%s2045_s27 + $0x140] sm:$0xff] %v230_v40  ;;  %233 = vst [vmem:[%s2045_s27 + $0x148] sm:$0xff] %v232_v41  ;;  %v234_v42 = vld [vmem:[%s2040_s26 + $0x2a0] sm:$0xff]  ;;  %v236_v43 = vld [vmem:[%s2040_s26 + $0x2a8] sm:$0xff] }
  0x2a   : > { %v238_v44 = vld [vmem:[%s2040_s26 + $0x2c0] sm:$0xff]  ;;  %235 = vst [vmem:[%s2045_s27 + $0x150] sm:$0xff] %v234_v42  ;;  %237 = vst [vmem:[%s2045_s27 + $0x158] sm:$0xff] %v236_v43  ;;  %v240_v45 = vld [vmem:[%s2040_s26 + $0x2c8] sm:$0xff] }
  0x2b   : > { %239 = vst [vmem:[%s2045_s27 + $0x160] sm:$0xff] %v238_v44  ;;  %v242_v46 = vld [vmem:[%s2040_s26 + $0x2e0] sm:$0xff]  ;;  %v244_v47 = vld [vmem:[%s2040_s26 + $0x2e8] sm:$0xff]  ;;  %241 = vst [vmem:[%s2045_s27 + $0x168] sm:$0xff] %v240_v45 }
  0x2c   : > { %243 = vst [vmem:[%s2045_s27 + $0x170] sm:$0xff] %v242_v46  ;;  %245 = vst [vmem:[%s2045_s27 + $0x178] sm:$0xff] %v244_v47  ;;  %v246_v48 = vld [vmem:[%s2040_s26 + $0x300] sm:$0xff]  ;;  %v248_v49 = vld [vmem:[%s2040_s26 + $0x308] sm:$0xff] }
  0x2d   : > { %v250_v50 = vld [vmem:[%s2040_s26 + $0x320] sm:$0xff]  ;;  %247 = vst [vmem:[%s2045_s27 + $0x180] sm:$0xff] %v246_v48  ;;  %249 = vst [vmem:[%s2045_s27 + $0x188] sm:$0xff] %v248_v49  ;;  %v252_v51 = vld [vmem:[%s2040_s26 + $0x328] sm:$0xff] }
  0x2e   : > { %251 = vst [vmem:[%s2045_s27 + $0x190] sm:$0xff] %v250_v50  ;;  %v254_v52 = vld [vmem:[%s2040_s26 + $0x340] sm:$0xff]  ;;  %v256_v53 = vld [vmem:[%s2040_s26 + $0x348] sm:$0xff]  ;;  %253 = vst [vmem:[%s2045_s27 + $0x198] sm:$0xff] %v252_v51 }
  0x2f   : > { %255 = vst [vmem:[%s2045_s27 + $0x1a0] sm:$0xff] %v254_v52  ;;  %257 = vst [vmem:[%s2045_s27 + $0x1a8] sm:$0xff] %v256_v53  ;;  %v258_v54 = vld [vmem:[%s2040_s26 + $0x360] sm:$0xff]  ;;  %v260_v55 = vld [vmem:[%s2040_s26 + $0x368] sm:$0xff] }
  0x30   : > { %v262_v56 = vld [vmem:[%s2040_s26 + $0x380] sm:$0xff]  ;;  %259 = vst [vmem:[%s2045_s27 + $0x1b0] sm:$0xff] %v258_v54  ;;  %261 = vst [vmem:[%s2045_s27 + $0x1b8] sm:$0xff] %v260_v55  ;;  %v264_v57 = vld [vmem:[%s2040_s26 + $0x388] sm:$0xff] }
  0x31   : > { %263 = vst [vmem:[%s2045_s27 + $0x1c0] sm:$0xff] %v262_v56  ;;  %v266_v58 = vld [vmem:[%s2040_s26 + $0x3a0] sm:$0xff]  ;;  %v268_v59 = vld [vmem:[%s2040_s26 + $0x3a8] sm:$0xff]  ;;  %265 = vst [vmem:[%s2045_s27 + $0x1c8] sm:$0xff] %v264_v57 }
  0x32   : > { %267 = vst [vmem:[%s2045_s27 + $0x1d0] sm:$0xff] %v266_v58  ;;  %269 = vst [vmem:[%s2045_s27 + $0x1d8] sm:$0xff] %v268_v59  ;;  %v270_v60 = vld [vmem:[%s2040_s26 + $0x3c0] sm:$0xff]  ;;  %v272_v61 = vld [vmem:[%s2040_s26 + $0x3c8] sm:$0xff] }
  0x33   : > { %v274_v62 = vld [vmem:[%s2040_s26 + $0x3e0] sm:$0xff]  ;;  %271 = vst [vmem:[%s2045_s27 + $0x1e0] sm:$0xff] %v270_v60  ;;  %273 = vst [vmem:[%s2045_s27 + $0x1e8] sm:$0xff] %v272_v61  ;;  %v276_v63 = vld [vmem:[%s2040_s26 + $0x3e8] sm:$0xff] }
  0x34   : > { %275 = vst [vmem:[%s2045_s27 + $0x1f0] sm:$0xff] %v274_v62  ;;  %v278_v0 = vld [vmem:[%s2040_s26 + $0x400] sm:$0xff]  ;;  %v280_v1 = vld [vmem:[%s2040_s26 + $0x408] sm:$0xff]  ;;  %277 = vst [vmem:[%s2045_s27 + $0x1f8] sm:$0xff] %v276_v63 }
  0x35   : > { %279 = vst [vmem:[%s2045_s27 + $0x200] sm:$0xff] %v278_v0  ;;  %281 = vst [vmem:[%s2045_s27 + $0x208] sm:$0xff] %v280_v1  ;;  %v282_v2 = vld [vmem:[%s2040_s26 + $0x420] sm:$0xff]  ;;  %v284_v3 = vld [vmem:[%s2040_s26 + $0x428] sm:$0xff] }
  0x36   : > { %v286_v4 = vld [vmem:[%s2040_s26 + $0x440] sm:$0xff]  ;;  %283 = vst [vmem:[%s2045_s27 + $0x210] sm:$0xff] %v282_v2  ;;  %285 = vst [vmem:[%s2045_s27 + $0x218] sm:$0xff] %v284_v3  ;;  %v288_v5 = vld [vmem:[%s2040_s26 + $0x448] sm:$0xff] }
  0x37   : > { %287 = vst [vmem:[%s2045_s27 + $0x220] sm:$0xff] %v286_v4  ;;  %v290_v6 = vld [vmem:[%s2040_s26 + $0x460] sm:$0xff]  ;;  %v292_v7 = vld [vmem:[%s2040_s26 + $0x468] sm:$0xff]  ;;  %289 = vst [vmem:[%s2045_s27 + $0x228] sm:$0xff] %v288_v5 }
  0x38   : > { %291 = vst [vmem:[%s2045_s27 + $0x230] sm:$0xff] %v290_v6  ;;  %293 = vst [vmem:[%s2045_s27 + $0x238] sm:$0xff] %v292_v7  ;;  %v294_v8 = vld [vmem:[%s2040_s26 + $0x480] sm:$0xff]  ;;  %v296_v9 = vld [vmem:[%s2040_s26 + $0x488] sm:$0xff] }
  0x39   : > { %v298_v10 = vld [vmem:[%s2040_s26 + $0x4a0] sm:$0xff]  ;;  %295 = vst [vmem:[%s2045_s27 + $0x240] sm:$0xff] %v294_v8  ;;  %297 = vst [vmem:[%s2045_s27 + $0x248] sm:$0xff] %v296_v9  ;;  %v300_v11 = vld [vmem:[%s2040_s26 + $0x4a8] sm:$0xff] }
  0x3a   : > { %299 = vst [vmem:[%s2045_s27 + $0x250] sm:$0xff] %v298_v10  ;;  %v302_v12 = vld [vmem:[%s2040_s26 + $0x4c0] sm:$0xff]  ;;  %v304_v13 = vld [vmem:[%s2040_s26 + $0x4c8] sm:$0xff]  ;;  %301 = vst [vmem:[%s2045_s27 + $0x258] sm:$0xff] %v300_v11 }
  0x3b   : > { %303 = vst [vmem:[%s2045_s27 + $0x260] sm:$0xff] %v302_v12  ;;  %305 = vst [vmem:[%s2045_s27 + $0x268] sm:$0xff] %v304_v13  ;;  %v306_v14 = vld [vmem:[%s2040_s26 + $0x4e0] sm:$0xff]  ;;  %v308_v15 = vld [vmem:[%s2040_s26 + $0x4e8] sm:$0xff] }
  0x3c   : > { %v310_v16 = vld [vmem:[%s2040_s26 + $0x500] sm:$0xff]  ;;  %307 = vst [vmem:[%s2045_s27 + $0x270] sm:$0xff] %v306_v14  ;;  %309 = vst [vmem:[%s2045_s27 + $0x278] sm:$0xff] %v308_v15  ;;  %v312_v17 = vld [vmem:[%s2040_s26 + $0x508] sm:$0xff] }
  0x3d   : > { %311 = vst [vmem:[%s2045_s27 + $0x280] sm:$0xff] %v310_v16  ;;  %v314_v18 = vld [vmem:[%s2040_s26 + $0x520] sm:$0xff]  ;;  %v316_v19 = vld [vmem:[%s2040_s26 + $0x528] sm:$0xff]  ;;  %313 = vst [vmem:[%s2045_s27 + $0x288] sm:$0xff] %v312_v17 }
  0x3e   : > { %315 = vst [vmem:[%s2045_s27 + $0x290] sm:$0xff] %v314_v18  ;;  %317 = vst [vmem:[%s2045_s27 + $0x298] sm:$0xff] %v316_v19  ;;  %v318_v20 = vld [vmem:[%s2040_s26 + $0x540] sm:$0xff]  ;;  %v320_v21 = vld [vmem:[%s2040_s26 + $0x548] sm:$0xff] }
  0x3f   : > { %v322_v22 = vld [vmem:[%s2040_s26 + $0x560] sm:$0xff]  ;;  %319 = vst [vmem:[%s2045_s27 + $0x2a0] sm:$0xff] %v318_v20  ;;  %321 = vst [vmem:[%s2045_s27 + $0x2a8] sm:$0xff] %v320_v21  ;;  %v324_v23 = vld [vmem:[%s2040_s26 + $0x568] sm:$0xff] }
  0x40   : > { %323 = vst [vmem:[%s2045_s27 + $0x2b0] sm:$0xff] %v322_v22  ;;  %v326_v24 = vld [vmem:[%s2040_s26 + $0x580] sm:$0xff]  ;;  %v328_v25 = vld [vmem:[%s2040_s26 + $0x588] sm:$0xff]  ;;  %325 = vst [vmem:[%s2045_s27 + $0x2b8] sm:$0xff] %v324_v23 }
  0x41   : > { %327 = vst [vmem:[%s2045_s27 + $0x2c0] sm:$0xff] %v326_v24  ;;  %329 = vst [vmem:[%s2045_s27 + $0x2c8] sm:$0xff] %v328_v25  ;;  %v330_v26 = vld [vmem:[%s2040_s26 + $0x5a0] sm:$0xff]  ;;  %v332_v27 = vld [vmem:[%s2040_s26 + $0x5a8] sm:$0xff] }
  0x42   : > { %v334_v28 = vld [vmem:[%s2040_s26 + $0x5c0] sm:$0xff]  ;;  %331 = vst [vmem:[%s2045_s27 + $0x2d0] sm:$0xff] %v330_v26  ;;  %333 = vst [vmem:[%s2045_s27 + $0x2d8] sm:$0xff] %v332_v27  ;;  %v336_v29 = vld [vmem:[%s2040_s26 + $0x5c8] sm:$0xff] }
  0x43   : > { %335 = vst [vmem:[%s2045_s27 + $0x2e0] sm:$0xff] %v334_v28  ;;  %v338_v30 = vld [vmem:[%s2040_s26 + $0x5e0] sm:$0xff]  ;;  %v340_v31 = vld [vmem:[%s2040_s26 + $0x5e8] sm:$0xff]  ;;  %337 = vst [vmem:[%s2045_s27 + $0x2e8] sm:$0xff] %v336_v29 }
  0x44   : > { %339 = vst [vmem:[%s2045_s27 + $0x2f0] sm:$0xff] %v338_v30  ;;  %341 = vst [vmem:[%s2045_s27 + $0x2f8] sm:$0xff] %v340_v31  ;;  %v342_v32 = vld [vmem:[%s2040_s26 + $0x600] sm:$0xff]  ;;  %v344_v33 = vld [vmem:[%s2040_s26 + $0x608] sm:$0xff] }
  0x45   : > { %v346_v34 = vld [vmem:[%s2040_s26 + $0x620] sm:$0xff]  ;;  %343 = vst [vmem:[%s2045_s27 + $0x300] sm:$0xff] %v342_v32  ;;  %345 = vst [vmem:[%s2045_s27 + $0x308] sm:$0xff] %v344_v33  ;;  %v348_v35 = vld [vmem:[%s2040_s26 + $0x628] sm:$0xff] }
  0x46   : > { %347 = vst [vmem:[%s2045_s27 + $0x310] sm:$0xff] %v346_v34  ;;  %v350_v36 = vld [vmem:[%s2040_s26 + $0x640] sm:$0xff]  ;;  %v352_v37 = vld [vmem:[%s2040_s26 + $0x648] sm:$0xff]  ;;  %349 = vst [vmem:[%s2045_s27 + $0x318] sm:$0xff] %v348_v35 }
  0x47   : > { %351 = vst [vmem:[%s2045_s27 + $0x320] sm:$0xff] %v350_v36  ;;  %353 = vst [vmem:[%s2045_s27 + $0x328] sm:$0xff] %v352_v37  ;;  %v354_v38 = vld [vmem:[%s2040_s26 + $0x660] sm:$0xff]  ;;  %v356_v39 = vld [vmem:[%s2040_s26 + $0x668] sm:$0xff] }
  0x48   : > { %v358_v40 = vld [vmem:[%s2040_s26 + $0x680] sm:$0xff]  ;;  %355 = vst [vmem:[%s2045_s27 + $0x330] sm:$0xff] %v354_v38  ;;  %357 = vst [vmem:[%s2045_s27 + $0x338] sm:$0xff] %v356_v39  ;;  %v360_v41 = vld [vmem:[%s2040_s26 + $0x688] sm:$0xff] }
  0x49   : > { %359 = vst [vmem:[%s2045_s27 + $0x340] sm:$0xff] %v358_v40  ;;  %v362_v42 = vld [vmem:[%s2040_s26 + $0x6a0] sm:$0xff]  ;;  %v364_v43 = vld [vmem:[%s2040_s26 + $0x6a8] sm:$0xff]  ;;  %361 = vst [vmem:[%s2045_s27 + $0x348] sm:$0xff] %v360_v41 }
  0x4a   : > { %363 = vst [vmem:[%s2045_s27 + $0x350] sm:$0xff] %v362_v42  ;;  %365 = vst [vmem:[%s2045_s27 + $0x358] sm:$0xff] %v364_v43  ;;  %v366_v44 = vld [vmem:[%s2040_s26 + $0x6c0] sm:$0xff]  ;;  %v368_v45 = vld [vmem:[%s2040_s26 + $0x6c8] sm:$0xff] }
  0x4b   : > { %v370_v46 = vld [vmem:[%s2040_s26 + $0x6e0] sm:$0xff]  ;;  %367 = vst [vmem:[%s2045_s27 + $0x360] sm:$0xff] %v366_v44  ;;  %369 = vst [vmem:[%s2045_s27 + $0x368] sm:$0xff] %v368_v45  ;;  %v372_v47 = vld [vmem:[%s2040_s26 + $0x6e8] sm:$0xff] }
  0x4c   : > { %371 = vst [vmem:[%s2045_s27 + $0x370] sm:$0xff] %v370_v46  ;;  %v374_v48 = vld [vmem:[%s2040_s26 + $0x700] sm:$0xff]  ;;  %v376_v49 = vld [vmem:[%s2040_s26 + $0x708] sm:$0xff]  ;;  %373 = vst [vmem:[%s2045_s27 + $0x378] sm:$0xff] %v372_v47 }
  0x4d   : > { %375 = vst [vmem:[%s2045_s27 + $0x380] sm:$0xff] %v374_v48  ;;  %377 = vst [vmem:[%s2045_s27 + $0x388] sm:$0xff] %v376_v49  ;;  %v378_v50 = vld [vmem:[%s2040_s26 + $0x720] sm:$0xff]  ;;  %v380_v51 = vld [vmem:[%s2040_s26 + $0x728] sm:$0xff] }
  0x4e   : > { %v382_v52 = vld [vmem:[%s2040_s26 + $0x740] sm:$0xff]  ;;  %379 = vst [vmem:[%s2045_s27 + $0x390] sm:$0xff] %v378_v50  ;;  %381 = vst [vmem:[%s2045_s27 + $0x398] sm:$0xff] %v380_v51  ;;  %v384_v53 = vld [vmem:[%s2040_s26 + $0x748] sm:$0xff] }
  0x4f   : > { %383 = vst [vmem:[%s2045_s27 + $0x3a0] sm:$0xff] %v382_v52  ;;  %v386_v54 = vld [vmem:[%s2040_s26 + $0x760] sm:$0xff]  ;;  %v388_v55 = vld [vmem:[%s2040_s26 + $0x768] sm:$0xff]  ;;  %385 = vst [vmem:[%s2045_s27 + $0x3a8] sm:$0xff] %v384_v53 }
  0x50   : > { %387 = vst [vmem:[%s2045_s27 + $0x3b0] sm:$0xff] %v386_v54  ;;  %389 = vst [vmem:[%s2045_s27 + $0x3b8] sm:$0xff] %v388_v55  ;;  %v390_v56 = vld [vmem:[%s2040_s26 + $0x780] sm:$0xff]  ;;  %v392_v57 = vld [vmem:[%s2040_s26 + $0x788] sm:$0xff] }
  0x51   : > { %v394_v58 = vld [vmem:[%s2040_s26 + $0x7a0] sm:$0xff]  ;;  %391 = vst [vmem:[%s2045_s27 + $0x3c0] sm:$0xff] %v390_v56  ;;  %393 = vst [vmem:[%s2045_s27 + $0x3c8] sm:$0xff] %v392_v57  ;;  %v396_v59 = vld [vmem:[%s2040_s26 + $0x7a8] sm:$0xff] }
  0x52   : > { %395 = vst [vmem:[%s2045_s27 + $0x3d0] sm:$0xff] %v394_v58  ;;  %v398_v60 = vld [vmem:[%s2040_s26 + $0x7c0] sm:$0xff]  ;;  %v400_v61 = vld [vmem:[%s2040_s26 + $0x7c8] sm:$0xff]  ;;  %397 = vst [vmem:[%s2045_s27 + $0x3d8] sm:$0xff] %v396_v59 }
  0x53   : > { %399 = vst [vmem:[%s2045_s27 + $0x3e0] sm:$0xff] %v398_v60  ;;  %401 = vst [vmem:[%s2045_s27 + $0x3e8] sm:$0xff] %v400_v61  ;;  %v402_v62 = vld [vmem:[%s2040_s26 + $0x7e0] sm:$0xff]  ;;  %v404_v63 = vld [vmem:[%s2040_s26 + $0x7e8] sm:$0xff] }
  0x54   : > { %403 = vst [vmem:[%s2045_s27 + $0x3f0] sm:$0xff] %v402_v62  ;;  %405 = vst [vmem:[%s2045_s27 + $0x3f8] sm:$0xff] %v404_v63 }
  0x55 PF: > { %p1565_p7 = scmp.ge.s32.totalorder %s1977_s14, 1  ;;  %p410_p8 = scmp.lt.s32.totalorder %s1977_s14, 3 }
  0x57   : > { %p411_p9 = pnand %p1565_p7, %p410_p8 }
  0x58   : > { %s417_s28 = sand.u32 (!%p411_p9), 1, %s1969_s12   ;;  %v1855_v0 = vld [vmem:[%s2475_s0 + $0x4] ss:$16 sps:$4 sm:$0xff] (!%p411_p9)   ;;  %v1979_v9 = vmov (!%p411_p9), 0  }
  0x59   : > { %414 = sbr.rel (%p411_p9) target bundleno = 454 (0x1c6), region = 51  ;;  %s1566_s29 = sshll.u32 (!%p411_p9), %s417_s28, 10  ;;  %1277 = vmatprep.mubr.bf16.mxu0 (!%p411_p9), %v1855_v0  ;;  %1363 = vmatprep.mubr.bf16.mxu1 (!%p411_p9), %v1855_v0 }
  0x5a   : > { %s2308_s5 = scalar_lea.vmem (!%p411_p9), [#allocation2], %s1566_s29  ;;  %1756 = vset.pattern.permute.xlu0 (!%p411_p9), %v1979_v9  ;;  %s2455_s23 = sshll.u32 (!%p411_p9), %s417_s28, 5 }
  0x5b   : > { %v1757_v1 = vld [vmem:[%s2308_s5 + $0x4] ss:$16 sps:$4 sm:$0xff] (!%p411_p9)   ;;  %v1759_v2 = vld [vmem:[%s2308_s5 + $0xc] ss:$16 sps:$4 sm:$0xff] (!%p411_p9)   ;;  %v1761_v3 = vld [vmem:[%s2308_s5] ss:$16 sps:$4 sm:$0xff] (!%p411_p9)  }
  0x5c   : > { %1245 = vmatprep.subr.bf16.mxu0 (!%p411_p9), %v1757_v1  ;;  %v1762_v4 = vld [vmem:[%s2308_s5 + $0x8] ss:$16 sps:$4 sm:$0xff] (!%p411_p9)   ;;  %1331 = vmatprep.subr.bf16.mxu1 (!%p411_p9), %v1759_v2  ;;  %v1763_v5 = vld [vmem:[%s2308_s5 + $0x24] ss:$16 sps:$4 sm:$0xff] (!%p411_p9)   ;;  %v1765_v6 = vld [vmem:[%s2308_s5 + $0x2c] ss:$16 sps:$4 sm:$0xff] (!%p411_p9)  }
  0x5d   : > { %1246 = vmatpush1.bf16.msra.mxu0 (!%p411_p9), %v1761_v3  ;;  %1332 = vmatpush1.bf16.msra.mxu1 (!%p411_p9), %v1762_v4  ;;  %v1767_v7 = vld [vmem:[%s2308_s5 + $0x20] ss:$16 sps:$4 sm:$0xff] (!%p411_p9)   ;;  %v1768_v8 = vld [vmem:[%s2308_s5 + $0x28] ss:$16 sps:$4 sm:$0xff] (!%p411_p9)   ;;  %v1769_v10 = vld [vmem:[%s2308_s5 + $0x44] ss:$16 sps:$4 sm:$0xff] (!%p411_p9)  }
  0x5e   : > { %1247 = vmatprep.subr.bf16.mxu0 (!%p411_p9), %v1763_v5  ;;  %1333 = vmatprep.subr.bf16.mxu1 (!%p411_p9), %v1765_v6  ;;  %v1771_v11 = vld [vmem:[%s2308_s5 + $0x4c] ss:$16 sps:$4 sm:$0xff] (!%p411_p9)   ;;  %v1773_v12 = vld [vmem:[%s2308_s5 + $0x40] ss:$16 sps:$4 sm:$0xff] (!%p411_p9)   ;;  %v1774_v13 = vld [vmem:[%s2308_s5 + $0x48] ss:$16 sps:$4 sm:$0xff] (!%p411_p9)  }
  0x5f   : > { %v1775_v14 = vld [vmem:[%s2308_s5 + $0x64] ss:$16 sps:$4 sm:$0xff] (!%p411_p9)   ;;  %v1777_v15 = vld [vmem:[%s2308_s5 + $0x6c] ss:$16 sps:$4 sm:$0xff] (!%p411_p9)   ;;  %v1779_v16 = vld [vmem:[%s2308_s5 + $0x60] ss:$16 sps:$4 sm:$0xff] (!%p411_p9)  }
  0x60   : > { %v1780_v17 = vld [vmem:[%s2308_s5 + $0x68] ss:$16 sps:$4 sm:$0xff]   ;;  %v1781_v18 = vld [vmem:[%s2308_s5 + $0x84] ss:$16 sps:$4 sm:$0xff]   ;;  %v1783_v19 = vld [vmem:[%s2308_s5 + $0x8c] ss:$16 sps:$4 sm:$0xff]  }
  0x61   : > { %1248 = vmatpush1.bf16.msra.mxu0 %v1767_v7  ;;  %1334 = vmatpush1.bf16.msra.mxu1 %v1768_v8  ;;  %v1785_v20 = vld [vmem:[%s2308_s5 + $0x80] ss:$16 sps:$4 sm:$0xff]   ;;  %v1786_v21 = vld [vmem:[%s2308_s5 + $0x88] ss:$16 sps:$4 sm:$0xff]   ;;  %v1787_v22 = vld [vmem:[%s2308_s5 + $0xa4] ss:$16 sps:$4 sm:$0xff]  }
  0x62   : > { %1249 = vmatprep.subr.bf16.mxu0 %v1769_v10  ;;  %1335 = vmatprep.subr.bf16.mxu1 %v1771_v11  ;;  %v1789_v23 = vld [vmem:[%s2308_s5 + $0xac] ss:$16 sps:$4 sm:$0xff]   ;;  %v1791_v24 = vld [vmem:[%s2308_s5 + $0xa0] ss:$16 sps:$4 sm:$0xff]   ;;  %v1792_v25 = vld [vmem:[%s2308_s5 + $0xa8] ss:$16 sps:$4 sm:$0xff]  }
  0x63   : > { %v1793_v26 = vld [vmem:[%s2308_s5 + $0xc4] ss:$16 sps:$4 sm:$0xff]   ;;  %v1795_v27 = vld [vmem:[%s2308_s5 + $0xcc] ss:$16 sps:$4 sm:$0xff]   ;;  %v1797_v28 = vld [vmem:[%s2308_s5 + $0xc0] ss:$16 sps:$4 sm:$0xff]  }
  0x64   : > { %v1798_v29 = vld [vmem:[%s2308_s5 + $0xc8] ss:$16 sps:$4 sm:$0xff]   ;;  %v1799_v30 = vld [vmem:[%s2308_s5 + $0xe4] ss:$16 sps:$4 sm:$0xff]   ;;  %v1801_v31 = vld [vmem:[%s2308_s5 + $0xec] ss:$16 sps:$4 sm:$0xff]  }
  0x65   : > { %1250 = vmatpush1.bf16.msra.mxu0 %v1773_v12  ;;  %1336 = vmatpush1.bf16.msra.mxu1 %v1774_v13  ;;  %v1803_v32 = vld [vmem:[%s2308_s5 + $0xe0] ss:$16 sps:$4 sm:$0xff]   ;;  %v1804_v33 = vld [vmem:[%s2308_s5 + $0xe8] ss:$16 sps:$4 sm:$0xff]   ;;  %v1805_v34 = vld [vmem:[%s2308_s5 + $0x104] ss:$16 sps:$4 sm:$0xff]  }
  0x66   : > { %1251 = vmatprep.subr.bf16.mxu0 %v1775_v14  ;;  %1337 = vmatprep.subr.bf16.mxu1 %v1777_v15  ;;  %v1807_v35 = vld [vmem:[%s2308_s5 + $0x10c] ss:$16 sps:$4 sm:$0xff]   ;;  %v1809_v36 = vld [vmem:[%s2308_s5 + $0x100] ss:$16 sps:$4 sm:$0xff]   ;;  %v1810_v37 = vld [vmem:[%s2308_s5 + $0x108] ss:$16 sps:$4 sm:$0xff]  }
  0x67   : > { %v1811_v38 = vld [vmem:[%s2308_s5 + $0x124] ss:$16 sps:$4 sm:$0xff]   ;;  %v1813_v39 = vld [vmem:[%s2308_s5 + $0x12c] ss:$16 sps:$4 sm:$0xff]   ;;  %v1815_v40 = vld [vmem:[%s2308_s5 + $0x120] ss:$16 sps:$4 sm:$0xff]  }
  0x68   : > { %v1816_v41 = vld [vmem:[%s2308_s5 + $0x128] ss:$16 sps:$4 sm:$0xff]   ;;  %v1817_v42 = vld [vmem:[%s2308_s5 + $0x144] ss:$16 sps:$4 sm:$0xff]   ;;  %v1819_v43 = vld [vmem:[%s2308_s5 + $0x14c] ss:$16 sps:$4 sm:$0xff]  }
  0x69   : > { %1252 = vmatpush1.bf16.msra.mxu0 %v1779_v16  ;;  %1338 = vmatpush1.bf16.msra.mxu1 %v1780_v17  ;;  %v1821_v44 = vld [vmem:[%s2308_s5 + $0x140] ss:$16 sps:$4 sm:$0xff]   ;;  %v1822_v45 = vld [vmem:[%s2308_s5 + $0x148] ss:$16 sps:$4 sm:$0xff]   ;;  %v1823_v46 = vld [vmem:[%s2308_s5 + $0x164] ss:$16 sps:$4 sm:$0xff]  }
  0x6a   : > { %1253 = vmatprep.subr.bf16.mxu0 %v1781_v18  ;;  %1339 = vmatprep.subr.bf16.mxu1 %v1783_v19  ;;  %v1825_v47 = vld [vmem:[%s2308_s5 + $0x16c] ss:$16 sps:$4 sm:$0xff]   ;;  %v1827_v48 = vld [vmem:[%s2308_s5 + $0x160] ss:$16 sps:$4 sm:$0xff]   ;;  %v1828_v49 = vld [vmem:[%s2308_s5 + $0x168] ss:$16 sps:$4 sm:$0xff]  }
  0x6b   : > { %v1829_v50 = vld [vmem:[%s2308_s5 + $0x184] ss:$16 sps:$4 sm:$0xff]   ;;  %v1831_v51 = vld [vmem:[%s2308_s5 + $0x18c] ss:$16 sps:$4 sm:$0xff]   ;;  %v1833_v52 = vld [vmem:[%s2308_s5 + $0x180] ss:$16 sps:$4 sm:$0xff]  }
  0x6c   : > { %v1834_v53 = vld [vmem:[%s2308_s5 + $0x188] ss:$16 sps:$4 sm:$0xff]   ;;  %v1835_v54 = vld [vmem:[%s2308_s5 + $0x1a4] ss:$16 sps:$4 sm:$0xff]   ;;  %v1837_v55 = vld [vmem:[%s2308_s5 + $0x1ac] ss:$16 sps:$4 sm:$0xff]  }
  0x6d   : > { %1254 = vmatpush1.bf16.msra.mxu0 %v1785_v20  ;;  %1340 = vmatpush1.bf16.msra.mxu1 %v1786_v21  ;;  %v1839_v56 = vld [vmem:[%s2308_s5 + $0x1a0] ss:$16 sps:$4 sm:$0xff]   ;;  %v1840_v57 = vld [vmem:[%s2308_s5 + $0x1a8] ss:$16 sps:$4 sm:$0xff]   ;;  %v1841_v58 = vld [vmem:[%s2308_s5 + $0x1c4] ss:$16 sps:$4 sm:$0xff]  }
  0x6e   : > { %1255 = vmatprep.subr.bf16.mxu0 %v1787_v22  ;;  %1341 = vmatprep.subr.bf16.mxu1 %v1789_v23  ;;  %v1843_v59 = vld [vmem:[%s2308_s5 + $0x1cc] ss:$16 sps:$4 sm:$0xff]   ;;  %v1845_v60 = vld [vmem:[%s2308_s5 + $0x1c0] ss:$16 sps:$4 sm:$0xff]   ;;  %v1846_v61 = vld [vmem:[%s2308_s5 + $0x1c8] ss:$16 sps:$4 sm:$0xff]  }
  0x6f   : > { %v1847_v62 = vld [vmem:[%s2308_s5 + $0x1e4] ss:$16 sps:$4 sm:$0xff]   ;;  %v1849_v63 = vld [vmem:[%s2308_s5 + $0x1ec] ss:$16 sps:$4 sm:$0xff]   ;;  %v1851_v0 = vld [vmem:[%s2308_s5 + $0x1e0] ss:$16 sps:$4 sm:$0xff]  }
  0x70   : > { %v1852_v1 = vld [vmem:[%s2308_s5 + $0x1e8] ss:$16 sps:$4 sm:$0xff]   ;;  %v1858_v2 = vld [vmem:[%s2308_s5 + $0x204] ss:$16 sps:$4 sm:$0xff]   ;;  %v1861_v3 = vld [vmem:[%s2308_s5 + $0x20c] ss:$16 sps:$4 sm:$0xff]  }
  0x71   : > { %1256 = vmatpush1.bf16.msra.mxu0 %v1791_v24  ;;  %1342 = vmatpush1.bf16.msra.mxu1 %v1792_v25  ;;  %v1853_v4 = vld [vmem:[%s2475_s0] ss:$16 sps:$4 sm:$0xff]   ;;  %v1859_v6 = vld [vmem:[%s2308_s5 + $0x208] ss:$16 sps:$4 sm:$0xff]   ;;  %v1864_v7 = vld [vmem:[%s2308_s5 + $0x224] ss:$16 sps:$4 sm:$0xff]  }
  0x72   : > { %1257 = vmatprep.subr.bf16.mxu0 %v1793_v26  ;;  %1343 = vmatprep.subr.bf16.mxu1 %v1795_v27  ;;  %v1856_v5 = vld [vmem:[%s2308_s5 + $0x200] ss:$16 sps:$4 sm:$0xff]   ;;  %v1867_v8 = vld [vmem:[%s2308_s5 + $0x22c] ss:$16 sps:$4 sm:$0xff]   ;;  %v1865_v10 = vld [vmem:[%s2308_s5 + $0x228] ss:$16 sps:$4 sm:$0xff]  }
  0x73   : > { %v1862_v9 = vld [vmem:[%s2308_s5 + $0x220] ss:$16 sps:$4 sm:$0xff]   ;;  %v1870_v11 = vld [vmem:[%s2308_s5 + $0x244] ss:$16 sps:$4 sm:$0xff]   ;;  %v1873_v12 = vld [vmem:[%s2308_s5 + $0x24c] ss:$16 sps:$4 sm:$0xff]  }
  0x74   : > { %v1868_v13 = vld [vmem:[%s2308_s5 + $0x240] ss:$16 sps:$4 sm:$0xff]   ;;  %v1871_v14 = vld [vmem:[%s2308_s5 + $0x248] ss:$16 sps:$4 sm:$0xff]   ;;  %v1876_v15 = vld [vmem:[%s2308_s5 + $0x264] ss:$16 sps:$4 sm:$0xff]  }
  0x75   : > { %1258 = vmatpush1.bf16.msra.mxu0 %v1797_v28  ;;  %1344 = vmatpush1.bf16.msra.mxu1 %v1798_v29  ;;  %v1879_v16 = vld [vmem:[%s2308_s5 + $0x26c] ss:$16 sps:$4 sm:$0xff]   ;;  %v1874_v17 = vld [vmem:[%s2308_s5 + $0x260] ss:$16 sps:$4 sm:$0xff]   ;;  %v1877_v18 = vld [vmem:[%s2308_s5 + $0x268] ss:$16 sps:$4 sm:$0xff]  }
  0x76   : > { %1259 = vmatprep.subr.bf16.mxu0 %v1799_v30  ;;  %1345 = vmatprep.subr.bf16.mxu1 %v1801_v31  ;;  %v1882_v19 = vld [vmem:[%s2308_s5 + $0x284] ss:$16 sps:$4 sm:$0xff]   ;;  %v1885_v20 = vld [vmem:[%s2308_s5 + $0x28c] ss:$16 sps:$4 sm:$0xff]   ;;  %v1880_v21 = vld [vmem:[%s2308_s5 + $0x280] ss:$16 sps:$4 sm:$0xff]  }
  0x77   : > { %v1883_v22 = vld [vmem:[%s2308_s5 + $0x288] ss:$16 sps:$4 sm:$0xff]   ;;  %v1888_v23 = vld [vmem:[%s2308_s5 + $0x2a4] ss:$16 sps:$4 sm:$0xff]   ;;  %v1891_v24 = vld [vmem:[%s2308_s5 + $0x2ac] ss:$16 sps:$4 sm:$0xff]  }
  0x78   : > { %v1886_v25 = vld [vmem:[%s2308_s5 + $0x2a0] ss:$16 sps:$4 sm:$0xff]   ;;  %v1889_v26 = vld [vmem:[%s2308_s5 + $0x2a8] ss:$16 sps:$4 sm:$0xff]   ;;  %v1894_v27 = vld [vmem:[%s2308_s5 + $0x2c4] ss:$16 sps:$4 sm:$0xff]  }
  0x79   : > { %1260 = vmatpush1.bf16.msra.mxu0 %v1803_v32  ;;  %1346 = vmatpush1.bf16.msra.mxu1 %v1804_v33  ;;  %v1897_v28 = vld [vmem:[%s2308_s5 + $0x2cc] ss:$16 sps:$4 sm:$0xff]   ;;  %v573_v30 = vld [vmem:[%s2477_s2] sm:$0xff]  ;;  %v1895_v32 = vld [vmem:[%s2308_s5 + $0x2c8] ss:$16 sps:$4 sm:$0xff]   ;;  %s438_s12 = scalar_lea.vmem [#allocation3], %s2455_s23 }
  0x7a   : > { %1261 = vmatprep.subr.bf16.mxu0 %v1805_v34  ;;  %1347 = vmatprep.subr.bf16.mxu1 %v1807_v35  ;;  %v1954_v29 = vld [vmem:[%s2475_s0 + $0xc] ss:$16 sps:$4 sm:$0xff]   ;;  %v1892_v31 = vld [vmem:[%s2308_s5 + $0x2c0] ss:$16 sps:$4 sm:$0xff]   ;;  %v1900_v33 = vld [vmem:[%s2308_s5 + $0x2e4] ss:$16 sps:$4 sm:$0xff]  }
  0x7b   : > { %v1903_v34 = vld [vmem:[%s2308_s5 + $0x2ec] ss:$16 sps:$4 sm:$0xff]   ;;  %577 = vperm.xlu0 %1756, %v573_v30   ;;  %s1714_s24 = sshll.u32 (%p2030_p5), %s1558_s15, 4 }
  0x7c   : > { %v574_v35 = vld [vmem:[%s2477_s2 + $0x8] sm:$0xff]  ;;  %s1478_s27 = scalar_lea.vmem (%p2030_p5), %s2478_s3, %s1714_s24 }
  0x7d   : > { %1262 = vmatpush1.bf16.msra.mxu0 %v1809_v36  ;;  %1348 = vmatpush1.bf16.msra.mxu1 %v1810_v37  ;;  %v1898_v36 = vld [vmem:[%s2308_s5 + $0x2e0] ss:$16 sps:$4 sm:$0xff]   ;;  %v1901_v37 = vld [vmem:[%s2308_s5 + $0x2e8] ss:$16 sps:$4 sm:$0xff]  }
  0x7e   : > { %1263 = vmatprep.subr.bf16.mxu0 %v1811_v38  ;;  %1349 = vmatprep.subr.bf16.mxu1 %v1813_v39  ;;  %v1906_v38 = vld [vmem:[%s2308_s5 + $0x304] ss:$16 sps:$4 sm:$0xff]   ;;  %v1909_v39 = vld [vmem:[%s2308_s5 + $0x30c] ss:$16 sps:$4 sm:$0xff]  }
  0x7f   : > { %582 = vperm.xlu0 %1756, %v574_v35  }
  0x81   : > { %1264 = vmatpush1.bf16.msra.mxu0 %v1815_v40  ;;  %1350 = vmatpush1.bf16.msra.mxu1 %v1816_v41  ;;  %v1904_v40 = vld [vmem:[%s2308_s5 + $0x300] ss:$16 sps:$4 sm:$0xff]   ;;  %v1907_v41 = vld [vmem:[%s2308_s5 + $0x308] ss:$16 sps:$4 sm:$0xff]  }
  0x82   : > { %1265 = vmatprep.subr.bf16.mxu0 %v1817_v42  ;;  %1351 = vmatprep.subr.bf16.mxu1 %v1819_v43  ;;  %v1912_v42 = vld [vmem:[%s2308_s5 + $0x324] ss:$16 sps:$4 sm:$0xff]   ;;  %v1915_v43 = vld [vmem:[%s2308_s5 + $0x32c] ss:$16 sps:$4 sm:$0xff]  }
  0x85   : > { %1266 = vmatpush1.bf16.msra.mxu0 %v1821_v44  ;;  %1352 = vmatpush1.bf16.msra.mxu1 %v1822_v45  ;;  %v1910_v44 = vld [vmem:[%s2308_s5 + $0x320] ss:$16 sps:$4 sm:$0xff]   ;;  %v1913_v45 = vld [vmem:[%s2308_s5 + $0x328] ss:$16 sps:$4 sm:$0xff]  }
  0x86   : > { %1267 = vmatprep.subr.bf16.mxu0 %v1823_v46  ;;  %1353 = vmatprep.subr.bf16.mxu1 %v1825_v47  ;;  %v1918_v46 = vld [vmem:[%s2308_s5 + $0x344] ss:$16 sps:$4 sm:$0xff]   ;;  %v1921_v47 = vld [vmem:[%s2308_s5 + $0x34c] ss:$16 sps:$4 sm:$0xff]  }
  0x89   : > { %1268 = vmatpush1.bf16.msra.mxu0 %v1827_v48  ;;  %1354 = vmatpush1.bf16.msra.mxu1 %v1828_v49  ;;  %v1916_v48 = vld [vmem:[%s2308_s5 + $0x340] ss:$16 sps:$4 sm:$0xff]   ;;  %v1919_v49 = vld [vmem:[%s2308_s5 + $0x348] ss:$16 sps:$4 sm:$0xff]  }
  0x8a   : > { %1269 = vmatprep.subr.bf16.mxu0 %v1829_v50  ;;  %1355 = vmatprep.subr.bf16.mxu1 %v1831_v51  ;;  %v1924_v50 = vld [vmem:[%s2308_s5 + $0x364] ss:$16 sps:$4 sm:$0xff]   ;;  %v1927_v51 = vld [vmem:[%s2308_s5 + $0x36c] ss:$16 sps:$4 sm:$0xff]  }
  0x8d   : > { %1270 = vmatpush1.bf16.msra.mxu0 %v1833_v52  ;;  %1356 = vmatpush1.bf16.msra.mxu1 %v1834_v53  ;;  %v1922_v52 = vld [vmem:[%s2308_s5 + $0x360] ss:$16 sps:$4 sm:$0xff]   ;;  %v1925_v53 = vld [vmem:[%s2308_s5 + $0x368] ss:$16 sps:$4 sm:$0xff]  }
  0x8e   : > { %1271 = vmatprep.subr.bf16.mxu0 %v1835_v54  ;;  %1357 = vmatprep.subr.bf16.mxu1 %v1837_v55  ;;  %v1930_v54 = vld [vmem:[%s2308_s5 + $0x384] ss:$16 sps:$4 sm:$0xff]   ;;  %v1933_v55 = vld [vmem:[%s2308_s5 + $0x38c] ss:$16 sps:$4 sm:$0xff]  }
  0x91   : > { %1272 = vmatpush1.bf16.msra.mxu0 %v1839_v56  ;;  %1358 = vmatpush1.bf16.msra.mxu1 %v1840_v57  ;;  %v1928_v56 = vld [vmem:[%s2308_s5 + $0x380] ss:$16 sps:$4 sm:$0xff]   ;;  %v1931_v57 = vld [vmem:[%s2308_s5 + $0x388] ss:$16 sps:$4 sm:$0xff]  }
  0x92   : > { %1273 = vmatprep.subr.bf16.mxu0 %v1841_v58  ;;  %1359 = vmatprep.subr.bf16.mxu1 %v1843_v59  ;;  %v1936_v58 = vld [vmem:[%s2308_s5 + $0x3a4] ss:$16 sps:$4 sm:$0xff]   ;;  %v1939_v59 = vld [vmem:[%s2308_s5 + $0x3ac] ss:$16 sps:$4 sm:$0xff]  }
  0x95   : > { %1274 = vmatpush1.bf16.msra.mxu0 %v1845_v60  ;;  %1360 = vmatpush1.bf16.msra.mxu1 %v1846_v61  ;;  %v1934_v60 = vld [vmem:[%s2308_s5 + $0x3a0] ss:$16 sps:$4 sm:$0xff]   ;;  %v1937_v61 = vld [vmem:[%s2308_s5 + $0x3a8] ss:$16 sps:$4 sm:$0xff]  }
  0x96   : > { %1275 = vmatprep.subr.bf16.mxu0 %v1847_v62  ;;  %1361 = vmatprep.subr.bf16.mxu1 %v1849_v63  ;;  %v1942_v62 = vld [vmem:[%s2308_s5 + $0x3c4] ss:$16 sps:$4 sm:$0xff]   ;;  %v1945_v63 = vld [vmem:[%s2308_s5 + $0x3cc] ss:$16 sps:$4 sm:$0xff]  }
  0x99   : > { %1276 = vmatpush1.bf16.msra.mxu0 %v1851_v0  ;;  %1362 = vmatpush1.bf16.msra.mxu1 %v1852_v1  ;;  %v1940_v0 = vld [vmem:[%s2308_s5 + $0x3c0] ss:$16 sps:$4 sm:$0xff]   ;;  %v1943_v1 = vld [vmem:[%s2308_s5 + $0x3c8] ss:$16 sps:$4 sm:$0xff]  }
  0x9a   : > { %1288 = vmatprep.subr.bf16.mxu0 %v1858_v2  ;;  %1374 = vmatprep.subr.bf16.mxu1 %v1861_v3  ;;  %v1948_v2 = vld [vmem:[%s2308_s5 + $0x3e4] ss:$16 sps:$4 sm:$0xff]   ;;  %v1951_v3 = vld [vmem:[%s2308_s5 + $0x3ec] ss:$16 sps:$4 sm:$0xff]  }
  0x9c   : > { %1278 = vmatmul.mubr.bf16.vlgmr.msra.gmra.mrb[0].mxu0 %v1853_v4  ;;  %1364 = vmatmul.mubr.bf16.vlgmr.msra.gmra.mrb[0].mxu1 %v1853_v4  ;;  %v1946_v4 = vld [vmem:[%s2308_s5 + $0x3e0] ss:$16 sps:$4 sm:$0xff]  }
  0x9d   : > { %1289 = vmatpush1.bf16.msra.mxu0 %v1856_v5  ;;  %1375 = vmatpush1.bf16.msra.mxu1 %v1859_v6  ;;  %v1949_v5 = vld [vmem:[%s2308_s5 + $0x3e8] ss:$16 sps:$4 sm:$0xff]  }
  0x9e   : > { %1290 = vmatprep.subr.bf16.mxu0 %v1864_v7  ;;  %1376 = vmatprep.subr.bf16.mxu1 %v1867_v8  ;;  %v1952_v6 = vld [vmem:[%s2475_s0 + $0x8] ss:$16 sps:$4 sm:$0xff]  }
  0x9f   : > { %1320 = vmatprep.mubr.bf16.mxu0 %v1954_v29  ;;  %1406 = vmatprep.mubr.bf16.mxu1 %v1954_v29 }
  0xa1   : > { %1291 = vmatpush1.bf16.msra.mxu0 %v1862_v9  ;;  %1377 = vmatpush1.bf16.msra.mxu1 %v1865_v10 }
  0xa2   : > { %1292 = vmatprep.subr.bf16.mxu0 %v1870_v11  ;;  %1378 = vmatprep.subr.bf16.mxu1 %v1873_v12 }
  0xa5   : > { %1293 = vmatpush1.bf16.msra.mxu0 %v1868_v13  ;;  %1379 = vmatpush1.bf16.msra.mxu1 %v1871_v14 }
  0xa6   : > { %1294 = vmatprep.subr.bf16.mxu0 %v1876_v15  ;;  %1380 = vmatprep.subr.bf16.mxu1 %v1879_v16 }
  0xa9   : > { %1295 = vmatpush1.bf16.msra.mxu0 %v1874_v17  ;;  %1381 = vmatpush1.bf16.msra.mxu1 %v1877_v18 }
  0xaa   : > { %1296 = vmatprep.subr.bf16.mxu0 %v1882_v19  ;;  %1382 = vmatprep.subr.bf16.mxu1 %v1885_v20 }
  0xad   : > { %1297 = vmatpush1.bf16.msra.mxu0 %v1880_v21  ;;  %1383 = vmatpush1.bf16.msra.mxu1 %v1883_v22 }
  0xae   : > { %1298 = vmatprep.subr.bf16.mxu0 %v1888_v23  ;;  %1384 = vmatprep.subr.bf16.mxu1 %v1891_v24 }
  0xb1   : > { %1299 = vmatpush1.bf16.msra.mxu0 %v1886_v25  ;;  %1385 = vmatpush1.bf16.msra.mxu1 %v1889_v26 }
  0xb2   : > { %1300 = vmatprep.subr.bf16.mxu0 %v1894_v27  ;;  %1386 = vmatprep.subr.bf16.mxu1 %v1897_v28 }
  0xb5   : > { %1301 = vmatpush1.bf16.msra.mxu0 %v1892_v31  ;;  %1387 = vmatpush1.bf16.msra.mxu1 %v1895_v32 }
  0xb6   : > { %1302 = vmatprep.subr.bf16.mxu0 %v1900_v33  ;;  %1388 = vmatprep.subr.bf16.mxu1 %v1903_v34 }
  0xb9   : > { %1303 = vmatpush1.bf16.msra.mxu0 %v1898_v36  ;;  %1389 = vmatpush1.bf16.msra.mxu1 %v1901_v37 }
  0xba   : > { %1304 = vmatprep.subr.bf16.mxu0 %v1906_v38  ;;  %1390 = vmatprep.subr.bf16.mxu1 %v1909_v39 }
  0xbd   : > { %1305 = vmatpush1.bf16.msra.mxu0 %v1904_v40  ;;  %1391 = vmatpush1.bf16.msra.mxu1 %v1907_v41 }
  0xbe   : > { %1306 = vmatprep.subr.bf16.mxu0 %v1912_v42  ;;  %1392 = vmatprep.subr.bf16.mxu1 %v1915_v43 }
  0xc1   : > { %1307 = vmatpush1.bf16.msra.mxu0 %v1910_v44  ;;  %1393 = vmatpush1.bf16.msra.mxu1 %v1913_v45 }
  0xc2   : > { %1308 = vmatprep.subr.bf16.mxu0 %v1918_v46  ;;  %1394 = vmatprep.subr.bf16.mxu1 %v1921_v47 }
  0xc5   : > { %1309 = vmatpush1.bf16.msra.mxu0 %v1916_v48  ;;  %1395 = vmatpush1.bf16.msra.mxu1 %v1919_v49 }
  0xc6   : > { %1310 = vmatprep.subr.bf16.mxu0 %v1924_v50  ;;  %1396 = vmatprep.subr.bf16.mxu1 %v1927_v51 }
  0xc9   : > { %1311 = vmatpush1.bf16.msra.mxu0 %v1922_v52  ;;  %1397 = vmatpush1.bf16.msra.mxu1 %v1925_v53 }
  0xca   : > { %1312 = vmatprep.subr.bf16.mxu0 %v1930_v54  ;;  %1398 = vmatprep.subr.bf16.mxu1 %v1933_v55 }
  0xcd   : > { %1313 = vmatpush1.bf16.msra.mxu0 %v1928_v56  ;;  %1399 = vmatpush1.bf16.msra.mxu1 %v1931_v57 }
  0xce   : > { %1314 = vmatprep.subr.bf16.mxu0 %v1936_v58  ;;  %1400 = vmatprep.subr.bf16.mxu1 %v1939_v59 }
  0xd1   : > { %1315 = vmatpush1.bf16.msra.mxu0 %v1934_v60  ;;  %1401 = vmatpush1.bf16.msra.mxu1 %v1937_v61 }
  0xd2   : > { %1316 = vmatprep.subr.bf16.mxu0 %v1942_v62  ;;  %1402 = vmatprep.subr.bf16.mxu1 %v1945_v63 }
  0xd5   : > { %1317 = vmatpush1.bf16.msra.mxu0 %v1940_v0  ;;  %1403 = vmatpush1.bf16.msra.mxu1 %v1943_v1 }
  0xd6   : > { %1318 = vmatprep.subr.bf16.mxu0 %v1948_v2  ;;  %1404 = vmatprep.subr.bf16.mxu1 %v1951_v3 }
  0xd9   : > { %1319 = vmatpush1.bf16.msra.mxu0 %v1946_v4  ;;  %1405 = vmatpush1.bf16.msra.mxu1 %v1949_v5 }
  0xdc   : > { %1321 = vmatmul.mubr.bf16.vlgmr.msra.gmra.mrb[0].mxu0 %v1952_v6  ;;  %1407 = vmatmul.mubr.bf16.vlgmr.msra.gmra.mrb[0].mxu1 %v1952_v6 }
  0xfa   : > { %v578_v7 = vpop.permute.xlu0 %577 }
  0xfe   : > { %v583_v20 = vpop.permute.xlu0 %582 }
 0x1af   : > { %v1322_v8 = vpop.f32.mrb[0].mxu0  ;;  %v1408_v9 = vpop.f32.mrb[0].mxu1 }
 0x1b0   : > { %v1715_v10 = vadd.f32 %v1322_v8, %v578_v7  ;;  %v1719_v11 = vadd.f32 %v1408_v9, %v578_v7  ;;  %v1324_v12 = vpop.f32.mrb[1].mxu0  ;;  %v1410_v13 = vpop.f32.mrb[1].mxu1 }
 0x1b1   : > { %v1716_v14 = vadd.f32 %v1324_v12, %v578_v7  ;;  %v1720_v15 = vadd.f32 %v1410_v13, %v578_v7  ;;  %v1326_v16 = vpop.f32.mrb[2].mxu0  ;;  %v1412_v17 = vpop.f32.mrb[2].mxu1 }
 0x1b2   : > { %vm1417_vm0 = vcmp.ge.f32.partialorder %v1715_v10, 0.0  ;;  %v1425_v18 = vmul.f32 0.01, %v1715_v10  ;;  %vm1419_vm1 = vcmp.ge.f32.partialorder %v1719_v11, 0.0  ;;  %v1427_v19 = vmul.f32 0.01, %v1719_v11 }
 0x1b3   : > { %vm1418_vm2 = vcmp.ge.f32.partialorder %v1716_v14, 0.0  ;;  %v1426_v21 = vmul.f32 0.01, %v1716_v14  ;;  %vm1420_vm3 = vcmp.ge.f32.partialorder %v1720_v15, 0.0  ;;  %v1428_v22 = vmul.f32 0.01, %v1720_v15 }
 0x1b4   : > { %v1433_v23 = vsel %vm1417_vm0, %v1715_v10, %v1425_v18  ;;  %v1435_v24 = vsel %vm1419_vm1, %v1719_v11, %v1427_v19  ;;  %v1717_v25 = vadd.f32 %v1326_v16, %v583_v20  ;;  %v1721_v26 = vadd.f32 %v1412_v17, %v583_v20  ;;  %v1328_v27 = vpop.f32.mrb[3].mxu0  ;;  %v1414_v28 = vpop.f32.mrb[3].mxu1 }
 0x1b5   : > { %v1434_v29 = vsel %vm1418_vm2, %v1716_v14, %v1426_v21  ;;  %v1436_v30 = vsel %vm1420_vm3, %v1720_v15, %v1428_v22  ;;  %v1718_v31 = vadd.f32 %v1328_v27, %v583_v20  ;;  %v1722_v32 = vadd.f32 %v1414_v28, %v583_v20 }
 0x1b6   : > { %v1710_v33 = vpack.c.bf16 %v1434_v29, %v1433_v23  ;;  %v1711_v34 = vpack.c.bf16 %v1436_v30, %v1435_v24  ;;  %vm1421_vm4 = vcmp.ge.f32.partialorder %v1717_v25, 0.0  ;;  %v1429_v35 = vmul.f32 0.01, %v1717_v25 }
 0x1b7   : > { %vm1423_vm5 = vcmp.ge.f32.partialorder %v1721_v26, 0.0  ;;  %v1431_v36 = vmul.f32 0.01, %v1721_v26  ;;  %vm1422_vm6 = vcmp.ge.f32.partialorder %v1718_v31, 0.0  ;;  %v1430_v37 = vmul.f32 0.01, %v1718_v31 }
 0x1b8   : > { %1465 = vst [vmem:[%s438_s12] sm:$0xff] %v1710_v33  ;;  %1466 = vst [vmem:[%s438_s12 + $0x8] sm:$0xff] %v1711_v34  ;;  %v1437_v38 = vsel %vm1421_vm4, %v1717_v25, %v1429_v35  ;;  %vm1424_vm7 = vcmp.ge.f32.partialorder %v1722_v32, 0.0  ;;  %v1432_v39 = vmul.f32 0.01, %v1722_v32  ;;  %1475 = sbr.rel (!%p2030_p5) target bundleno = 454 (0x1c6), region = 59 }
 0x1b9   : > { %v1439_v40 = vsel %vm1423_vm5, %v1721_v26, %v1431_v36  ;;  %v1438_v41 = vsel %vm1422_vm6, %v1718_v31, %v1430_v37 }
 0x1ba   : > { %v1712_v42 = vpack.c.bf16 %v1438_v41, %v1437_v38  ;;  %v1440_v43 = vsel %vm1424_vm7, %v1722_v32, %v1432_v39 }
 0x1bb   : > { %v1713_v44 = vpack.c.bf16 %v1440_v43, %v1439_v40 }
 0x1bc   : > { %1467 = vst [vmem:[%s438_s12 + $0x10] sm:$0xff] %v1712_v42 }
 0x1bd   : > { %1468 = vst [vmem:[%s438_s12 + $0x18] sm:$0xff] %v1713_v44 }
 0x1bf   : > { %v1491_v45 = vld [vmem:[%s438_s12] sm:$0xff]  ;;  %v1493_v46 = vld [vmem:[%s438_s12 + $0x8] sm:$0xff] }
 0x1c0   : > { %1492 = vst [vmem:[%s1478_s27] sm:$0xff] %v1491_v45  ;;  %1494 = vst [vmem:[%s1478_s27 + $0x8] sm:$0xff] %v1493_v46 }
 0x1c3   : > { %v1495_v47 = vld [vmem:[%s438_s12 + $0x10] sm:$0xff] }
 0x1c4   : > { %v1497_v48 = vld [vmem:[%s438_s12 + $0x18] sm:$0xff]  ;;  %1496 = vst [vmem:[%s1478_s27 + $0x20] sm:$0xff] %v1495_v47 }
 0x1c5   : > { %1498 = vst [vmem:[%s1478_s27 + $0x28] sm:$0xff] %v1497_v48 }
 0x1c6 PF: > { %p10_p10 = scmp.ge.s32.totalorder %s2017_s16, 4   ;;  %s2480_s12 = smov %s1973_s13 }
 0x1c7   : > { %s2481_s13 = smov %s2028_s19  ;;  %s2482_s14 = smov %s2017_s16 }
 0x1c8   :  { %12 = sbr.rel (!%p10_p10) target bundleno = 2 (0x2), region = 113 }

</bundles_post_ra>
